<compile_context>
chip_gen: v6e
topology: v6e:2x2x1
jax: 0.10.0
libtpu: 0.0.40
codegen_flags: <defaults>
</compile_context>

<pallas_src>
import functools
import math

import jax
import jax.numpy as jnp
from jax import lax
from jax.experimental import pallas as pl
from jax.experimental.pallas import tpu as pltpu


def _round_up(n, m):
    return ((n + m - 1) // m) * m


def _erf(x):
    # Abramowitz & Stegun 7.1.26 rational approximation (max abs err ~1.5e-7).
    # mul/add on the VPU; exp and the reciprocal ride the EUP slot.
    a1, a2, a3, a4, a5 = (0.254829592, -0.284496736, 1.421413741,
                          -1.453152027, 1.061405429)
    p = 0.3275911
    ax = jnp.abs(x)
    t = pl.reciprocal(1.0 + p * ax, approx=True)
    poly = t * (a1 + t * (a2 + t * (a3 + t * (a4 + t * a5))))
    e = 1.0 - poly * jnp.exp(-ax * ax)
    return jnp.where(x < 0.0, -e, e)


def _gelu_exact(x):
    # nn.GELU() default (approximate='none'): 0.5 * x * (1 + erf(x / sqrt(2)))
    return 0.5 * x * (1.0 + _erf(x * (1.0 / math.sqrt(2.0))))


def _mlp_kernel(x_ref, w1_ref, w2_ref, gb_ref, o_ref, *, eps: float, dim: int):
    # Matmul operands stay in their stored dtype (bf16 weights hit the fast MXU path);
    # only activation / normalization math runs in f32.
    x = x_ref[...]                                             # (tm, Cp)
    w1 = w1_ref[...]                                           # (Cp, Hp)
    w2 = w2_ref[...]                                           # (Hp, Cp)

    h = jnp.dot(x, w1, preferred_element_type=jnp.float32)     # MXU: fc1, f32 accum
    h = _gelu_exact(h)                                         # drop1: p=0 -> identity
    y = jnp.dot(h.astype(w2.dtype), w2,
                preferred_element_type=jnp.float32)            # MXU: fc2, (tm, Cp) f32

    # LayerNorm over the true channel dim (biased variance, matches nn.LayerNorm).
    # Padded channels of y are exactly zero (zero-padded W2 columns), so plain sums
    # divided by `dim` give the correct statistics.
    inv_dim = 1.0 / dim
    mean = jnp.sum(y, axis=-1, keepdims=True) * inv_dim
    if dim == y.shape[-1]:
        c = y - mean
    else:
        lane = lax.broadcasted_iota(jnp.int32, y.shape, 1)
        c = jnp.where(lane < dim, y - mean, 0.0)
    var = jnp.sum(c * c, axis=-1, keepdims=True) * inv_dim
    yn = c * lax.rsqrt(var + eps)                              # EUP rsqrt (free slot)

    gamma = gb_ref[0:1, :].astype(jnp.float32)                 # (1, Cp)
    beta = gb_ref[1:2, :].astype(jnp.float32)                  # (1, Cp)
    o_ref[...] = (yn * gamma + beta).astype(o_ref.dtype)       # drop2: identity


def _vmem_limit_bytes():
    # Generation-aware scoped-VMEM budget: stay well under physical capacity
    # (64 MiB on v7x, 128 MiB on v5e/v6e) while lifting the 16/32 MiB defaults.
    try:
        cap = int(getattr(pltpu.get_tpu_info(), "vmem_capacity_bytes",
                          64 * 1024 * 1024))
    except Exception:
        cap = 64 * 1024 * 1024                      # conservative (v7x-sized) fallback
    return max(min(cap - 8 * 1024 * 1024, 100 * 1024 * 1024), 16 * 1024 * 1024)


def mlp_forward(x, w1, w2, gamma, beta, *, eps: float = 1e-5, tile_rows=None):
    """x: (B, C, H, W); w1 = fc1.weight.T (C, hidden); w2 = fc2.weight.T (hidden, C)."""
    B, C, H, W = x.shape
    hidden = w1.shape[1]
    assert w1.shape == (C, hidden) and w2.shape == (hidden, C)
    assert gamma.shape == (C,) and beta.shape == (C,)

    # Lane-dense padding: channel/hidden dims rounded up to multiples of 128 so MXU
    # columns, VPU lanes and the output store are fully used.  Zero padding keeps the
    # matmuls exact; LN uses the true C inside the kernel.
    Cp = _round_up(C, 128)
    Hp = _round_up(hidden, 128)

    # NCHW -> NHWC rows (channel dim on lanes).
    # TODO(synk): fuse this transpose (and the inverse below) into the kernel via an
    # NCHW BlockSpec + in-kernel pltpu.einshape to drop two wrapper-side HBM passes.
    x2 = jnp.transpose(x, (0, 2, 3, 1)).reshape(-1, C)
    N = x2.shape[0]
    if Cp != C:
        x2 = jnp.pad(x2, ((0, 0), (0, Cp - C)))
    w1p = jnp.pad(w1, ((0, Cp - C), (0, Hp - hidden))) if (Cp, Hp) != (C, hidden) else w1
    w2p = jnp.pad(w2, ((0, Hp - hidden), (0, Cp - C))) if (Cp, Hp) != (C, hidden) else w2
    # LN affine params fused into one (2, Cp) f32 input (padded lanes -> 0 output).
    gb = jnp.stack([gamma, beta]).astype(jnp.float32)
    if Cp != C:
        gb = jnp.pad(gb, ((0, 0), (0, Cp - C)))

    x_bytes = jnp.dtype(x.dtype).itemsize
    w_bytes = jnp.dtype(w1.dtype).itemsize
    vmem_limit = _vmem_limit_bytes()

    if tile_rows is None:
        # Resident weights (counted at 2 buffers to stay safe if the single-buffer
        # request below is unavailable) + LN params.
        weight_vmem = 2 * (Cp * Hp + Hp * Cp) * w_bytes + 2 * (2 * Cp) * 4
        avail = max(vmem_limit - weight_vmem, 2 * 1024 * 1024)
        # Per row: double-buffered in/out row blocks + ~3 live f32 copies of the hidden
        # activation (h + GELU temporaries) + f32 y / LN temporaries.
        per_row = 2 * Cp * x_bytes + 2 * Cp * x_bytes + 3 * Hp * 4 + 2 * Cp * 4
        tile_rows = avail // per_row
        # Keep the live f32 hidden intermediate around <= 8 MiB (v7x guidance).
        tile_rows = min(tile_rows, (8 * 1024 * 1024) // (Hp * 4), 1024)
    tile_rows = min(int(tile_rows), _round_up(N, 8))
    if tile_rows >= 256:
        tile_rows = (tile_rows // 256) * 256        # match the 256x256 MXU (v6e/v7x)
    else:
        tile_rows = max(8, (tile_rows // 8) * 8)
    tm = tile_rows

    cost = pl.CostEstimate(
        flops=int(4 * N * Cp * Hp),                 # two matmuls x 2 flops/MAC
        transcendentals=int(N * Hp),                # exp in the erf approximation
        bytes_accessed=int(N * Cp * 2 * x_bytes + 2 * Cp * Hp * w_bytes),
    )

    kernel = functools.partial(_mlp_kernel, eps=eps, dim=C)
    grid = (pl.cdiv(N, tm),)

    # TODO(synk): for configs where 2*Cp*Hp*dtype approaches the VMEM budget (large C on
    # v7x), add a hidden-dim reduction grid axis (W1 column / W2 row blocks + f32
    # accumulator, pl.when init/finalize) instead of keeping both weights resident.
    def _call(single_buffer_weights):
        # Grid-invariant inputs (weights, LN params) are DMA'd once; requesting a single
        # buffer halves their resident VMEM footprint.
        res = ({"pipeline_mode": pl.Buffered(1)} if single_buffer_weights else {})
        grid_spec = pltpu.PrefetchScalarGridSpec(
            num_scalar_prefetch=0,
            grid=grid,
            in_specs=[
                pl.BlockSpec((tm, Cp), lambda i: (i, 0)),            # x row tile
                pl.BlockSpec((Cp, Hp), lambda i: (0, 0), **res),     # W1 (resident)
                pl.BlockSpec((Hp, Cp), lambda i: (0, 0), **res),     # W2 (resident)
                pl.BlockSpec((2, Cp), lambda i: (0, 0), **res),      # gamma/beta
            ],
            out_specs=pl.BlockSpec((tm, Cp), lambda i: (i, 0)),
        )
        return pl.pallas_call(
            kernel,
            out_shape=jax.ShapeDtypeStruct((N, Cp), x.dtype),
            grid_spec=grid_spec,
            compiler_params=pltpu.CompilerParams(
                dimension_semantics=("parallel",),   # shard row tiles across cores
                vmem_limit_bytes=int(vmem_limit),
            ),
            cost_estimate=cost,
        )(x2, w1p, w2p, gb)

    try:
        out = _call(True)
    except Exception:
        # JAX version without BlockSpec(pipeline_mode=...): fall back to default specs.
        out = _call(False)

    out = out[:, :C] if Cp != C else out
    return jnp.transpose(out.reshape(B, H, W, C), (0, 3, 1, 2))


def _reference(x, w1, w2, gamma, beta, eps=1e-5):
    xf = jnp.transpose(x, (0, 2, 3, 1)).astype(jnp.float32)
    h = jnp.dot(xf, w1.astype(jnp.float32), precision=lax.Precision.HIGHEST)
    h = jax.nn.gelu(h, approximate=False)           # nn.GELU default: exact erf GELU
    y = jnp.dot(h, w2.astype(jnp.float32), precision=lax.Precision.HIGHEST)
    mean = jnp.mean(y, axis=-1, keepdims=True)
    c = y - mean
    var = jnp.mean(c * c, axis=-1, keepdims=True)
    y = c * lax.rsqrt(var + eps) * gamma + beta
    return jnp.transpose(y, (0, 3, 1, 2)).astype(x.dtype)


if __name__ == "__main__":
    # Small shapes consistent with the module: NCHW feature map, dim=32, mlp_ratio=4.
    B, C, H, W = 2, 32, 16, 16
    mlp_ratio = 4
    hidden = int(mlp_ratio * C)

    key = jax.random.PRNGKey(0)
    kx, k1, k2, kg, kb = jax.random.split(key, 5)

    x = jax.random.normal(kx, (B, C, H, W), dtype=jnp.float32)
    # fc1/fc2 have bias=False in the module; weights stored already-transposed.
    w1 = jax.random.normal(k1, (C, hidden), dtype=jnp.float32) / math.sqrt(C)
    w2 = jax.random.normal(k2, (hidden, C), dtype=jnp.float32) / math.sqrt(hidden)
    # LayerNorm affine params (perturbed from ones/zeros to exercise the path).
    gamma = jnp.ones((C,), jnp.float32) + 0.02 * jax.random.normal(kg, (C,))
    beta = 0.02 * jax.random.normal(kb, (C,))

    y = mlp_forward(x, w1, w2, gamma, beta, eps=1e-5)
    y = jax.block_until_ready(y)

    y_ref = _reference(x, w1, w2, gamma, beta, eps=1e-5)
    assert y.shape == x.shape and y.dtype == x.dtype
    # Tolerance covers MXU default-precision f32 matmuls (bf16 passes) and the
    # approximate-reciprocal erf; with full-f32 MXU passes the error is ~1e-5.
    max_err = jnp.max(jnp.abs(y - y_ref))
    assert jnp.allclose(y, y_ref, atol=2e-2, rtol=2e-2), f"mismatch vs reference: {max_err}"

    print("KERNEL_OK")
</pallas_src>

<mosaic_0001>
module attributes {stable_mosaic.version = 11 : i64} {
  func.func @_mlp_kernel(%arg0: i32, %arg1: memref<512x128xf32, #tpu.memory_space<vmem>>, %arg2: memref<128x128xf32, #tpu.memory_space<vmem>>, %arg3: memref<128x128xf32, #tpu.memory_space<vmem>>, %arg4: memref<2x128xf32, #tpu.memory_space<vmem>>, %arg5: memref<512x128xf32, #tpu.memory_space<vmem>>) attributes {dimension_semantics = [#tpu.dimension_semantics<parallel>], iteration_bounds = array<i64: 1>, scalar_prefetch = 0 : i64, scratch_operands = 0 : i64, tpu.core_type = #tpu.core_type<tc>, window_params = [{transform_indices = @transform_0, window_bounds = array<i64: 512, 128>}, {pipeline_mode = #tpu.pipeline_mode<synchronous>, transform_indices = @transform_1, window_bounds = array<i64: 128, 128>}, {pipeline_mode = #tpu.pipeline_mode<synchronous>, transform_indices = @transform_2, window_bounds = array<i64: 128, 128>}, {pipeline_mode = #tpu.pipeline_mode<synchronous>, transform_indices = @transform_3, window_bounds = array<i64: 2, 128>}, {transform_indices = @transform_4, window_bounds = array<i64: 512, 128>}]} {
    %c0 = arith.constant 0 : index
    %c0_0 = arith.constant 0 : index
    %0 = vector.load %arg1[%c0, %c0_0] : memref<512x128xf32, #tpu.memory_space<vmem>>, vector<512x128xf32>
    %c0_1 = arith.constant 0 : index
    %c0_2 = arith.constant 0 : index
    %1 = vector.load %arg2[%c0_1, %c0_2] : memref<128x128xf32, #tpu.memory_space<vmem>>, vector<128x128xf32>
    %c0_3 = arith.constant 0 : index
    %c0_4 = arith.constant 0 : index
    %2 = vector.load %arg3[%c0_3, %c0_4] : memref<128x128xf32, #tpu.memory_space<vmem>>, vector<128x128xf32>
    %cst = arith.constant dense<0.000000e+00> : vector<512x128xf32>
    %3 = tpu.matmul %0, %1, %cst {dimension_numbers = #tpu.dot_dimension_numbers<[1], [0], [0], [1], [0, 0, 1, 1], [], []>} : vector<512x128xf32>, vector<128x128xf32>, vector<512x128xf32> -> vector<512x128xf32>
    %cst_5 = arith.constant 5.000000e-01 : f32
    %4 = vector.broadcast %cst_5 : f32 to vector<512x128xf32>
    %5 = arith.mulf %4, %3 : vector<512x128xf32>
    %cst_6 = arith.constant 0.707106769 : f32
    %6 = vector.broadcast %cst_6 : f32 to vector<512x128xf32>
    %7 = arith.mulf %3, %6 : vector<512x128xf32>
    %8 = math.absf %7 : vector<512x128xf32>
    %cst_7 = arith.constant 0.327591091 : f32
    %9 = vector.broadcast %cst_7 : f32 to vector<512x128xf32>
    %10 = arith.mulf %9, %8 : vector<512x128xf32>
    %cst_8 = arith.constant 1.000000e+00 : f32
    %11 = vector.broadcast %cst_8 : f32 to vector<512x128xf32>
    %12 = arith.addf %11, %10 : vector<512x128xf32>
    %13 = tpu.reciprocal %12 {approx = true} : vector<512x128xf32> -> vector<512x128xf32>
    %cst_9 = arith.constant 1.06140542 : f32
    %14 = vector.broadcast %cst_9 : f32 to vector<512x128xf32>
    %15 = arith.mulf %13, %14 : vector<512x128xf32>
    %cst_10 = arith.constant -1.45315206 : f32
    %16 = vector.broadcast %cst_10 : f32 to vector<512x128xf32>
    %17 = arith.addf %16, %15 : vector<512x128xf32>
    %18 = arith.mulf %13, %17 : vector<512x128xf32>
    %cst_11 = arith.constant 1.42141378 : f32
    %19 = vector.broadcast %cst_11 : f32 to vector<512x128xf32>
    %20 = arith.addf %19, %18 : vector<512x128xf32>
    %21 = arith.mulf %13, %20 : vector<512x128xf32>
    %cst_12 = arith.constant -0.284496725 : f32
    %22 = vector.broadcast %cst_12 : f32 to vector<512x128xf32>
    %23 = arith.addf %22, %21 : vector<512x128xf32>
    %24 = arith.mulf %13, %23 : vector<512x128xf32>
    %cst_13 = arith.constant 0.254829586 : f32
    %25 = vector.broadcast %cst_13 : f32 to vector<512x128xf32>
    %26 = arith.addf %25, %24 : vector<512x128xf32>
    %27 = arith.mulf %13, %26 : vector<512x128xf32>
    %cst_14 = arith.constant 0.000000e+00 : f32
    %28 = vector.broadcast %cst_14 : f32 to vector<512x128xf32>
    %29 = arith.subf %28, %8 : vector<512x128xf32>
    %30 = arith.mulf %29, %8 : vector<512x128xf32>
    %31 = math.exp %30 : vector<512x128xf32>
    %32 = arith.mulf %27, %31 : vector<512x128xf32>
    %cst_15 = arith.constant 1.000000e+00 : f32
    %33 = vector.broadcast %cst_15 : f32 to vector<512x128xf32>
    %34 = arith.subf %33, %32 : vector<512x128xf32>
    %cst_16 = arith.constant 0.000000e+00 : f32
    %35 = vector.broadcast %cst_16 : f32 to vector<512x128xf32>
    %36 = arith.cmpf olt, %7, %35 : vector<512x128xf32>
    %cst_17 = arith.constant 0.000000e+00 : f32
    %37 = vector.broadcast %cst_17 : f32 to vector<512x128xf32>
    %38 = arith.subf %37, %34 : vector<512x128xf32>
    %39 = arith.select %36, %38, %34 : vector<512x128xi1>, vector<512x128xf32>
    %cst_18 = arith.constant 1.000000e+00 : f32
    %40 = vector.broadcast %cst_18 : f32 to vector<512x128xf32>
    %41 = arith.addf %40, %39 : vector<512x128xf32>
    %42 = arith.mulf %5, %41 : vector<512x128xf32>
    %cst_19 = arith.constant dense<0.000000e+00> : vector<512x128xf32>
    %43 = tpu.matmul %42, %2, %cst_19 {dimension_numbers = #tpu.dot_dimension_numbers<[1], [0], [0], [1], [0, 0, 1, 1], [], []>} : vector<512x128xf32>, vector<128x128xf32>, vector<512x128xf32> -> vector<512x128xf32>
    %cst_20 = arith.constant dense<0.000000e+00> : vector<512xf32>
    %44 = vector.multi_reduction <add>, %43, %cst_20 [1] : vector<512x128xf32> to vector<512xf32>
    %45 = vector.shape_cast %44 : vector<512xf32> to vector<512x1xf32>
    %cst_21 = arith.constant 3.125000e-02 : f32
    %46 = vector.broadcast %cst_21 : f32 to vector<512x1xf32>
    %47 = arith.mulf %45, %46 : vector<512x1xf32>
    %48 = tpu.iota {dimensions = array<i32: 1>} : vector<512x128xi32>
    %c32_i32 = arith.constant 32 : i32
    %49 = vector.broadcast %c32_i32 : i32 to vector<512x128xi32>
    %50 = arith.cmpi slt, %48, %49 : vector<512x128xi32>
    %51 = vector.broadcast %47 : vector<512x1xf32> to vector<512x128xf32>
    %52 = arith.subf %43, %51 : vector<512x128xf32>
    %cst_22 = arith.constant 0.000000e+00 : f32
    %53 = vector.broadcast %cst_22 : f32 to vector<512x128xf32>
    %54 = arith.select %50, %52, %53 : vector<512x128xi1>, vector<512x128xf32>
    %55 = arith.mulf %54, %54 : vector<512x128xf32>
    %cst_23 = arith.constant dense<0.000000e+00> : vector<512xf32>
    %56 = vector.multi_reduction <add>, %55, %cst_23 [1] : vector<512x128xf32> to vector<512xf32>
    %57 = vector.shape_cast %56 : vector<512xf32> to vector<512x1xf32>
    %cst_24 = arith.constant 3.125000e-02 : f32
    %58 = vector.broadcast %cst_24 : f32 to vector<512x1xf32>
    %59 = arith.mulf %57, %58 : vector<512x1xf32>
    %cst_25 = arith.constant 9.99999974E-6 : f32
    %60 = vector.broadcast %cst_25 : f32 to vector<512x1xf32>
    %61 = arith.addf %59, %60 : vector<512x1xf32>
    %62 = math.rsqrt %61 : vector<512x1xf32>
    %63 = vector.broadcast %62 : vector<512x1xf32> to vector<512x128xf32>
    %64 = arith.mulf %54, %63 : vector<512x128xf32>
    %c0_26 = arith.constant 0 : index
    %c0_27 = arith.constant 0 : index
    %65 = vector.load %arg4[%c0_26, %c0_27] : memref<2x128xf32, #tpu.memory_space<vmem>>, vector<1x128xf32>
    %c1 = arith.constant 1 : index
    %c0_28 = arith.constant 0 : index
    %66 = vector.load %arg4[%c1, %c0_28] : memref<2x128xf32, #tpu.memory_space<vmem>>, vector<1x128xf32>
    %67 = vector.broadcast %65 : vector<1x128xf32> to vector<512x128xf32>
    %68 = arith.mulf %64, %67 : vector<512x128xf32>
    %69 = vector.broadcast %66 : vector<1x128xf32> to vector<512x128xf32>
    %70 = arith.addf %68, %69 : vector<512x128xf32>
    %c0_29 = arith.constant 0 : index
    %c0_30 = arith.constant 0 : index
    %71 = vector.load %arg5[%c0_29, %c0_30] : memref<512x128xf32, #tpu.memory_space<vmem>>, vector<512x128xf32>
    tpu.vector_store %arg5[%c0_29, %c0_30], %70 {strides = array<i32>} : memref<512x128xf32, #tpu.memory_space<vmem>>, vector<512x128xf32>,
    return
  }
  func.func @transform_0(%arg0: i32) -> (i32, i32) {
    %c0_i32 = arith.constant 0 : i32
    %c0_i32_0 = arith.constant 0 : i32
    return %arg0, %c0_i32 : i32, i32
  }
  func.func @transform_1(%arg0: i32) -> (i32, i32) {
    %c0_i32 = arith.constant 0 : i32
    %c0_i32_0 = arith.constant 0 : i32
    %c0_i32_1 = arith.constant 0 : i32
    return %c0_i32, %c0_i32_0 : i32, i32
  }
  func.func @transform_2(%arg0: i32) -> (i32, i32) {
    %c0_i32 = arith.constant 0 : i32
    %c0_i32_0 = arith.constant 0 : i32
    %c0_i32_1 = arith.constant 0 : i32
    return %c0_i32, %c0_i32_0 : i32, i32
  }
  func.func @transform_3(%arg0: i32) -> (i32, i32) {
    %c0_i32 = arith.constant 0 : i32
    %c0_i32_0 = arith.constant 0 : i32
    %c0_i32_1 = arith.constant 0 : i32
    return %c0_i32, %c0_i32_0 : i32, i32
  }
  func.func @transform_4(%arg0: i32) -> (i32, i32) {
    %c0_i32 = arith.constant 0 : i32
    %c0_i32_0 = arith.constant 0 : i32
    return %arg0, %c0_i32 : i32, i32
  }
}

module attributes {stable_mosaic.version = 11 : i64} {
  func.func @_mlp_kernel(%arg0: i32, %arg1: memref<512x128xf32, #tpu.memory_space<vmem>>, %arg2: memref<128x128xf32, #tpu.memory_space<vmem>>, %arg3: memref<128x128xf32, #tpu.memory_space<vmem>>, %arg4: memref<2x128xf32, #tpu.memory_space<vmem>>, %arg5: memref<512x128xf32, #tpu.memory_space<vmem>>) attributes {dimension_semantics = [#tpu.dimension_semantics<parallel>], iteration_bounds = array<i64: 1>, scalar_prefetch = 0 : i64, scratch_operands = 0 : i64, tpu.core_type = #tpu.core_type<tc>, window_params = [{transform_indices = @transform_0, window_bounds = array<i64: 512, 128>}, {pipeline_mode = #tpu.pipeline_mode<synchronous>, transform_indices = @transform_1, window_bounds = array<i64: 128, 128>}, {pipeline_mode = #tpu.pipeline_mode<synchronous>, transform_indices = @transform_2, window_bounds = array<i64: 128, 128>}, {pipeline_mode = #tpu.pipeline_mode<synchronous>, transform_indices = @transform_3, window_bounds = array<i64: 2, 128>}, {transform_indices = @transform_4, window_bounds = array<i64: 512, 128>}]} {
    %c0 = arith.constant 0 : index
    %c0_0 = arith.constant 0 : index
    %0 = vector.load %arg1[%c0, %c0_0] : memref<512x128xf32, #tpu.memory_space<vmem>>, vector<512x128xf32>
    %c0_1 = arith.constant 0 : index
    %c0_2 = arith.constant 0 : index
    %1 = vector.load %arg2[%c0_1, %c0_2] : memref<128x128xf32, #tpu.memory_space<vmem>>, vector<128x128xf32>
    %c0_3 = arith.constant 0 : index
    %c0_4 = arith.constant 0 : index
    %2 = vector.load %arg3[%c0_3, %c0_4] : memref<128x128xf32, #tpu.memory_space<vmem>>, vector<128x128xf32>
    %cst = arith.constant dense<0.000000e+00> : vector<512x128xf32>
    %3 = tpu.matmul %0, %1, %cst {dimension_numbers = #tpu.dot_dimension_numbers<[1], [0], [0], [1], [0, 0, 1, 1], [], []>} : vector<512x128xf32>, vector<128x128xf32>, vector<512x128xf32> -> vector<512x128xf32>
    %cst_5 = arith.constant 5.000000e-01 : f32
    %4 = vector.broadcast %cst_5 : f32 to vector<512x128xf32>
    %5 = arith.mulf %4, %3 : vector<512x128xf32>
    %cst_6 = arith.constant 0.707106769 : f32
    %6 = vector.broadcast %cst_6 : f32 to vector<512x128xf32>
    %7 = arith.mulf %3, %6 : vector<512x128xf32>
    %8 = math.absf %7 : vector<512x128xf32>
    %cst_7 = arith.constant 0.327591091 : f32
    %9 = vector.broadcast %cst_7 : f32 to vector<512x128xf32>
    %10 = arith.mulf %9, %8 : vector<512x128xf32>
    %cst_8 = arith.constant 1.000000e+00 : f32
    %11 = vector.broadcast %cst_8 : f32 to vector<512x128xf32>
    %12 = arith.addf %11, %10 : vector<512x128xf32>
    %13 = tpu.reciprocal %12 {approx = true} : vector<512x128xf32> -> vector<512x128xf32>
    %cst_9 = arith.constant 1.06140542 : f32
    %14 = vector.broadcast %cst_9 : f32 to vector<512x128xf32>
    %15 = arith.mulf %13, %14 : vector<512x128xf32>
    %cst_10 = arith.constant -1.45315206 : f32
    %16 = vector.broadcast %cst_10 : f32 to vector<512x128xf32>
    %17 = arith.addf %16, %15 : vector<512x128xf32>
    %18 = arith.mulf %13, %17 : vector<512x128xf32>
    %cst_11 = arith.constant 1.42141378 : f32
    %19 = vector.broadcast %cst_11 : f32 to vector<512x128xf32>
    %20 = arith.addf %19, %18 : vector<512x128xf32>
    %21 = arith.mulf %13, %20 : vector<512x128xf32>
    %cst_12 = arith.constant -0.284496725 : f32
    %22 = vector.broadcast %cst_12 : f32 to vector<512x128xf32>
    %23 = arith.addf %22, %21 : vector<512x128xf32>
    %24 = arith.mulf %13, %23 : vector<512x128xf32>
    %cst_13 = arith.constant 0.254829586 : f32
    %25 = vector.broadcast %cst_13 : f32 to vector<512x128xf32>
    %26 = arith.addf %25, %24 : vector<512x128xf32>
    %27 = arith.mulf %13, %26 : vector<512x128xf32>
    %cst_14 = arith.constant 0.000000e+00 : f32
    %28 = vector.broadcast %cst_14 : f32 to vector<512x128xf32>
    %29 = arith.subf %28, %8 : vector<512x128xf32>
    %30 = arith.mulf %29, %8 : vector<512x128xf32>
    %31 = math.exp %30 : vector<512x128xf32>
    %32 = arith.mulf %27, %31 : vector<512x128xf32>
    %cst_15 = arith.constant 1.000000e+00 : f32
    %33 = vector.broadcast %cst_15 : f32 to vector<512x128xf32>
    %34 = arith.subf %33, %32 : vector<512x128xf32>
    %cst_16 = arith.constant 0.000000e+00 : f32
    %35 = vector.broadcast %cst_16 : f32 to vector<512x128xf32>
    %36 = arith.cmpf olt, %7, %35 : vector<512x128xf32>
    %cst_17 = arith.constant 0.000000e+00 : f32
    %37 = vector.broadcast %cst_17 : f32 to vector<512x128xf32>
    %38 = arith.subf %37, %34 : vector<512x128xf32>
    %39 = arith.select %36, %38, %34 : vector<512x128xi1>, vector<512x128xf32>
    %cst_18 = arith.constant 1.000000e+00 : f32
    %40 = vector.broadcast %cst_18 : f32 to vector<512x128xf32>
    %41 = arith.addf %40, %39 : vector<512x128xf32>
    %42 = arith.mulf %5, %41 : vector<512x128xf32>
    %cst_19 = arith.constant dense<0.000000e+00> : vector<512x128xf32>
    %43 = tpu.matmul %42, %2, %cst_19 {dimension_numbers = #tpu.dot_dimension_numbers<[1], [0], [0], [1], [0, 0, 1, 1], [], []>} : vector<512x128xf32>, vector<128x128xf32>, vector<512x128xf32> -> vector<512x128xf32>
    %cst_20 = arith.constant dense<0.000000e+00> : vector<512xf32>
    %44 = vector.multi_reduction <add>, %43, %cst_20 [1] : vector<512x128xf32> to vector<512xf32>
    %45 = vector.shape_cast %44 : vector<512xf32> to vector<512x1xf32>
    %cst_21 = arith.constant 3.125000e-02 : f32
    %46 = vector.broadcast %cst_21 : f32 to vector<512x1xf32>
    %47 = arith.mulf %45, %46 : vector<512x1xf32>
    %48 = tpu.iota {dimensions = array<i32: 1>} : vector<512x128xi32>
    %c32_i32 = arith.constant 32 : i32
    %49 = vector.broadcast %c32_i32 : i32 to vector<512x128xi32>
    %50 = arith.cmpi slt, %48, %49 : vector<512x128xi32>
    %51 = vector.broadcast %47 : vector<512x1xf32> to vector<512x128xf32>
    %52 = arith.subf %43, %51 : vector<512x128xf32>
    %cst_22 = arith.constant 0.000000e+00 : f32
    %53 = vector.broadcast %cst_22 : f32 to vector<512x128xf32>
    %54 = arith.select %50, %52, %53 : vector<512x128xi1>, vector<512x128xf32>
    %55 = arith.mulf %54, %54 : vector<512x128xf32>
    %cst_23 = arith.constant dense<0.000000e+00> : vector<512xf32>
    %56 = vector.multi_reduction <add>, %55, %cst_23 [1] : vector<512x128xf32> to vector<512xf32>
    %57 = vector.shape_cast %56 : vector<512xf32> to vector<512x1xf32>
    %cst_24 = arith.constant 3.125000e-02 : f32
    %58 = vector.broadcast %cst_24 : f32 to vector<512x1xf32>
    %59 = arith.mulf %57, %58 : vector<512x1xf32>
    %cst_25 = arith.constant 9.99999974E-6 : f32
    %60 = vector.broadcast %cst_25 : f32 to vector<512x1xf32>
    %61 = arith.addf %59, %60 : vector<512x1xf32>
    %62 = math.rsqrt %61 : vector<512x1xf32>
    %63 = vector.broadcast %62 : vector<512x1xf32> to vector<512x128xf32>
    %64 = arith.mulf %54, %63 : vector<512x128xf32>
    %c0_26 = arith.constant 0 : index
    %c0_27 = arith.constant 0 : index
    %65 = vector.load %arg4[%c0_26, %c0_27] : memref<2x128xf32, #tpu.memory_space<vmem>>, vector<1x128xf32>
    %c1 = arith.constant 1 : index
    %c0_28 = arith.constant 0 : index
    %66 = vector.load %arg4[%c1, %c0_28] : memref<2x128xf32, #tpu.memory_space<vmem>>, vector<1x128xf32>
    %67 = vector.broadcast %65 : vector<1x128xf32> to vector<512x128xf32>
    %68 = arith.mulf %64, %67 : vector<512x128xf32>
    %69 = vector.broadcast %66 : vector<1x128xf32> to vector<512x128xf32>
    %70 = arith.addf %68, %69 : vector<512x128xf32>
    %c0_29 = arith.constant 0 : index
    %c0_30 = arith.constant 0 : index
    %71 = vector.load %arg5[%c0_29, %c0_30] : memref<512x128xf32, #tpu.memory_space<vmem>>, vector<512x128xf32>
    tpu.vector_store %arg5[%c0_29, %c0_30], %70 {strides = array<i32>} : memref<512x128xf32, #tpu.memory_space<vmem>>, vector<512x128xf32>,
    return
  }
  func.func @transform_0(%arg0: i32) -> (i32, i32) {
    %c0_i32 = arith.constant 0 : i32
    %c0_i32_0 = arith.constant 0 : i32
    return %arg0, %c0_i32 : i32, i32
  }
  func.func @transform_1(%arg0: i32) -> (i32, i32) {
    %c0_i32 = arith.constant 0 : i32
    %c0_i32_0 = arith.constant 0 : i32
    %c0_i32_1 = arith.constant 0 : i32
    return %c0_i32, %c0_i32_0 : i32, i32
  }
  func.func @transform_2(%arg0: i32) -> (i32, i32) {
    %c0_i32 = arith.constant 0 : i32
    %c0_i32_0 = arith.constant 0 : i32
    %c0_i32_1 = arith.constant 0 : i32
    return %c0_i32, %c0_i32_0 : i32, i32
  }
  func.func @transform_3(%arg0: i32) -> (i32, i32) {
    %c0_i32 = arith.constant 0 : i32
    %c0_i32_0 = arith.constant 0 : i32
    %c0_i32_1 = arith.constant 0 : i32
    return %c0_i32, %c0_i32_0 : i32, i32
  }
  func.func @transform_4(%arg0: i32) -> (i32, i32) {
    %c0_i32 = arith.constant 0 : i32
    %c0_i32_0 = arith.constant 0 : i32
    return %arg0, %c0_i32 : i32, i32
  }
}

</mosaic_0001>

<bundles_post_ra>
// kernel: tpu_custom_call.1
= control target key start
LH: loop header
LB: loop body
LE: loop exit
PB: predicated region body
PF: predicated region fallthrough
CT: control target
= control target key end

     0   :  { %9 = vsyncpa [#allocation3], 0  ;;  %s6965_s0 = inlined_call_operand.hbm [shape: f32[512,128], index: 0, kind: input, shape index: {}]   ;;  %s6966_s1 = inlined_call_operand.hbm [shape: f32[128,128], index: 1, kind: input, shape index: {}]   ;;  %s6967_s2 = inlined_call_operand.hbm [shape: f32[128,128], index: 2, kind: input, shape index: {}]   ;;  %s6968_s3 = inlined_call_operand.vmem [shape: f32[2,128], index: 3, kind: input, shape index: {}]   ;;  %s6969_s4 = inlined_call_operand.hbm [shape: f32[512,128], index: 4, kind: output, shape index: {}]  }
   0x1   :  { %10 = vsyncpa [#allocation6], 0 }
   0x2   :  { %11 = vsyncpa [#allocation4], 0  ;;  %s4476_s15 = smov [#allocation5]   ;;  %s4477_s17 = smov [#allocation2]  }
   0x3   :  { %s29_s16 = sshll.u32 %s4476_s15, 4  ;;  %s17_s18 = sshll.u32 %s4477_s17, 4  ;;  %s30_s16 = int_to_ptr.vmem [resolvable:$true] %s29_s16  ;;  %s18_s18 = int_to_ptr.vmem [resolvable:$true] %s17_s18 }
   0x4   :  { %s4398_s19 = scalar_lea.vmem %s30_s16, 2048  ;;  %p4403_p1 = scmp.lt.s32.totalorder %s30_s16, %s30_s16 }
   0x5   :  { %p4399_p0 = scmp.ne.s32.totalorder %s30_s16, %s4398_s19  ;;  %p4404_p2 = scmp.lt.s32.totalorder %s4398_s19, %s4398_s19 }
   0x7   :  { %p4405_p3 = por %p4404_p2, %p4403_p1 }
   0x9   :  { %p4406_p4 = pnand %p4405_p3, %p4399_p0 }
   0xb   :  { %4409 = shalt.err (!%p4406_p4)
}
   0xc   :  { %s4478_s20 = smov 128   ;;  %s4479_s21 = smov 8  }
   0xd   :  { %35 = dma.hbm_to_vmem [thread:$0]  %s6966_s1, 2048, %s30_s16, [#allocation6], %s4478_s20, %s4478_s20, %s4479_s21  }
   0xe   :  { %s4418_s24 = scalar_lea.vmem %s18_s18, 8192  ;;  %p4423_p6 = scmp.lt.s32.totalorder %s18_s18, %s18_s18 }
   0xf   :  { %p4419_p5 = scmp.ne.s32.totalorder %s18_s18, %s4418_s24  ;;  %p4424_p7 = scmp.lt.s32.totalorder %s4418_s24, %s4418_s24 }
  0x11   :  { %p4425_p8 = por %p4424_p7, %p4423_p6 }
  0x13   :  { %p4426_p9 = pnand %p4425_p8, %p4419_p5 }
  0x15   :  { %4429 = shalt.err (!%p4426_p9)
}
  0x16   :  { %23 = dma.hbm_to_vmem [thread:$0]  %s6965_s0, 8192, %s18_s18, [#allocation3], %s4478_s20, %s4478_s20, %s4479_s21  }
  0x17   :  { %s4480_s27 = smov [#allocation7]  }
  0x18   :  { %s41_s28 = sshll.u32 %s4480_s27, 4  ;;  %s42_s28 = int_to_ptr.vmem [resolvable:$true] %s41_s28 }
  0x19   :  { %s4438_s29 = scalar_lea.vmem %s42_s28, 2048  ;;  %p4443_p11 = scmp.lt.s32.totalorder %s42_s28, %s42_s28 }
  0x1a   :  { %p4439_p10 = scmp.ne.s32.totalorder %s42_s28, %s4438_s29  ;;  %p4444_p12 = scmp.lt.s32.totalorder %s4438_s29, %s4438_s29 }
  0x1c   :  { %p4445_p13 = por %p4444_p12, %p4443_p11 }
  0x1e   :  { %p4446_p0 = pnand %p4445_p13, %p4439_p10 }
  0x20   :  { %4449 = shalt.err (!%p4446_p0)
}
  0x21   :  { %47 = dma.hbm_to_vmem [thread:$0]  %s6967_s2, 2048, %s42_s28, [#allocation6], %s4478_s20, %s4478_s20, %s4479_s21  }
  0x22   :  { %4470 = dma.done.wait [#allocation3], 8192  }
  0x23   :  { %4471 = vsyncadd [#allocation3], 4294959104 }
  0x24   :  { %4472 = dma.done.wait [#allocation6], 4096  }
  0x25   :  { %4473 = vsyncadd [#allocation6], 4294963200  ;;  %v138_v0 = vld [vmem:[#allocation5 + $0x78] sm:$0xff]  ;;  %v137_v1 = vld [vmem:[#allocation5 + $0x70] sm:$0xff]  ;;  %s4481_s11 = smov [#allocation8]  }
  0x26   :  { %3742 = vmatprep.subr.mxu0 %v138_v0  ;;  %v136_v2 = vld [vmem:[#allocation5 + $0x68] sm:$0xff]  ;;  %v135_v3 = vld [vmem:[#allocation5 + $0x60] sm:$0xff]  ;;  %v134_v5 = vld [vmem:[#allocation5 + $0x58] sm:$0xff]  ;;  %s3567_s12 = sshll.u32 %s4481_s11, 4  ;;  %s3568_s12 = int_to_ptr.vmem [resolvable:$true] %s3567_s12 }
  0x27   :  { %3743 = vmatpush3.msra.mxu0 %v138_v0  ;;  %v59_v4 = vld [vmem:[#allocation2] sm:$0xff]  ;;  %v133_v6 = vld [vmem:[#allocation5 + $0x50] sm:$0xff]  ;;  %v132_v7 = vld [vmem:[#allocation5 + $0x48] sm:$0xff]  ;;  %p4455_p2 = scmp.lt.s32.totalorder %s3568_s12, %s3568_s12 }
  0x28   :  { %3744 = vmatprep.subr.mxu0 %v137_v1  ;;  %3774 = vmatprep.mubr.f32.mxu0 %v59_v4  ;;  %v131_v8 = vld [vmem:[#allocation5 + $0x40] sm:$0xff]  ;;  %v130_v9 = vld [vmem:[#allocation5 + $0x38] sm:$0xff]  ;;  %v129_v10 = vld [vmem:[#allocation5 + $0x30] sm:$0xff] }
  0x29   :  { %3745 = vmatpush3.msra.mxu0 %v137_v1  ;;  %v128_v11 = vld [vmem:[#allocation5 + $0x28] sm:$0xff]  ;;  %v127_v12 = vld [vmem:[#allocation5 + $0x20] sm:$0xff]  ;;  %v126_v13 = vld [vmem:[#allocation5 + $0x18] sm:$0xff] }
  0x2a   :  { %3746 = vmatprep.subr.mxu0 %v136_v2  ;;  %v125_v14 = vld [vmem:[#allocation5 + $0x10] sm:$0xff]  ;;  %v124_v15 = vld [vmem:[#allocation5 + $0x8] sm:$0xff]  ;;  %v123_v16 = vld [vmem:[#allocation5] sm:$0xff] }
  0x2b   :  { %3747 = vmatpush3.msra.mxu0 %v136_v2  ;;  %v60_v17 = vld [vmem:[#allocation2 + $0x8] sm:$0xff]  ;;  %v61_v18 = vld [vmem:[#allocation2 + $0x10] sm:$0xff]  ;;  %v62_v19 = vld [vmem:[#allocation2 + $0x18] sm:$0xff] }
  0x2c   :  { %3748 = vmatprep.subr.mxu0 %v135_v3  ;;  %v63_v20 = vld [vmem:[#allocation2 + $0x20] sm:$0xff]  ;;  %v64_v21 = vld [vmem:[#allocation2 + $0x28] sm:$0xff]  ;;  %v65_v22 = vld [vmem:[#allocation2 + $0x30] sm:$0xff] }
  0x2d   :  { %3749 = vmatpush3.msra.mxu0 %v135_v3  ;;  %v66_v23 = vld [vmem:[#allocation2 + $0x38] sm:$0xff]  ;;  %v67_v24 = vld [vmem:[#allocation2 + $0x40] sm:$0xff]  ;;  %v68_v25 = vld [vmem:[#allocation2 + $0x48] sm:$0xff] }
  0x2e   :  { %3750 = vmatprep.subr.mxu0 %v134_v5  ;;  %v69_v26 = vld [vmem:[#allocation2 + $0x50] sm:$0xff]  ;;  %v70_v27 = vld [vmem:[#allocation2 + $0x58] sm:$0xff]  ;;  %v71_v28 = vld [vmem:[#allocation2 + $0x60] sm:$0xff] }
  0x2f   :  { %3751 = vmatpush3.msra.mxu0 %v134_v5  ;;  %v72_v29 = vld [vmem:[#allocation2 + $0x68] sm:$0xff]  ;;  %v73_v30 = vld [vmem:[#allocation2 + $0x70] sm:$0xff]  ;;  %v74_v31 = vld [vmem:[#allocation2 + $0x78] sm:$0xff] }
  0x30   :  { %3752 = vmatprep.subr.mxu0 %v133_v6  ;;  %v75_v32 = vld [vmem:[#allocation2 + $0x80] sm:$0xff]  ;;  %v76_v33 = vld [vmem:[#allocation2 + $0x88] sm:$0xff]  ;;  %v77_v34 = vld [vmem:[#allocation2 + $0x90] sm:$0xff] }
  0x31   :  { %3753 = vmatpush3.msra.mxu0 %v133_v6  ;;  %v78_v35 = vld [vmem:[#allocation2 + $0x98] sm:$0xff]  ;;  %v79_v36 = vld [vmem:[#allocation2 + $0xa0] sm:$0xff]  ;;  %v80_v37 = vld [vmem:[#allocation2 + $0xa8] sm:$0xff] }
  0x32   :  { %3754 = vmatprep.subr.mxu0 %v132_v7  ;;  %v81_v38 = vld [vmem:[#allocation2 + $0xb0] sm:$0xff]  ;;  %v82_v39 = vld [vmem:[#allocation2 + $0xb8] sm:$0xff]  ;;  %v83_v40 = vld [vmem:[#allocation2 + $0xc0] sm:$0xff] }
  0x33   :  { %3755 = vmatpush3.msra.mxu0 %v132_v7  ;;  %v84_v41 = vld [vmem:[#allocation2 + $0xc8] sm:$0xff]  ;;  %v85_v42 = vld [vmem:[#allocation2 + $0xd0] sm:$0xff]  ;;  %v86_v43 = vld [vmem:[#allocation2 + $0xd8] sm:$0xff] }
  0x34   :  { %3756 = vmatprep.subr.mxu0 %v131_v8  ;;  %v87_v44 = vld [vmem:[#allocation2 + $0xe0] sm:$0xff]  ;;  %v88_v45 = vld [vmem:[#allocation2 + $0xe8] sm:$0xff]  ;;  %v89_v46 = vld [vmem:[#allocation2 + $0xf0] sm:$0xff] }
  0x35   :  { %3757 = vmatpush3.msra.mxu0 %v131_v8  ;;  %v90_v47 = vld [vmem:[#allocation2 + $0xf8] sm:$0xff]  ;;  %v91_v48 = vld [vmem:[#allocation2 + $0x100] sm:$0xff]  ;;  %v92_v49 = vld [vmem:[#allocation2 + $0x108] sm:$0xff] }
  0x36   :  { %3758 = vmatprep.subr.mxu0 %v130_v9  ;;  %v93_v50 = vld [vmem:[#allocation2 + $0x110] sm:$0xff]  ;;  %v94_v51 = vld [vmem:[#allocation2 + $0x118] sm:$0xff]  ;;  %v95_v52 = vld [vmem:[#allocation2 + $0x120] sm:$0xff] }
  0x37   :  { %3759 = vmatpush3.msra.mxu0 %v130_v9  ;;  %v96_v53 = vld [vmem:[#allocation2 + $0x128] sm:$0xff]  ;;  %v97_v54 = vld [vmem:[#allocation2 + $0x130] sm:$0xff]  ;;  %v98_v55 = vld [vmem:[#allocation2 + $0x138] sm:$0xff] }
  0x38   :  { %3760 = vmatprep.subr.mxu0 %v129_v10  ;;  %v99_v56 = vld [vmem:[#allocation2 + $0x140] sm:$0xff]  ;;  %v100_v57 = vld [vmem:[#allocation2 + $0x148] sm:$0xff]  ;;  %v101_v58 = vld [vmem:[#allocation2 + $0x150] sm:$0xff] }
  0x39   :  { %3761 = vmatpush3.msra.mxu0 %v129_v10  ;;  %v102_v59 = vld [vmem:[#allocation2 + $0x158] sm:$0xff]  ;;  %v103_v60 = vld [vmem:[#allocation2 + $0x160] sm:$0xff]  ;;  %v104_v61 = vld [vmem:[#allocation2 + $0x168] sm:$0xff] }
  0x3a   :  { %3762 = vmatprep.subr.mxu0 %v128_v11  ;;  %v105_v62 = vld [vmem:[#allocation2 + $0x170] sm:$0xff]  ;;  %v106_v63 = vld [vmem:[#allocation2 + $0x178] sm:$0xff]  ;;  %v107_v0 = vld [vmem:[#allocation2 + $0x180] sm:$0xff] }
  0x3b   :  { %3763 = vmatpush3.msra.mxu0 %v128_v11  ;;  %v108_v1 = vld [vmem:[#allocation2 + $0x188] sm:$0xff]  ;;  %v109_v2 = vld [vmem:[#allocation2 + $0x190] sm:$0xff]  ;;  %v110_v3 = vld [vmem:[#allocation2 + $0x198] sm:$0xff] }
  0x3c   :  { %3764 = vmatprep.subr.mxu0 %v127_v12  ;;  %v111_v4 = vld [vmem:[#allocation2 + $0x1a0] sm:$0xff]  ;;  %v112_v5 = vld [vmem:[#allocation2 + $0x1a8] sm:$0xff]  ;;  %v113_v6 = vld [vmem:[#allocation2 + $0x1b0] sm:$0xff] }
  0x3d   :  { %3765 = vmatpush3.msra.mxu0 %v127_v12  ;;  %v114_v7 = vld [vmem:[#allocation2 + $0x1b8] sm:$0xff]  ;;  %v115_v8 = vld [vmem:[#allocation2 + $0x1c0] sm:$0xff]  ;;  %v116_v9 = vld [vmem:[#allocation2 + $0x1c8] sm:$0xff] }
  0x3e   :  { %3766 = vmatprep.subr.mxu0 %v126_v13  ;;  %v117_v10 = vld [vmem:[#allocation2 + $0x1d0] sm:$0xff]  ;;  %v118_v11 = vld [vmem:[#allocation2 + $0x1d8] sm:$0xff]  ;;  %v119_v12 = vld [vmem:[#allocation2 + $0x1e0] sm:$0xff] }
  0x3f   :  { %3767 = vmatpush3.msra.mxu0 %v126_v13  ;;  %v120_v13 = vld [vmem:[#allocation2 + $0x1e8] sm:$0xff] }
  0x40   :  { %3768 = vmatprep.subr.mxu0 %v125_v14 }
  0x41   :  { %3769 = vmatpush3.msra.mxu0 %v125_v14  ;;  %v121_v14 = vld [vmem:[#allocation2 + $0x1f0] sm:$0xff] }
  0x42   :  { %3770 = vmatprep.subr.mxu0 %v124_v15 }
  0x43   :  { %3771 = vmatpush3.msra.mxu0 %v124_v15  ;;  %v122_v15 = vld [vmem:[#allocation2 + $0x1f8] sm:$0xff] }
  0x44   :  { %3772 = vmatprep.subr.mxu0 %v123_v16 }
  0x45   :  { %3773 = vmatpush3.msra.mxu0 %v123_v16  ;;  %v154_v16 = vld [vmem:[#allocation7 + $0x78] sm:$0xff] }
  0x46   :  { %3775 = vmatmul.mubr.f32.vlgmr.msra.gmra.mxu0 %v60_v17  ;;  %3870 = vmatprep.subr.mxu1 %v154_v16  ;;  %v153_v17 = vld [vmem:[#allocation7 + $0x70] sm:$0xff] }
  0x47   :  { %3777 = vmatprep.mubr.f32.mxu0 %v61_v18  ;;  %3871 = vmatpush3.msra.mxu1 %v154_v16  ;;  %v152_v18 = vld [vmem:[#allocation7 + $0x68] sm:$0xff] }
  0x48   :  { %3872 = vmatprep.subr.mxu1 %v153_v17 }
  0x49   :  { %3873 = vmatpush3.msra.mxu1 %v153_v17 }
  0x4a   :  { %3778 = vmatmul.mubr.f32.gmra.mxu0 %v62_v19  ;;  %3874 = vmatprep.subr.mxu1 %v152_v18  ;;  %v151_v19 = vld [vmem:[#allocation7 + $0x60] sm:$0xff] }
  0x4b   :  { %3780 = vmatprep.mubr.f32.mxu0 %v63_v20  ;;  %3875 = vmatpush3.msra.mxu1 %v152_v18  ;;  %v150_v20 = vld [vmem:[#allocation7 + $0x58] sm:$0xff] }
  0x4c   :  { %3876 = vmatprep.subr.mxu1 %v151_v19 }
  0x4d   :  { %3877 = vmatpush3.msra.mxu1 %v151_v19 }
  0x4e   :  { %3781 = vmatmul.mubr.f32.gmra.mxu0 %v64_v21  ;;  %3878 = vmatprep.subr.mxu1 %v150_v20  ;;  %v149_v21 = vld [vmem:[#allocation7 + $0x50] sm:$0xff] }
  0x4f   :  { %3783 = vmatprep.mubr.f32.mxu0 %v65_v22  ;;  %3879 = vmatpush3.msra.mxu1 %v150_v20  ;;  %v148_v22 = vld [vmem:[#allocation7 + $0x48] sm:$0xff] }
  0x50   :  { %3880 = vmatprep.subr.mxu1 %v149_v21 }
  0x51   :  { %3881 = vmatpush3.msra.mxu1 %v149_v21 }
  0x52   :  { %3784 = vmatmul.mubr.f32.gmra.mxu0 %v66_v23  ;;  %3882 = vmatprep.subr.mxu1 %v148_v22  ;;  %v147_v23 = vld [vmem:[#allocation7 + $0x40] sm:$0xff] }
  0x53   :  { %3786 = vmatprep.mubr.f32.mxu0 %v67_v24  ;;  %3883 = vmatpush3.msra.mxu1 %v148_v22  ;;  %v146_v24 = vld [vmem:[#allocation7 + $0x38] sm:$0xff] }
  0x54   :  { %3884 = vmatprep.subr.mxu1 %v147_v23 }
  0x55   :  { %3885 = vmatpush3.msra.mxu1 %v147_v23 }
  0x56   :  { %3787 = vmatmul.mubr.f32.gmra.mxu0 %v68_v25  ;;  %3886 = vmatprep.subr.mxu1 %v146_v24  ;;  %v145_v25 = vld [vmem:[#allocation7 + $0x30] sm:$0xff] }
  0x57   :  { %3789 = vmatprep.mubr.f32.mxu0 %v69_v26  ;;  %3887 = vmatpush3.msra.mxu1 %v146_v24  ;;  %v144_v26 = vld [vmem:[#allocation7 + $0x28] sm:$0xff] }
  0x58   :  { %3888 = vmatprep.subr.mxu1 %v145_v25 }
  0x59   :  { %3889 = vmatpush3.msra.mxu1 %v145_v25 }
  0x5a   :  { %3790 = vmatmul.mubr.f32.gmra.mxu0 %v70_v27  ;;  %3890 = vmatprep.subr.mxu1 %v144_v26 }
  0x5b   :  { %3792 = vmatprep.mubr.f32.mxu0 %v71_v28  ;;  %3891 = vmatpush3.msra.mxu1 %v144_v26 }
  0x5e   :  { %3793 = vmatmul.mubr.f32.gmra.mxu0 %v72_v29 }
  0x5f   :  { %3795 = vmatprep.mubr.f32.mxu0 %v73_v30 }
  0x62   :  { %3796 = vmatmul.mubr.f32.gmra.mxu0 %v74_v31 }
  0x63   :  { %3798 = vmatprep.mubr.f32.mxu0 %v75_v32 }
  0x66   :  { %3799 = vmatmul.mubr.f32.gmra.mxu0 %v76_v33 }
  0x67   :  { %3801 = vmatprep.mubr.f32.mxu0 %v77_v34 }
  0x6a   :  { %3802 = vmatmul.mubr.f32.gmra.mxu0 %v78_v35  ;;  %v143_v35 = vld [vmem:[#allocation7 + $0x20] sm:$0xff] }
  0x6b   :  { %3804 = vmatprep.mubr.f32.mxu0 %v79_v36  ;;  %3892 = vmatprep.subr.mxu1 %v143_v35 }
  0x6c   :  { %3893 = vmatpush3.msra.mxu1 %v143_v35 }
  0x6e   :  { %3805 = vmatmul.mubr.f32.gmra.mxu0 %v80_v37  ;;  %v142_v37 = vld [vmem:[#allocation7 + $0x18] sm:$0xff] }
  0x6f   :  { %3807 = vmatprep.mubr.f32.mxu0 %v81_v38  ;;  %3894 = vmatprep.subr.mxu1 %v142_v37 }
  0x70   :  { %3895 = vmatpush3.msra.mxu1 %v142_v37 }
  0x72   :  { %3808 = vmatmul.mubr.f32.gmra.mxu0 %v82_v39 }
  0x73   :  { %3810 = vmatprep.mubr.f32.mxu0 %v83_v40 }
  0x76   :  { %3811 = vmatmul.mubr.f32.gmra.mxu0 %v84_v41 }
  0x77   :  { %3813 = vmatprep.mubr.f32.mxu0 %v85_v42 }
  0x7a   :  { %3814 = vmatmul.mubr.f32.gmra.mxu0 %v86_v43 }
  0x7b   :  { %3816 = vmatprep.mubr.f32.mxu0 %v87_v44 }
  0x7e   :  { %3817 = vmatmul.mubr.f32.gmra.mxu0 %v88_v45  ;;  %v141_v45 = vld [vmem:[#allocation7 + $0x10] sm:$0xff] }
  0x7f   :  { %3819 = vmatprep.mubr.f32.mxu0 %v89_v46  ;;  %3896 = vmatprep.subr.mxu1 %v141_v45 }
  0x80   :  { %3897 = vmatpush3.msra.mxu1 %v141_v45 }
  0x82   :  { %3820 = vmatmul.mubr.f32.gmra.mxu0 %v90_v47 }
  0x83   :  { %3822 = vmatprep.mubr.f32.mxu0 %v91_v48 }
  0x86   :  { %3823 = vmatmul.mubr.f32.gmra.mxu0 %v92_v49 }
  0x87   :  { %3825 = vmatprep.mubr.f32.mxu0 %v93_v50 }
  0x8a   :  { %3826 = vmatmul.mubr.f32.gmra.mxu0 %v94_v51 }
  0x8b   :  { %3828 = vmatprep.mubr.f32.mxu0 %v95_v52 }
  0x8e   :  { %3829 = vmatmul.mubr.f32.gmra.mxu0 %v96_v53 }
  0x8f   :  { %3831 = vmatprep.mubr.f32.mxu0 %v97_v54 }
  0x92   :  { %3832 = vmatmul.mubr.f32.gmra.mxu0 %v98_v55  ;;  %v140_v55 = vld [vmem:[#allocation7 + $0x8] sm:$0xff] }
  0x93   :  { %3834 = vmatprep.mubr.f32.mxu0 %v99_v56  ;;  %3898 = vmatprep.subr.mxu1 %v140_v55 }
  0x94   :  { %3899 = vmatpush3.msra.mxu1 %v140_v55 }
  0x96   :  { %3835 = vmatmul.mubr.f32.gmra.mxu0 %v100_v57 }
  0x97   :  { %3837 = vmatprep.mubr.f32.mxu0 %v101_v58 }
  0x9a   :  { %3838 = vmatmul.mubr.f32.gmra.mxu0 %v102_v59 }
  0x9b   :  { %3840 = vmatprep.mubr.f32.mxu0 %v103_v60 }
  0x9e   :  { %3841 = vmatmul.mubr.f32.gmra.mxu0 %v104_v61  ;;  %v139_v61 = vld [vmem:[#allocation7] sm:$0xff] }
  0x9f   :  { %3843 = vmatprep.mubr.f32.mxu0 %v105_v62  ;;  %3900 = vmatprep.subr.mxu1 %v139_v61 }
  0xa0   :  { %3901 = vmatpush3.msra.mxu1 %v139_v61 }
  0xa2   :  { %3844 = vmatmul.mubr.f32.gmra.mxu0 %v106_v63 }
  0xa3   :  { %3846 = vmatprep.mubr.f32.mxu0 %v107_v0 }
  0xa6   :  { %3847 = vmatmul.mubr.f32.gmra.mxu0 %v108_v1 }
  0xa7   :  { %3849 = vmatprep.mubr.f32.mxu0 %v109_v2 }
  0xaa   :  { %3850 = vmatmul.mubr.f32.gmra.mxu0 %v110_v3 }
  0xab   :  { %3852 = vmatprep.mubr.f32.mxu0 %v111_v4 }
  0xae   :  { %3853 = vmatmul.mubr.f32.gmra.mxu0 %v112_v5 }
  0xaf   :  { %3855 = vmatprep.mubr.f32.mxu0 %v113_v6 }
  0xb2   :  { %3856 = vmatmul.mubr.f32.gmra.mxu0 %v114_v7 }
  0xb3   :  { %3858 = vmatprep.mubr.f32.mxu0 %v115_v8 }
  0xb6   :  { %3859 = vmatmul.mubr.f32.gmra.mxu0 %v116_v9 }
  0xb7   :  { %3861 = vmatprep.mubr.f32.mxu0 %v117_v10 }
  0xba   :  { %3862 = vmatmul.mubr.f32.gmra.mxu0 %v118_v11 }
  0xbb   :  { %3864 = vmatprep.mubr.f32.mxu0 %v119_v12 }
  0xbe   :  { %3865 = vmatmul.mubr.f32.gmra.mxu0 %v120_v13 }
  0xbf   :  { %3867 = vmatprep.mubr.f32.mxu0 %v121_v14 }
  0xc2   :  { %3868 = vmatmul.mubr.f32.gmra.mxu0 %v122_v15 }
 0x106   :  { %v4525_v27 = vpop.f32.mrf.mxu0 }
 0x107   :  { %v4528_v28 = vmul.f32 0.70710677, %v4525_v27  ;;  %v4614_v18 = vmul.f32 0.5, %v4525_v27 }
 0x108   :  { %v4530_v29 = vpop.f32.mrf.mxu0 }
 0x109   :  { %v4533_v30 = vand.u32 2147483647, %v4528_v28  ;;  %v4587_v62 = vmul.f32 0.70710677, %v4530_v29  ;;  %v4622_v21 = vmul.f32 0.5, %v4530_v29  ;;  %vm1885_vm0 = vcmp.lt.f32.partialorder %v4528_v28, 0.0 }
 0x10a   :  { %v4535_v31 = vpop.f32.mrf.mxu0 }
 0x10b   :  { %v733_v32 = vmul.f32 0.3275911, %v4533_v30  ;;  %v4539_v33 = vmul.f32 0.70710677, %v4535_v31  ;;  %v1501_v3 = vsub.f32 0.0, %v4533_v30  ;;  %v4636_v37 = vmul.f32 0.5, %v4535_v31 }
 0x10c   :  { %v4541_v34 = vpop.f32.mrf.mxu0  ;;  %v668_v10 = vand.u32 2147483647, %v4587_v62 }
 0x10d   :  { %v797_v36 = vadd.f32 1.0, %v733_v32  ;;  %v4544_v38 = vand.u32 2147483647, %v4539_v33  ;;  %v4547_v39 = vmul.f32 0.70710677, %v4541_v34  ;;  %v1565_v15 = vmul.f32 %v1501_v3, %v4533_v30 }
 0x10e   :  { %v4549_v40 = vpop.f32.mrf.mxu0  ;;  %v1500_v25 = vsub.f32 0.0, %v668_v10  ;;  %v732_v29 = vmul.f32 0.3275911, %v668_v10  ;;  %vm1887_vm1 = vcmp.lt.f32.partialorder %v4539_v33, 0.0 }
 0x10f   :  { %4004 = vrcp.f32 %v797_v36  ;;  %v735_v41 = vmul.f32 0.3275911, %v4544_v38  ;;  %v4553_v42 = vand.u32 2147483647, %v4547_v39  ;;  %v4558_v44 = vmul.f32 0.70710677, %v4549_v40 }
 0x110   :  { %v4555_v43 = vpop.f32.mrf.mxu0  ;;  %v1503_v13 = vsub.f32 0.0, %v4544_v38  ;;  %v1630_v32 = vmul.f32 1.442695, %v1565_v15  ;;  %v1564_v55 = vmul.f32 %v1500_v25, %v668_v10  ;;  %vm1886_vm2 = vcmp.lt.f32.partialorder %v4547_v39, 0.0 }
 0x111   :  { %v799_v46 = vadd.f32 1.0, %v735_v41  ;;  %v734_v47 = vmul.f32 0.3275911, %v4553_v42  ;;  %v4564_v49 = vand.u32 2147483647, %v4558_v44  ;;  %vm1889_vm3 = vcmp.lt.f32.partialorder %v4558_v44, 0.0 }
 0x112   :  { %v4561_v48 = vpop.f32.mrf.mxu0  ;;  %v4568_v52 = vmul.f32 0.70710677, %v4555_v43  ;;  %v1567_v26 = vmul.f32 %v1503_v13, %v4544_v38  ;;  %v1502_v38 = vsub.f32 0.0, %v4553_v42 }
 0x113   :  { %4006 = vrcp.f32 %v799_v46  ;;  %v798_v50 = vadd.f32 1.0, %v734_v47  ;;  %v737_v51 = vmul.f32 0.3275911, %v4564_v49  ;;  %v4573_v54 = vmul.f32 0.70710677, %v4561_v48 }
 0x114   :  { %v4570_v53 = vpop.f32.mrf.mxu0  ;;  %v4576_v57 = vand.u32 2147483647, %v4568_v52  ;;  %vm1888_vm4 = vcmp.lt.f32.partialorder %v4568_v52, 0.0 }
 0x115   :  { %4008 = vrcp.f32 %v798_v50  ;;  %v801_v56 = vadd.f32 1.0, %v737_v51  ;;  %v4579_v58 = vand.u32 2147483647, %v4573_v54  ;;  %v4582_v59 = vmul.f32 0.70710677, %v4570_v53 }
 0x116   :  { %v4584_v60 = vpop.f32.mrf.mxu0  ;;  %v736_v63 = vmul.f32 0.3275911, %v4576_v57  ;;  %vm1891_vm5 = vcmp.lt.f32.partialorder %v4573_v54, 0.0 }
 0x117   :  { %4010 = vrcp.f32 %v801_v56  ;;  %v739_v0 = vmul.f32 0.3275911, %v4579_v58  ;;  %v4592_v1 = vand.u32 2147483647, %v4582_v59  ;;  %v4598_v6 = vmul.f32 0.70710677, %v4584_v60 }
 0x118   :  { %v800_v4 = vadd.f32 1.0, %v736_v63  ;;  %v4602_v9 = vpop.f32.mrf.mxu0  ;;  %v1634_v56 = vmul.f32 1.442695, %v1567_v26  ;;  %vm1890_vm6 = vcmp.lt.f32.partialorder %v4582_v59, 0.0 }
 0x119   :  { %v803_v5 = vadd.f32 1.0, %v739_v0  ;;  %v738_v8 = vmul.f32 0.3275911, %v4592_v1  ;;  %v4606_v11 = vand.u32 2147483647, %v4598_v6  ;;  %vm1893_vm7 = vcmp.lt.f32.partialorder %v4598_v6, 0.0 }
 0x11a   :  { %4012 = vrcp.f32 %v800_v4  ;;  %v4617_v19 = vmul.f32 0.70710677, %v4602_v9  ;;  %v4619_v20 = vpop.f32.mrf.mxu0  ;;  %v1505_v4 = vsub.f32 0.0, %v4564_v49 }
 0x11b   :  { %4014 = vrcp.f32 %v803_v5  ;;  %v802_v14 = vadd.f32 1.0, %v738_v8  ;;  %v741_v16 = vmul.f32 0.3275911, %v4606_v11  ;;  %v4633_v36 = vmul.f32 0.70710677, %v4619_v20 }
 0x11c   :  { %v4594_v2 = vpop.eup %4004  ;;  %v4628_v27 = vand.u32 2147483647, %v4617_v19  ;;  %v1504_v5 = vsub.f32 0.0, %v4576_v57  ;;  %v796_v8 = vadd.f32 1.0, %v732_v29  ;;  %vm1892_vm8 = vcmp.lt.f32.partialorder %v4617_v19, 0.0 }
 0x11d   :  { %v925_v7 = vmul.f32 1.0614054, %v4594_v2  ;;  %4016 = vrcp.f32 %v802_v14  ;;  %v805_v23 = vadd.f32 1.0, %v741_v16  ;;  %v4643_v47 = vand.u32 2147483647, %v4633_v36 }
 0x11e   :  { %v740_v46 = vmul.f32 0.3275911, %v4628_v27  ;;  %v4657_v14 = vmul.f32 1.442695, %v1564_v55  ;;  %v1566_v16 = vmul.f32 %v1502_v38, %v4553_v42  ;;  %v1507_v38 = vsub.f32 0.0, %v4579_v58 }
 0x11f   :  { %v989_v12 = vadd.f32 -1.4531521, %v925_v7  ;;  %4018 = vrcp.f32 %v805_v23  ;;  %v743_v7 = vmul.f32 0.3275911, %v4643_v47  ;;  %vm1895_vm9 = vcmp.lt.f32.partialorder %v4633_v36, 0.0 }
 0x120   :  { %v4611_v17 = vpop.eup %4006  ;;  %4020 = vpow2.f32 %v1630_v32  ;;  %v804_v0 = vadd.f32 1.0, %v740_v46  ;;  %v1569_v32 = vmul.f32 %v1505_v4, %v4564_v49 }
 0x121   :  { %v927_v22 = vmul.f32 1.0614054, %v4611_v17  ;;  %v1053_v24 = vmul.f32 %v4594_v2, %v989_v12  ;;  %v4653_v12 = vmul.f32 0.5, %v4541_v34 }
 0x122   :  { %v4630_v30 = vpop.eup %4008  ;;  %4022 = vrcp.f32 %v804_v0  ;;  %v1638_v0 = vmul.f32 1.442695, %v1569_v32 }
 0x123   :  { %v991_v35 = vadd.f32 -1.4531521, %v927_v22  ;;  %v926_v41 = vmul.f32 1.0614054, %v4630_v30  ;;  %v1117_v51 = vadd.f32 1.4214138, %v1053_v24  ;;  %4024 = vpow2.f32 %v1634_v56 }
 0x124   :  { %v4645_v50 = vpop.eup %4010  ;;  %v807_v22 = vadd.f32 1.0, %v743_v7 }
 0x125   :  { %v1055_v45 = vmul.f32 %v4611_v17, %v991_v35  ;;  %v990_v61 = vadd.f32 -1.4531521, %v926_v41  ;;  %v929_v63 = vmul.f32 1.0614054, %v4645_v50  ;;  %v1181_v24 = vmul.f32 %v4594_v2, %v1117_v51 }
 0x126   :  { %v1568_v35 = vmul.f32 %v1504_v5, %v4576_v57  ;;  %v1632_v51 = vmul.f32 1.442695, %v1566_v16  ;;  %4026 = vrcp.f32 %v807_v22 }
 0x127   :  { %v1119_v31 = vadd.f32 1.4214138, %v1055_v45  ;;  %v1054_v3 = vmul.f32 %v4630_v30, %v990_v61  ;;  %v993_v10 = vadd.f32 -1.4531521, %v929_v63  ;;  %v4655_v13 = vpop.eup %4012  ;;  %v1506_v61 = vsub.f32 0.0, %v4592_v1 }
 0x128   :  { %v4660_v23 = vpop.eup %4014  ;;  %v928_v34 = vmul.f32 1.0614054, %v4655_v13  ;;  %v1245_v56 = vadd.f32 -0.28449672, %v1181_v24  ;;  %4028 = vpow2.f32 %v1632_v51 }
 0x129   :  { %v1118_v15 = vadd.f32 1.4214138, %v1054_v3  ;;  %v1183_v25 = vmul.f32 %v4611_v17, %v1119_v31  ;;  %v1057_v26 = vmul.f32 %v4645_v50, %v993_v10  ;;  %v931_v29 = vmul.f32 1.0614054, %v4660_v23 }
 0x12a   :  { %v992_v45 = vadd.f32 -1.4531521, %v928_v34  ;;  %v4671_v46 = vpop.eup %4016  ;;  %v1636_v3 = vmul.f32 1.442695, %v1568_v35  ;;  %v1570_v24 = vmul.f32 %v1506_v61, %v4592_v1  ;;  %4030 = vpow2.f32 %v1638_v0 }
 0x12b   :  { %v1182_v42 = vmul.f32 %v4630_v30, %v1118_v15  ;;  %v1121_v41 = vadd.f32 1.4214138, %v1057_v26  ;;  %v995_v55 = vadd.f32 -1.4531521, %v931_v29  ;;  %v1247_v31 = vadd.f32 -0.28449672, %v1183_v25 }
 0x12c   :  { %v1056_v49 = vmul.f32 %v4655_v13, %v992_v45  ;;  %v930_v57 = vmul.f32 1.0614054, %v4671_v46  ;;  %v4678_v5 = vpop.eup %4018  ;;  %v1571_v15 = vmul.f32 %v1507_v38, %v4579_v58  ;;  %v1509_v25 = vsub.f32 0.0, %v4606_v11 }
 0x12d   :  { %v1185_v63 = vmul.f32 %v4645_v50, %v1121_v41  ;;  %v1059_v4 = vmul.f32 %v4660_v23, %v995_v55  ;;  %v1246_v7 = vadd.f32 -0.28449672, %v1182_v42  ;;  %v1309_v26 = vmul.f32 %v4594_v2, %v1245_v56  ;;  %v4021_v29 = vpop.eup %4020 }
 0x12e   :  { %v1120_v10 = vadd.f32 1.4214138, %v1056_v49  ;;  %v994_v16 = vadd.f32 -1.4531521, %v930_v57  ;;  %v1311_v34 = vmul.f32 %v4611_v17, %v1247_v31  ;;  %v933_v41 = vmul.f32 1.0614054, %v4678_v5 }
 0x12f   :  { %v1123_v22 = vadd.f32 1.4214138, %v1059_v4  ;;  %v1249_v42 = vadd.f32 -0.28449672, %v1185_v63  ;;  %v1310_v45 = vmul.f32 %v4630_v30, %v1246_v7  ;;  %4032 = vpow2.f32 %v1636_v3  ;;  %v4690_v51 = vpop.eup %4022 }
 0x130   :  { %v1184_v32 = vmul.f32 %v4655_v13, %v1120_v10  ;;  %v1058_v35 = vmul.f32 %v4671_v46, %v994_v16  ;;  %v1642_v38 = vmul.f32 1.442695, %v1571_v15  ;;  %v1640_v61 = vmul.f32 1.442695, %v1570_v24  ;;  %v4025_v10 = vpop.eup %4024 }
 0x131   :  { %v1187_v58 = vmul.f32 %v4660_v23, %v1123_v22  ;;  %v997_v56 = vadd.f32 -1.4531521, %v933_v41  ;;  %v1573_v31 = vmul.f32 %v1509_v25, %v4606_v11  ;;  %v1373_v49 = vadd.f32 0.2548296, %v1309_v26 }
 0x132   :  { %v1248_v1 = vadd.f32 -0.28449672, %v1184_v32  ;;  %v1122_v55 = vadd.f32 1.4214138, %v1058_v35  ;;  %4034 = vrcp.f32 %v796_v8  ;;  %v1375_v57 = vadd.f32 0.2548296, %v1311_v34 }
 0x133   :  { %v1251_v63 = vadd.f32 -0.28449672, %v1187_v58  ;;  %v1313_v0 = vmul.f32 %v4645_v50, %v1249_v42  ;;  %v1061_v3 = vmul.f32 %v4678_v5, %v997_v56  ;;  %v1374_v15 = vadd.f32 0.2548296, %v1310_v45  ;;  %v4703_v25 = vpop.eup %4026 }
 0x134   :  { %v1312_v4 = vmul.f32 %v4655_v13, %v1248_v1  ;;  %v1186_v7 = vmul.f32 %v4671_v46, %v1122_v55  ;;  %v4698_v16 = vmul.f32 0.5, %v4549_v40  ;;  %4036 = vpow2.f32 %v1642_v38 }
 0x135   :  { %v932_v11 = vmul.f32 1.0614054, %v4690_v51  ;;  %4038 = vpow2.f32 %v4657_v14  ;;  %v1646_v22 = vmul.f32 1.442695, %v1573_v31  ;;  %v1508_v24 = vsub.f32 0.0, %v4628_v27 }
 0x136   :  { %v1250_v8 = vadd.f32 -0.28449672, %v1186_v7  ;;  %v1437_v26 = vmul.f32 %v4594_v2, %v1373_v49  ;;  %v1315_v34 = vmul.f32 %v4660_v23, %v1251_v63  ;;  %v1125_v32 = vadd.f32 1.4214138, %v1061_v3  ;;  %v4716_v2 = vpop.f32.mrf.mxu0 }
 0x137   :  { %v996_v35 = vadd.f32 -1.4531521, %v932_v11  ;;  %v1439_v40 = vmul.f32 %v4611_v17, %v1375_v57  ;;  %v1377_v42 = vadd.f32 0.2548296, %v1313_v0  ;;  %v1376_v58 = vadd.f32 0.2548296, %v1312_v4 }
 0x138   :  { %4040 = vpow2.f32 %v1640_v61  ;;  %v1438_v41 = vmul.f32 %v4630_v30, %v1374_v15  ;;  %v4710_v14 = vmul.f32 0.5, %v4555_v43  ;;  %v4713_v45 = vmul.f32 0.5, %v4561_v48  ;;  %v4029_v61 = vpop.eup %4028  ;;  %v4734_v15 = vpop.f32.mrf.mxu0 }
 0x139   :  { %v1189_v1 = vmul.f32 %v4678_v5, %v1125_v32  ;;  %v1314_v38 = vmul.f32 %v4671_v46, %v1250_v8  ;;  %4042 = vpow2.f32 %v1646_v22  ;;  %v1060_v17 = vmul.f32 %v4690_v51, %v996_v35  ;;  %v4031_v0 = vpop.eup %4030 }
 0x13a   :  { %v935_v55 = vmul.f32 1.0614054, %v4703_v25  ;;  %v4721_v56 = vmul.f32 %v4021_v29, %v1437_v26  ;;  %v1379_v30 = vadd.f32 0.2548296, %v1315_v34  ;;  %v1572_v31 = vmul.f32 %v1508_v24, %v4628_v27 }
 0x13b   :  { %v1253_v43 = vadd.f32 -0.28449672, %v1189_v1  ;;  %v4724_v48 = vmul.f32 %v4025_v10, %v1439_v40  ;;  %v1441_v49 = vmul.f32 %v4645_v50, %v1377_v42  ;;  %v1440_v57 = vmul.f32 %v4655_v13, %v1376_v58 }
 0x13c   :  { %v1124_v63 = vadd.f32 1.4214138, %v1060_v17  ;;  %v4728_v4 = vmul.f32 %v4029_v61, %v1438_v41  ;;  %v999_v3 = vadd.f32 -1.4531521, %v935_v55  ;;  %v4732_v29 = vmul.f32 0.70710677, %v4716_v2  ;;  %v4033_v11 = vpop.eup %4032  ;;  %v4758_v41 = vpop.f32.mrf.mxu0 }
 0x13d   :  { %v1317_v7 = vmul.f32 %v4678_v5, %v1253_v43  ;;  %v4738_v27 = vmul.f32 0.5, %v4570_v53  ;;  %v1378_v50 = vadd.f32 0.2548296, %v1314_v38  ;;  %v4741_v13 = vmul.f32 0.5, %v4584_v60 }
 0x13e   :  { %v1511_v10 = vsub.f32 0.0, %v4643_v47  ;;  %v1821_v8 = vsub.f32 1.0, %v4721_v56  ;;  %v1443_v22 = vmul.f32 %v4660_v23, %v1379_v30  ;;  %v1188_v24 = vmul.f32 %v4690_v51, %v1124_v63 }
 0x13f   :  { %v4749_v26 = vand.u32 2147483647, %v4732_v29  ;;  %v4751_v34 = vpop.eup %4034  ;;  %v1823_v53 = vsub.f32 1.0, %v4724_v48  ;;  %v1761_v60 = vmul.f32 %v4031_v0, %v1441_v49  ;;  %v1760_v32 = vmul.f32 %v4033_v11, %v1440_v57 }
 0x140   :  { %v1644_v35 = vmul.f32 1.442695, %v1572_v31  ;;  %v1822_v40 = vsub.f32 1.0, %v4728_v4  ;;  %v1381_v42 = vadd.f32 0.2548296, %v1317_v7  ;;  %v1063_v58 = vmul.f32 %v4703_v25, %v999_v3 }
 0x141   :  { %v742_v23 = vmul.f32 0.3275911, %v4749_v26  ;;  %v4037_v1 = vpop.eup %4036  ;;  %v1442_v38 = vmul.f32 %v4671_v46, %v1378_v50  ;;  %v4762_v17 = vmul.f32 0.5, %v4602_v9  ;;  %v4765_v55 = vmul.f32 0.5, %v4619_v20 }
 0x142   :  { %v1575_v61 = vmul.f32 %v1511_v10, %v4643_v47  ;;  %v4768_v56 = vpop.eup %4038  ;;  %v1949_v30 = vsub.f32 0.0, %v1821_v8  ;;  %v1763_v43 = vmul.f32 %v4037_v1, %v1443_v22  ;;  %v1252_v31 = vadd.f32 -0.28449672, %v1188_v24  ;;  %v4773_v47 = vpop.f32.mrf.mxu0 }
 0x143   :  { %v806_v48 = vadd.f32 1.0, %v742_v23  ;;  %v1951_v49 = vsub.f32 0.0, %v1823_v53  ;;  %v1825_v46 = vsub.f32 1.0, %v1761_v60  ;;  %v1824_v57 = vsub.f32 1.0, %v1760_v32 }
 0x144   :  { %4044 = vpow2.f32 %v1644_v35  ;;  %v1950_v63 = vsub.f32 0.0, %v1822_v40  ;;  %v1445_v20 = vmul.f32 %v4678_v5, %v1381_v42  ;;  %v1127_v0 = vadd.f32 1.4214138, %v1063_v58  ;;  %v4800_v23 = vpop.f32.mrf.mxu0 }
 0x145   :  { %v4041_v9 = vpop.eup %4040  ;;  %4046 = vrcp.f32 %v806_v48  ;;  %v1650_v7 = vmul.f32 1.442695, %v1575_v61  ;;  %v4777_v3 = vmul.f32 0.5, %v4716_v2  ;;  %v4780_v11 = vmul.f32 0.70710677, %v4734_v15 }
 0x146   :  { %v1762_v4 = vmul.f32 %v4041_v9, %v1442_v38  ;;  %v4043_v50 = vpop.eup %4042  ;;  %v2013_v10 = vsel %vm1885_vm0, %v1949_v30, %v1821_v8  ;;  %v1827_v22 = vsub.f32 1.0, %v1763_v43  ;;  %v1316_v5 = vmul.f32 %v4690_v51, %v1252_v31 }
 0x147   :  { %v4786_v24 = vmul.f32 0.70710677, %v4758_v41  ;;  %v2015_v60 = vsel %vm1887_vm1, %v1951_v49, %v1823_v53  ;;  %v1953_v32 = vsub.f32 0.0, %v1825_v46  ;;  %v1952_v35 = vsub.f32 0.0, %v1824_v57 }
 0x148   :  { %v4791_v2 = vand.u32 2147483647, %v4780_v11  ;;  %v2014_v42 = vsel %vm1886_vm2, %v1950_v63, %v1822_v40  ;;  %v1765_v28 = vmul.f32 %v4043_v50, %v1445_v20  ;;  %v1191_v8 = vmul.f32 %v4703_v25, %v1127_v0  ;;  %v4812_v0 = vpop.f32.mrf.mxu0 }
 0x149   :  { %v4798_v58 = vand.u32 2147483647, %v4786_v24  ;;  %v2077_v33 = vadd.f32 1.0, %v2013_v10  ;;  %v1826_v53 = vsub.f32 1.0, %v1762_v4  ;;  %4048 = vpow2.f32 %v1650_v7 }
 0x14a   :  { %v745_v1 = vmul.f32 0.3275911, %v4791_v2  ;;  %v2079_v38 = vadd.f32 1.0, %v2015_v60  ;;  %v1955_v61 = vsub.f32 0.0, %v1827_v22  ;;  %v1380_v30 = vadd.f32 0.2548296, %v1316_v5 }
 0x14b   :  { %v744_v39 = vmul.f32 0.3275911, %v4798_v58  ;;  %v2078_v40 = vadd.f32 1.0, %v2014_v42  ;;  %v2017_v43 = vsel %vm1889_vm3, %v1953_v32, %v1825_v46  ;;  %v2016_v31 = vsel %vm1888_vm4, %v1952_v35, %v1824_v57  ;;  %v4837_v32 = vpop.f32.mrf.mxu0 }
 0x14c   :  { %v809_v48 = vadd.f32 1.0, %v745_v1  ;;  %v1829_v49 = vsub.f32 1.0, %v1765_v28  ;;  %v1255_v9 = vadd.f32 -0.28449672, %v1191_v8  ;;  %v4810_v20 = vmul.f32 0.70710677, %v4773_v47 }
 0x14d   :  { %v808_v63 = vadd.f32 1.0, %v744_v39  ;;  %v4815_v4 = vmul.f32 %v2077_v33, %v4614_v18  ;;  %v1954_v7 = vsub.f32 0.0, %v1826_v53  ;;  %v4818_v44 = vmul.f32 0.5, %v4734_v15 }
 0x14e   :  { %4050 = vrcp.f32 %v809_v48  ;;  %v2019_v52 = vsel %vm1891_vm5, %v1955_v61, %v1827_v22  ;;  %v1444_v46 = vmul.f32 %v4690_v51, %v1380_v30  ;;  %v1510_v57 = vsub.f32 0.0, %v4749_v26 }
 0x14f   :  { %4052 = vrcp.f32 %v808_v63  ;;  %v2081_v50 = vadd.f32 1.0, %v2017_v43  ;;  %v2080_v10 = vadd.f32 1.0, %v2016_v31  ;;  %v4825_v5 = vand.u32 2147483647, %v4810_v20 }
 0x150   :  { %v4828_v18 = vmul.f32 0.70710677, %v4800_v23  ;;  %v4831_v15 = vmul.f32 %v2079_v38, %v4636_v37  ;;  %v4834_v54 = vmul.f32 %v2078_v40, %v4653_v12  ;;  %v1957_v22 = vsub.f32 0.0, %v1829_v49 }
 0x151   :  { %v4045_v60 = vpop.eup %4044  ;;  %v1319_v51 = vmul.f32 %v4703_v25, %v1255_v9  ;;  %v2083_v42 = vadd.f32 1.0, %v2019_v52  ;;  %v2018_v28 = vsel %vm1890_vm6, %v1954_v7, %v1826_v53  ;;  %v747_v8 = vmul.f32 0.3275911, %v4825_v5 }
 0x152   :  { %v4839_v35 = vpop.eup %4046  ;;  %v4845_v33 = vand.u32 2147483647, %v4828_v18  ;;  %v1764_v37 = vmul.f32 %v4045_v60, %v1444_v46  ;;  %v1574_v1 = vmul.f32 %v1510_v57, %v4749_v26  ;;  %v4850_v38 = vmul.f32 0.70710677, %v4812_v0  ;;  %v4864_v26 = vpop.f32.mrf.mxu0 }
 0x153   :  { %v934_v12 = vmul.f32 1.0614054, %v4839_v35  ;;  %v4853_v61 = vmul.f32 %v2081_v50, %v4698_v16  ;;  %v4856_v30 = vmul.f32 %v2080_v10, %v4710_v14  ;;  %v811_v59 = vadd.f32 1.0, %v747_v8 }
 0x154   :  { %v746_v53 = vmul.f32 0.3275911, %v4845_v33  ;;  %v2021_v39 = vsel %vm1893_vm7, %v1957_v22, %v1829_v49  ;;  %v1383_v40 = vadd.f32 0.2548296, %v1319_v51  ;;  %v4862_v31 = vand.u32 2147483647, %v4850_v38 }
 0x155   :  { %7021 = vst [vmem:[#allocation12_spill] sm:$0xff] %v4853_v61  ;;  %7022 = vst [vmem:[#allocation13_spill] sm:$0xff] %v4856_v30  ;;  %v998_v43 = vadd.f32 -1.4531521, %v934_v12  ;;  %v4867_v48 = vmul.f32 %v2083_v42, %v4713_v45  ;;  %v2082_v16 = vadd.f32 1.0, %v2018_v28  ;;  %4054 = vrcp.f32 %v811_v59 }
 0x156   :  { %v810_v14 = vadd.f32 1.0, %v746_v53  ;;  %v4049_v9 = vpop.eup %4048  ;;  %v1828_v63 = vsub.f32 1.0, %v1764_v37  ;;  %v1648_v49 = vmul.f32 1.442695, %v1574_v1  ;;  %v749_v7 = vmul.f32 0.3275911, %v4862_v31 }
 0x157   :  { %7023 = vst [vmem:[#allocation14_spill] sm:$0xff] %v4867_v48  ;;  %v1062_v6 = vmul.f32 %v4839_v35, %v998_v43  ;;  %v2085_v52 = vadd.f32 1.0, %v2021_v39  ;;  %v4873_v46 = vmul.f32 0.5, %v4758_v41  ;;  %v4876_v57 = vmul.f32 0.70710677, %v4837_v32 }
 0x158   :  { %v4879_v45 = vmul.f32 0.70710677, %v4864_v26  ;;  %v1447_v50 = vmul.f32 %v4703_v25, %v1383_v40  ;;  %v1513_v10 = vsub.f32 0.0, %v4791_v2  ;;  %4056 = vrcp.f32 %v810_v14 }
 0x159   :  { %v813_v60 = vadd.f32 1.0, %v749_v7  ;;  %v4884_v22 = vmul.f32 %v2082_v16, %v4738_v27  ;;  %v1512_v51 = vsub.f32 0.0, %v4798_v58  ;;  %v4888_v41 = vand.u32 2147483647, %v4876_v57 }
 0x15a   :  { %v4891_v42 = vand.u32 2147483647, %v4879_v45  ;;  %v1956_v8 = vsub.f32 0.0, %v1828_v63  ;;  %v1126_v37 = vadd.f32 1.4214138, %v1062_v6  ;;  %4058 = vpow2.f32 %v1648_v49 }
 0x15b   :  { %7024 = vst [vmem:[#allocation15_spill] sm:$0xff] %v4884_v22  ;;  %v4893_v28 = vpop.eup %4050  ;;  %v4896_v25 = vmul.f32 0.5, %v4773_v47  ;;  %v4901_v27 = vmul.f32 %v2085_v52, %v4741_v13  ;;  %4060 = vrcp.f32 %v813_v60  ;;  %v748_v59 = vmul.f32 0.3275911, %v4888_v41  ;;  %v4910_v47 = vpop.f32.mrf.mxu0 }
 0x15c   :  { %v4898_v12 = vpop.eup %4052  ;;  %v937_v1 = vmul.f32 1.0614054, %v4893_v28  ;;  %v4905_v53 = vmul.f32 %v4049_v9, %v1447_v50  ;;  %v1577_v39 = vmul.f32 %v1513_v10, %v4791_v2  ;;  %v1515_v43 = vsub.f32 0.0, %v4825_v5 }
 0x15d   :  { %7025 = vst [vmem:[#allocation16_spill] sm:$0xff] %v4901_v27  ;;  %v936_v40 = vmul.f32 1.0614054, %v4898_v12  ;;  %v1576_v14 = vmul.f32 %v1512_v51, %v4798_v58  ;;  %v812_v13 = vadd.f32 1.0, %v748_v59  ;;  %v751_v6 = vmul.f32 0.3275911, %v4891_v42 }
 0x15e   :  { %v1001_v16 = vadd.f32 -1.4531521, %v937_v1  ;;  %v2020_v49 = vsel %vm1892_vm8, %v1956_v8, %v1828_v63  ;;  %v1190_v9 = vmul.f32 %v4839_v35, %v1126_v37  ;;  %v1514_v2 = vsub.f32 0.0, %v4845_v33  ;;  %v4931_v1 = vpop.f32.mrf.mxu0 }
 0x15f   :  { %v1000_v7 = vadd.f32 -1.4531521, %v936_v40  ;;  %4062 = vrcp.f32 %v812_v13  ;;  %v815_v50 = vadd.f32 1.0, %v751_v6  ;;  %v4920_v10 = vmul.f32 0.70710677, %v4910_v47 }
 0x160   :  { %v1065_v52 = vmul.f32 %v4893_v28, %v1001_v16  ;;  %v1654_v60 = vmul.f32 1.442695, %v1577_v39  ;;  %v1579_v51 = vmul.f32 %v1515_v43, %v4825_v5  ;;  %v1517_v19 = vsub.f32 0.0, %v4862_v31 }
 0x161   :  { %v1064_v58 = vmul.f32 %v4898_v12, %v1000_v7  ;;  %v4926_v8 = vmul.f32 0.5, %v4800_v23  ;;  %4064 = vrcp.f32 %v815_v50  ;;  %v4929_v37 = vand.u32 2147483647, %v4920_v10 }
 0x162   :  { %v1129_v63 = vadd.f32 1.4214138, %v1065_v52  ;;  %v4933_v59 = vpop.eup %4054  ;;  %v2084_v40 = vadd.f32 1.0, %v2020_v49  ;;  %v1254_v39 = vadd.f32 -0.28449672, %v1190_v9  ;;  %v1578_v13 = vmul.f32 %v1514_v2, %v4845_v33 }
 0x163   :  { %v1652_v16 = vmul.f32 1.442695, %v1576_v14  ;;  %v1128_v43 = vadd.f32 1.4214138, %v1064_v58  ;;  %v939_v6 = vmul.f32 1.0614054, %v4933_v59  ;;  %v1581_v50 = vmul.f32 %v1517_v19, %v4862_v31 }
 0x164   :  { %v1193_v5 = vmul.f32 %v4893_v28, %v1129_v63  ;;  %v750_v23 = vmul.f32 0.3275911, %v4929_v37  ;;  %v1831_v7 = vsub.f32 1.0, %v4905_v53  ;;  %v1658_v52 = vmul.f32 1.442695, %v1579_v51 }
 0x165   :  { %v4942_v27 = vmul.f32 0.70710677, %v4931_v1  ;;  %v4944_v49 = vpop.eup %4056  ;;  %4066 = vpow2.f32 %v1654_v60  ;;  %v1003_v14 = vadd.f32 -1.4531521, %v939_v6  ;;  %v1516_v33 = vsub.f32 0.0, %v4888_v41 }
 0x166   :  { %v814_v9 = vadd.f32 1.0, %v750_v23  ;;  %v1318_v2 = vmul.f32 %v4839_v35, %v1254_v39  ;;  %4068 = vpow2.f32 %v1652_v16  ;;  %v938_v58 = vmul.f32 1.0614054, %v4944_v49 }
 0x167   :  { %v1656_v63 = vmul.f32 1.442695, %v1578_v13  ;;  %v4059_v53 = vpop.eup %4058  ;;  %v1257_v51 = vadd.f32 -0.28449672, %v1193_v5  ;;  %v1192_v31 = vmul.f32 %v4898_v12, %v1128_v43  ;;  %v1067_v19 = vmul.f32 %v4933_v59, %v1003_v14 }
 0x168   :  { %4070 = vrcp.f32 %v814_v9  ;;  %v4951_v48 = vpop.eup %4060  ;;  %v1002_v60 = vadd.f32 -1.4531521, %v938_v58  ;;  %v1662_v6 = vmul.f32 1.442695, %v1581_v50  ;;  %v4955_v39 = vand.u32 2147483647, %v4942_v27 }
 0x169   :  { %4072 = vpow2.f32 %v1658_v52  ;;  %v1131_v16 = vadd.f32 1.4214138, %v1067_v19  ;;  %v941_v13 = vmul.f32 1.0614054, %v4951_v48  ;;  %v1580_v5 = vmul.f32 %v1516_v33, %v4888_v41 }
 0x16a   :  { %v1519_v43 = vsub.f32 0.0, %v4891_v42  ;;  %v4961_v23 = vmul.f32 %v2084_v40, %v4762_v17  ;;  %v1382_v14 = vadd.f32 0.2548296, %v1318_v2  ;;  %v1066_v9 = vmul.f32 %v4944_v49, %v1002_v60 }
 0x16b   :  { %4074 = vpow2.f32 %v1656_v63  ;;  %v1321_v52 = vmul.f32 %v4893_v28, %v1257_v51  ;;  %v1256_v50 = vadd.f32 -0.28449672, %v1192_v31  ;;  %v1195_v58 = vmul.f32 %v4933_v59, %v1131_v16 }
 0x16c   :  { %7026 = vst [vmem:[#allocation17_spill] sm:$0xff] %v4961_v23  ;;  %v1005_v22 = vadd.f32 -1.4531521, %v941_v13  ;;  %v4966_v19 = vpop.eup %4062  ;;  %v1959_v61 = vsub.f32 0.0, %v1831_v7  ;;  %v1130_v30 = vadd.f32 1.4214138, %v1066_v9  ;;  %4076 = vpow2.f32 %v1662_v6 }
 0x16d   :  { %v753_v41 = vmul.f32 0.3275911, %v4955_v39  ;;  %v1259_v33 = vadd.f32 -0.28449672, %v1195_v58  ;;  %v1660_v40 = vmul.f32 1.442695, %v1580_v5  ;;  %v1583_v2 = vmul.f32 %v1519_v43, %v4891_v42 }
 0x16e   :  { %v1069_v17 = vmul.f32 %v4951_v48, %v1005_v22  ;;  %v4971_v63 = vpop.eup %4064  ;;  %v1446_v51 = vmul.f32 %v4839_v35, %v1382_v14  ;;  %v1194_v31 = vmul.f32 %v4944_v49, %v1130_v30  ;;  %v940_v60 = vmul.f32 1.0614054, %v4966_v19 }
 0x16f   :  { %v817_v16 = vadd.f32 1.0, %v753_v41  ;;  %v1385_v13 = vadd.f32 0.2548296, %v1321_v52  ;;  %v1320_v6 = vmul.f32 %v4898_v12, %v1256_v50  ;;  %v943_v58 = vmul.f32 1.0614054, %v4971_v63 }
 0x170   :  { %v1133_v9 = vadd.f32 1.4214138, %v1069_v17  ;;  %v1323_v22 = vmul.f32 %v4933_v59, %v1259_v33  ;;  %v1258_v5 = vadd.f32 -0.28449672, %v1194_v31  ;;  %v1004_v23 = vadd.f32 -1.4531521, %v940_v60 }
 0x171   :  { %4078 = vrcp.f32 %v817_v16  ;;  %v2023_v42 = vsel %vm1895_vm9, %v1959_v61, %v1831_v7  ;;  %v1007_v30 = vadd.f32 -1.4531521, %v943_v58  ;;  %v1666_v43 = vmul.f32 1.442695, %v1583_v2 }
 0x172   :  { %v1197_v35 = vmul.f32 %v4951_v48, %v1133_v9  ;;  %v4067_v14 = vpop.eup %4066  ;;  %v4982_v41 = vmul.f32 %v4059_v53, %v1446_v51  ;;  %v1322_v52 = vmul.f32 %v4944_v49, %v1258_v5  ;;  %v1068_v50 = vmul.f32 %v4966_v19, %v1004_v23 }
 0x173   :  { %v1518_v17 = vsub.f32 0.0, %v4929_v37  ;;  %v4069_v33 = vpop.eup %4068  ;;  %v1449_v31 = vmul.f32 %v4893_v28, %v1385_v13  ;;  %v1384_v60 = vadd.f32 0.2548296, %v1320_v6  ;;  %v1071_v36 = vmul.f32 %v4971_v63, %v1007_v30 }
 0x174   :  { %v1261_v16 = vadd.f32 -0.28449672, %v1197_v35  ;;  %v1387_v7 = vadd.f32 0.2548296, %v1323_v22  ;;  %v1386_v2 = vadd.f32 0.2548296, %v1322_v52  ;;  %4080 = vpow2.f32 %v1660_v40 }
 0x175   :  { %v4989_v61 = vpop.eup %4070  ;;  %v1132_v9 = vadd.f32 1.4214138, %v1068_v50  ;;  %v2087_v51 = vadd.f32 1.0, %v2023_v42  ;;  %v1135_v23 = vadd.f32 1.4214138, %v1071_v36  ;;  %4082 = vpow2.f32 %v1666_v43 }
 0x176   :  { %v4073_v53 = vpop.eup %4072  ;;  %v1325_v58 = vmul.f32 %v4951_v48, %v1261_v16  ;;  %v1830_v5 = vsub.f32 1.0, %v4982_v41  ;;  %vm1894_vm10 = vcmp.lt.f32.partialorder %v4732_v29, 0.0  ;;  %v942_v13 = vmul.f32 1.0614054, %v4989_v61  ;;  %v321_v16 = vpop.f32.mrf.mxu0 }
 0x177   :  { %v1196_v28 = vmul.f32 %v4966_v19, %v1132_v9  ;;  %v1582_v6 = vmul.f32 %v1518_v17, %v4929_v37  ;;  %v4997_v35 = vmul.f32 %v4067_v14, %v1449_v31  ;;  %v1448_v40 = vmul.f32 %v4898_v12, %v1384_v60 }
 0x178   :  { %v4075_v22 = vpop.eup %4074  ;;  %v1389_v42 = vadd.f32 0.2548296, %v1325_v58  ;;  %v1199_v30 = vmul.f32 %v4971_v63, %v1135_v23  ;;  %v1451_v43 = vmul.f32 %v4933_v59, %v1387_v7  ;;  %v1450_v41 = vmul.f32 %v4944_v49, %v1386_v2 }
 0x179   :  { %v1260_v52 = vadd.f32 -0.28449672, %v1196_v28  ;;  %v1006_v50 = vadd.f32 -1.4531521, %v942_v13  ;;  %v4077_v36 = vpop.eup %4076  ;;  %v5004_v9 = vmul.f32 %v2087_v51, %v4765_v55  ;;  %v5007_v37 = vmul.f32 0.5, %v4812_v0 }
 0x17a   :  { %v5010_v14 = vmul.f32 0.5, %v4837_v32  ;;  %v1263_v12 = vadd.f32 -0.28449672, %v1199_v30  ;;  %v1958_v17 = vsub.f32 0.0, %v1830_v5  ;;  %v1453_v31 = vmul.f32 %v4951_v48, %v1389_v42 }
 0x17b   :  { %7027 = vst [vmem:[#allocation18_spill] sm:$0xff] %v5004_v9  ;;  %v1324_v59 = vmul.f32 %v4966_v19, %v1260_v52  ;;  %v1070_v49 = vmul.f32 %v4989_v61, %v1006_v50  ;;  %v1833_v60 = vsub.f32 1.0, %v4997_v35  ;;  %vm1897_vm11 = vcmp.lt.f32.partialorder %v4780_v11, 0.0 }
 0x17c   :  { %v5017_v55 = vmul.f32 %v4069_v33, %v1448_v40  ;;  %v1327_v0 = vmul.f32 %v4971_v63, %v1263_v12  ;;  %v5020_v7 = vmul.f32 0.70710677, %v321_v16  ;;  %v1771_v32 = vmul.f32 %v4073_v53, %v1451_v43  ;;  %v5042_v43 = vpop.f32.mrf.mxu0 }
 0x17d   :  { %v1770_v2 = vmul.f32 %v4075_v22, %v1450_v41  ;;  %v1134_v51 = vadd.f32 1.4214138, %v1070_v49  ;;  %v1664_v58 = vmul.f32 1.442695, %v1582_v6  ;;  %v1388_v48 = vadd.f32 0.2548296, %v1324_v59 }
 0x17e   :  { %v5022_v23 = vpop.eup %4078  ;;  %v5025_v28 = vmul.f32 0.5, %v4864_v26  ;;  %v1521_v13 = vsub.f32 0.0, %v4955_v39  ;;  %v5029_v35 = vand.u32 2147483647, %v5020_v7  ;;  %v1773_v33 = vmul.f32 %v4077_v36, %v1453_v31 }
 0x17f   :  { %v1391_v40 = vadd.f32 0.2548296, %v1327_v0  ;;  %v5032_v42 = vmul.f32 0.5, %v4910_v47  ;;  %v1198_v53 = vmul.f32 %v4989_v61, %v1134_v51  ;;  %v2022_v6 = vsel %vm1894_vm10, %v1958_v17, %v1830_v5 }
 0x180   :  { %v1961_v22 = vsub.f32 0.0, %v1833_v60  ;;  %v1832_v30 = vsub.f32 1.0, %v5017_v55  ;;  %vm1896_vm12 = vcmp.lt.f32.partialorder %v4786_v24, 0.0  ;;  %vm1899_vm13 = vcmp.lt.f32.partialorder %v4810_v20, 0.0 }
 0x181   :  { %vm1898_vm14 = vcmp.lt.f32.partialorder %v4828_v18, 0.0  ;;  %v945_v26 = vmul.f32 1.0614054, %v5022_v23  ;;  %v1835_v47 = vsub.f32 1.0, %v1771_v32  ;;  %v1834_v41 = vsub.f32 1.0, %v1770_v2  ;;  %v4081_v29 = vpop.eup %4080 }
 0x182   :  { %v1262_v52 = vadd.f32 -0.28449672, %v1198_v53  ;;  %v752_v50 = vmul.f32 0.3275911, %v5029_v35  ;;  %vm1901_vm15 = vcmp.lt.f32.partialorder %v4850_v38, 0.0  ;;  %v1452_v5 = vmul.f32 %v4966_v19, %v1388_v48  ;;  %v4083_v17 = vpop.eup %4082  ;;  %v5054_v53 = vpop.f32.mrf.mxu0 }
 0x183   :  { %4084 = vpow2.f32 %v1664_v58  ;;  %v1009_v36 = vadd.f32 -1.4531521, %v945_v26  ;;  %v1585_v12 = vmul.f32 %v1521_v13, %v4955_v39  ;;  %v1837_v31 = vsub.f32 1.0, %v1773_v33 }
 0x184   :  { %v1455_v59 = vmul.f32 %v4971_v63, %v1391_v40  ;;  %v5050_v49 = vmul.f32 0.5, %v4931_v1  ;;  %v816_v55 = vadd.f32 1.0, %v752_v50  ;;  %v2086_v0 = vadd.f32 1.0, %v2022_v6  ;;  %v5070_v50 = vpop.f32.mrf.mxu0 }
 0x185   :  { %v1960_v32 = vsub.f32 0.0, %v1832_v30  ;;  %v1326_v2 = vmul.f32 %v4989_v61, %v1262_v52  ;;  %v1073_v51 = vmul.f32 %v5022_v23, %v1009_v36  ;;  %v2025_v19 = vsel %vm1897_vm11, %v1961_v22, %v1833_v60 }
 0x186   :  { %v1963_v39 = vsub.f32 0.0, %v1835_v47  ;;  %v1962_v58 = vsub.f32 0.0, %v1834_v41  ;;  %4086 = vrcp.f32 %v816_v55  ;;  %v1772_v48 = vmul.f32 %v4081_v29, %v1452_v5 }
 0x187   :  { %v1137_v63 = vadd.f32 1.4214138, %v1073_v51  ;;  %v1670_v13 = vmul.f32 1.442695, %v1585_v12  ;;  %v5058_v1 = vmul.f32 0.5, %v321_v16  ;;  %v1965_v33 = vsub.f32 0.0, %v1837_v31 }
 0x188   :  { %v1775_v40 = vmul.f32 %v4083_v17, %v1455_v59  ;;  %v5061_v6 = vmul.f32 0.70710677, %v5042_v43  ;;  %v5064_v26 = vmul.f32 0.70710677, %v5054_v53  ;;  %v5067_v52 = vmul.f32 %v2086_v0, %v4777_v3  ;;  %v5089_v0 = vpop.f32.mrf.mxu0 }
 0x189   :  { %v2089_v11 = vadd.f32 1.0, %v2025_v19  ;;  %v1390_v60 = vadd.f32 0.2548296, %v1326_v2  ;;  %v1201_v22 = vmul.f32 %v5022_v23, %v1137_v63  ;;  %v2024_v16 = vsel %vm1896_vm12, %v1960_v32, %v1832_v30 }
 0x18a   :  { %v2027_v29 = vsel %vm1899_vm13, %v1963_v39, %v1835_v47  ;;  %v2026_v5 = vsel %vm1898_vm14, %v1962_v58, %v1834_v41  ;;  %vm1900_vm0 = vcmp.lt.f32.partialorder %v4876_v57, 0.0  ;;  %v691_v3 = vand.u32 2147483647, %v5061_v6 }
 0x18b   :  { %v1836_v36 = vsub.f32 1.0, %v1772_v48  ;;  %vm1903_vm1 = vcmp.lt.f32.partialorder %v4879_v45, 0.0  ;;  %v1265_v12 = vadd.f32 -0.28449672, %v1201_v22  ;;  %v1520_v17 = vsub.f32 0.0, %v5029_v35  ;;  %v5106_v22 = vpop.f32.mrf.mxu0 }
 0x18c   :  { %v5083_v59 = vand.u32 2147483647, %v5064_v26  ;;  %v2029_v24 = vsel %vm1901_vm15, %v1965_v33, %v1837_v31  ;;  %v1839_v20 = vsub.f32 1.0, %v1775_v40  ;;  %4088 = vpow2.f32 %v1670_v13 }
 0x18d   :  { %v755_v18 = vmul.f32 0.3275911, %v691_v3  ;;  %v2088_v30 = vadd.f32 1.0, %v2024_v16  ;;  %v2091_v47 = vadd.f32 1.0, %v2027_v29  ;;  %v1454_v41 = vmul.f32 %v4989_v61, %v1390_v60 }
 0x18e   :  { %v754_v55 = vmul.f32 0.3275911, %v5083_v59  ;;  %v2090_v32 = vadd.f32 1.0, %v2026_v5  ;;  %v1329_v2 = vmul.f32 %v5022_v23, %v1265_v12  ;;  %v5093_v19 = vmul.f32 0.70710677, %v5070_v50 }
 0x18f   :  { %v819_v51 = vadd.f32 1.0, %v755_v18  ;;  %v2093_v38 = vadd.f32 1.0, %v2029_v24  ;;  %v1964_v31 = vsub.f32 0.0, %v1836_v36  ;;  %v1584_v39 = vmul.f32 %v1520_v17, %v5029_v35 }
 0x190   :  { %v818_v58 = vadd.f32 1.0, %v754_v55  ;;  %v4085_v48 = vpop.eup %4084  ;;  %v5097_v63 = vmul.f32 %v2089_v11, %v4818_v44  ;;  %v1967_v61 = vsub.f32 0.0, %v1839_v20  ;;  %v693_v13 = vand.u32 2147483647, %v5093_v19 }
 0x191   :  { %4090 = vrcp.f32 %v819_v51  ;;  %v5101_v33 = vmul.f32 %v2088_v30, %v4873_v46  ;;  %v5104_v40 = vmul.f32 %v2091_v47, %v4896_v25  ;;  %v1774_v60 = vmul.f32 %v4085_v48, %v1454_v41  ;;  %v5137_v30 = vpop.f32.mrf.mxu0 }
 0x192   :  { %7028 = vst [vmem:[#allocation19_spill] sm:$0xff] %v5097_v63  ;;  %4092 = vrcp.f32 %v818_v58  ;;  %v5109_v35 = vmul.f32 %v2090_v32, %v4926_v8  ;;  %v1393_v16 = vadd.f32 0.2548296, %v1329_v2  ;;  %v5112_v44 = vmul.f32 0.5, %v5042_v43 }
 0x193   :  { %7029 = vst [vmem:[#allocation20_spill] sm:$0xff] %v5101_v33  ;;  %7030 = vst [vmem:[#allocation21_spill] sm:$0xff] %v5104_v40  ;;  %v757_v11 = vmul.f32 0.3275911, %v693_v13  ;;  %v5114_v29 = vpop.eup %4086  ;;  %v5117_v46 = vmul.f32 %v2093_v38, %v5007_v37  ;;  %v2028_v25 = vsel %vm1900_vm0, %v1964_v31, %v1836_v36  ;;  %v1668_v5 = vmul.f32 1.442695, %v1584_v39 }
 0x194   :  { %7031 = vst [vmem:[#allocation22_spill] sm:$0xff] %v5109_v35  ;;  %v5122_v12 = vmul.f32 0.70710677, %v5089_v0  ;;  %v2031_v8 = vsel %vm1903_vm1, %v1967_v61, %v1839_v20  ;;  %vm1902_vm2 = vcmp.lt.f32.partialorder %v4920_v10, 0.0  ;;  %v944_v43 = vmul.f32 1.0614054, %v5114_v29 }
 0x195   :  { %7032 = vst [vmem:[#allocation23_spill] sm:$0xff] %v5117_v46  ;;  %v1523_v17 = vsub.f32 0.0, %v691_v3  ;;  %v821_v24 = vadd.f32 1.0, %v757_v11  ;;  %v1838_v18 = vsub.f32 1.0, %v1774_v60  ;;  %v5129_v37 = vmul.f32 0.5, %v5054_v53 }
 0x196   :  { %v5132_v57 = vand.u32 2147483647, %v5122_v12  ;;  %v5135_v36 = vmul.f32 0.70710677, %v5106_v22  ;;  %v1457_v45 = vmul.f32 %v5022_v23, %v1393_v16  ;;  %v1008_v20 = vadd.f32 -1.4531521, %v944_v43 }
 0x197   :  { %v1522_v47 = vsub.f32 0.0, %v5083_v59  ;;  %4094 = vrcp.f32 %v821_v24  ;;  %v2092_v41 = vadd.f32 1.0, %v2028_v25  ;;  %v2095_v55 = vadd.f32 1.0, %v2031_v8 }
 0x198   :  { %v756_v32 = vmul.f32 0.3275911, %v5132_v57  ;;  %v5143_v53 = vand.u32 2147483647, %v5135_v36  ;;  %v1072_v2 = vmul.f32 %v5114_v29, %v1008_v20  ;;  %4096 = vpow2.f32 %v1668_v5 }
 0x199   :  { %v1587_v51 = vmul.f32 %v1523_v17, %v691_v3  ;;  %v5147_v38 = vmul.f32 0.70710677, %v5137_v30  ;;  %v4089_v31 = vpop.eup %4088  ;;  %v1966_v23 = vsub.f32 0.0, %v1838_v18  ;;  %v1525_v39 = vsub.f32 0.0, %v693_v13 }
 0x19a   :  { %v820_v58 = vadd.f32 1.0, %v756_v32  ;;  %v759_v48 = vmul.f32 0.3275911, %v5143_v53  ;;  %v5150_v61 = vmul.f32 %v4089_v31, %v1457_v45  ;;  %v1136_v60 = vadd.f32 1.4214138, %v1072_v2 }
 0x19b   :  { %v1586_v16 = vmul.f32 %v1522_v47, %v5083_v59  ;;  %v5154_v11 = vand.u32 2147483647, %v5147_v38  ;;  %v5157_v25 = vmul.f32 %v2092_v41, %v5010_v14  ;;  %v5160_v3 = vmul.f32 %v2095_v55, %v5025_v28  ;;  %v5177_v47 = vpop.f32.mrf.mxu0 }
 0x19c   :  { %4098 = vrcp.f32 %v820_v58  ;;  %v823_v5 = vadd.f32 1.0, %v759_v48  ;;  %v1200_v8 = vmul.f32 %v5114_v29, %v1136_v60  ;;  %v1674_v43 = vmul.f32 1.442695, %v1587_v51 }
 0x19d   :  { %7033 = vst [vmem:[#allocation24_spill] sm:$0xff] %v5157_v25  ;;  %7034 = vst [vmem:[#allocation25_spill] sm:$0xff] %v5160_v3  ;;  %v5164_v17 = vmul.f32 0.5, %v5070_v50  ;;  %v758_v24 = vmul.f32 0.3275911, %v5154_v11  ;;  %v5171_v45 = vsel %vm1902_vm2, %v1966_v23, %v1838_v18  ;;  %v1589_v14 = vmul.f32 %v1525_v39, %v693_v13 }
 0x19e   :  { %v5167_v59 = vpop.eup %4090  ;;  %v5174_v28 = vmul.f32 0.5, %v5089_v0  ;;  %v924_v20 = vmul.f32 1.0614054, %v4751_v34  ;;  %v6970_v50 = vsub.f32 1.0, %v5150_v61  ;;  %v1672_v32 = vmul.f32 1.442695, %v1586_v16 }
 0x19f   :  { %v5179_v41 = vpop.eup %4092  ;;  %v947_v55 = vmul.f32 1.0614054, %v5167_v59  ;;  %4100 = vrcp.f32 %v823_v5  ;;  %v1524_v18 = vsub.f32 0.0, %v5132_v57  ;;  %v822_v13 = vadd.f32 1.0, %v758_v24  ;;  %v5194_v5 = vpop.f32.mrf.mxu0 }
 0x1a0   :  { %7035 = vst [vmem:[#allocation26_spill] sm:$0xff] %v5174_v28  ;;  %v946_v10 = vmul.f32 1.0614054, %v5179_v41  ;;  %v988_v2 = vadd.f32 -1.4531521, %v924_v20  ;;  %4102 = vpow2.f32 %v1674_v43  ;;  %v1527_v60 = vsub.f32 0.0, %v5143_v53 }
 0x1a1   :  { %v1264_v0 = vadd.f32 -0.28449672, %v1200_v8  ;;  %v1011_v51 = vadd.f32 -1.4531521, %v947_v55  ;;  %v5186_v31 = vmul.f32 0.70710677, %v5177_v47  ;;  %4104 = vrcp.f32 %v822_v13 }
 0x1a2   :  { %v1010_v23 = vadd.f32 -1.4531521, %v946_v10  ;;  %v1678_v39 = vmul.f32 1.442695, %v1589_v14  ;;  %v1052_v58 = vmul.f32 %v4751_v34, %v988_v2  ;;  %4106 = vpow2.f32 %v1672_v32 }
 0x1a3   :  { %v1075_v48 = vmul.f32 %v5167_v59, %v1011_v51  ;;  %v5192_v16 = vand.u32 2147483647, %v5186_v31  ;;  %v5200_v43 = vsub.f32 0.0, %v6970_v50  ;;  %v1588_v14 = vmul.f32 %v1524_v18, %v5132_v57 }
 0x1a4   :  { %v5196_v8 = vpop.eup %4094  ;;  %v1074_v24 = vmul.f32 %v5179_v41, %v1010_v23  ;;  %v1116_v20 = vadd.f32 1.4214138, %v1052_v58  ;;  %v1328_v55 = vmul.f32 %v5114_v29, %v1264_v0  ;;  %4108 = vpow2.f32 %v1678_v39 }
 0x1a5   :  { %v1139_v32 = vadd.f32 1.4214138, %v1075_v48  ;;  %v949_v10 = vmul.f32 1.0614054, %v5196_v8  ;;  %v761_v13 = vmul.f32 0.3275911, %v5192_v16  ;;  %v4097_v2 = vpop.eup %4096  ;;  %v1591_v57 = vmul.f32 %v1527_v60, %v5143_v53 }
 0x1a6   :  { %v1138_v51 = vadd.f32 1.4214138, %v1074_v24  ;;  %v1180_v3 = vmul.f32 %v4751_v34, %v1116_v20  ;;  %v5209_v50 = vmul.f32 0.70710677, %v5194_v5  ;;  %v1526_v58 = vsub.f32 0.0, %v5154_v11 }
 0x1a7   :  { %v1203_v23 = vmul.f32 %v5167_v59, %v1139_v32  ;;  %v1013_v46 = vadd.f32 -1.4531521, %v949_v10  ;;  %v825_v18 = vadd.f32 1.0, %v761_v13  ;;  %v1392_v24 = vadd.f32 0.2548296, %v1328_v55 }
 0x1a8   :  { %v1202_v0 = vmul.f32 %v5179_v41, %v1138_v51  ;;  %v1244_v48 = vadd.f32 -0.28449672, %v1180_v3  ;;  %v5216_v25 = vand.u32 2147483647, %v5209_v50  ;;  %v1676_v35 = vmul.f32 1.442695, %v1588_v14 }
 0x1a9   :  { %v5218_v39 = vpop.eup %4098  ;;  %v1267_v20 = vadd.f32 -0.28449672, %v1203_v23  ;;  %v1077_v40 = vmul.f32 %v5196_v8, %v1013_v46  ;;  %4110 = vrcp.f32 %v825_v18  ;;  %v1682_v3 = vmul.f32 1.442695, %v1591_v57 }
 0x1aa   :  { %v1266_v32 = vadd.f32 -0.28449672, %v1202_v0  ;;  %v948_v10 = vmul.f32 1.0614054, %v5218_v39  ;;  %v1308_v53 = vmul.f32 %v4751_v34, %v1244_v48  ;;  %v760_v51 = vmul.f32 0.3275911, %v5216_v25 }
 0x1ab   :  { %v1331_v60 = vmul.f32 %v5167_v59, %v1267_v20  ;;  %v1141_v13 = vadd.f32 1.4214138, %v1077_v40  ;;  %v1590_v46 = vmul.f32 %v1526_v58, %v5154_v11  ;;  %vm1905_vm3 = vcmp.lt.f32.partialorder %v4942_v27, 0.0 }
 0x1ac   :  { %v5225_v63 = vpop.eup %4100  ;;  %v1330_v55 = vmul.f32 %v5179_v41, %v1266_v32  ;;  %v1012_v23 = vadd.f32 -1.4531521, %v948_v10  ;;  %v1372_v14 = vadd.f32 0.2548296, %v1308_v53  ;;  %4112 = vpow2.f32 %v1676_v35 }
 0x1ad   :  { %v1395_v0 = vadd.f32 0.2548296, %v1331_v60  ;;  %v1205_v48 = vmul.f32 %v5196_v8, %v1141_v13  ;;  %v951_v18 = vmul.f32 1.0614054, %v5225_v63  ;;  %v4103_v40 = vpop.eup %4102  ;;  %vm1884_vm4 = vcmp.lt.f32.partialorder %v4587_v62, 0.0 }
 0x1ae   :  { %v1456_v57 = vmul.f32 %v5114_v29, %v1392_v24  ;;  %v1394_v20 = vadd.f32 0.2548296, %v1330_v55  ;;  %v1076_v32 = vmul.f32 %v5218_v39, %v1012_v23  ;;  %v1436_v10 = vmul.f32 %v4751_v34, %v1372_v14  ;;  %v5236_v11 = vpop.eup %4104 }
 0x1af   :  { %v1459_v58 = vmul.f32 %v5167_v59, %v1395_v0  ;;  %v1269_v53 = vadd.f32 -0.28449672, %v1205_v48  ;;  %v1015_v60 = vadd.f32 -1.4531521, %v951_v18  ;;  %v824_v13 = vadd.f32 1.0, %v760_v51  ;;  %v4107_v35 = vpop.eup %4106 }
 0x1b0   :  { %v1140_v33 = vadd.f32 1.4214138, %v1076_v32  ;;  %4114 = vpow2.f32 %v1682_v3  ;;  %v950_v28 = vmul.f32 1.0614054, %v5236_v11  ;;  %v1680_v9 = vmul.f32 1.442695, %v1590_v46 }
 0x1b1   :  { %v1333_v29 = vmul.f32 %v5196_v8, %v1269_v53  ;;  %v1079_v24 = vmul.f32 %v5225_v63, %v1015_v60  ;;  %v1756_v55 = vmul.f32 %v4768_v56, %v1436_v10  ;;  %v1529_v34 = vsub.f32 0.0, %v5192_v16  ;;  %v4109_v51 = vpop.eup %4108 }
 0x1b2   :  { %v5244_v23 = vmul.f32 %v4097_v2, %v1456_v57  ;;  %v1204_v59 = vmul.f32 %v5218_v39, %v1140_v33  ;;  %v1014_v14 = vadd.f32 -1.4531521, %v950_v28  ;;  %4116 = vrcp.f32 %v824_v13 }
 0x1b3   :  { %v1779_v0 = vmul.f32 %v4103_v40, %v1459_v58  ;;  %v1458_v3 = vmul.f32 %v5179_v41, %v1394_v20  ;;  %v1143_v48 = vadd.f32 1.4214138, %v1079_v24  ;;  %v1820_v46 = vsub.f32 1.0, %v1756_v55 }
 0x1b4   :  { %v2094_v18 = vadd.f32 1.0, %v5171_v45  ;;  %v1397_v32 = vadd.f32 0.2548296, %v1333_v29  ;;  %v1268_v53 = vadd.f32 -0.28449672, %v1204_v59  ;;  %v1078_v56 = vmul.f32 %v5236_v11, %v1014_v14  ;;  %v5274_v14 = vpop.f32.mrf.mxu0 }
 0x1b5   :  { %v1207_v10 = vmul.f32 %v5225_v63, %v1143_v48  ;;  %4118 = vpow2.f32 %v1680_v9  ;;  %v1948_v2 = vsub.f32 0.0, %v1820_v46  ;;  %v1593_v33 = vmul.f32 %v1529_v34, %v5192_v16 }
 0x1b6   :  { %v7036_v28 = vsub.f32 1.0, %v5150_v61  ;;  %v1840_v40 = vsub.f32 1.0, %v5244_v23  ;;  %vm1904_vm5 = vcmp.lt.f32.partialorder %v5020_v7, 0.0  ;;  %vm1907_vm6 = vcmp.lt.f32.partialorder %v5061_v6, 0.0  ;;  %v5261_v20 = vpop.eup %4110 }
 0x1b7   :  { %v1332_v45 = vmul.f32 %v5218_v39, %v1268_v53  ;;  %v1142_v57 = vadd.f32 1.4214138, %v1078_v56  ;;  %v1843_v9 = vsub.f32 1.0, %v1779_v0  ;;  %v1778_v58 = vmul.f32 %v4107_v35, %v1458_v3 }
 0x1b8   :  { %v2033_v41 = vsel %vm1905_vm3, %v5200_v43, %v7036_v28  ;;  %v1271_v16 = vadd.f32 -0.28449672, %v1207_v10  ;;  %v2012_v61 = vsel %vm1884_vm4, %v1948_v2, %v1820_v46  ;;  %v5266_v27 = vmul.f32 %v2094_v18, %v5032_v42 }
 0x1b9   :  { %v1461_v43 = vmul.f32 %v5196_v8, %v1397_v32  ;;  %v1396_v60 = vadd.f32 0.2548296, %v1332_v45  ;;  %v1206_v13 = vmul.f32 %v5236_v11, %v1142_v57  ;;  %v2076_v24 = vadd.f32 1.0, %v2012_v61  ;;  %v4113_v23 = vpop.eup %4112 }
 0x1ba   :  { %v1335_v29 = vmul.f32 %v5225_v63, %v1271_v16  ;;  %v1686_v55 = vmul.f32 1.442695, %v1593_v33  ;;  %v1528_v34 = vsub.f32 0.0, %v5216_v25  ;;  %v2097_v35 = vadd.f32 1.0, %v2033_v41  ;;  %v5294_v41 = vpop.f32.mrf.mxu0 }
 0x1bb   :  { %v1968_v59 = vsub.f32 0.0, %v1840_v40  ;;  %vm1906_vm7 = vcmp.lt.f32.partialorder %v5064_v26, 0.0  ;;  %v1270_v62 = vadd.f32 -0.28449672, %v1206_v13  ;;  %v953_v42 = vmul.f32 1.0614054, %v5261_v20 }
 0x1bc   :  { %v1971_v8 = vsub.f32 0.0, %v1843_v9  ;;  %v1842_v0 = vsub.f32 1.0, %v1778_v58  ;;  %v1399_v3 = vadd.f32 0.2548296, %v1335_v29  ;;  %v2140_v48 = vmul.f32 %v2076_v24, %v4622_v21 }
 0x1bd   :  { %v5277_v46 = vmul.f32 %v4109_v51, %v1461_v43  ;;  %v1460_v18 = vmul.f32 %v5218_v39, %v1396_v60  ;;  %v1334_v32 = vmul.f32 %v5236_v11, %v1270_v62  ;;  %v1017_v53 = vadd.f32 -1.4531521, %v953_v42  ;;  %v4115_v56 = vpop.eup %4114 }
 0x1be   :  { %v5282_v10 = vmul.f32 0.5, %v5106_v22  ;;  %v1463_v2 = vmul.f32 %v5225_v63, %v1399_v3  ;;  %v5286_v33 = vmul.f32 0.5, %v5137_v30  ;;  %3902 = vmatprep.mubr.f32.mxu1 %v2140_v48  ;;  %v1592_v28 = vmul.f32 %v1528_v34, %v5216_v25  ;;  %v7037_v34 = vld [vmem:[#allocation13_spill] sm:$0xff] }
 0x1bf   :  { %v5290_v21 = vmul.f32 %v2097_v35, %v5050_v49  ;;  %v1398_v51 = vadd.f32 0.2548296, %v1334_v32  ;;  %3903 = vmatmul.mubr.f32.vlgmr.msra.gmra.mxu1 %v4815_v4  ;;  %v1081_v39 = vmul.f32 %v5261_v20, %v1017_v53  ;;  %4120 = vpow2.f32 %v1686_v55  ;;  %v5296_v22 = vpop.eup %4116 }
 0x1c0   :  { %v2032_v63 = vsel %vm1904_vm5, %v1968_v59, %v1840_v40  ;;  %v2035_v30 = vsel %vm1907_vm6, %v1971_v8, %v1843_v9  ;;  %v1970_v25 = vsub.f32 0.0, %v1842_v0  ;;  %vm1909_vm8 = vcmp.lt.f32.partialorder %v5093_v19, 0.0  ;;  %3905 = vmatprep.mubr.f32.mxu1 %v4834_v54 }
 0x1c1   :  { %v5305_v4 = vmul.f32 0.70710677, %v5274_v14  ;;  %v1845_v49 = vsub.f32 1.0, %v5277_v46  ;;  %v5308_v45 = vmul.f32 %v4113_v23, %v1460_v18  ;;  %v1462_v57 = vmul.f32 %v5236_v11, %v1398_v51  ;;  %v5322_v11 = vpop.f32.mrf.mxu0  ;;  %v7038_v46 = vld [vmem:[#allocation12_spill] sm:$0xff] }
 0x1c2   :  { %v1145_v58 = vadd.f32 1.4214138, %v1081_v39  ;;  %v5311_v7 = vmul.f32 %v4115_v56, %v1463_v2  ;;  %v952_v6 = vmul.f32 1.0614054, %v5296_v22  ;;  %v1684_v40 = vmul.f32 1.442695, %v1592_v28  ;;  %v4119_v16 = vpop.eup %4118 }
 0x1c3   :  { %v5315_v9 = vand.u32 2147483647, %v5305_v4  ;;  %v2096_v54 = vadd.f32 1.0, %v2032_v63  ;;  %v2099_v61 = vadd.f32 1.0, %v2035_v30  ;;  %3906 = vmatmul.mubr.f32.gmra.mxu1 %v4831_v15  ;;  %v5320_v60 = vmul.f32 0.70710677, %v5294_v41  ;;  %v5343_v18 = vpop.f32.mrf.mxu0 }
 0x1c4   :  { %v1209_v43 = vmul.f32 %v5261_v20, %v1145_v58  ;;  %v2034_v13 = vsel %vm1906_vm7, %v1970_v25, %v1842_v0  ;;  %vm1908_vm9 = vcmp.lt.f32.partialorder %v5122_v12, 0.0  ;;  %v1782_v29 = vmul.f32 %v4119_v16, %v1462_v57  ;;  %3908 = vmatprep.mubr.f32.mxu1 %v7037_v34  ;;  %v7039_v2 = vld [vmem:[#allocation15_spill] sm:$0xff]  ;;  %v7041_v16 = vld [vmem:[#allocation17_spill] sm:$0xff] }
 0x1c5   :  { %v1016_v24 = vadd.f32 -1.4531521, %v952_v6  ;;  %v763_v55 = vmul.f32 0.3275911, %v5315_v9  ;;  %v1973_v23 = vsub.f32 0.0, %v1845_v49  ;;  %v1844_v35 = vsub.f32 1.0, %v5308_v45  ;;  %v5364_v58 = vpop.f32.mrf.mxu0 }
 0x1c6   :  { %vm1911_vm10 = vcmp.lt.f32.partialorder %v5135_v36, 0.0  ;;  %v1273_v15 = vadd.f32 -0.28449672, %v1209_v43  ;;  %v698_v59 = vand.u32 2147483647, %v5320_v60  ;;  %v1847_v62 = vsub.f32 1.0, %v5311_v7 }
 0x1c7   :  { %v1080_v26 = vmul.f32 %v5296_v22, %v1016_v24  ;;  %4122 = vpow2.f32 %v1684_v40  ;;  %v827_v42 = vadd.f32 1.0, %v763_v55  ;;  %v2098_v8 = vadd.f32 1.0, %v2034_v13  ;;  %3909 = vmatmul.mubr.f32.gmra.mxu1 %v7038_v46 }
 0x1c8   :  { %vm1910_vm11 = vcmp.lt.f32.partialorder %v5147_v38, 0.0  ;;  %v5336_v0 = vmul.f32 0.5, %v5177_v47  ;;  %v1337_v3 = vmul.f32 %v5261_v20, %v1273_v15  ;;  %v5340_v48 = vmul.f32 0.5, %v5194_v5  ;;  %3911 = vmatprep.mubr.f32.mxu1 %v7039_v2  ;;  %v5397_v38 = vpop.f32.mrf.mxu0 }
 0x1c9   :  { %v1846_v32 = vsub.f32 1.0, %v1782_v29  ;;  %v1144_v53 = vadd.f32 1.4214138, %v1080_v26  ;;  %4124 = vrcp.f32 %v827_v42  ;;  %v762_v56 = vmul.f32 0.3275911, %v698_v59 }
 0x1ca   :  { %v5347_v28 = vmul.f32 %v2096_v54, %v5058_v1  ;;  %v2037_v47 = vsel %vm1909_vm8, %v1973_v23, %v1845_v49  ;;  %v1972_v51 = vsub.f32 0.0, %v1844_v35  ;;  %v1401_v39 = vadd.f32 0.2548296, %v1337_v3  ;;  %v7040_v49 = vld [vmem:[#allocation14_spill] sm:$0xff]  ;;  %v7042_v23 = vld [vmem:[#allocation16_spill] sm:$0xff] }
 0x1cb   :  { %v5352_v5 = vmul.f32 %v2099_v61, %v5112_v44  ;;  %v1975_v63 = vsub.f32 0.0, %v1847_v62  ;;  %v1208_v30 = vmul.f32 %v5296_v22, %v1144_v53  ;;  %v826_v25 = vadd.f32 1.0, %v762_v56  ;;  %3912 = vmatmul.mubr.f32.gmra.mxu1 %v7040_v49 }
 0x1cc   :  { %v5356_v45 = vmul.f32 %v2098_v8, %v5129_v37  ;;  %v1465_v57 = vmul.f32 %v5261_v20, %v1401_v39  ;;  %v5360_v1 = vmul.f32 0.5, %v5274_v14  ;;  %v1531_v19 = vsub.f32 0.0, %v5315_v9  ;;  %v4121_v44 = vpop.eup %4120  ;;  %3914 = vmatprep.mubr.f32.mxu1 %v7041_v16 }
 0x1cd   :  { %v2101_v7 = vadd.f32 1.0, %v2037_v47  ;;  %v1974_v6 = vsub.f32 0.0, %v1846_v32  ;;  %v1272_v40 = vadd.f32 -0.28449672, %v1208_v30  ;;  %4126 = vrcp.f32 %v826_v25  ;;  %v7045_v25 = vld [vmem:[#allocation20_spill] sm:$0xff] }
 0x1ce   :  { %v2036_v37 = vsel %vm1908_vm9, %v1972_v51, %v1844_v35  ;;  %v1530_v20 = vsub.f32 0.0, %v698_v59  ;;  %v5370_v14 = vmul.f32 0.70710677, %v5322_v11  ;;  %v5373_v54 = vmul.f32 0.70710677, %v5343_v18  ;;  %v7043_v51 = vld [vmem:[#allocation18_spill] sm:$0xff] }
 0x1cf   :  { %v2039_v61 = vsel %vm1911_vm10, %v1975_v63, %v1847_v62  ;;  %v1785_v43 = vmul.f32 %v4121_v44, %v1465_v57  ;;  %v1336_v13 = vmul.f32 %v5296_v22, %v1272_v40  ;;  %v5379_v29 = vmul.f32 0.70710677, %v5364_v58  ;;  %3915 = vmatmul.mubr.f32.gmra.mxu1 %v7042_v23  ;;  %v5411_v40 = vpop.f32.mrf.mxu0 }
 0x1d0   :  { %v1595_v24 = vmul.f32 %v1531_v19, %v5315_v9  ;;  %v5383_v12 = vmul.f32 0.5, %v5294_v41  ;;  %v701_v55 = vand.u32 2147483647, %v5370_v14  ;;  %v700_v34 = vand.u32 2147483647, %v5373_v54  ;;  %3917 = vmatprep.mubr.f32.mxu1 %v5067_v52 }
 0x1d1   :  { %v2100_v35 = vadd.f32 1.0, %v2036_v37  ;;  %v2038_v36 = vsel %vm1910_vm11, %v1974_v6, %v1846_v32  ;;  %v1400_v15 = vadd.f32 0.2548296, %v1336_v13  ;;  %v703_v62 = vand.u32 2147483647, %v5379_v29 }
 0x1d2   :  { %v2103_v26 = vadd.f32 1.0, %v2039_v61  ;;  %vm1913_vm12 = vcmp.lt.f32.partialorder %v5186_v31, 0.0  ;;  %v1594_v41 = vmul.f32 %v1530_v20, %v698_v59  ;;  %v765_v9 = vmul.f32 0.3275911, %v701_v55  ;;  %v7044_v59 = vld [vmem:[#allocation26_spill] sm:$0xff] }
 0x1d3   :  { %v764_v42 = vmul.f32 0.3275911, %v700_v34  ;;  %v5394_v8 = vmul.f32 %v2101_v7, %v5164_v17  ;;  %v1849_v3 = vsub.f32 1.0, %v1785_v43  ;;  %v1464_v46 = vmul.f32 %v5296_v22, %v1400_v15  ;;  %3918 = vmatmul.mubr.f32.gmra.mxu1 %v7043_v51 }
 0x1d4   :  { %v767_v53 = vmul.f32 0.3275911, %v703_v62  ;;  %v4123_v32 = vpop.eup %4122  ;;  %v2102_v56 = vadd.f32 1.0, %v2038_v36  ;;  %vm1912_vm13 = vcmp.lt.f32.partialorder %v5209_v50, 0.0  ;;  %v1690_v52 = vmul.f32 1.442695, %v1595_v24  ;;  %3920 = vmatprep.mubr.f32.mxu1 %v7045_v25 }
 0x1d5   :  { %v829_v2 = vadd.f32 1.0, %v765_v9  ;;  %v828_v47 = vadd.f32 1.0, %v764_v42  ;;  %v5402_v39 = vmul.f32 %v2100_v35, %v7044_v59  ;;  %v1784_v17 = vmul.f32 %v4123_v32, %v1464_v46  ;;  %v7047_v24 = vld [vmem:[#allocation22_spill] sm:$0xff]  ;;  %v5434_v9 = vpop.f32.mrf.mxu0 }
 0x1d6   :  { %v1533_v63 = vsub.f32 0.0, %v701_v55  ;;  %v831_v30 = vadd.f32 1.0, %v767_v53  ;;  %v5405_v22 = vpop.eup %4124  ;;  %v5408_v57 = vmul.f32 %v2103_v26, %v5282_v10  ;;  %v1688_v19 = vmul.f32 1.442695, %v1594_v41  ;;  %v7046_v10 = vld [vmem:[#allocation19_spill] sm:$0xff]  ;;  %v7048_v53 = vld [vmem:[#allocation21_spill] sm:$0xff] }
 0x1d7   :  { %4128 = vrcp.f32 %v829_v2  ;;  %v1532_v49 = vsub.f32 0.0, %v700_v34  ;;  %v1977_v44 = vsub.f32 0.0, %v1849_v3  ;;  %v1848_v7 = vsub.f32 1.0, %v1784_v17  ;;  %3921 = vmatmul.mubr.f32.gmra.mxu1 %v7046_v10  ;;  %v5446_v25 = vpop.f32.mrf.mxu0 }
 0x1d8   :  { %v955_v6 = vmul.f32 1.0614054, %v5405_v22  ;;  %4130 = vrcp.f32 %v828_v47  ;;  %v5414_v16 = vmul.f32 %v2102_v56, %v5286_v33  ;;  %v1535_v37 = vsub.f32 0.0, %v703_v62  ;;  %3923 = vmatprep.mubr.f32.mxu1 %v7047_v24 }
 0x1d9   :  { %4132 = vpow2.f32 %v1690_v52  ;;  %v5417_v20 = vmul.f32 0.70710677, %v5397_v38  ;;  %v1976_v61 = vsub.f32 0.0, %v1848_v7  ;;  %v1597_v13 = vmul.f32 %v1533_v63, %v701_v55  ;;  %v7049_v52 = vld [vmem:[#allocation24_spill] sm:$0xff] }
 0x1da   :  { %v1019_v43 = vadd.f32 -1.4531521, %v955_v6  ;;  %4134 = vrcp.f32 %v831_v30  ;;  %v5421_v23 = vpop.eup %4126  ;;  %v5424_v35 = vmul.f32 0.5, %v5343_v18  ;;  %v1596_v33 = vmul.f32 %v1532_v49, %v700_v34 }
 0x1db   :  { %v702_v36 = vand.u32 2147483647, %v5417_v20  ;;  %v5428_v15 = vmul.f32 0.70710677, %v5411_v40  ;;  %v2041_v26 = vsel %vm1913_vm12, %v1977_v44, %v1849_v3  ;;  %v954_v55 = vmul.f32 1.0614054, %v5421_v23  ;;  %3924 = vmatmul.mubr.f32.gmra.mxu1 %v7048_v53 }
 0x1dc   :  { %v1083_v41 = vmul.f32 %v5405_v22, %v1019_v43  ;;  %4136 = vpow2.f32 %v1688_v19  ;;  %v1599_v42 = vmul.f32 %v1535_v37, %v703_v62  ;;  %v2040_v32 = vsel %vm1912_vm13, %v1976_v61, %v1848_v7  ;;  %3926 = vmatprep.mubr.f32.mxu1 %v7049_v52  ;;  %v7050_v44 = vld [vmem:[#allocation23_spill] sm:$0xff] }
 0x1dd   :  { %v766_v46 = vmul.f32 0.3275911, %v702_v36  ;;  %v1534_v18 = vsub.f32 0.0, %v702_v36  ;;  %v705_v34 = vand.u32 2147483647, %v5428_v15  ;;  %v2105_v2 = vadd.f32 1.0, %v2041_v26 }
 0x1de   :  { %v1147_v56 = vadd.f32 1.4214138, %v1083_v41  ;;  %v1018_v31 = vadd.f32 -1.4531521, %v954_v55  ;;  %v1694_v3 = vmul.f32 1.442695, %v1597_v13 }
 0x1df   :  { %v1692_v47 = vmul.f32 1.442695, %v1596_v33  ;;  %v830_v51 = vadd.f32 1.0, %v766_v46  ;;  %v769_v59 = vmul.f32 0.3275911, %v705_v34  ;;  %v1598_v63 = vmul.f32 %v1534_v18, %v702_v36  ;;  %3927 = vmatmul.mubr.f32.gmra.mxu1 %v7050_v44  ;;  %v7051_v55 = vld [vmem:[#allocation25_spill] sm:$0xff] }
 0x1e0   :  { %v1211_v62 = vmul.f32 %v5405_v22, %v1147_v56  ;;  %v1082_v17 = vmul.f32 %v5421_v23, %v1018_v31  ;;  %v5444_v30 = vmul.f32 0.70710677, %v5434_v9  ;;  %v2104_v50 = vadd.f32 1.0, %v2040_v32  ;;  %3929 = vmatprep.mubr.f32.mxu1 %v5266_v27 }
 0x1e1   :  { %v1698_v19 = vmul.f32 1.442695, %v1599_v42  ;;  %4138 = vrcp.f32 %v830_v51  ;;  %v833_v49 = vadd.f32 1.0, %v769_v59  ;;  %v5452_v10 = vmul.f32 %v2105_v2, %v5336_v0 }
 0x1e2   :  { %v1275_v7 = vadd.f32 -0.28449672, %v1211_v62  ;;  %v1146_v6 = vadd.f32 1.4214138, %v1082_v17  ;;  %4140 = vpow2.f32 %v1694_v3  ;;  %v704_v37 = vand.u32 2147483647, %v5444_v30 }
 0x1e3   :  { %4142 = vpow2.f32 %v1692_v47  ;;  %v1537_v61 = vsub.f32 0.0, %v705_v34  ;;  %v5455_v43 = vmul.f32 0.70710677, %v5446_v25  ;;  %v1696_v36 = vmul.f32 1.442695, %v1598_v63  ;;  %3930 = vmatmul.mubr.f32.gmra.mxu1 %v7051_v55 }
 0x1e4   :  { %v5457_v13 = vpop.eup %4128  ;;  %v1339_v24 = vmul.f32 %v5405_v22, %v1275_v7  ;;  %v1210_v33 = vmul.f32 %v5421_v23, %v1146_v6  ;;  %4144 = vrcp.f32 %v833_v49  ;;  %v768_v0 = vmul.f32 0.3275911, %v704_v37  ;;  %3932 = vmatprep.mubr.f32.mxu1 %v5347_v28 }
 0x1e5   :  { %v5461_v26 = vpop.eup %4130  ;;  %v957_v27 = vmul.f32 1.0614054, %v5457_v13  ;;  %4146 = vpow2.f32 %v1698_v19  ;;  %v1536_v41 = vsub.f32 0.0, %v704_v37  ;;  %v5466_v46 = vmul.f32 %v2104_v50, %v5340_v48 }
 0x1e6   :  { %v4133_v42 = vpop.eup %4132  ;;  %v1403_v18 = vadd.f32 0.2548296, %v1339_v24  ;;  %v1274_v53 = vadd.f32 -0.28449672, %v1210_v33  ;;  %v956_v32 = vmul.f32 1.0614054, %v5461_v26  ;;  %v1601_v3 = vmul.f32 %v1537_v61, %v705_v34 }
 0x1e7   :  { %v5470_v56 = vpop.eup %4134  ;;  %vm1915_vm14 = vcmp.lt.f32.partialorder %v5305_v4, 0.0  ;;  %v1021_v31 = vadd.f32 -1.4531521, %v957_v27  ;;  %v832_v52 = vadd.f32 1.0, %v768_v0  ;;  %v707_v2 = vand.u32 2147483647, %v5455_v43  ;;  %3933 = vmatmul.mubr.f32.gmra.mxu1 %v5290_v21  ;;  %v5484_v21 = vpop.f32.mrf.mxu0 }
 0x1e8   :  { %v1467_v47 = vmul.f32 %v5405_v22, %v1403_v18  ;;  %v1338_v48 = vmul.f32 %v5421_v23, %v1274_v53  ;;  %v1020_v51 = vadd.f32 -1.4531521, %v956_v32  ;;  %v959_v59 = vmul.f32 1.0614054, %v5470_v56  ;;  %3935 = vmatprep.mubr.f32.mxu1 %v5356_v45 }
 0x1e9   :  { %v4137_v62 = vpop.eup %4136  ;;  %v1085_v17 = vmul.f32 %v5457_v13, %v1021_v31  ;;  %4148 = vrcp.f32 %v832_v52  ;;  %v1600_v28 = vmul.f32 %v1536_v41, %v704_v37  ;;  %v771_v63 = vmul.f32 0.3275911, %v707_v2 }
 0x1ea   :  { %v1787_v50 = vmul.f32 %v4133_v42, %v1467_v47  ;;  %v1402_v34 = vadd.f32 0.2548296, %v1338_v48  ;;  %v1084_v19 = vmul.f32 %v5461_v26, %v1020_v51  ;;  %v1023_v49 = vadd.f32 -1.4531521, %v959_v59 }
 0x1eb   :  { %vm1914_vm15 = vcmp.lt.f32.partialorder %v5320_v60, 0.0  ;;  %v1149_v22 = vadd.f32 1.4214138, %v1085_v17  ;;  %4150 = vpow2.f32 %v1696_v36  ;;  %v1702_v44 = vmul.f32 1.442695, %v1601_v3  ;;  %3936 = vmatmul.mubr.f32.gmra.mxu1 %v5352_v5 }
 0x1ec   :  { %v835_v7 = vadd.f32 1.0, %v771_v63  ;;  %v1851_v6 = vsub.f32 1.0, %v1787_v50  ;;  %v1466_v61 = vmul.f32 %v5421_v23, %v1402_v34  ;;  %v1148_v37 = vadd.f32 1.4214138, %v1084_v19  ;;  %3938 = vmatprep.mubr.f32.mxu1 %v5402_v39 }
 0x1ed   :  { %v1087_v24 = vmul.f32 %v5470_v56, %v1023_v49  ;;  %v1213_v33 = vmul.f32 %v5457_v13, %v1149_v22  ;;  %v1700_v27 = vmul.f32 1.442695, %v1600_v28  ;;  %v1539_v0 = vsub.f32 0.0, %v707_v2 }
 0x1ee   :  { %4152 = vrcp.f32 %v835_v7  ;;  %v5488_v45 = vpop.eup %4138  ;;  %v1979_v36 = vsub.f32 0.0, %v1851_v6  ;;  %v1786_v41 = vmul.f32 %v4137_v62, %v1466_v61  ;;  %v1212_v55 = vmul.f32 %v5461_v26, %v1148_v37 }
 0x1ef   :  { %v1151_v42 = vadd.f32 1.4214138, %v1087_v24  ;;  %v4141_v23 = vpop.eup %4140  ;;  %v1277_v18 = vadd.f32 -0.28449672, %v1213_v33  ;;  %v958_v53 = vmul.f32 1.0614054, %v5488_v45  ;;  %4154 = vpow2.f32 %v1702_v44  ;;  %3939 = vmatmul.mubr.f32.gmra.mxu1 %v5394_v8 }
 0x1f0   :  { %v5494_v32 = vmul.f32 0.70710677, %v5484_v21  ;;  %v4143_v31 = vpop.eup %4142  ;;  %v2043_v5 = vsel %vm1915_vm14, %v1979_v36, %v1851_v6  ;;  %v1850_v3 = vsub.f32 1.0, %v1786_v41  ;;  %v1276_v52 = vadd.f32 -0.28449672, %v1212_v55  ;;  %3941 = vmatprep.mubr.f32.mxu1 %v5414_v16 }
 0x1f1   :  { %v1215_v47 = vmul.f32 %v5470_v56, %v1151_v42  ;;  %v5499_v48 = vpop.eup %4144  ;;  %v2107_v51 = vadd.f32 1.0, %v2043_v5  ;;  %v1341_v39 = vmul.f32 %v5457_v13, %v1277_v18  ;;  %v1022_v59 = vadd.f32 -1.4531521, %v958_v53 }
 0x1f2   :  { %4156 = vpow2.f32 %v1700_v27  ;;  %v4147_v62 = vpop.eup %4146  ;;  %v1978_v17 = vsub.f32 0.0, %v1850_v3  ;;  %v1340_v28 = vmul.f32 %v5461_v26, %v1276_v52  ;;  %v961_v4 = vmul.f32 1.0614054, %v5499_v48 }
 0x1f3   :  { %v1279_v63 = vadd.f32 -0.28449672, %v1215_v47  ;;  %v1405_v50 = vadd.f32 0.2548296, %v1341_v39  ;;  %v1086_v34 = vmul.f32 %v5488_v45, %v1022_v59  ;;  %v1603_v19 = vmul.f32 %v1539_v0, %v707_v2  ;;  %3942 = vmatmul.mubr.f32.gmra.mxu1 %v5408_v57 }
 0x1f4   :  { %v706_v49 = vand.u32 2147483647, %v5494_v32  ;;  %v2042_v22 = vsel %vm1914_vm15, %v1978_v17, %v1850_v3  ;;  %vm1917_vm0 = vcmp.lt.f32.partialorder %v5370_v14, 0.0  ;;  %v1404_v8 = vadd.f32 0.2548296, %v1340_v28  ;;  %3944 = vmatprep.mubr.f32.mxu1 %v5466_v46 }
 0x1f5   :  { %v1343_v44 = vmul.f32 %v5470_v56, %v1279_v63  ;;  %v1025_v7 = vadd.f32 -1.4531521, %v961_v4  ;;  %v2106_v6 = vadd.f32 1.0, %v2042_v22  ;;  %v1469_v61 = vmul.f32 %v5457_v13, %v1405_v50 }
 0x1f6   :  { %vm1916_vm1 = vcmp.lt.f32.partialorder %v5373_v54, 0.0  ;;  %v1150_v16 = vadd.f32 1.4214138, %v1086_v34  ;;  %v770_v37 = vmul.f32 0.3275911, %v706_v49  ;;  %v5515_v2 = vpop.eup %4148  ;;  %v2171_v60 = vmul.f32 %v2107_v51, %v5360_v1  ;;  %v5534_v34 = vpop.f32.mrf.mxu0 }
 0x1f7   :  { %v1468_v24 = vmul.f32 %v5461_v26, %v1404_v8  ;;  %v1407_v33 = vadd.f32 0.2548296, %v1343_v44  ;;  %v1089_v27 = vmul.f32 %v5499_v48, %v1025_v7  ;;  %v2170_v0 = vmul.f32 %v2106_v6, %v5383_v12  ;;  %3945 = vmatmul.mubr.f32.gmra.mxu1 %v5452_v10 }
 0x1f8   :  { %v1789_v13 = vmul.f32 %v4141_v23, %v1469_v61  ;;  %v1214_v36 = vmul.f32 %v5488_v45, %v1150_v16  ;;  %v960_v41 = vmul.f32 1.0614054, %v5515_v2  ;;  %v4151_v55 = vpop.eup %4150  ;;  %v834_v1 = vadd.f32 1.0, %v770_v37  ;;  %v5544_v54 = vpop.f32.mrf.mxu0 }
 0x1f9   :  { %v1788_v57 = vmul.f32 %v4143_v31, %v1468_v24  ;;  %v1471_v42 = vmul.f32 %v5470_v56, %v1407_v33  ;;  %v1153_v18 = vadd.f32 1.4214138, %v1089_v27  ;;  %v1538_v3 = vsub.f32 0.0, %v706_v49  ;;  %3947 = vmatprep.mubr.f32.mxu1 %v2170_v0 }
 0x1fa   :  { %v1853_v53 = vsub.f32 1.0, %v1789_v13  ;;  %v1278_v26 = vadd.f32 -0.28449672, %v1214_v36  ;;  %v1024_v5 = vadd.f32 -1.4531521, %v960_v41  ;;  %4158 = vrcp.f32 %v834_v1 }
 0x1fb   :  { %v5526_v46 = vpop.eup %4152  ;;  %v1852_v12 = vsub.f32 1.0, %v1788_v57  ;;  %v1791_v23 = vmul.f32 %v4147_v62, %v1471_v42  ;;  %v1217_v52 = vmul.f32 %v5499_v48, %v1153_v18  ;;  %v1706_v10 = vmul.f32 1.442695, %v1603_v19  ;;  %3948 = vmatmul.mubr.f32.gmra.mxu1 %v2171_v60 }
 0x1fc   :  { %v1981_v47 = vsub.f32 0.0, %v1853_v53  ;;  %v1342_v31 = vmul.f32 %v5488_v45, %v1278_v26  ;;  %v1088_v56 = vmul.f32 %v5515_v2, %v1024_v5  ;;  %v963_v51 = vmul.f32 1.0614054, %v5526_v46  ;;  %v4155_v39 = vpop.eup %4154 }
 0x1fd   :  { %v1980_v59 = vsub.f32 0.0, %v1852_v12  ;;  %v1855_v17 = vsub.f32 1.0, %v1791_v23  ;;  %v1281_v28 = vadd.f32 -0.28449672, %v1217_v52  ;;  %v1602_v6 = vmul.f32 %v1538_v3, %v706_v49 }
 0x1fe   :  { %v2045_v63 = vsel %vm1917_vm0, %v1981_v47, %v1853_v53  ;;  %v1406_v62 = vadd.f32 0.2548296, %v1342_v31  ;;  %v1152_v4 = vadd.f32 1.4214138, %v1088_v56  ;;  %v1027_v50 = vadd.f32 -1.4531521, %v963_v51 }
 0x1ff   :  { %v4157_v22 = vpop.eup %4156  ;;  %v2109_v8 = vadd.f32 1.0, %v2045_v63  ;;  %v2044_v44 = vsel %vm1916_vm1, %v1980_v59, %v1852_v12  ;;  %v1345_v7 = vmul.f32 %v5499_v48, %v1281_v28  ;;  %v573_v37 = vmul.f32 0.5, %v5322_v11  ;;  %v5567_v59 = vpop.f32.mrf.mxu0 }
 0x200   :  { %v2108_v61 = vadd.f32 1.0, %v2044_v44  ;;  %v1470_v19 = vmul.f32 %v5488_v45, %v1406_v62  ;;  %v1216_v14 = vmul.f32 %v5515_v2, %v1152_v4  ;;  %v1091_v16 = vmul.f32 %v5526_v46, %v1027_v50 }
 0x201   :  { %v1983_v24 = vsub.f32 0.0, %v1855_v17  ;;  %v1409_v33 = vadd.f32 0.2548296, %v1345_v7  ;;  %4160 = vpow2.f32 %v1706_v10  ;;  %v2173_v13 = vmul.f32 %v2109_v8, %v573_v37 }
 0x202   :  { %v2172_v60 = vmul.f32 %v2108_v61, %v5424_v35  ;;  %v1790_v27 = vmul.f32 %v4151_v55, %v1470_v19  ;;  %v1280_v0 = vadd.f32 -0.28449672, %v1216_v14  ;;  %vm1919_vm2 = vcmp.lt.f32.partialorder %v5379_v29, 0.0 }
 0x203   :  { %v1473_v45 = vmul.f32 %v5499_v48, %v1409_v33  ;;  %v1155_v49 = vadd.f32 1.4214138, %v1091_v16  ;;  %v1704_v57 = vmul.f32 1.442695, %v1602_v6  ;;  %v5550_v11 = vmul.f32 0.70710677, %v5534_v34 }
 0x204   :  { %v1854_v36 = vsub.f32 1.0, %v1790_v27  ;;  %v1344_v41 = vmul.f32 %v5515_v2, %v1280_v0  ;;  %3950 = vmatprep.mubr.f32.mxu1 %v2172_v60  ;;  %v2047_v35 = vsel %vm1919_vm2, %v1983_v24, %v1855_v17  ;;  %v5554_v18 = vmul.f32 0.70710677, %v5544_v54 }
 0x205   :  { %v1793_v55 = vmul.f32 %v4155_v39, %v1473_v45  ;;  %v1219_v42 = vmul.f32 %v5526_v46, %v1155_v49  ;;  %3951 = vmatmul.mubr.f32.gmra.mxu1 %v2173_v13  ;;  %v574_v29 = vmul.f32 0.5, %v5397_v38  ;;  %v709_v53 = vand.u32 2147483647, %v5550_v11 }
 0x206   :  { %v1982_v48 = vsub.f32 0.0, %v1854_v36  ;;  %v1408_v1 = vadd.f32 0.2548296, %v1344_v41  ;;  %vm1918_vm3 = vcmp.lt.f32.partialorder %v5417_v20, 0.0  ;;  %v5560_v3 = vand.u32 2147483647, %v5554_v18 }
 0x207   :  { %v1857_v26 = vsub.f32 1.0, %v1793_v55  ;;  %v1283_v5 = vadd.f32 -0.28449672, %v1219_v42  ;;  %v5562_v12 = vpop.eup %4158  ;;  %v2111_v23 = vadd.f32 1.0, %v2047_v35  ;;  %v773_v31 = vmul.f32 0.3275911, %v709_v53 }
 0x208   :  { %v2046_v52 = vsel %vm1918_vm3, %v1982_v48, %v1854_v36  ;;  %v1472_v47 = vmul.f32 %v5515_v2, %v1408_v1  ;;  %v962_v39 = vmul.f32 1.0614054, %v5562_v12  ;;  %v575_v20 = vmul.f32 0.5, %v5364_v58  ;;  %v5574_v58 = vpop.f32.mrf.mxu0 }
 0x209   :  { %v2110_v56 = vadd.f32 1.0, %v2046_v52  ;;  %v1985_v38 = vsub.f32 0.0, %v1857_v26  ;;  %v1347_v51 = vmul.f32 %v5526_v46, %v1283_v5  ;;  %v837_v28 = vadd.f32 1.0, %v773_v31 }
 0x20a   :  { %v1792_v17 = vmul.f32 %v4157_v22, %v1472_v47  ;;  %v772_v10 = vmul.f32 0.3275911, %v5560_v3  ;;  %vm1921_vm4 = vcmp.lt.f32.partialorder %v5428_v15, 0.0  ;;  %v1026_v2 = vadd.f32 -1.4531521, %v962_v39  ;;  %v5588_v45 = vpop.f32.mrf.mxu0 }
 0x20b   :  { %v2174_v63 = vmul.f32 %v2110_v56, %v574_v29  ;;  %v1411_v62 = vadd.f32 0.2548296, %v1347_v51  ;;  %v2175_v4 = vmul.f32 %v2111_v23, %v575_v20  ;;  %v2049_v50 = vsel %vm1921_vm4, %v1985_v38, %v1857_v26 }
 0x20c   :  { %v1856_v8 = vsub.f32 1.0, %v1792_v17  ;;  %4162 = vrcp.f32 %v837_v28  ;;  %v1090_v7 = vmul.f32 %v5562_v12, %v1026_v2  ;;  %v836_v6 = vadd.f32 1.0, %v772_v10  ;;  %v5602_v23 = vpop.f32.mrf.mxu0 }
 0x20d   :  { %v1475_v44 = vmul.f32 %v5526_v46, %v1411_v62  ;;  %4164 = vpow2.f32 %v1704_v57  ;;  %3953 = vmatprep.mubr.f32.mxu1 %v2174_v63  ;;  %vm1920_vm5 = vcmp.lt.f32.partialorder %v5444_v30, 0.0  ;;  %v2113_v61 = vadd.f32 1.0, %v2049_v50 }
 0x20e   :  { %v1984_v22 = vsub.f32 0.0, %v1856_v8  ;;  %3954 = vmatmul.mubr.f32.gmra.mxu1 %v2175_v4  ;;  %v4161_v15 = vpop.eup %4160  ;;  %v1154_v19 = vadd.f32 1.4214138, %v1090_v7  ;;  %v1541_v14 = vsub.f32 0.0, %v709_v53  ;;  %4166 = vrcp.f32 %v836_v6 }
 0x20f   :  { %v1795_v37 = vmul.f32 %v4161_v15, %v1475_v44  ;;  %v5578_v46 = vmul.f32 0.70710677, %v5567_v59  ;;  %v5581_v24 = vmul.f32 0.70710677, %v5574_v58  ;;  %v576_v33 = vmul.f32 0.5, %v5434_v9 }
 0x210   :  { %v2048_v16 = vsel %vm1920_vm5, %v1984_v22, %v1856_v8  ;;  %v1218_v30 = vmul.f32 %v5562_v12, %v1154_v19  ;;  %v577_v27 = vmul.f32 0.5, %v5411_v40  ;;  %v1605_v41 = vmul.f32 %v1541_v14, %v709_v53 }
 0x211   :  { %v2112_v60 = vadd.f32 1.0, %v2048_v16  ;;  %v711_v0 = vand.u32 2147483647, %v5578_v46  ;;  %v710_v13 = vand.u32 2147483647, %v5581_v24  ;;  %v1540_v57 = vsub.f32 0.0, %v5560_v3 }
 0x212   :  { %v1282_v36 = vadd.f32 -0.28449672, %v1218_v30  ;;  %v2177_v35 = vmul.f32 %v2113_v61, %v577_v27  ;;  %v1859_v55 = vsub.f32 1.0, %v1795_v37  ;;  %v5592_v29 = vmul.f32 0.5, %v5446_v25 }
 0x213   :  { %v2176_v49 = vmul.f32 %v2112_v60, %v576_v33  ;;  %v775_v42 = vmul.f32 0.3275911, %v711_v0  ;;  %v774_v9 = vmul.f32 0.3275911, %v710_v13  ;;  %v5595_v40 = vmul.f32 0.5, %v5484_v21 }
 0x214   :  { %v1346_v48 = vmul.f32 %v5562_v12, %v1282_v36  ;;  %v5599_v1 = vmul.f32 0.70710677, %v5588_v45  ;;  %vm1923_vm6 = vcmp.lt.f32.partialorder %v5455_v43, 0.0  ;;  %v1543_v26 = vsub.f32 0.0, %v711_v0 }
 0x215   :  { %3956 = vmatprep.mubr.f32.mxu1 %v2176_v49  ;;  %v839_v53 = vadd.f32 1.0, %v775_v42  ;;  %v838_v5 = vadd.f32 1.0, %v774_v9  ;;  %v1710_v25 = vmul.f32 1.442695, %v1605_v41  ;;  %v1604_v47 = vmul.f32 %v1540_v57, %v5560_v3 }
 0x216   :  { %3957 = vmatmul.mubr.f32.gmra.mxu1 %v2177_v35  ;;  %v1410_v52 = vadd.f32 0.2548296, %v1346_v48  ;;  %v713_v21 = vand.u32 2147483647, %v5599_v1  ;;  %v1987_v31 = vsub.f32 0.0, %v1859_v55  ;;  %vm1922_vm7 = vcmp.lt.f32.partialorder %v5494_v32, 0.0 }
 0x217   :  { %v5608_v56 = vmul.f32 0.5, %v5534_v34  ;;  %4168 = vrcp.f32 %v839_v53  ;;  %v5614_v39 = vmul.f32 0.5, %v5544_v54  ;;  %v1607_v28 = vmul.f32 %v1543_v26, %v711_v0  ;;  %v5620_v34 = vpop.f32.mrf.mxu0 }
 0x218   :  { %v1474_v51 = vmul.f32 %v5562_v12, %v1410_v52  ;;  %4170 = vrcp.f32 %v838_v5  ;;  %v777_v20 = vmul.f32 0.3275911, %v713_v21  ;;  %v1542_v10 = vsub.f32 0.0, %v710_v13 }
 0x219   :  { %v5610_v38 = vpop.eup %4162  ;;  %v5618_v63 = vmul.f32 0.70710677, %v5602_v23  ;;  %4172 = vpow2.f32 %v1710_v25  ;;  %v1708_v2 = vmul.f32 1.442695, %v1604_v47  ;;  %v2051_v54 = vsel %vm1923_vm6, %v1987_v31, %v1859_v55  ;;  %v5636_v0 = vpop.f32.mrf.mxu0 }
 0x21a   :  { %v4165_v17 = vpop.eup %4164  ;;  %v965_v3 = vmul.f32 1.0614054, %v5610_v38  ;;  %v841_v4 = vadd.f32 1.0, %v777_v20  ;;  %v1545_v8 = vsub.f32 0.0, %v713_v21  ;;  %v5629_v22 = vmul.f32 0.70710677, %v5620_v34 }
 0x21b   :  { %v1794_v62 = vmul.f32 %v4165_v17, %v1474_v51  ;;  %v5622_v12 = vpop.eup %4166  ;;  %v712_v44 = vand.u32 2147483647, %v5618_v63  ;;  %v1714_v61 = vmul.f32 1.442695, %v1607_v28  ;;  %v1606_v19 = vmul.f32 %v1542_v10, %v710_v13  ;;  %v5646_v32 = vpop.f32.mrf.mxu0 }
 0x21c   :  { %v1029_v50 = vadd.f32 -1.4531521, %v965_v3  ;;  %v964_v6 = vmul.f32 1.0614054, %v5622_v12  ;;  %4174 = vrcp.f32 %v841_v4  ;;  %v5633_v43 = vmul.f32 0.5, %v5574_v58 }
 0x21d   :  { %v1858_v7 = vsub.f32 1.0, %v1794_v62  ;;  %v776_v14 = vmul.f32 0.3275911, %v712_v44  ;;  %v715_v33 = vand.u32 2147483647, %v5629_v22  ;;  %4176 = vpow2.f32 %v1708_v2 }
 0x21e   :  { %v1093_v15 = vmul.f32 %v5610_v38, %v1029_v50  ;;  %v1028_v37 = vadd.f32 -1.4531521, %v964_v6  ;;  %v1609_v30 = vmul.f32 %v1545_v8, %v713_v21  ;;  %v2115_v49 = vadd.f32 1.0, %v2051_v54 }
 0x21f   :  { %v1986_v16 = vsub.f32 0.0, %v1858_v7  ;;  %v840_v27 = vadd.f32 1.0, %v776_v14  ;;  %v779_v41 = vmul.f32 0.3275911, %v715_v33  ;;  %v1712_v58 = vmul.f32 1.442695, %v1606_v19 }
 0x220   :  { %v1157_v60 = vadd.f32 1.4214138, %v1093_v15  ;;  %v1092_v13 = vmul.f32 %v5622_v12, %v1028_v37  ;;  %v1544_v42 = vsub.f32 0.0, %v712_v44  ;;  %v1718_v26 = vmul.f32 1.442695, %v1609_v30 }
 0x221   :  { %v2050_v36 = vsel %vm1922_vm7, %v1986_v16, %v1858_v7  ;;  %4178 = vrcp.f32 %v840_v27  ;;  %v843_v9 = vadd.f32 1.0, %v779_v41  ;;  %v5644_v5 = vmul.f32 0.70710677, %v5636_v0 }
 0x222   :  { %v2114_v57 = vadd.f32 1.0, %v2050_v36  ;;  %v1221_v35 = vmul.f32 %v5610_v38, %v1157_v60  ;;  %v1156_v55 = vadd.f32 1.4214138, %v1092_v13  ;;  %4180 = vpow2.f32 %v1714_v61 }
 0x223   :  { %v2179_v25 = vmul.f32 %v2115_v49, %v5592_v29  ;;  %4182 = vrcp.f32 %v843_v9  ;;  %v1547_v21 = vsub.f32 0.0, %v715_v33  ;;  %v714_v20 = vand.u32 2147483647, %v5644_v5 }
 0x224   :  { %v2178_v48 = vmul.f32 %v2114_v57, %v5595_v40  ;;  %v1285_v53 = vadd.f32 -0.28449672, %v1221_v35  ;;  %v5648_v52 = vpop.eup %4168  ;;  %v1220_v47 = vmul.f32 %v5622_v12, %v1156_v55  ;;  %4184 = vpow2.f32 %v1712_v58 }
 0x225   :  { %v5652_v31 = vpop.eup %4170  ;;  %v967_v40 = vmul.f32 1.0614054, %v5648_v52  ;;  %v1608_v28 = vmul.f32 %v1544_v42, %v712_v44  ;;  %v5659_v29 = vmul.f32 0.70710677, %v5646_v32  ;;  %4186 = vpow2.f32 %v1718_v26 }
 0x226   :  { %v1349_v51 = vmul.f32 %v5610_v38, %v1285_v53  ;;  %3959 = vmatprep.mubr.f32.mxu1 %v2178_v48  ;;  %v1284_v17 = vadd.f32 -0.28449672, %v1220_v47  ;;  %v966_v3 = vmul.f32 1.0614054, %v5652_v31  ;;  %v4173_v10 = vpop.eup %4172  ;;  %v778_v4 = vmul.f32 0.3275911, %v714_v20 }
 0x227   :  { %3960 = vmatmul.mubr.f32.gmra.mxu1 %v2179_v25  ;;  %v1031_v2 = vadd.f32 -1.4531521, %v967_v40  ;;  %vm1925_vm8 = vcmp.lt.f32.partialorder %v5550_v11, 0.0  ;;  %v1611_v8 = vmul.f32 %v1547_v21, %v715_v33  ;;  %v717_v7 = vand.u32 2147483647, %v5659_v29 }
 0x228   :  { %v1413_v62 = vadd.f32 0.2548296, %v1349_v51  ;;  %v1348_v54 = vmul.f32 %v5622_v12, %v1284_v17  ;;  %v1030_v50 = vadd.f32 -1.4531521, %v966_v3  ;;  %v842_v61 = vadd.f32 1.0, %v778_v4 }
 0x229   :  { %v5664_v6 = vpop.eup %4174  ;;  %v1095_v15 = vmul.f32 %v5648_v52, %v1031_v2  ;;  %v1546_v19 = vsub.f32 0.0, %v714_v20  ;;  %v1716_v60 = vmul.f32 1.442695, %v1608_v28  ;;  %vm1924_vm9 = vcmp.lt.f32.partialorder %v5554_v18, 0.0 }
 0x22a   :  { %v1477_v44 = vmul.f32 %v5610_v38, %v1413_v62  ;;  %v1412_v14 = vadd.f32 0.2548296, %v1348_v54  ;;  %v1094_v16 = vmul.f32 %v5652_v31, %v1030_v50  ;;  %v969_v37 = vmul.f32 1.0614054, %v5664_v6  ;;  %v4177_v49 = vpop.eup %4176 }
 0x22b   :  { %v1159_v33 = vadd.f32 1.4214138, %v1095_v15  ;;  %4188 = vrcp.f32 %v842_v61  ;;  %v781_v27 = vmul.f32 0.3275911, %v717_v7  ;;  %v1722_v41 = vmul.f32 1.442695, %v1611_v8 }
 0x22c   :  { %v1797_v30 = vmul.f32 %v4173_v10, %v1477_v44  ;;  %v1476_v36 = vmul.f32 %v5622_v12, %v1412_v14  ;;  %v1158_v38 = vadd.f32 1.4214138, %v1094_v16  ;;  %v1033_v13 = vadd.f32 -1.4531521, %v969_v37 }
 0x22d   :  { %v1223_v35 = vmul.f32 %v5648_v52, %v1159_v33  ;;  %v1610_v58 = vmul.f32 %v1546_v19, %v714_v20  ;;  %v845_v55 = vadd.f32 1.0, %v781_v27  ;;  %v1549_v26 = vsub.f32 0.0, %v717_v7  ;;  %v5687_v19 = vpop.f32.mrf.mxu0 }
 0x22e   :  { %v1861_v57 = vsub.f32 1.0, %v1797_v30  ;;  %v5673_v42 = vpop.eup %4178  ;;  %v1796_v9 = vmul.f32 %v4177_v49, %v1476_v36  ;;  %v1222_v48 = vmul.f32 %v5652_v31, %v1158_v38  ;;  %v1097_v53 = vmul.f32 %v5664_v6, %v1033_v13 }
 0x22f   :  { %v4181_v25 = vpop.eup %4180  ;;  %v1287_v21 = vadd.f32 -0.28449672, %v1223_v35  ;;  %v968_v12 = vmul.f32 1.0614054, %v5673_v42  ;;  %4190 = vrcp.f32 %v845_v55  ;;  %v1613_v50 = vmul.f32 %v1549_v26, %v717_v7 }
 0x230   :  { %v1989_v47 = vsub.f32 0.0, %v1861_v57  ;;  %v1860_v51 = vsub.f32 1.0, %v1796_v9  ;;  %v1286_v40 = vadd.f32 -0.28449672, %v1222_v48  ;;  %v1161_v17 = vadd.f32 1.4214138, %v1097_v53  ;;  %v5678_v20 = vpop.eup %4182 }
 0x231   :  { %4192 = vpow2.f32 %v1716_v60  ;;  %v1351_v28 = vmul.f32 %v5648_v52, %v1287_v21  ;;  %v1032_v10 = vadd.f32 -1.4531521, %v968_v12  ;;  %v4185_v62 = vpop.eup %4184  ;;  %v971_v15 = vmul.f32 1.0614054, %v5678_v20 }
 0x232   :  { %v2053_v3 = vsel %vm1925_vm8, %v1989_v47, %v1861_v57  ;;  %4194 = vpow2.f32 %v1722_v41  ;;  %v1988_v2 = vsub.f32 0.0, %v1860_v51  ;;  %v1350_v4 = vmul.f32 %v5652_v31, %v1286_v40  ;;  %v4187_v11 = vpop.eup %4186 }
 0x233   :  { %v1225_v54 = vmul.f32 %v5664_v6, %v1161_v17  ;;  %v1415_v8 = vadd.f32 0.2548296, %v1351_v28  ;;  %v1096_v44 = vmul.f32 %v5673_v42, %v1032_v10  ;;  %v1720_v61 = vmul.f32 1.442695, %v1610_v58 }
 0x234   :  { %v2117_v14 = vadd.f32 1.0, %v2053_v3  ;;  %v2052_v16 = vsel %vm1924_vm9, %v1988_v2, %v1860_v51  ;;  %vm1927_vm10 = vcmp.lt.f32.partialorder %v5578_v46, 0.0  ;;  %v1414_v37 = vadd.f32 0.2548296, %v1350_v4  ;;  %v5723_v46 = vpop.f32.mrf.mxu0 }
 0x235   :  { %v1289_v60 = vadd.f32 -0.28449672, %v1225_v54  ;;  %v2116_v30 = vadd.f32 1.0, %v2052_v16  ;;  %v1479_v7 = vmul.f32 %v5648_v52, %v1415_v8  ;;  %vm1926_vm11 = vcmp.lt.f32.partialorder %v5581_v24, 0.0 }
 0x236   :  { %v1160_v33 = vadd.f32 1.4214138, %v1096_v44  ;;  %v1035_v27 = vadd.f32 -1.4531521, %v971_v15  ;;  %v1478_v49 = vmul.f32 %v5652_v31, %v1414_v37  ;;  %v1726_v38 = vmul.f32 1.442695, %v1613_v50 }
 0x237   :  { %v1353_v36 = vmul.f32 %v5664_v6, %v1289_v60  ;;  %v5697_v13 = vmul.f32 0.70710677, %v5687_v19  ;;  %v2180_v18 = vmul.f32 %v2116_v30, %v5614_v39  ;;  %v1799_v41 = vmul.f32 %v4181_v25, %v1479_v7 }
 0x238   :  { %v1224_v57 = vmul.f32 %v5673_v42, %v1160_v33  ;;  %v1099_v35 = vmul.f32 %v5678_v20, %v1035_v27  ;;  %v5702_v52 = vpop.eup %4188  ;;  %v2181_v58 = vmul.f32 %v2117_v14, %v5608_v56  ;;  %v1798_v55 = vmul.f32 %v4185_v62, %v1478_v49 }
 0x239   :  { %v1417_v9 = vadd.f32 0.2548296, %v1353_v36  ;;  %v5706_v31 = vand.u32 2147483647, %v5697_v13  ;;  %v1863_v48 = vsub.f32 1.0, %v1799_v41  ;;  %4196 = vpow2.f32 %v1720_v61  ;;  %3962 = vmatprep.mubr.f32.mxu1 %v2180_v18 }
 0x23a   :  { %v1288_v53 = vadd.f32 -0.28449672, %v1224_v57  ;;  %v1163_v26 = vadd.f32 1.4214138, %v1099_v35  ;;  %v1862_v39 = vsub.f32 1.0, %v1798_v55  ;;  %3963 = vmatmul.mubr.f32.gmra.mxu1 %v2181_v58  ;;  %4198 = vpow2.f32 %v1726_v38  ;;  %v5738_v55 = vpop.f32.mrf.mxu0 }
 0x23b   :  { %v1481_v25 = vmul.f32 %v5664_v6, %v1417_v9  ;;  %v970_v47 = vmul.f32 1.0614054, %v5702_v52  ;;  %v780_v21 = vmul.f32 0.3275911, %v5706_v31  ;;  %v1991_v12 = vsub.f32 0.0, %v1863_v48 }
 0x23c   :  { %v1352_v56 = vmul.f32 %v5673_v42, %v1288_v53  ;;  %v1227_v51 = vmul.f32 %v5678_v20, %v1163_v26  ;;  %v5713_v40 = vpop.eup %4190  ;;  %v1990_v17 = vsub.f32 0.0, %v1862_v39  ;;  %v583_v60 = vmul.f32 0.5, %v5567_v59 }
 0x23d   :  { %v1801_v3 = vmul.f32 %v4187_v11, %v1481_v25  ;;  %v1034_v28 = vadd.f32 -1.4531521, %v970_v47  ;;  %v844_v10 = vadd.f32 1.0, %v780_v21  ;;  %v2055_v6 = vsel %vm1927_vm10, %v1991_v12, %v1863_v48 }
 0x23e   :  { %v4193_v62 = vpop.eup %4192  ;;  %v1416_v2 = vadd.f32 0.2548296, %v1352_v56  ;;  %v1291_v4 = vadd.f32 -0.28449672, %v1227_v51  ;;  %v973_v54 = vmul.f32 1.0614054, %v5713_v40  ;;  %v2054_v44 = vsel %vm1926_vm11, %v1990_v17, %v1862_v39 }
 0x23f   :  { %v4195_v50 = vpop.eup %4194  ;;  %v2119_v8 = vadd.f32 1.0, %v2055_v6  ;;  %v1865_v15 = vsub.f32 1.0, %v1801_v3  ;;  %v1098_v61 = vmul.f32 %v5702_v52, %v1034_v28  ;;  %v2118_v14 = vadd.f32 1.0, %v2054_v44 }
 0x240   :  { %v1480_v11 = vmul.f32 %v5673_v42, %v1416_v2  ;;  %v1355_v16 = vmul.f32 %v5678_v20, %v1291_v4  ;;  %v1037_v37 = vadd.f32 -1.4531521, %v973_v54  ;;  %4200 = vrcp.f32 %v844_v10  ;;  %v5746_v10 = vpop.f32.mrf.mxu0 }
 0x241   :  { %v1993_v30 = vsub.f32 0.0, %v1865_v15  ;;  %v1162_v7 = vadd.f32 1.4214138, %v1098_v61  ;;  %v2182_v33 = vmul.f32 %v2118_v14, %v5633_v43  ;;  %v2183_v36 = vmul.f32 %v2119_v8, %v583_v60 }
 0x242   :  { %v1800_v24 = vmul.f32 %v4193_v62, %v1480_v11  ;;  %v1419_v27 = vadd.f32 0.2548296, %v1355_v16  ;;  %v1101_v49 = vmul.f32 %v5713_v40, %v1037_v37  ;;  %v1548_v42 = vsub.f32 0.0, %v5706_v31 }
 0x243   :  { %v1226_v38 = vmul.f32 %v5702_v52, %v1162_v7  ;;  %v5731_v18 = vmul.f32 0.70710677, %v5723_v46  ;;  %vm1929_vm12 = vcmp.lt.f32.partialorder %v5599_v1, 0.0  ;;  %3965 = vmatprep.mubr.f32.mxu1 %v2182_v33  ;;  %vm1928_vm13 = vcmp.lt.f32.partialorder %v5618_v63, 0.0 }
 0x244   :  { %v1864_v59 = vsub.f32 1.0, %v1800_v24  ;;  %v1483_v41 = vmul.f32 %v5678_v20, %v1419_v27  ;;  %v1165_v57 = vadd.f32 1.4214138, %v1101_v49  ;;  %v2057_v43 = vsel %vm1929_vm12, %v1993_v30, %v1865_v15  ;;  %3966 = vmatmul.mubr.f32.gmra.mxu1 %v2183_v36  ;;  %v5755_v15 = vpop.f32.mrf.mxu0 }
 0x245   :  { %v1290_v35 = vadd.f32 -0.28449672, %v1226_v38  ;;  %v5736_v58 = vand.u32 2147483647, %v5731_v18  ;;  %v1612_v20 = vmul.f32 %v1548_v42, %v5706_v31  ;;  %v2121_v25 = vadd.f32 1.0, %v2057_v43 }
 0x246   :  { %v1992_v9 = vsub.f32 0.0, %v1864_v59  ;;  %v1803_v48 = vmul.f32 %v4195_v50, %v1483_v41  ;;  %v1229_v53 = vmul.f32 %v5713_v40, %v1165_v57  ;;  %v4197_v26 = vpop.eup %4196  ;;  %v584_v51 = vmul.f32 0.5, %v5602_v23  ;;  %v5770_v49 = vpop.f32.mrf.mxu0 }
 0x247   :  { %v1354_v1 = vmul.f32 %v5702_v52, %v1290_v35  ;;  %v783_v39 = vmul.f32 0.3275911, %v5736_v58  ;;  %v4199_v56 = vpop.eup %4198  ;;  %v585_v63 = vmul.f32 0.5, %v5588_v45  ;;  %v5751_v31 = vmul.f32 0.70710677, %v5738_v55 }
 0x248   :  { %v2056_v47 = vsel %vm1928_vm13, %v1992_v9, %v1864_v59  ;;  %v1867_v21 = vsub.f32 1.0, %v1803_v48  ;;  %v1293_v12 = vadd.f32 -0.28449672, %v1229_v53  ;;  %v1724_v4 = vmul.f32 1.442695, %v1612_v20 }
 0x249   :  { %v2120_v17 = vadd.f32 1.0, %v2056_v47  ;;  %v1418_v3 = vadd.f32 0.2548296, %v1354_v1  ;;  %v847_v28 = vadd.f32 1.0, %v783_v39  ;;  %v2185_v54 = vmul.f32 %v2121_v25, %v585_v63  ;;  %v5778_v1 = vpop.f32.mrf.mxu0 }
 0x24a   :  { %v1357_v62 = vmul.f32 %v5713_v40, %v1293_v12  ;;  %v1995_v50 = vsub.f32 0.0, %v1867_v21  ;;  %v718_v8 = vand.u32 2147483647, %v5751_v31  ;;  %v5761_v11 = vmul.f32 0.70710677, %v5746_v10 }
 0x24b   :  { %v2184_v6 = vmul.f32 %v2120_v17, %v584_v51  ;;  %v1482_v2 = vmul.f32 %v5702_v52, %v1418_v3  ;;  %4202 = vrcp.f32 %v847_v28  ;;  %vm1931_vm14 = vcmp.lt.f32.partialorder %v5629_v22, 0.0 }
 0x24c   :  { %v1421_v23 = vadd.f32 0.2548296, %v1357_v62  ;;  %v782_v14 = vmul.f32 0.3275911, %v718_v8  ;;  %4204 = vpow2.f32 %v1724_v4  ;;  %v2059_v37 = vsel %vm1931_vm14, %v1995_v50, %v1867_v21 }
 0x24d   :  { %v1802_v44 = vmul.f32 %v4197_v26, %v1482_v2  ;;  %3968 = vmatprep.mubr.f32.mxu1 %v2184_v6  ;;  %v5757_v45 = vpop.eup %4200  ;;  %v721_v7 = vand.u32 2147483647, %v5761_v11  ;;  %v5768_v27 = vmul.f32 0.70710677, %v5755_v15  ;;  %vm1930_vm15 = vcmp.lt.f32.partialorder %v5644_v5, 0.0 }
 0x24e   :  { %v1485_v61 = vmul.f32 %v5713_v40, %v1421_v23  ;;  %3969 = vmatmul.mubr.f32.gmra.mxu1 %v2185_v54  ;;  %v972_v16 = vmul.f32 1.0614054, %v5757_v45  ;;  %v846_v30 = vadd.f32 1.0, %v782_v14  ;;  %v1551_v40 = vsub.f32 0.0, %v5736_v58 }
 0x24f   :  { %v1866_v52 = vsub.f32 1.0, %v1802_v44  ;;  %v1550_v22 = vsub.f32 0.0, %v718_v8  ;;  %v785_v36 = vmul.f32 0.3275911, %v721_v7  ;;  %v2123_v38 = vadd.f32 1.0, %v2059_v37 }
 0x250   :  { %v1805_v60 = vmul.f32 %v4199_v56, %v1485_v61  ;;  %v1036_v24 = vadd.f32 -1.4531521, %v972_v16  ;;  %4206 = vrcp.f32 %v846_v30  ;;  %v720_v41 = vand.u32 2147483647, %v5768_v27 }
 0x251   :  { %v1994_v33 = vsub.f32 0.0, %v1866_v52  ;;  %v586_v57 = vmul.f32 0.5, %v5636_v0  ;;  %v849_v9 = vadd.f32 1.0, %v785_v36  ;;  %v587_v48 = vmul.f32 0.5, %v5620_v34 }
 0x252   :  { %v1100_v59 = vmul.f32 %v5757_v45, %v1036_v24  ;;  %v1869_v35 = vsub.f32 1.0, %v1805_v60  ;;  %v1615_v26 = vmul.f32 %v1551_v40, %v5736_v58  ;;  %v784_v5 = vmul.f32 0.3275911, %v720_v41 }
 0x253   :  { %v2058_v42 = vsel %vm1930_vm15, %v1994_v33, %v1866_v52  ;;  %v1614_v39 = vmul.f32 %v1550_v22, %v718_v8  ;;  %4208 = vrcp.f32 %v849_v9  ;;  %v2187_v25 = vmul.f32 %v2123_v38, %v587_v48 }
 0x254   :  { %v2122_v43 = vadd.f32 1.0, %v2058_v42  ;;  %v1164_v53 = vadd.f32 1.4214138, %v1100_v59  ;;  %v589_v47 = vmul.f32 0.5, %v5646_v32  ;;  %v848_v0 = vadd.f32 1.0, %v784_v5  ;;  %v5792_v32 = vpop.f32.mrf.mxu0 }
 0x255   :  { %vm1933_vm0 = vcmp.lt.f32.partialorder %v5659_v29, 0.0  ;;  %v1997_v34 = vsub.f32 0.0, %v1869_v35  ;;  %v5786_v56 = vmul.f32 0.5, %v5687_v19  ;;  %v5789_v58 = vmul.f32 0.70710677, %v5770_v49 }
 0x256   :  { %v2186_v20 = vmul.f32 %v2122_v43, %v586_v57  ;;  %v1228_v21 = vmul.f32 %v5757_v45, %v1164_v53  ;;  %v1730_v3 = vmul.f32 1.442695, %v1615_v26  ;;  %v1728_v28 = vmul.f32 1.442695, %v1614_v39  ;;  %v5826_v39 = vpop.f32.mrf.mxu0 }
 0x257   :  { %v1553_v63 = vsub.f32 0.0, %v721_v7  ;;  %4210 = vrcp.f32 %v848_v0  ;;  %v723_v62 = vand.u32 2147483647, %v5789_v58  ;;  %v5797_v19 = vmul.f32 0.5, %v5723_v46 }
 0x258   :  { %v5782_v12 = vpop.eup %4202  ;;  %3971 = vmatprep.mubr.f32.mxu1 %v2186_v20  ;;  %v1292_v51 = vadd.f32 -0.28449672, %v1228_v21  ;;  %v5800_v4 = vmul.f32 0.70710677, %v5778_v1  ;;  %v2061_v50 = vsel %vm1933_vm0, %v1997_v34, %v1869_v35  ;;  %v1552_v23 = vsub.f32 0.0, %v720_v41 }
 0x259   :  { %v975_v17 = vmul.f32 1.0614054, %v5782_v12  ;;  %3972 = vmatmul.mubr.f32.gmra.mxu1 %v2187_v25  ;;  %v4205_v54 = vpop.eup %4204  ;;  %v787_v8 = vmul.f32 0.3275911, %v723_v62  ;;  %v5805_v44 = vmul.f32 0.70710677, %v5792_v32  ;;  %4212 = vpow2.f32 %v1730_v3 }
 0x25a   :  { %v1356_v6 = vmul.f32 %v5757_v45, %v1292_v51  ;;  %v722_v46 = vand.u32 2147483647, %v5800_v4  ;;  %vm1932_vm1 = vcmp.lt.f32.partialorder %v5697_v13, 0.0  ;;  %4214 = vpow2.f32 %v1728_v28 }
 0x25b   :  { %v1039_v2 = vadd.f32 -1.4531521, %v975_v17  ;;  %v1617_v52 = vmul.f32 %v1553_v63, %v721_v7  ;;  %v851_v16 = vadd.f32 1.0, %v787_v8  ;;  %v5811_v37 = vand.u32 2147483647, %v5805_v44 }
 0x25c   :  { %v1420_v61 = vadd.f32 0.2548296, %v1356_v6  ;;  %v2125_v60 = vadd.f32 1.0, %v2061_v50  ;;  %v786_v24 = vmul.f32 0.3275911, %v722_v46  ;;  %v1616_v22 = vmul.f32 %v1552_v23, %v720_v41  ;;  %v5840_v23 = vpop.f32.mrf.mxu0 }
 0x25d   :  { %v1103_v14 = vmul.f32 %v5782_v12, %v1039_v2  ;;  %v5813_v29 = vpop.eup %4206  ;;  %4216 = vrcp.f32 %v851_v16  ;;  %v789_v36 = vmul.f32 0.3275911, %v5811_v37  ;;  %v1555_v42 = vsub.f32 0.0, %v723_v62 }
 0x25e   :  { %v1484_v30 = vmul.f32 %v5757_v45, %v1420_v61  ;;  %v974_v40 = vmul.f32 1.0614054, %v5813_v29  ;;  %v850_v59 = vadd.f32 1.0, %v786_v24  ;;  %v1734_v43 = vmul.f32 1.442695, %v1617_v52 }
 0x25f   :  { %v1167_v33 = vadd.f32 1.4214138, %v1103_v14  ;;  %v1554_v35 = vsub.f32 0.0, %v722_v46  ;;  %v853_v9 = vadd.f32 1.0, %v789_v36  ;;  %v5822_v26 = vmul.f32 0.5, %v5738_v55 }
 0x260   :  { %v1804_v38 = vmul.f32 %v4205_v54, %v1484_v30  ;;  %v1038_v57 = vadd.f32 -1.4531521, %v974_v40  ;;  %v5819_v48 = vpop.eup %4208  ;;  %4218 = vrcp.f32 %v850_v59  ;;  %v2189_v41 = vmul.f32 %v2125_v60, %v589_v47 }
 0x261   :  { %v1231_v7 = vmul.f32 %v5782_v12, %v1167_v33  ;;  %v977_v20 = vmul.f32 1.0614054, %v5819_v48  ;;  %4220 = vrcp.f32 %v853_v9  ;;  %v1732_v0 = vmul.f32 1.442695, %v1616_v22 }
 0x262   :  { %v1868_v45 = vsub.f32 1.0, %v1804_v38  ;;  %v1102_v5 = vmul.f32 %v5813_v29, %v1038_v57  ;;  %v1619_v34 = vmul.f32 %v1555_v42, %v723_v62  ;;  %4222 = vpow2.f32 %v1734_v43 }
 0x263   :  { %v1295_v53 = vadd.f32 -0.28449672, %v1231_v7  ;;  %v1041_v17 = vadd.f32 -1.4531521, %v977_v20  ;;  %v1618_v3 = vmul.f32 %v1554_v35, %v722_v46  ;;  %v1557_v63 = vsub.f32 0.0, %v5811_v37 }
 0x264   :  { %v1996_v25 = vsub.f32 0.0, %v1868_v45  ;;  %v1166_v51 = vadd.f32 1.4214138, %v1102_v5  ;;  %v5829_v55 = vpop.eup %4210  ;;  %v5835_v6 = vmul.f32 0.70710677, %v5826_v39  ;;  %4224 = vpow2.f32 %v1732_v0 }
 0x265   :  { %v1359_v21 = vmul.f32 %v5782_v12, %v1295_v53  ;;  %v1105_v62 = vmul.f32 %v5819_v48, %v1041_v17  ;;  %v976_v50 = vmul.f32 1.0614054, %v5829_v55  ;;  %v1738_v13 = vmul.f32 1.442695, %v1619_v34 }
 0x266   :  { %v2060_v47 = vsel %vm1932_vm1, %v1996_v25, %v1868_v45  ;;  %v1230_v54 = vmul.f32 %v5813_v29, %v1166_v51  ;;  %v724_v61 = vand.u32 2147483647, %v5835_v6  ;;  %v4213_v14 = vpop.eup %4212  ;;  %vm1935_vm2 = vcmp.lt.f32.partialorder %v5731_v18, 0.0 }
 0x267   :  { %v1423_v28 = vadd.f32 0.2548296, %v1359_v21  ;;  %v2124_v2 = vadd.f32 1.0, %v2060_v47  ;;  %v1169_v16 = vadd.f32 1.4214138, %v1105_v62  ;;  %v4215_v30 = vpop.eup %4214  ;;  %4226 = vpow2.f32 %v1738_v13 }
 0x268   :  { %v1294_v52 = vadd.f32 -0.28449672, %v1230_v54  ;;  %v1040_v60 = vadd.f32 -1.4531521, %v976_v50  ;;  %v1736_v24 = vmul.f32 1.442695, %v1618_v3 }
 0x269   :  { %v1487_v8 = vmul.f32 %v5782_v12, %v1423_v28  ;;  %v2188_v46 = vmul.f32 %v2124_v2, %v5786_v56  ;;  %v788_v40 = vmul.f32 0.3275911, %v724_v61  ;;  %v5847_v22 = vmul.f32 0.70710677, %v5840_v23 }
 0x26a   :  { %v1358_v12 = vmul.f32 %v5813_v29, %v1294_v52  ;;  %v1233_v36 = vmul.f32 %v5819_v48, %v1169_v16  ;;  %v1104_v38 = vmul.f32 %v5829_v55, %v1040_v60  ;;  %v1621_v56 = vmul.f32 %v1557_v63, %v5811_v37  ;;  %v5853_v7 = vpop.eup %4216 }
 0x26b   :  { %v1807_v33 = vmul.f32 %v4213_v14, %v1487_v8  ;;  %3974 = vmatprep.mubr.f32.mxu1 %v2188_v46  ;;  %v852_v59 = vadd.f32 1.0, %v788_v40  ;;  %v1556_v57 = vsub.f32 0.0, %v724_v61  ;;  %v5856_v43 = vand.u32 2147483647, %v5847_v22 }
 0x26c   :  { %3975 = vmatmul.mubr.f32.gmra.mxu1 %v2189_v41  ;;  %v1422_v35 = vadd.f32 0.2548296, %v1358_v12  ;;  %v1297_v9 = vadd.f32 -0.28449672, %v1233_v36  ;;  %v1168_v45 = vadd.f32 1.4214138, %v1104_v38  ;;  %v5882_v36 = vpop.f32.mrf.mxu0 }
 0x26d   :  { %v1871_v42 = vsub.f32 1.0, %v1807_v33  ;;  %vm1934_vm3 = vcmp.lt.f32.partialorder %v5751_v31, 0.0  ;;  %v5860_v5 = vmul.f32 0.5, %v5755_v15  ;;  %v979_v37 = vmul.f32 1.0614054, %v5853_v7  ;;  %v5863_v20 = vpop.eup %4218 }
 0x26e   :  { %4228 = vrcp.f32 %v852_v59  ;;  %v1486_v25 = vmul.f32 %v5813_v29, %v1422_v35  ;;  %v1361_v21 = vmul.f32 %v5819_v48, %v1297_v9  ;;  %v1232_v41 = vmul.f32 %v5829_v55, %v1168_v45  ;;  %v5869_v34 = vpop.eup %4220 }
 0x26f   :  { %v1999_v53 = vsub.f32 0.0, %v1871_v42  ;;  %v791_v0 = vmul.f32 0.3275911, %v5856_v43  ;;  %v1043_v51 = vadd.f32 -1.4531521, %v979_v37  ;;  %4230 = vpow2.f32 %v1736_v24  ;;  %v4223_v2 = vpop.eup %4222 }
 0x270   :  { %v978_v17 = vmul.f32 1.0614054, %v5863_v20  ;;  %v1742_v15 = vmul.f32 1.442695, %v1621_v56  ;;  %v1806_v3 = vmul.f32 %v4215_v30, %v1486_v25  ;;  %v1425_v47 = vadd.f32 0.2548296, %v1361_v21 }
 0x271   :  { %v1296_v28 = vadd.f32 -0.28449672, %v1232_v41  ;;  %v1620_v63 = vmul.f32 %v1556_v57, %v724_v61  ;;  %v1107_v29 = vmul.f32 %v5853_v7, %v1043_v51  ;;  %v981_v62 = vmul.f32 1.0614054, %v5869_v34  ;;  %v4225_v60 = vpop.eup %4224 }
 0x272   :  { %v1042_v54 = vadd.f32 -1.4531521, %v978_v17  ;;  %v855_v50 = vadd.f32 1.0, %v791_v0  ;;  %v2063_v8 = vsel %vm1935_vm2, %v1999_v53, %v1871_v42  ;;  %v1870_v13 = vsub.f32 1.0, %v1806_v3 }
 0x273   :  { %v1489_v14 = vmul.f32 %v5819_v48, %v1425_v47  ;;  %vm1937_vm4 = vcmp.lt.f32.partialorder %v5761_v11, 0.0  ;;  %v1360_v46 = vmul.f32 %v5829_v55, %v1296_v28  ;;  %v1171_v52 = vadd.f32 1.4214138, %v1107_v29 }
 0x274   :  { %v1106_v61 = vmul.f32 %v5863_v20, %v1042_v54  ;;  %v1045_v16 = vadd.f32 -1.4531521, %v981_v62  ;;  %4232 = vrcp.f32 %v855_v50  ;;  %v1998_v30 = vsub.f32 0.0, %v1870_v13  ;;  %v4227_v41 = vpop.eup %4226 }
 0x275   :  { %v1809_v33 = vmul.f32 %v4223_v2, %v1489_v14  ;;  %v1424_v24 = vadd.f32 0.2548296, %v1360_v46  ;;  %4234 = vpow2.f32 %v1742_v15  ;;  %v1235_v18 = vmul.f32 %v5853_v7, %v1171_v52 }
 0x276   :  { %v1170_v40 = vadd.f32 1.4214138, %v1106_v61  ;;  %v1109_v12 = vmul.f32 %v5869_v34, %v1045_v16  ;;  %v1740_v48 = vmul.f32 1.442695, %v1620_v63  ;;  %v2127_v38 = vadd.f32 1.0, %v2063_v8  ;;  %v5912_v16 = vpop.f32.mrf.mxu0 }
 0x277   :  { %v2062_v56 = vsel %vm1934_vm3, %v1998_v30, %v1870_v13  ;;  %v1873_v42 = vsub.f32 1.0, %v1809_v33  ;;  %v1488_v59 = vmul.f32 %v5829_v55, %v1424_v24  ;;  %v1299_v35 = vadd.f32 -0.28449672, %v1235_v18 }
 0x278   :  { %v2126_v57 = vadd.f32 1.0, %v2062_v56  ;;  %v1234_v9 = vmul.f32 %v5863_v20, %v1170_v40  ;;  %v1173_v45 = vadd.f32 1.4214138, %v1109_v12  ;;  %v1559_v25 = vsub.f32 0.0, %v5856_v43 }
 0x279   :  { %v2001_v53 = vsub.f32 0.0, %v1873_v42  ;;  %v1808_v37 = vmul.f32 %v4225_v60, %v1488_v59  ;;  %v5890_v21 = vmul.f32 0.70710677, %v5882_v36  ;;  %v1363_v31 = vmul.f32 %v5853_v7, %v1299_v35  ;;  %v5926_v59 = vpop.f32.mrf.mxu0 }
 0x27a   :  { %v2190_v0 = vmul.f32 %v2126_v57, %v5822_v26  ;;  %v1298_v51 = vadd.f32 -0.28449672, %v1234_v9  ;;  %v1237_v55 = vmul.f32 %v5869_v34, %v1173_v45  ;;  %v2191_v15 = vmul.f32 %v2127_v38, %v5797_v19 }
 0x27b   :  { %v5895_v17 = vpop.eup %4228  ;;  %v1872_v3 = vsub.f32 1.0, %v1808_v37  ;;  %vm1936_vm5 = vcmp.lt.f32.partialorder %v5768_v27, 0.0  ;;  %v5900_v47 = vand.u32 2147483647, %v5890_v21  ;;  %v2065_v28 = vsel %vm1937_vm4, %v2001_v53, %v1873_v42 }
 0x27c   :  { %v1427_v63 = vadd.f32 0.2548296, %v1363_v31  ;;  %v1362_v26 = vmul.f32 %v5863_v20, %v1298_v51  ;;  %v1301_v2 = vadd.f32 -0.28449672, %v1237_v55  ;;  %3977 = vmatprep.mubr.f32.mxu1 %v2190_v0  ;;  %v4231_v29 = vpop.eup %4230  ;;  %v980_v62 = vmul.f32 1.0614054, %v5895_v17 }
 0x27d   :  { %v2000_v54 = vsub.f32 0.0, %v1872_v3  ;;  %4236 = vpow2.f32 %v1740_v48  ;;  %v790_v19 = vmul.f32 0.3275911, %v5900_v47  ;;  %3978 = vmatmul.mubr.f32.gmra.mxu1 %v2191_v15  ;;  %v1623_v11 = vmul.f32 %v1559_v25, %v5856_v43 }
 0x27e   :  { %v1491_v50 = vmul.f32 %v5853_v7, %v1427_v63  ;;  %v1426_v8 = vadd.f32 0.2548296, %v1362_v26  ;;  %v1365_v13 = vmul.f32 %v5869_v34, %v1301_v2  ;;  %v2129_v14 = vadd.f32 1.0, %v2065_v28 }
 0x27f   :  { %v2064_v46 = vsel %vm1936_vm5, %v2000_v54, %v1872_v3  ;;  %v1044_v52 = vadd.f32 -1.4531521, %v980_v62  ;;  %v854_v61 = vadd.f32 1.0, %v790_v19  ;;  %v593_v7 = vmul.f32 0.5, %v5746_v10  ;;  %v5919_v43 = vpop.f32.mrf.mxu1 }
 0x280   :  { %v2128_v60 = vadd.f32 1.0, %v2064_v46  ;;  %v1811_v30 = vmul.f32 %v4227_v41, %v1491_v50  ;;  %v1490_v33 = vmul.f32 %v5863_v20, %v1426_v8  ;;  %v1429_v24 = vadd.f32 0.2548296, %v1365_v13  ;;  %2591 = vadd.xlane.f32.xlu0 %v5919_v43  ;;  %v5957_v50 = vpop.f32.mrf.mxu0 }
 0x281   :  { %v5915_v18 = vpop.eup %4232  ;;  %v1108_v40 = vmul.f32 %v5895_v17, %v1044_v52  ;;  %4238 = vrcp.f32 %v854_v61  ;;  %v2193_v20 = vmul.f32 %v2129_v14, %v593_v7  ;;  %vm1939_vm6 = vcmp.lt.f32.partialorder %v5789_v58, 0.0  ;;  %v5928_v57 = vpop.f32.mrf.mxu1 }
 0x282   :  { %v4235_v27 = vpop.eup %4234  ;;  %v2192_v12 = vmul.f32 %v2128_v60, %v5860_v5  ;;  %v1875_v48 = vsub.f32 1.0, %v1811_v30  ;;  %v1810_v38 = vmul.f32 %v4231_v29, %v1490_v33  ;;  %v1493_v56 = vmul.f32 %v5869_v34, %v1429_v24  ;;  %v5973_v24 = vpop.f32.mrf.mxu0 }
 0x283   :  { %v1172_v42 = vadd.f32 1.4214138, %v1108_v40  ;;  %v983_v10 = vmul.f32 1.0614054, %v5915_v18  ;;  %v1746_v45 = vmul.f32 1.442695, %v1623_v11  ;;  %v5937_v41 = vpop.f32.mrf.mxu1 }
 0x284   :  { %v2003_v35 = vsub.f32 0.0, %v1875_v48  ;;  %v1874_v9 = vsub.f32 1.0, %v1810_v38  ;;  %v5931_v5 = vmul.f32 0.70710677, %v5912_v16  ;;  %3980 = vmatprep.mubr.f32.mxu1 %v2192_v12  ;;  %v5933_v34 = vmul.f32 %v4235_v27, %v1493_v56  ;;  %2589 = vadd.xlane.f32.xlu0 %v5928_v57 }
 0x285   :  { %v1236_v53 = vmul.f32 %v5895_v17, %v1172_v42  ;;  %v1047_v37 = vadd.f32 -1.4531521, %v983_v10  ;;  %v1558_v25 = vsub.f32 0.0, %v5900_v47  ;;  %3981 = vmatmul.mubr.f32.gmra.mxu1 %v2193_v20  ;;  %v5945_v55 = vmul.f32 0.70710677, %v5926_v59  ;;  %2595 = vadd.xlane.f32.xlu1 %v5937_v41  ;;  %v5952_v58 = vpop.f32.mrf.mxu1 }
 0x286   :  { %v2067_v0 = vsel %vm1939_vm6, %v2003_v35, %v1875_v48  ;;  %v2002_v31 = vsub.f32 0.0, %v1874_v9  ;;  %v5942_v51 = vand.u32 2147483647, %v5931_v5  ;;  %v595_v15 = vmul.f32 0.5, %v5770_v49 }
 0x287   :  { %vm1938_vm7 = vcmp.lt.f32.partialorder %v5800_v4, 0.0  ;;  %v1300_v3 = vadd.f32 -0.28449672, %v1236_v53  ;;  %v1111_v28 = vmul.f32 %v5915_v18, %v1047_v37  ;;  %v2131_v63 = vadd.f32 1.0, %v2067_v0  ;;  %v5959_v49 = vpop.f32.mrf.mxu1 }
 0x288   :  { %v594_v26 = vmul.f32 0.5, %v5778_v1  ;;  %v2066_v2 = vsel %vm1938_vm7, %v2002_v31, %v1874_v9  ;;  %v793_v29 = vmul.f32 0.3275911, %v5942_v51  ;;  %4240 = vpow2.f32 %v1746_v45 }
 0x289   :  { %v2130_v54 = vadd.f32 1.0, %v2066_v2  ;;  %v1364_v62 = vmul.f32 %v5895_v17, %v1300_v3  ;;  %v1175_v19 = vadd.f32 1.4214138, %v1111_v28  ;;  %v1877_v8 = vsub.f32 1.0, %v5933_v34  ;;  %2593 = vadd.xlane.f32.xlu1 %v5952_v58  ;;  %v5968_v61 = vpop.f32.mrf.mxu1 }
 0x28a   :  { %v4237_v4 = vpop.eup %4236  ;;  %v1622_v13 = vmul.f32 %v1558_v25, %v5900_v47  ;;  %v857_v11 = vadd.f32 1.0, %v793_v29  ;;  %v5964_v1 = vand.u32 2147483647, %v5945_v55  ;;  %v2195_v60 = vmul.f32 %v2131_v63, %v595_v15  ;;  %2597 = vadd.xlane.f32.xlu0 %v5968_v61 }
 0x28b   :  { %v2194_v14 = vmul.f32 %v2130_v54, %v594_v26  ;;  %v1428_v46 = vadd.f32 0.2548296, %v1364_v62  ;;  %v1239_v52 = vmul.f32 %v5915_v18, %v1175_v19  ;;  %v5975_v7 = vpop.f32.mrf.mxu1  ;;  %v2005_v27 = vsub.f32 0.0, %v1877_v8 }
 0x28c   :  { %4242 = vrcp.f32 %v857_v11  ;;  %v792_v30 = vmul.f32 0.3275911, %v5964_v1  ;;  %v1744_v12 = vmul.f32 1.442695, %v1622_v13  ;;  %vm1941_vm8 = vcmp.lt.f32.partialorder %v5805_v44, 0.0 }
 0x28d   :  { %v1492_v47 = vmul.f32 %v5895_v17, %v1428_v46  ;;  %v1303_v33 = vadd.f32 -0.28449672, %v1239_v52  ;;  %3983 = vmatprep.mubr.f32.mxu1 %v2194_v14  ;;  %2599 = vadd.xlane.f32.xlu1 %v5959_v49  ;;  %v5983_v17 = vmul.f32 0.70710677, %v5957_v50  ;;  %v5985_v42 = vpop.f32.mrf.mxu1  ;;  %v5989_v10 = vmul.f32 0.70710677, %v5973_v24 }
 0x28e   :  { %v5977_v40 = vpop.eup %4238  ;;  %v856_v48 = vadd.f32 1.0, %v792_v30  ;;  %3984 = vmatmul.mubr.f32.gmra.mxu1 %v2195_v60  ;;  %2601 = vadd.xlane.f32.xlu0 %v5985_v42  ;;  %v1561_v34 = vsub.f32 0.0, %v5942_v51  ;;  %v2069_v37 = vsel %vm1941_vm8, %v2005_v27, %v1877_v8  ;;  %v596_v44 = vmul.f32 0.5, %v5826_v39 }
 0x28f   :  { %v1812_v38 = vmul.f32 %v4237_v4, %v1492_v47  ;;  %v1367_v56 = vmul.f32 %v5915_v18, %v1303_v33  ;;  %v982_v20 = vmul.f32 1.0614054, %v5977_v40  ;;  %v5993_v53 = vpop.f32.mrf.mxu1  ;;  %v5996_v25 = vand.u32 2147483647, %v5983_v17 }
 0x290   :  { %4244 = vrcp.f32 %v856_v48  ;;  %v5999_v0 = vand.u32 2147483647, %v5989_v10  ;;  %vm1940_vm9 = vcmp.lt.f32.partialorder %v5835_v6, 0.0  ;;  %v2133_v2 = vadd.f32 1.0, %v2069_v37 }
 0x291   :  { %v1876_v35 = vsub.f32 1.0, %v1812_v38  ;;  %v1431_v9 = vadd.f32 0.2548296, %v1367_v56  ;;  %v1046_v45 = vadd.f32 -1.4531521, %v982_v20  ;;  %2603 = vadd.xlane.f32.xlu1 %v5975_v7  ;;  %4246 = vpow2.f32 %v1744_v12  ;;  %v6004_v3 = vpop.f32.mrf.mxu1 }
 0x292   :  { %v795_v63 = vmul.f32 0.3275911, %v5996_v25  ;;  %v794_v26 = vmul.f32 0.3275911, %v5999_v0  ;;  %2605 = vadd.xlane.f32.xlu0 %v6004_v3  ;;  %v1625_v39 = vmul.f32 %v1561_v34, %v5942_v51  ;;  %v1560_v8 = vsub.f32 0.0, %v5964_v1 }
 0x293   :  { %v2004_v31 = vsub.f32 0.0, %v1876_v35  ;;  %v1110_v15 = vmul.f32 %v5977_v40, %v1046_v45  ;;  %v1495_v28 = vmul.f32 %v5915_v18, %v1431_v9  ;;  %v6012_v62 = vpop.f32.mrf.mxu1  ;;  %v597_v18 = vmul.f32 0.5, %v5792_v32 }
 0x294   :  { %v859_v6 = vadd.f32 1.0, %v795_v63  ;;  %v858_v13 = vadd.f32 1.0, %v794_v26  ;;  %v1750_v47 = vmul.f32 1.442695, %v1625_v39  ;;  %v1624_v32 = vmul.f32 %v1560_v8, %v5964_v1 }
 0x295   :  { %v2068_v29 = vsel %vm1940_vm9, %v2004_v31, %v1876_v35  ;;  %v1174_v54 = vadd.f32 1.4214138, %v1110_v15  ;;  %v4241_v19 = vpop.eup %4240  ;;  %2607 = vadd.xlane.f32.xlu1 %v5993_v53  ;;  %v6018_v14 = vpop.f32.mrf.mxu1  ;;  %v2197_v60 = vmul.f32 %v2133_v2, %v597_v18  ;;  %v1563_v37 = vsub.f32 0.0, %v5996_v25 }
 0x296   :  { %v2132_v4 = vadd.f32 1.0, %v2068_v29  ;;  %v1815_v52 = vmul.f32 %v4241_v19, %v1495_v28  ;;  %4248 = vrcp.f32 %v859_v6  ;;  %2609 = vadd.xlane.f32.xlu0 %v6018_v14  ;;  %v1748_v34 = vmul.f32 1.442695, %v1624_v32 }
 0x297   :  { %v1238_v11 = vmul.f32 %v5977_v40, %v1174_v54  ;;  %4250 = vrcp.f32 %v858_v13  ;;  %v6023_v33 = vpop.f32.mrf.mxu1  ;;  %v1562_v31 = vsub.f32 0.0, %v5999_v0  ;;  %vm1943_vm10 = vcmp.lt.f32.partialorder %v5847_v22, 0.0 }
 0x298   :  { %v2196_v46 = vmul.f32 %v2132_v4, %v596_v44  ;;  %v1879_v38 = vsub.f32 1.0, %v1815_v52  ;;  %4252 = vpow2.f32 %v1750_v47  ;;  %vm1942_vm11 = vcmp.lt.f32.partialorder %v5890_v21, 0.0 }
 0x299   :  { %v6021_v51 = vpop.eup %4242  ;;  %v1302_v30 = vadd.f32 -0.28449672, %v1238_v11  ;;  %2611 = vadd.xlane.f32.xlu1 %v6012_v62  ;;  %v6029_v48 = vpop.f32.mrf.mxu1  ;;  %4254 = vpow2.f32 %v1748_v34  ;;  %v1626_v8 = vmul.f32 %v1562_v31, %v5999_v0  ;;  %v599_v34 = vmul.f32 0.5, %v5840_v23 }
 0x29a   :  { %v985_v27 = vmul.f32 1.0614054, %v6021_v51  ;;  %3986 = vmatprep.mubr.f32.mxu1 %v2196_v46  ;;  %2613 = vadd.xlane.f32.xlu0 %v6029_v48  ;;  %v2007_v63 = vsub.f32 0.0, %v1879_v38  ;;  %vm1945_vm12 = vcmp.lt.f32.partialorder %v5931_v5, 0.0  ;;  %vm1944_vm13 = vcmp.lt.f32.partialorder %v5945_v55, 0.0 }
 0x29b   :  { %v1366_v12 = vmul.f32 %v5977_v40, %v1302_v30  ;;  %3987 = vmatmul.mubr.f32.gmra.mxu1 %v2197_v60  ;;  %v6034_v9 = vpop.f32.mrf.mxu1  ;;  %v601_v55 = vmul.f32 0.5, %v5912_v16  ;;  %vm1947_vm14 = vcmp.lt.f32.partialorder %v5983_v17, 0.0  ;;  %vm1946_vm15 = vcmp.lt.f32.partialorder %v5989_v10, 0.0 }
 0x29c   :  { %v1049_v56 = vadd.f32 -1.4531521, %v985_v27  ;;  %v2071_v13 = vsel %vm1943_vm10, %v2007_v63, %v1879_v38  ;;  %v1752_v38 = vmul.f32 1.442695, %v1626_v8 }
 0x29d   :  { %v6032_v20 = vpop.eup %4244  ;;  %v1430_v35 = vadd.f32 0.2548296, %v1366_v12  ;;  %2615 = vadd.xlane.f32.xlu1 %v6023_v33  ;;  %v6042_v15 = vpop.f32.mrf.mxu1  ;;  %v2135_v27 = vadd.f32 1.0, %v2071_v13 }
 0x29e   :  { %v1113_v1 = vmul.f32 %v6021_v51, %v1049_v56  ;;  %v984_v45 = vmul.f32 1.0614054, %v6032_v20  ;;  %v4247_v28 = vpop.eup %4246  ;;  %2617 = vadd.xlane.f32.xlu0 %v6042_v15  ;;  %v598_v56 = vmul.f32 0.5, %v5882_v36 }
 0x29f   :  { %v1494_v44 = vmul.f32 %v5977_v40, %v1430_v35  ;;  %v6045_v54 = vpop.f32.mrf.mxu1  ;;  %v1627_v40 = vmul.f32 %v1563_v37, %v5996_v25  ;;  %v2199_v36 = vmul.f32 %v2135_v27, %v599_v34 }
 0x2a0   :  { %v1177_v26 = vadd.f32 1.4214138, %v1113_v1  ;;  %v1048_v2 = vadd.f32 -1.4531521, %v984_v45 }
 0x2a1   :  { %v1814_v29 = vmul.f32 %v4247_v28, %v1494_v44  ;;  %2619 = vadd.xlane.f32.xlu1 %v6034_v9  ;;  %v6053_v6 = vpop.f32.mrf.mxu1  ;;  %v1754_v47 = vmul.f32 1.442695, %v1627_v40 }
 0x2a2   :  { %v1241_v39 = vmul.f32 %v6021_v51, %v1177_v26  ;;  %v1112_v19 = vmul.f32 %v6032_v20, %v1048_v2  ;;  %2621 = vadd.xlane.f32.xlu0 %v6053_v6 }
 0x2a3   :  { %v1878_v4 = vsub.f32 1.0, %v1814_v29  ;;  %v6056_v46 = vpop.eup %4248  ;;  %v6059_v25 = vpop.f32.mrf.mxu1  ;;  %4256 = vpow2.f32 %v1754_v47 }
 0x2a4   :  { %v1305_v18 = vadd.f32 -0.28449672, %v1241_v39  ;;  %v1176_v11 = vadd.f32 1.4214138, %v1112_v19  ;;  %v6061_v60 = vpop.eup %4250  ;;  %v987_v30 = vmul.f32 1.0614054, %v6056_v46  ;;  %4258 = vpow2.f32 %v1752_v38 }
 0x2a5   :  { %v2006_v52 = vsub.f32 0.0, %v1878_v4  ;;  %2623 = vadd.xlane.f32.xlu1 %v6045_v54  ;;  %v986_v12 = vmul.f32 1.0614054, %v6061_v60  ;;  %v6068_v21 = vpop.f32.mrf.mxu1  ;;  %v4253_v28 = vpop.eup %4252 }
 0x2a6   :  { %v1369_v22 = vmul.f32 %v6021_v51, %v1305_v18  ;;  %v1240_v0 = vmul.f32 %v6032_v20, %v1176_v11  ;;  %2625 = vadd.xlane.f32.xlu0 %v6068_v21  ;;  %v1051_v37 = vadd.f32 -1.4531521, %v987_v30  ;;  %v4255_v11 = vpop.eup %4254 }
 0x2a7   :  { %v2070_v32 = vsel %vm1942_vm11, %v2006_v52, %v1878_v4  ;;  %v1050_v44 = vadd.f32 -1.4531521, %v986_v12  ;;  %v6073_v31 = vpop.f32.mrf.mxu1 }
 0x2a8   :  { %v2134_v35 = vadd.f32 1.0, %v2070_v32  ;;  %v1433_v1 = vadd.f32 0.2548296, %v1369_v22  ;;  %v1304_v45 = vadd.f32 -0.28449672, %v1240_v0  ;;  %v1115_v29 = vmul.f32 %v6056_v46, %v1051_v37 }
 0x2a9   :  { %2627 = vadd.xlane.f32.xlu1 %v6059_v25  ;;  %v1114_v39 = vmul.f32 %v6061_v60, %v1050_v44  ;;  %v6080_v23 = vpop.f32.mrf.mxu1 }
 0x2aa   :  { %v2198_v63 = vmul.f32 %v2134_v35, %v598_v56  ;;  %v1497_v26 = vmul.f32 %v6021_v51, %v1433_v1  ;;  %v1368_v2 = vmul.f32 %v6032_v20, %v1304_v45  ;;  %2629 = vadd.xlane.f32.xlu0 %v6080_v23  ;;  %v1179_v4 = vadd.f32 1.4214138, %v1115_v29 }
 0x2ab   :  { %v1178_v51 = vadd.f32 1.4214138, %v1114_v39  ;;  %v6083_v8 = vpop.f32.mrf.mxu1 }
 0x2ac   :  { %v1817_v19 = vmul.f32 %v4253_v28, %v1497_v26  ;;  %v1432_v40 = vadd.f32 0.2548296, %v1368_v2  ;;  %3989 = vmatprep.mubr.f32.mxu1 %v2198_v63  ;;  %v1243_v52 = vmul.f32 %v6056_v46, %v1179_v4  ;;  %v600_v26 = vmul.f32 0.5, %v5926_v59 }
 0x2ad   :  { %3990 = vmatmul.mubr.f32.gmra.mxu1 %v2199_v36  ;;  %2631 = vadd.xlane.f32.xlu1 %v6073_v31  ;;  %v1242_v22 = vmul.f32 %v6061_v60, %v1178_v51  ;;  %v6089_v0 = vpop.f32.mrf.mxu1 }
 0x2ae   :  { %v1881_v13 = vsub.f32 1.0, %v1817_v19  ;;  %v1496_v18 = vmul.f32 %v6032_v20, %v1432_v40  ;;  %2633 = vadd.xlane.f32.xlu0 %v6089_v0  ;;  %v1307_v27 = vadd.f32 -0.28449672, %v1243_v52 }
 0x2af   :  { %v1306_v32 = vadd.f32 -0.28449672, %v1242_v22  ;;  %v6092_v12 = vpop.f32.mrf.mxu1 }
 0x2b0   :  { %v2009_v30 = vsub.f32 0.0, %v1881_v13  ;;  %v1816_v47 = vmul.f32 %v4255_v11, %v1496_v18  ;;  %v1371_v56 = vmul.f32 %v6056_v46, %v1307_v27  ;;  %v4257_v63 = vpop.eup %4256 }
 0x2b1   :  { %2635 = vadd.xlane.f32.xlu1 %v6083_v8  ;;  %v1370_v35 = vmul.f32 %v6061_v60, %v1306_v32  ;;  %v6098_v1 = vpop.f32.mrf.mxu1  ;;  %v4259_v19 = vpop.eup %4258  ;;  %v602_v32 = vmul.f32 0.5, %v5973_v24 }
 0x2b2   :  { %v1880_v20 = vsub.f32 1.0, %v1816_v47  ;;  %v2073_v38 = vsel %vm1945_vm12, %v2009_v30, %v1881_v13  ;;  %2637 = vadd.xlane.f32.xlu0 %v6098_v1  ;;  %v1435_v34 = vadd.f32 0.2548296, %v1371_v56 }
 0x2b3   :  { %v1434_v37 = vadd.f32 0.2548296, %v1370_v35  ;;  %v6102_v44 = vpop.f32.mrf.mxu1  ;;  %v2137_v5 = vadd.f32 1.0, %v2073_v38  ;;  %v603_v38 = vmul.f32 0.5, %v5957_v50 }
 0x2b4   :  { %v2008_v45 = vsub.f32 0.0, %v1880_v20  ;;  %v1499_v36 = vmul.f32 %v6056_v46, %v1435_v34 }
 0x2b5   :  { %2639 = vadd.xlane.f32.xlu1 %v6092_v12  ;;  %v1498_v29 = vmul.f32 %v6061_v60, %v1434_v37  ;;  %v6108_v39 = vpop.f32.mrf.mxu1  ;;  %v2201_v18 = vmul.f32 %v2137_v5, %v601_v55 }
 0x2b6   :  { %v2072_v28 = vsel %vm1944_vm13, %v2008_v45, %v1880_v20  ;;  %2641 = vadd.xlane.f32.xlu0 %v6108_v39  ;;  %v1819_v4 = vmul.f32 %v4257_v63, %v1499_v36 }
 0x2b7   :  { %v2136_v2 = vadd.f32 1.0, %v2072_v28  ;;  %v1818_v51 = vmul.f32 %v4259_v19, %v1498_v29  ;;  %v6112_v13 = vpop.f32.mrf.mxu1 }
 0x2b8   :  { %v1883_v59 = vsub.f32 1.0, %v1819_v4 }
 0x2b9   :  { %v2200_v40 = vmul.f32 %v2136_v2, %v600_v26  ;;  %2643 = vadd.xlane.f32.xlu1 %v6102_v44  ;;  %v1882_v11 = vsub.f32 1.0, %v1818_v51  ;;  %v6115_v46 = vpop.f32.mrf.mxu1 }
 0x2ba   :  { %2645 = vadd.xlane.f32.xlu0 %v6115_v46  ;;  %v2011_v60 = vsub.f32 0.0, %v1883_v59 }
 0x2bb   :  { %3992 = vmatprep.mubr.f32.mxu1 %v2200_v40  ;;  %v2010_v16 = vsub.f32 0.0, %v1882_v11  ;;  %v6118_v52 = vpop.f32.mrf.mxu1 }
 0x2bc   :  { %3993 = vmatmul.mubr.f32.gmra.mxu1 %v2201_v18  ;;  %v2075_v22 = vsel %vm1947_vm14, %v2011_v60, %v1883_v59 }
 0x2bd   :  { %2647 = vadd.xlane.f32.xlu1 %v6112_v13  ;;  %v2074_v30 = vsel %vm1946_vm15, %v2010_v16, %v1882_v11  ;;  %v6123_v47 = vpop.f32.mrf.mxu1  ;;  %v2139_v27 = vadd.f32 1.0, %v2075_v22 }
 0x2be   :  { %v2138_v20 = vadd.f32 1.0, %v2074_v30  ;;  %2649 = vadd.xlane.f32.xlu0 %v6123_v47 }
 0x2bf   :  { %v2203_v17 = vmul.f32 %v2139_v27, %v603_v38 }
 0x2c0   :  { %v2202_v56 = vmul.f32 %v2138_v20, %v602_v32 }
 0x2c1   :  { %2651 = vadd.xlane.f32.xlu1 %v6118_v52 }
 0x2c2   :  { %3995 = vmatprep.mubr.f32.mxu1 %v2202_v56 }
 0x2c3   :  { %3996 = vmatmul.mubr.f32.gmra.mxu1 %v2203_v17 }
 0x2c5   :  { %v6129_v10 = vpop.f32.mrf.mxu1 }
 0x2c6   :  { %7052 = vst [vmem:[#allocation13_spill] sm:$0xff] %v6129_v10  ;;  %2655 = vadd.xlane.f32.xlu1 %v6129_v10 }
 0x2c7   :  { %v6131_v35 = vpop.f32.mrf.mxu1 }
 0x2c8   :  { %7053 = vst [vmem:[#allocation12_spill] sm:$0xff] %v6131_v35  ;;  %2653 = vadd.xlane.f32.xlu0 %v6131_v35 }
 0x2ce   :  { %v6135_v24 = vpop.f32.mrf.mxu1 }
 0x2cf   :  { %7054 = vst [vmem:[#allocation15_spill] sm:$0xff] %v6135_v24  ;;  %2659 = vadd.xlane.f32.xlu1 %v6135_v24 }
 0x2d0   :  { %v6138_v45 = vpop.f32.mrf.mxu1 }
 0x2d1   :  { %7055 = vst [vmem:[#allocation14_spill] sm:$0xff] %v6138_v45  ;;  %2657 = vadd.xlane.f32.xlu0 %v6138_v45 }
 0x2d6   :  { %v6141_v50 = vpop.f32.mrf.mxu1 }
 0x2d7   :  { %7056 = vst [vmem:[#allocation17_spill] sm:$0xff] %v6141_v50  ;;  %2663 = vadd.xlane.f32.xlu1 %v6141_v50 }
 0x2d8   :  { %v6144_v34 = vpop.f32.mrf.mxu1 }
 0x2d9   :  { %7057 = vst [vmem:[#allocation16_spill] sm:$0xff] %v6144_v34  ;;  %2661 = vadd.xlane.f32.xlu0 %v6144_v34 }
 0x2e7   :  { %v6147_v37 = vpop.f32.mrf.mxu1 }
 0x2e8   :  { %7058 = vst [vmem:[#allocation18_spill] sm:$0xff] %v6147_v37  ;;  %2667 = vadd.xlane.f32.xlu1 %v6147_v37 }
 0x2e9   :  { %v6150_v5 = vpop.f32.mrf.mxu1 }
 0x2ea   :  { %7059 = vst [vmem:[#allocation26_spill] sm:$0xff] %v6150_v5  ;;  %2665 = vadd.xlane.f32.xlu0 %v6150_v5 }
 0x2fa   :  { %v6153_v28 = vpop.f32.mrf.mxu1 }
 0x2fb   :  { %7060 = vst [vmem:[#allocation20_spill] sm:$0xff] %v6153_v28  ;;  %2671 = vadd.xlane.f32.xlu1 %v6153_v28 }
 0x2fc   :  { %v6156_v63 = vpop.f32.mrf.mxu1 }
 0x2fd   :  { %7061 = vst [vmem:[#allocation19_spill] sm:$0xff] %v6156_v63  ;;  %2669 = vadd.xlane.f32.xlu0 %v6156_v63 }
 0x304   :  { %v6159_v26 = vpop.f32.mrf.mxu1 }
 0x305   :  { %7062 = vst [vmem:[#allocation22_spill] sm:$0xff] %v6159_v26  ;;  %2675 = vadd.xlane.f32.xlu1 %v6159_v26  ;;  %v2781_v26 = vlaneseq }
 0x306   :  { %v6162_v2 = vpop.f32.mrf.mxu1 }
 0x307   :  { %7063 = vst [vmem:[#allocation21_spill] sm:$0xff] %v6162_v2  ;;  %2673 = vadd.xlane.f32.xlu0 %v6162_v2  ;;  %v6235_v37 = vand.u32 127, %v2781_v26 }
 0x309   :  { %v2592_v60 = vpop.xlane.xlu0 %2591  ;;  %vm2783_vm0 = vcmp.lt.s32.totalorder %v6235_v37, 32 }
 0x30a   :  { %v2718_v28 = vmul.f32 0.03125, %v2592_v60 }
 0x30c   :  { %v2785_v50 = vsub.f32 %v5919_v43, %v2718_v28 }
 0x30d   :  { %v2590_v30 = vpop.xlane.xlu0 %2589 }
 0x30e   :  { %v6165_v36 = vpop.f32.mrf.mxu1  ;;  %v2596_v59 = vpop.xlane.xlu1 %2595  ;;  %v2717_v34 = vmul.f32 0.03125, %v2590_v30  ;;  %v6253_v30 = vsel %vm2783_vm0, %v2785_v50, 0.0 }
 0x30f   :  { %7064 = vst [vmem:[#allocation24_spill] sm:$0xff] %v6165_v36  ;;  %2679 = vadd.xlane.f32.xlu1 %v6165_v36  ;;  %v2720_v45 = vmul.f32 0.03125, %v2596_v59 }
 0x310   :  { %v6168_v29 = vpop.f32.mrf.mxu1  ;;  %v2784_v60 = vsub.f32 %v5928_v57, %v2717_v34  ;;  %v2913_v57 = vmul.f32 %v6253_v30, %v6253_v30 }
 0x311   :  { %7065 = vst [vmem:[#allocation23_spill] sm:$0xff] %v6168_v29  ;;  %2677 = vadd.xlane.f32.xlu0 %v6168_v29  ;;  %v2787_v10 = vsub.f32 %v5937_v41, %v2720_v45 }
 0x312   :  { %v2594_v16 = vpop.xlane.xlu1 %2593  ;;  %v6260_v28 = vsel %vm2783_vm0, %v2784_v60, 0.0 }
 0x313   :  { %v2598_v38 = vpop.xlane.xlu0 %2597  ;;  %v2719_v26 = vmul.f32 0.03125, %v2594_v16  ;;  %7082 = vst [vmem:[#allocation42_spill] sm:$0xff] %v6260_v28  ;;  %v6272_v59 = vsel %vm2783_vm0, %v2787_v10, 0.0  ;;  %v2912_v16 = vmul.f32 %v6260_v28, %v6260_v28 }
 0x314   :  { %v2721_v34 = vmul.f32 0.03125, %v2598_v38 }
 0x315   :  { %v2786_v43 = vsub.f32 %v5952_v58, %v2719_v26 }
 0x316   :  { %v2600_v27 = vpop.xlane.xlu1 %2599  ;;  %v2788_v60 = vsub.f32 %v5968_v61, %v2721_v34 }
 0x317   :  { %v2602_v17 = vpop.xlane.xlu0 %2601  ;;  %v6281_v38 = vsel %vm2783_vm0, %v2786_v43, 0.0 }
 0x318   :  { %v2723_v10 = vmul.f32 0.03125, %v2602_v17  ;;  %v2914_v28 = vmul.f32 %v6281_v38, %v6281_v38  ;;  %v6299_v17 = vsel %vm2783_vm0, %v2788_v60, 0.0 }
 0x319   :  { %v6171_v19 = vpop.f32.mrf.mxu1 }
 0x31a   :  { %7066 = vst [vmem:[#allocation25_spill] sm:$0xff] %v6171_v19  ;;  %2683 = vadd.xlane.f32.xlu1 %v6171_v19  ;;  %v2604_v56 = vpop.xlane.xlu1 %2603 }
 0x31b   :  { %v6174_v55 = vpop.f32.mrf.mxu1  ;;  %v2724_v58 = vmul.f32 0.03125, %v2604_v56 }
 0x31c   :  { %7067 = vst [vmem:[#allocation27_spill] sm:$0xff] %v6174_v55  ;;  %2681 = vadd.xlane.f32.xlu0 %v6174_v55 }
 0x32c   :  { %v6177_v40 = vpop.f32.mrf.mxu1 }
 0x32d   :  { %7068 = vst [vmem:[#allocation28_spill] sm:$0xff] %v6177_v40  ;;  %2687 = vadd.xlane.f32.xlu1 %v6177_v40 }
 0x32e   :  { %v6180_v4 = vpop.f32.mrf.mxu1 }
 0x32f   :  { %7069 = vst [vmem:[#allocation29_spill] sm:$0xff] %v6180_v4  ;;  %2685 = vadd.xlane.f32.xlu0 %v6180_v4 }
 0x33d   :  { %v6183_v51 = vpop.f32.mrf.mxu1 }
 0x33e   :  { %7070 = vst [vmem:[#allocation30_spill] sm:$0xff] %v6183_v51  ;;  %2691 = vadd.xlane.f32.xlu1 %v6183_v51  ;;  %v2606_v51 = vpop.xlane.xlu0 %2605 }
 0x33f   :  { %v6186_v18 = vpop.f32.mrf.mxu1 }
 0x340   :  { %7071 = vst [vmem:[#allocation31_spill] sm:$0xff] %v6186_v18  ;;  %2689 = vadd.xlane.f32.xlu0 %v6186_v18 }
 0x345   :  { %v6189_v11 = vpop.f32.mrf.mxu1 }
 0x346   :  { %7072 = vst [vmem:[#allocation32_spill] sm:$0xff] %v6189_v11  ;;  %2695 = vadd.xlane.f32.xlu1 %v6189_v11  ;;  %v2608_v11 = vpop.xlane.xlu1 %2607 }
 0x347   :  { %v6192_v22 = vpop.f32.mrf.mxu1  ;;  %v2726_v56 = vmul.f32 0.03125, %v2608_v11  ;;  %v2790_v11 = vsub.f32 %v5985_v42, %v2723_v10 }
 0x348   :  { %7073 = vst [vmem:[#allocation33_spill] sm:$0xff] %v6192_v22  ;;  %2693 = vadd.xlane.f32.xlu0 %v6192_v22 }
 0x349   :  { %v2793_v34 = vsub.f32 %v5993_v53, %v2726_v56 }
 0x34a   :  { %v6207_v4 = vpop.xlane.xlu1 %2611 }
 0x34e   :  { %v6195_v32 = vpop.f32.mrf.mxu1  ;;  %v6211_v40 = vpop.xlane.xlu1 %2615 }
 0x34f   :  { %7074 = vst [vmem:[#allocation34_spill] sm:$0xff] %v6195_v32  ;;  %2699 = vadd.xlane.f32.xlu1 %v6195_v32  ;;  %v6209_v32 = vpop.xlane.xlu0 %2609 }
 0x350   :  { %v6198_v20 = vpop.f32.mrf.mxu1  ;;  %v2727_v60 = vmul.f32 0.03125, %v6209_v32 }
 0x351   :  { %7075 = vst [vmem:[#allocation35_spill] sm:$0xff] %v6198_v20  ;;  %2697 = vadd.xlane.f32.xlu0 %v6198_v20 }
 0x352   :  { %v6215_v20 = vpop.xlane.xlu1 %2619  ;;  %v2794_v32 = vsub.f32 %v6018_v14, %v2727_v60 }
 0x353   :  { %v6213_v55 = vpop.xlane.xlu0 %2613 }
 0x35b   :  { %v6201_v18 = vpop.f32.mrf.mxu1 }
 0x35c   :  { %7076 = vst [vmem:[#allocation36_spill] sm:$0xff] %v6201_v18  ;;  %2703 = vadd.xlane.f32.xlu1 %v6201_v18  ;;  %v6220_v18 = vpop.xlane.xlu0 %2617 }
 0x35d   :  { %v6204_v22 = vpop.f32.mrf.mxu1 }
 0x35e   :  { %7077 = vst [vmem:[#allocation37_spill] sm:$0xff] %v6204_v22  ;;  %2701 = vadd.xlane.f32.xlu0 %v6204_v22  ;;  %v6225_v22 = vpop.xlane.xlu1 %2623 }
 0x35f   :  { %v2734_v60 = vmul.f32 0.03125, %v6225_v22 }
 0x360   :  { %v6227_v36 = vpop.xlane.xlu0 %2621 }
 0x362   :  { %v6229_v2 = vpop.xlane.xlu1 %2627 }
 0x364   :  { %v6231_v63 = vpop.xlane.xlu0 %2625 }
 0x368   :  { %v6245_v24 = vpop.xlane.xlu0 %2629 }
 0x36c   :  { %v6265_v41 = vpop.xlane.xlu0 %2633 }
 0x36d   :  { %v6217_v19 = vpop.f32.mrf.mxu1 }
 0x36e   :  { %7078 = vst [vmem:[#allocation38_spill] sm:$0xff] %v6217_v19  ;;  %2707 = vadd.xlane.f32.xlu1 %v6217_v19  ;;  %v6237_v19 = vpop.xlane.xlu1 %2631 }
 0x36f   :  { %v6222_v29 = vpop.f32.mrf.mxu1 }
 0x370   :  { %7079 = vst [vmem:[#allocation39_spill] sm:$0xff] %v6222_v29  ;;  %2705 = vadd.xlane.f32.xlu0 %v6222_v29  ;;  %v6293_v43 = vpop.xlane.xlu0 %2637 }
 0x372   :  { %v6248_v35 = vpop.xlane.xlu1 %2635 }
 0x37c   :  { %v6233_v5 = vpop.f32.mrf.mxu1 }
 0x37d   :  { %7080 = vst [vmem:[#allocation40_spill] sm:$0xff] %v6233_v5  ;;  %2711 = vadd.xlane.f32.xlu1 %v6233_v5  ;;  %v2722_v5 = vmul.f32 0.03125, %v2600_v27  ;;  %v6277_v27 = vpop.xlane.xlu1 %2639 }
 0x37e   :  { %v6240_v29 = vpop.f32.mrf.mxu1 }
 0x37f   :  { %7081 = vst [vmem:[#allocation41_spill] sm:$0xff] %v6240_v29  ;;  %2709 = vadd.xlane.f32.xlu0 %v6240_v29  ;;  %v2789_v50 = vsub.f32 %v5959_v49, %v2722_v5  ;;  %v2915_v49 = vmul.f32 %v6272_v59, %v6272_v59  ;;  %v2791_v5 = vsub.f32 %v5975_v7, %v2724_v58 }
 0x381   :  { %v6289_v26 = vsel %vm2783_vm0, %v2789_v50, 0.0  ;;  %v6301_v7 = vpop.xlane.xlu1 %2643  ;;  %v2728_v50 = vmul.f32 0.03125, %v6207_v4  ;;  %v6308_v58 = vsel %vm2783_vm0, %v2791_v5, 0.0  ;;  %v6321_v4 = vsel %vm2783_vm0, %v2790_v11, 0.0 }
 0x382   :  { %v2917_v61 = vmul.f32 %v6289_v26, %v6289_v26  ;;  %v2919_v42 = vmul.f32 %v6308_v58, %v6308_v58  ;;  %v2918_v5 = vmul.f32 %v6321_v4, %v6321_v4 }
 0x383   :  { %v6255_v29 = vpop.f32.mrf.mxu1  ;;  %v2795_v53 = vsub.f32 %v6012_v62, %v2728_v50  ;;  %v2731_v50 = vmul.f32 0.03125, %v6220_v18 }
 0x384   :  { %2715 = vadd.xlane.f32.xlu1 %v6255_v29 }
 0x385   :  { %v6267_v45 = vpop.f32.mrf.mxu1  ;;  %v6328_v10 = vpop.xlane.xlu1 %2647  ;;  %v6344_v14 = vsel %vm2783_vm0, %v2795_v53, 0.0  ;;  %v2798_v18 = vsub.f32 %v6042_v15, %v2731_v50 }
 0x386   :  { %2713 = vadd.xlane.f32.xlu0 %v6267_v45 }
 0x388   :  { %2978 = vadd.xlane.f32.xlu1 %v2913_v57  ;;  %v2725_v57 = vmul.f32 0.03125, %v2606_v51 }
 0x38a   :  { %2976 = vadd.xlane.f32.xlu0 %v2912_v16  ;;  %v2792_v51 = vsub.f32 %v6004_v3, %v2725_v57  ;;  %v2916_v16 = vmul.f32 %v6299_v17, %v6299_v17  ;;  %v6326_v3 = vsel %vm2783_vm0, %v2793_v34, 0.0 }
 0x38b   :  { %v2921_v62 = vmul.f32 %v6326_v3, %v6326_v3 }
 0x38c   :  { %2982 = vadd.xlane.f32.xlu1 %v2915_v49  ;;  %v6316_v49 = vpop.xlane.xlu0 %2641  ;;  %v6337_v56 = vsel %vm2783_vm0, %v2792_v51, 0.0 }
 0x38d   :  { %v2920_v34 = vmul.f32 %v6337_v56, %v6337_v56 }
 0x38e   :  { %2980 = vadd.xlane.f32.xlu0 %v2914_v28  ;;  %v2730_v28 = vmul.f32 0.03125, %v6211_v40  ;;  %v2729_v40 = vmul.f32 0.03125, %v6213_v55  ;;  %v2923_v55 = vmul.f32 %v6344_v14, %v6344_v14 }
 0x390   :  { %2986 = vadd.xlane.f32.xlu1 %v2917_v61  ;;  %v2797_v57 = vsub.f32 %v6023_v33, %v2730_v28  ;;  %v2732_v61 = vmul.f32 0.03125, %v6215_v20  ;;  %v6346_v11 = vpop.xlane.xlu0 %2645  ;;  %v6355_v33 = vsel %vm2783_vm0, %v2794_v32, 0.0  ;;  %v6357_v20 = vpop.xlane.xlu1 %2651  ;;  %v2796_v51 = vsub.f32 %v6029_v48, %v2729_v40 }
 0x391   :  { %v2922_v53 = vmul.f32 %v6355_v33, %v6355_v33  ;;  %v2733_v28 = vmul.f32 0.03125, %v6227_v36 }
 0x392   :  { %2984 = vadd.xlane.f32.xlu0 %v2916_v16  ;;  %v2799_v16 = vsub.f32 %v6034_v9, %v2732_v61  ;;  %v2801_v9 = vsub.f32 %v6045_v54, %v2734_v60  ;;  %v6377_v22 = vsel %vm2783_vm0, %v2796_v51, 0.0  ;;  %v2737_v51 = vmul.f32 0.03125, %v6245_v24 }
 0x393   :  { %v2800_v36 = vsub.f32 %v6053_v6, %v2733_v28  ;;  %v2924_v40 = vmul.f32 %v6377_v22, %v6377_v22 }
 0x394   :  { %2990 = vadd.xlane.f32.xlu1 %v2919_v42  ;;  %v6364_v42 = vsel %vm2783_vm0, %v2797_v57, 0.0  ;;  %v6372_v32 = vpop.xlane.xlu0 %2649  ;;  %v6382_v15 = vsel %vm2783_vm0, %v2799_v16, 0.0  ;;  %v6393_v57 = vsel %vm2783_vm0, %v2798_v18, 0.0  ;;  %v6400_v6 = vsel %vm2783_vm0, %v2801_v9, 0.0 }
 0x395   :  { %v2925_v48 = vmul.f32 %v6364_v42, %v6364_v42  ;;  %v2927_v54 = vmul.f32 %v6382_v15, %v6382_v15  ;;  %v2740_v18 = vmul.f32 0.03125, %v6248_v35  ;;  %v2804_v24 = vsub.f32 %v6080_v23, %v2737_v51 }
 0x396   :  { %2988 = vadd.xlane.f32.xlu0 %v2918_v5  ;;  %v2736_v5 = vmul.f32 0.03125, %v6229_v2  ;;  %v2735_v2 = vmul.f32 0.03125, %v6231_v63  ;;  %v2929_v63 = vmul.f32 %v6400_v6, %v6400_v6  ;;  %v2743_v51 = vmul.f32 0.03125, %v6316_v49 }
 0x398   :  { %2994 = vadd.xlane.f32.xlu1 %v2921_v62  ;;  %v6384_v62 = vpop.xlane.xlu1 %2655  ;;  %v2803_v61 = vsub.f32 %v6059_v25, %v2736_v5  ;;  %v6402_v50 = vpop.xlane.xlu0 %2653  ;;  %v6411_v25 = vsel %vm2783_vm0, %v2800_v36, 0.0  ;;  %v2802_v16 = vsub.f32 %v6068_v21, %v2735_v2  ;;  %v2742_v5 = vmul.f32 0.03125, %v6277_v27 }
 0x399   :  { %v2928_v28 = vmul.f32 %v6411_v25, %v6411_v25  ;;  %v2741_v27 = vmul.f32 0.03125, %v6293_v43  ;;  %v2810_v49 = vsub.f32 %v6108_v39, %v2743_v51  ;;  %v7083_v51 = vld [vmem:[#allocation13_spill] sm:$0xff] }
 0x39a   :  { %2992 = vadd.xlane.f32.xlu0 %v2920_v34  ;;  %v2738_v34 = vmul.f32 0.03125, %v6237_v19  ;;  %v6433_v35 = vsel %vm2783_vm0, %v2802_v16, 0.0  ;;  %v2809_v2 = vsub.f32 %v6092_v12, %v2742_v5 }
 0x39c   :  { %2998 = vadd.xlane.f32.xlu1 %v2923_v55  ;;  %v2926_v55 = vmul.f32 %v6393_v57, %v6393_v57  ;;  %v6413_v19 = vpop.xlane.xlu1 %2659  ;;  %v2805_v60 = vsub.f32 %v6073_v31, %v2738_v34  ;;  %v6428_v9 = vpop.xlane.xlu0 %2657  ;;  %v2807_v31 = vsub.f32 %v6083_v8, %v2740_v18  ;;  %v6474_v18 = vsel %vm2783_vm0, %v2809_v2, 0.0 }
 0x39e   :  { %2996 = vadd.xlane.f32.xlu0 %v2922_v53  ;;  %v6420_v53 = vsel %vm2783_vm0, %v2803_v61, 0.0  ;;  %v6438_v23 = vsel %vm2783_vm0, %v2805_v60, 0.0  ;;  %v2744_v61 = vmul.f32 0.03125, %v6301_v7  ;;  %v2746_v60 = vmul.f32 0.03125, %v6328_v10 }
 0x39f   :  { %v2931_v21 = vmul.f32 %v6420_v53, %v6420_v53  ;;  %v2933_v8 = vmul.f32 %v6438_v23, %v6438_v23 }
 0x3a0   :  { %3002 = vadd.xlane.f32.xlu1 %v2925_v48  ;;  %v2739_v48 = vmul.f32 0.03125, %v6265_v41  ;;  %v6440_v36 = vpop.xlane.xlu1 %2663  ;;  %v6458_v34 = vpop.xlane.xlu0 %2661  ;;  %v2811_v16 = vsub.f32 %v6102_v44, %v2744_v61  ;;  %v2813_v44 = vsub.f32 %v6112_v13, %v2746_v60  ;;  %v2749_v61 = vmul.f32 0.03125, %v6402_v50  ;;  %v7084_v50 = vld [vmem:[#allocation12_spill] sm:$0xff] }
 0x3a2   :  { %3000 = vadd.xlane.f32.xlu0 %v2924_v40  ;;  %v2806_v41 = vsub.f32 %v6089_v0, %v2739_v48  ;;  %v2930_v40 = vmul.f32 %v6433_v35, %v6433_v35  ;;  %v6456_v0 = vsel %vm2783_vm0, %v2807_v31, 0.0  ;;  %v6490_v39 = vsel %vm2783_vm0, %v2811_v16, 0.0 }
 0x3a3   :  { %v2935_v43 = vmul.f32 %v6456_v0, %v6456_v0  ;;  %v2939_v13 = vmul.f32 %v6490_v39, %v6490_v39  ;;  %v2816_v60 = vsub.f32 %v7084_v50, %v2749_v61  ;;  %v7087_v61 = vld [vmem:[#allocation17_spill] sm:$0xff] }
 0x3a4   :  { %3006 = vadd.xlane.f32.xlu1 %v2927_v54  ;;  %v6449_v54 = vsel %vm2783_vm0, %v2804_v24, 0.0  ;;  %v6467_v12 = vsel %vm2783_vm0, %v2806_v41, 0.0  ;;  %v2668_v7 = vpop.xlane.xlu1 %2667  ;;  %v2666_v48 = vpop.xlane.xlu0 %2665  ;;  %v6499_v41 = vsel %vm2783_vm0, %v2810_v49, 0.0 }
 0x3a5   :  { %v2934_v24 = vmul.f32 %v6467_v12, %v6467_v12  ;;  %v2938_v2 = vmul.f32 %v6499_v41, %v6499_v41  ;;  %v2755_v50 = vmul.f32 0.03125, %v2666_v48 }
 0x3a6   :  { %3004 = vadd.xlane.f32.xlu0 %v2926_v55  ;;  %v2932_v55 = vmul.f32 %v6449_v54, %v6449_v54 }
 0x3a8   :  { %3010 = vadd.xlane.f32.xlu1 %v2929_v63  ;;  %v2808_v63 = vsub.f32 %v6098_v1, %v2741_v27  ;;  %v2937_v1 = vmul.f32 %v6474_v18, %v6474_v18  ;;  %v2672_v31 = vpop.xlane.xlu1 %2671  ;;  %v2670_v27 = vpop.xlane.xlu0 %2669 }
 0x3aa   :  { %3008 = vadd.xlane.f32.xlu0 %v2928_v28  ;;  %v2745_v28 = vmul.f32 0.03125, %v6346_v11  ;;  %v6485_v10 = vsel %vm2783_vm0, %v2808_v63, 0.0  ;;  %v2752_v63 = vmul.f32 0.03125, %v6413_v19 }
 0x3ab   :  { %v2936_v5 = vmul.f32 %v6485_v10, %v6485_v10 }
 0x3ac   :  { %3014 = vadd.xlane.f32.xlu1 %v2931_v21  ;;  %v2748_v21 = vmul.f32 0.03125, %v6357_v20  ;;  %v2812_v11 = vsub.f32 %v6115_v46, %v2745_v28  ;;  %v2747_v20 = vmul.f32 0.03125, %v6372_v32  ;;  %v6506_v46 = vsel %vm2783_vm0, %v2813_v44, 0.0  ;;  %v2676_v32 = vpop.xlane.xlu1 %2675  ;;  %v2674_v28 = vpop.xlane.xlu0 %2673 }
 0x3ae   :  { %3012 = vadd.xlane.f32.xlu0 %v2930_v40  ;;  %v2815_v40 = vsub.f32 %v6118_v52, %v2748_v21  ;;  %v6515_v52 = vsel %vm2783_vm0, %v2812_v11, 0.0  ;;  %v2754_v21 = vmul.f32 0.03125, %v6440_v36 }
 0x3af   :  { %v2940_v49 = vmul.f32 %v6515_v52, %v6515_v52 }
 0x3b0   :  { %3018 = vadd.xlane.f32.xlu1 %v2933_v8  ;;  %v2750_v8 = vmul.f32 0.03125, %v6384_v62  ;;  %v2814_v62 = vsub.f32 %v6123_v47, %v2747_v20  ;;  %v6522_v16 = vsel %vm2783_vm0, %v2815_v40, 0.0 }
 0x3b1   :  { %v2943_v47 = vmul.f32 %v6522_v16, %v6522_v16 }
 0x3b2   :  { %3016 = vadd.xlane.f32.xlu0 %v2932_v55  ;;  %v2941_v55 = vmul.f32 %v6506_v46, %v6506_v46  ;;  %v6533_v19 = vsel %vm2783_vm0, %v2814_v62, 0.0  ;;  %v2756_v62 = vmul.f32 0.03125, %v2668_v7 }
 0x3b3   :  { %v2942_v20 = vmul.f32 %v6533_v19, %v6533_v19 }
 0x3b4   :  { %3022 = vadd.xlane.f32.xlu1 %v2935_v43  ;;  %v2817_v43 = vsub.f32 %v7083_v51, %v2750_v8  ;;  %v6547_v8 = vsel %vm2783_vm0, %v2816_v60, 0.0  ;;  %v2678_v51 = vpop.xlane.xlu0 %2677 }
 0x3b6   :  { %3020 = vadd.xlane.f32.xlu0 %v2934_v24  ;;  %v2751_v24 = vmul.f32 0.03125, %v6428_v9  ;;  %v6538_v11 = vsel %vm2783_vm0, %v2817_v43, 0.0 }
 0x3b7   :  { %v2945_v40 = vmul.f32 %v6538_v11, %v6538_v11 }
 0x3b8   :  { %3026 = vadd.xlane.f32.xlu1 %v2937_v1  ;;  %v7085_v1 = vld [vmem:[#allocation15_spill] sm:$0xff] }
 0x3b9   :  { %v2819_v44 = vsub.f32 %v7085_v1, %v2752_v63  ;;  %v2944_v63 = vmul.f32 %v6547_v8, %v6547_v8 }
 0x3ba   :  { %3024 = vadd.xlane.f32.xlu0 %v2936_v5  ;;  %v2680_v5 = vpop.xlane.xlu1 %2679 }
 0x3bb   :  { %v6551_v36 = vsel %vm2783_vm0, %v2819_v44, 0.0  ;;  %v2758_v44 = vmul.f32 0.03125, %v2672_v31  ;;  %v7092_v31 = vld [vmem:[#allocation20_spill] sm:$0xff] }
 0x3bc   :  { %3030 = vadd.xlane.f32.xlu1 %v2939_v13  ;;  %v7086_v13 = vld [vmem:[#allocation14_spill] sm:$0xff]  ;;  %v2947_v60 = vmul.f32 %v6551_v36, %v6551_v36 }
 0x3bd   :  { %v2818_v9 = vsub.f32 %v7086_v13, %v2751_v24  ;;  %v7088_v24 = vld [vmem:[#allocation16_spill] sm:$0xff] }
 0x3be   :  { %3028 = vadd.xlane.f32.xlu0 %v2938_v2  ;;  %v2753_v2 = vmul.f32 0.03125, %v6458_v34 }
 0x3bf   :  { %v6557_v43 = vsel %vm2783_vm0, %v2818_v9, 0.0  ;;  %v2757_v9 = vmul.f32 0.03125, %v2670_v27 }
 0x3c0   :  { %3034 = vadd.xlane.f32.xlu1 %v2941_v55  ;;  %v2821_v55 = vsub.f32 %v7087_v61, %v2754_v21  ;;  %v2820_v34 = vsub.f32 %v7088_v24, %v2753_v2  ;;  %v7090_v21 = vld [vmem:[#allocation26_spill] sm:$0xff]  ;;  %v2946_v48 = vmul.f32 %v6557_v43, %v6557_v43 }
 0x3c1   :  { %v2822_v13 = vsub.f32 %v7090_v21, %v2755_v50  ;;  %v7094_v50 = vld [vmem:[#allocation19_spill] sm:$0xff]  ;;  %v2762_v21 = vmul.f32 0.03125, %v2680_v5 }
 0x3c2   :  { %3032 = vadd.xlane.f32.xlu0 %v2940_v49  ;;  %v2684_v49 = vpop.xlane.xlu1 %2683  ;;  %v6566_v7 = vsel %vm2783_vm0, %v2821_v55, 0.0  ;;  %v6576_v2 = vsel %vm2783_vm0, %v2820_v34, 0.0  ;;  %v2825_v55 = vsub.f32 %v7092_v31, %v2758_v44 }
 0x3c3   :  { %v6585_v27 = vsel %vm2783_vm0, %v2822_v13, 0.0  ;;  %v2948_v24 = vmul.f32 %v6576_v2, %v6576_v2 }
 0x3c4   :  { %3038 = vadd.xlane.f32.xlu1 %v2943_v47  ;;  %v7089_v47 = vld [vmem:[#allocation18_spill] sm:$0xff]  ;;  %7093 = vst [vmem:[#allocation12_spill] sm:$0xff] %v6585_v27 }
 0x3c5   :  { %v2823_v1 = vsub.f32 %v7089_v47, %v2756_v62  ;;  %v2760_v62 = vmul.f32 0.03125, %v2676_v32  ;;  %v6594_v47 = vsel %vm2783_vm0, %v2825_v55, 0.0  ;;  %v2759_v32 = vmul.f32 0.03125, %v2674_v28 }
 0x3c6   :  { %3036 = vadd.xlane.f32.xlu0 %v2942_v20  ;;  %v2949_v20 = vmul.f32 %v6566_v7, %v6566_v7  ;;  %7095 = vst [vmem:[#allocation15_spill] sm:$0xff] %v6594_v47  ;;  %v2953_v31 = vmul.f32 %v6594_v47, %v6594_v47 }
 0x3c7   :  { %v6580_v61 = vsel %vm2783_vm0, %v2823_v1, 0.0  ;;  %v7096_v1 = vld [vmem:[#allocation22_spill] sm:$0xff] }
 0x3c8   :  { %3042 = vadd.xlane.f32.xlu1 %v2945_v40  ;;  %v2682_v40 = vpop.xlane.xlu0 %2681  ;;  %7091 = vst [vmem:[#allocation13_spill] sm:$0xff] %v6580_v61  ;;  %v2951_v34 = vmul.f32 %v6580_v61, %v6580_v61  ;;  %v2827_v44 = vsub.f32 %v7096_v1, %v2760_v62  ;;  %v7098_v62 = vld [vmem:[#allocation24_spill] sm:$0xff]  ;;  %v2764_v1 = vmul.f32 0.03125, %v2684_v49  ;;  %v7102_v49 = vld [vmem:[#allocation25_spill] sm:$0xff] }
 0x3ca   :  { %3040 = vadd.xlane.f32.xlu0 %v2944_v63  ;;  %v2688_v63 = vpop.xlane.xlu1 %2687  ;;  %v6608_v5 = vsel %vm2783_vm0, %v2827_v44, 0.0 }
 0x3cb   :  { %v2955_v47 = vmul.f32 %v6608_v5, %v6608_v5 }
 0x3cc   :  { %3046 = vadd.xlane.f32.xlu1 %v2947_v60  ;;  %v2824_v60 = vsub.f32 %v7094_v50, %v2757_v9  ;;  %v2686_v13 = vpop.xlane.xlu0 %2685  ;;  %v2950_v9 = vmul.f32 %v6585_v27, %v6585_v27  ;;  %v7097_v50 = vld [vmem:[#allocation21_spill] sm:$0xff]  ;;  %v2763_v27 = vmul.f32 0.03125, %v2682_v40 }
 0x3cd   :  { %v2826_v28 = vsub.f32 %v7097_v50, %v2759_v32 }
 0x3ce   :  { %3044 = vadd.xlane.f32.xlu0 %v2946_v48  ;;  %v6599_v48 = vsel %vm2783_vm0, %v2824_v60, 0.0  ;;  %v2692_v55 = vpop.xlane.xlu1 %2691  ;;  %v7099_v60 = vld [vmem:[#allocation23_spill] sm:$0xff] }
 0x3cf   :  { %v6618_v32 = vsel %vm2783_vm0, %v2826_v28, 0.0 }
 0x3d0   :  { %3050 = vadd.xlane.f32.xlu1 %v2949_v20  ;;  %v2761_v20 = vmul.f32 0.03125, %v2678_v51  ;;  %v2952_v51 = vmul.f32 %v6599_v48, %v6599_v48  ;;  %v2690_v61 = vpop.xlane.xlu0 %2689  ;;  %7100 = vst [vmem:[#allocation14_spill] sm:$0xff] %v6618_v32  ;;  %v2954_v28 = vmul.f32 %v6618_v32, %v6618_v32 }
 0x3d2   :  { %3048 = vadd.xlane.f32.xlu0 %v2948_v24  ;;  %v2829_v24 = vsub.f32 %v7098_v62, %v2762_v21  ;;  %v2831_v21 = vsub.f32 %v7102_v49, %v2764_v1  ;;  %v7106_v1 = vld [vmem:[#allocation28_spill] sm:$0xff]  ;;  %v2767_v49 = vmul.f32 0.03125, %v2690_v61 }
 0x3d4   :  { %3054 = vadd.xlane.f32.xlu1 %v2951_v34  ;;  %v2828_v34 = vsub.f32 %v7099_v60, %v2761_v20  ;;  %v6622_v44 = vsel %vm2783_vm0, %v2829_v24, 0.0  ;;  %v2696_v20 = vpop.xlane.xlu1 %2695  ;;  %v6636_v24 = vsel %vm2783_vm0, %v2831_v21, 0.0 }
 0x3d5   :  { %7101 = vst [vmem:[#allocation17_spill] sm:$0xff] %v6622_v44  ;;  %v2957_v62 = vmul.f32 %v6622_v44, %v6622_v44  ;;  %7105 = vst [vmem:[#allocation18_spill] sm:$0xff] %v6636_v24  ;;  %v7107_v44 = vld [vmem:[#allocation29_spill] sm:$0xff] }
 0x3d6   :  { %3052 = vadd.xlane.f32.xlu0 %v2950_v9  ;;  %v2766_v9 = vmul.f32 0.03125, %v2688_v63  ;;  %v6627_v40 = vsel %vm2783_vm0, %v2828_v34, 0.0  ;;  %v2765_v63 = vmul.f32 0.03125, %v2686_v13  ;;  %v2694_v34 = vpop.xlane.xlu0 %2693 }
 0x3d7   :  { %7103 = vst [vmem:[#allocation16_spill] sm:$0xff] %v6627_v40 }
 0x3d8   :  { %3058 = vadd.xlane.f32.xlu1 %v2953_v31  ;;  %v7104_v31 = vld [vmem:[#allocation27_spill] sm:$0xff]  ;;  %v2833_v60 = vsub.f32 %v7106_v1, %v2766_v9  ;;  %v2700_v21 = vpop.xlane.xlu1 %2699  ;;  %v2832_v13 = vsub.f32 %v7107_v44, %v2765_v63  ;;  %v7108_v9 = vld [vmem:[#allocation30_spill] sm:$0xff]  ;;  %v2770_v1 = vmul.f32 0.03125, %v2696_v20  ;;  %v7110_v20 = vld [vmem:[#allocation32_spill] sm:$0xff] }
 0x3d9   :  { %v2830_v50 = vsub.f32 %v7104_v31, %v2763_v27  ;;  %v2959_v31 = vmul.f32 %v6636_v24, %v6636_v24 }
 0x3da   :  { %3056 = vadd.xlane.f32.xlu0 %v2952_v51  ;;  %v2768_v51 = vmul.f32 0.03125, %v2692_v55  ;;  %v6650_v55 = vsel %vm2783_vm0, %v2833_v60, 0.0  ;;  %v2698_v32 = vpop.xlane.xlu0 %2697  ;;  %v6660_v44 = vsel %vm2783_vm0, %v2832_v13, 0.0  ;;  %v2837_v60 = vsub.f32 %v7110_v20, %v2770_v1  ;;  %v7113_v1 = vld [vmem:[#allocation34_spill] sm:$0xff] }
 0x3db   :  { %v6641_v27 = vsel %vm2783_vm0, %v2830_v50, 0.0  ;;  %v7109_v50 = vld [vmem:[#allocation31_spill] sm:$0xff]  ;;  %v2961_v24 = vmul.f32 %v6650_v55, %v6650_v55  ;;  %v2960_v13 = vmul.f32 %v6660_v44, %v6660_v44 }
 0x3dc   :  { %3062 = vadd.xlane.f32.xlu1 %v2955_v47  ;;  %v2956_v47 = vmul.f32 %v6627_v40, %v6627_v40  ;;  %v2958_v61 = vmul.f32 %v6641_v27, %v6641_v27  ;;  %v2769_v40 = vmul.f32 0.03125, %v2694_v34 }
 0x3de   :  { %3060 = vadd.xlane.f32.xlu0 %v2954_v28  ;;  %v2835_v28 = vsub.f32 %v7108_v9, %v2768_v51  ;;  %v2772_v51 = vmul.f32 0.03125, %v2700_v21  ;;  %v2771_v21 = vmul.f32 0.03125, %v2698_v32 }
 0x3e0   :  { %3066 = vadd.xlane.f32.xlu1 %v2957_v62  ;;  %v2834_v62 = vsub.f32 %v7109_v50, %v2767_v49  ;;  %v6664_v63 = vsel %vm2783_vm0, %v2835_v28, 0.0  ;;  %v7111_v49 = vld [vmem:[#allocation33_spill] sm:$0xff]  ;;  %v6678_v28 = vsel %vm2783_vm0, %v2837_v60, 0.0  ;;  %v2839_v50 = vsub.f32 %v7113_v1, %v2772_v51 }
 0x3e1   :  { %v2963_v9 = vmul.f32 %v6664_v63, %v6664_v63  ;;  %7112 = vst [vmem:[#allocation26_spill] sm:$0xff] %v6678_v28  ;;  %v2965_v20 = vmul.f32 %v6678_v28, %v6678_v28 }
 0x3e2   :  { %3064 = vadd.xlane.f32.xlu0 %v2956_v47  ;;  %v6669_v34 = vsel %vm2783_vm0, %v2834_v62, 0.0  ;;  %v6692_v32 = vsel %vm2783_vm0, %v2839_v50, 0.0 }
 0x3e3   :  { %7116 = vst [vmem:[#allocation19_spill] sm:$0xff] %v6692_v32 }
 0x3e4   :  { %3070 = vadd.xlane.f32.xlu1 %v2959_v31  ;;  %v2836_v31 = vsub.f32 %v7111_v49, %v2769_v40  ;;  %v7115_v49 = vld [vmem:[#allocation35_spill] sm:$0xff] }
 0x3e5   :  { %v2704_v47 = vpop.xlane.xlu1 %2703  ;;  %v2838_v60 = vsub.f32 %v7115_v49, %v2771_v21  ;;  %v7119_v21 = vld [vmem:[#allocation37_spill] sm:$0xff] }
 0x3e6   :  { %3068 = vadd.xlane.f32.xlu0 %v2958_v61  ;;  %v2774_v61 = vmul.f32 0.03125, %v2704_v47  ;;  %v6683_v40 = vsel %vm2783_vm0, %v2836_v31, 0.0  ;;  %v7117_v47 = vld [vmem:[#allocation36_spill] sm:$0xff] }
 0x3e7   :  { %v2702_v62 = vpop.xlane.xlu0 %2701  ;;  %7114 = vst [vmem:[#allocation20_spill] sm:$0xff] %v6683_v40  ;;  %v2964_v31 = vmul.f32 %v6683_v40, %v6683_v40  ;;  %v6701_v1 = vsel %vm2783_vm0, %v2838_v60, 0.0 }
 0x3e8   :  { %3074 = vadd.xlane.f32.xlu1 %v2961_v24  ;;  %v2962_v24 = vmul.f32 %v6669_v34, %v6669_v34  ;;  %v2773_v51 = vmul.f32 0.03125, %v2702_v62  ;;  %7118 = vst [vmem:[#allocation22_spill] sm:$0xff] %v6701_v1 }
 0x3ea   :  { %3072 = vadd.xlane.f32.xlu0 %v2960_v13  ;;  %v2841_v13 = vsub.f32 %v7117_v47, %v2774_v61  ;;  %v2840_v49 = vsub.f32 %v7119_v21, %v2773_v51  ;;  %v2966_v61 = vmul.f32 %v6701_v1, %v6701_v1  ;;  %v7122_v21 = vld [vmem:[#allocation38_spill] sm:$0xff] }
 0x3ec   :  { %3078 = vadd.xlane.f32.xlu1 %v2963_v9  ;;  %v2967_v9 = vmul.f32 %v6692_v32, %v6692_v32  ;;  %v6706_v50 = vsel %vm2783_vm0, %v2841_v13, 0.0 }
 0x3ed   :  { %7120 = vst [vmem:[#allocation21_spill] sm:$0xff] %v6706_v50  ;;  %v2969_v62 = vmul.f32 %v6706_v50, %v6706_v50 }
 0x3ee   :  { %3076 = vadd.xlane.f32.xlu0 %v2962_v24  ;;  %v6714_v24 = vsel %vm2783_vm0, %v2840_v49, 0.0 }
 0x3ef   :  { %7121 = vst [vmem:[#allocation24_spill] sm:$0xff] %v6714_v24 }
 0x3f0   :  { %3082 = vadd.xlane.f32.xlu1 %v2965_v20 }
 0x3f2   :  { %3080 = vadd.xlane.f32.xlu0 %v2964_v31  ;;  %v2968_v31 = vmul.f32 %v6714_v24, %v6714_v24 }
 0x3f4   :  { %3086 = vadd.xlane.f32.xlu1 %v2967_v9  ;;  %v7123_v9 = vld [vmem:[#allocation39_spill] sm:$0xff] }
 0x3f6   :  { %3084 = vadd.xlane.f32.xlu0 %v2966_v61 }
 0x3f7   :  { %v2708_v20 = vpop.xlane.xlu1 %2707 }
 0x3f8   :  { %v2776_v60 = vmul.f32 0.03125, %v2708_v20  ;;  %3090 = vadd.xlane.f32.xlu1 %v2969_v62 }
 0x3f9   :  { %v2706_v51 = vpop.xlane.xlu0 %2705 }
 0x3fa   :  { %v2775_v47 = vmul.f32 0.03125, %v2706_v51  ;;  %v2843_v13 = vsub.f32 %v7122_v21, %v2776_v60  ;;  %3088 = vadd.xlane.f32.xlu0 %v2968_v31  ;;  %v7126_v21 = vld [vmem:[#allocation40_spill] sm:$0xff] }
 0x3fc   :  { %v2842_v1 = vsub.f32 %v7123_v9, %v2775_v47  ;;  %v6722_v50 = vsel %vm2783_vm0, %v2843_v13, 0.0  ;;  %v7127_v9 = vld [vmem:[#allocation41_spill] sm:$0xff] }
 0x3fd   :  { %7124 = vst [vmem:[#allocation23_spill] sm:$0xff] %v6722_v50  ;;  %v2971_v49 = vmul.f32 %v6722_v50, %v6722_v50 }
 0x3fe   :  { %v6728_v61 = vsel %vm2783_vm0, %v2842_v1, 0.0 }
 0x3ff   :  { %7125 = vst [vmem:[#allocation25_spill] sm:$0xff] %v6728_v61  ;;  %3094 = vadd.xlane.f32.xlu1 %v2971_v49  ;;  %v2970_v62 = vmul.f32 %v6728_v61, %v6728_v61 }
 0x401   :  { %3092 = vadd.xlane.f32.xlu0 %v2970_v62 }
 0x406   :  { %v2712_v20 = vpop.xlane.xlu1 %2711 }
 0x407   :  { %v2778_v60 = vmul.f32 0.03125, %v2712_v20 }
 0x408   :  { %v2710_v51 = vpop.xlane.xlu0 %2709 }
 0x409   :  { %v2777_v47 = vmul.f32 0.03125, %v2710_v51  ;;  %v2845_v13 = vsub.f32 %v7126_v21, %v2778_v60 }
 0x40b   :  { %v2844_v31 = vsub.f32 %v7127_v9, %v2777_v47  ;;  %v6736_v50 = vsel %vm2783_vm0, %v2845_v13, 0.0 }
 0x40c   :  { %7128 = vst [vmem:[#allocation27_spill] sm:$0xff] %v6736_v50  ;;  %v2973_v1 = vmul.f32 %v6736_v50, %v6736_v50 }
 0x40d   :  { %v6742_v49 = vsel %vm2783_vm0, %v2844_v31, 0.0  ;;  %v2716_v20 = vpop.xlane.xlu1 %2715 }
 0x40e   :  { %7129 = vst [vmem:[#allocation28_spill] sm:$0xff] %v6742_v49  ;;  %3098 = vadd.xlane.f32.xlu1 %v2973_v1  ;;  %v2972_v62 = vmul.f32 %v6742_v49, %v6742_v49  ;;  %v2780_v51 = vmul.f32 0.03125, %v2716_v20 }
 0x40f   :  { %v2714_v60 = vpop.xlane.xlu0 %2713 }
 0x410   :  { %3096 = vadd.xlane.f32.xlu0 %v2972_v62  ;;  %v2779_v47 = vmul.f32 0.03125, %v2714_v60  ;;  %v2847_v21 = vsub.f32 %v6255_v29, %v2780_v51 }
 0x411   :  { %v2979_v13 = vpop.xlane.xlu1 %2978 }
 0x412   :  { %v2846_v9 = vsub.f32 %v6267_v45, %v2779_v47  ;;  %v6750_v50 = vsel %vm2783_vm0, %v2847_v21, 0.0  ;;  %v3105_v31 = vmul.f32 0.03125, %v2979_v13 }
 0x413   :  { %7130 = vst [vmem:[#allocation29_spill] sm:$0xff] %v6750_v50  ;;  %v2975_v1 = vmul.f32 %v6750_v50, %v6750_v50  ;;  %v2977_v61 = vpop.xlane.xlu0 %2976 }
 0x414   :  { %v6756_v20 = vsel %vm2783_vm0, %v2846_v9, 0.0  ;;  %v3169_v62 = vadd.f32 1e-05, %v3105_v31  ;;  %v3104_v60 = vmul.f32 0.03125, %v2977_v61 }
 0x415   :  { %7131 = vst [vmem:[#allocation30_spill] sm:$0xff] %v6756_v20  ;;  %3102 = vadd.xlane.f32.xlu1 %v2975_v1  ;;  %v2974_v29 = vmul.f32 %v6756_v20, %v6756_v20  ;;  %v2983_v45 = vpop.xlane.xlu1 %2982 }
 0x416   :  { %4260 = vrsqrt.f32 %v3169_v62  ;;  %v3107_v51 = vmul.f32 0.03125, %v2983_v45  ;;  %v3168_v47 = vadd.f32 1e-05, %v3104_v60 }
 0x417   :  { %3100 = vadd.xlane.f32.xlu0 %v2974_v29  ;;  %v2981_v21 = vpop.xlane.xlu0 %2980 }
 0x418   :  { %v3171_v13 = vadd.f32 1e-05, %v3107_v51  ;;  %4262 = vrsqrt.f32 %v3168_v47  ;;  %v3106_v50 = vmul.f32 0.03125, %v2981_v21 }
 0x419   :  { %v2987_v49 = vpop.xlane.xlu1 %2986 }
 0x41a   :  { %4264 = vrsqrt.f32 %v3171_v13  ;;  %v3170_v37 = vadd.f32 1e-05, %v3106_v50  ;;  %v3109_v9 = vmul.f32 0.03125, %v2987_v49  ;;  %v6763_v50 = vld [vmem:[%s6968_s3] ss:$0 sm:$0xff] }
 0x41b   :  { %v2985_v24 = vpop.xlane.xlu0 %2984 }
 0x41c   :  { %4266 = vrsqrt.f32 %v3170_v37  ;;  %v3173_v61 = vadd.f32 1e-05, %v3109_v9  ;;  %v3108_v31 = vmul.f32 0.03125, %v2985_v24 }
 0x41d   :  { %v2991_v1 = vpop.xlane.xlu1 %2990 }
 0x41e   :  { %4268 = vrsqrt.f32 %v3173_v61  ;;  %v3172_v20 = vadd.f32 1e-05, %v3108_v31  ;;  %v3111_v32 = vmul.f32 0.03125, %v2991_v1  ;;  %v7132_v31 = vld [vmem:[#allocation42_spill] sm:$0xff] }
 0x41f   :  { %v2989_v62 = vpop.xlane.xlu0 %2988 }
 0x420   :  { %4270 = vrsqrt.f32 %v3172_v20  ;;  %v3175_v60 = vadd.f32 1e-05, %v3111_v32  ;;  %v3110_v29 = vmul.f32 0.03125, %v2989_v62  ;;  %v6769_v32 = vld [vmem:[%s6968_s3 + $0x1] ss:$0 sm:$0xff] }
 0x421   :  { %v2995_v45 = vpop.xlane.xlu1 %2994 }
 0x422   :  { %4272 = vrsqrt.f32 %v3175_v60  ;;  %v3174_v51 = vadd.f32 1e-05, %v3110_v29  ;;  %v3113_v47 = vmul.f32 0.03125, %v2995_v45 }
 0x423   :  { %v4261_v21 = vpop.eup %4260  ;;  %v2993_v49 = vpop.xlane.xlu0 %2992 }
 0x424   :  { %v3297_v24 = vmul.f32 %v4261_v21, %v6253_v30  ;;  %4274 = vrsqrt.f32 %v3174_v51  ;;  %v3177_v13 = vadd.f32 1e-05, %v3113_v47  ;;  %v3112_v37 = vmul.f32 0.03125, %v2993_v49 }
 0x425   :  { %v4263_v9 = vpop.eup %4262  ;;  %v2999_v20 = vpop.xlane.xlu1 %2998 }
 0x426   :  { %v3367_v61 = vmul.f32 %v6763_v50, %v3297_v24  ;;  %v3296_v1 = vmul.f32 %v4263_v9, %v7132_v31  ;;  %4276 = vrsqrt.f32 %v3177_v13  ;;  %v3176_v62 = vadd.f32 1e-05, %v3112_v37 }
 0x427   :  { %v4265_v60 = vpop.eup %4264  ;;  %v3115_v29 = vmul.f32 0.03125, %v2999_v20  ;;  %v2997_v45 = vpop.xlane.xlu0 %2996 }
 0x428   :  { %v3435_v30 = vadd.f32 %v6769_v32, %v3367_v61  ;;  %v3299_v51 = vmul.f32 %v4265_v60, %v6272_v59  ;;  %v3366_v47 = vmul.f32 %v6763_v50, %v3296_v1  ;;  %4278 = vrsqrt.f32 %v3176_v62 }
 0x429   :  { %v4267_v21 = vpop.eup %4266  ;;  %v3179_v49 = vadd.f32 1e-05, %v3115_v29  ;;  %v3114_v40 = vmul.f32 0.03125, %v2997_v45  ;;  %v3003_v28 = vpop.xlane.xlu1 %3002 }
 0x42a   :  { %3499 = vst [vmem:[#allocation8 + $0x8] sm:$0xff] %v3435_v30  ;;  %v3369_v24 = vmul.f32 %v6763_v50, %v3299_v51  ;;  %v3434_v13 = vadd.f32 %v6769_v32, %v3366_v47  ;;  %v3298_v37 = vmul.f32 %v4267_v21, %v6281_v38  ;;  %v3117_v9 = vmul.f32 0.03125, %v3003_v28 }
 0x42b   :  { %v4269_v20 = vpop.eup %4268  ;;  %4280 = vrsqrt.f32 %v3179_v49  ;;  %v3178_v61 = vadd.f32 1e-05, %v3114_v40  ;;  %v3001_v31 = vpop.xlane.xlu0 %3000 }
 0x42c   :  { %v3437_v59 = vadd.f32 %v6769_v32, %v3369_v24  ;;  %3498 = vst [vmem:[#allocation8] sm:$0xff] %v3434_v13  ;;  %v3368_v1 = vmul.f32 %v6763_v50, %v3298_v37  ;;  %v3301_v62 = vmul.f32 %v4269_v20, %v6289_v26  ;;  %v3181_v60 = vadd.f32 1e-05, %v3117_v9 }
 0x42d   :  { %v4271_v29 = vpop.eup %4270  ;;  %4282 = vrsqrt.f32 %v3178_v61  ;;  %v3116_v45 = vmul.f32 0.03125, %v3001_v31  ;;  %v3007_v30 = vpop.xlane.xlu1 %3006 }
 0x42e   :  { %3501 = vst [vmem:[#allocation8 + $0x18] sm:$0xff] %v3437_v59  ;;  %v3436_v38 = vadd.f32 %v6769_v32, %v3368_v1  ;;  %v3371_v28 = vmul.f32 %v6763_v50, %v3301_v62  ;;  %v3300_v40 = vmul.f32 %v4271_v29, %v6299_v17  ;;  %4284 = vrsqrt.f32 %v3181_v60 }
 0x42f   :  { %v4273_v51 = vpop.eup %4272  ;;  %v3180_v47 = vadd.f32 1e-05, %v3116_v45  ;;  %v3119_v21 = vmul.f32 0.03125, %v3007_v30  ;;  %v3005_v49 = vpop.xlane.xlu0 %3004 }
 0x430   :  { %3500 = vst [vmem:[#allocation8 + $0x10] sm:$0xff] %v3436_v38  ;;  %v3439_v26 = vadd.f32 %v6769_v32, %v3371_v28  ;;  %v3370_v24 = vmul.f32 %v6763_v50, %v3300_v40  ;;  %v3303_v13 = vmul.f32 %v4273_v51, %v6308_v58  ;;  %v3118_v37 = vmul.f32 0.03125, %v3005_v49 }
 0x431   :  { %v4275_v9 = vpop.eup %4274  ;;  %4286 = vrsqrt.f32 %v3180_v47  ;;  %v3183_v20 = vadd.f32 1e-05, %v3119_v21  ;;  %v3011_v61 = vpop.xlane.xlu1 %3010 }
 0x432   :  { %3503 = vst [vmem:[#allocation8 + $0x28] sm:$0xff] %v3439_v26  ;;  %v3438_v17 = vadd.f32 %v6769_v32, %v3370_v24  ;;  %v3373_v31 = vmul.f32 %v6763_v50, %v3303_v13  ;;  %v3302_v59 = vmul.f32 %v4275_v9, %v6321_v4  ;;  %v3182_v1 = vadd.f32 1e-05, %v3118_v37 }
 0x433   :  { %v4277_v62 = vpop.eup %4276  ;;  %4288 = vrsqrt.f32 %v3183_v20  ;;  %v3121_v60 = vmul.f32 0.03125, %v3011_v61  ;;  %v3009_v29 = vpop.xlane.xlu0 %3008 }
 0x434   :  { %3502 = vst [vmem:[#allocation8 + $0x20] sm:$0xff] %v3438_v17  ;;  %v3441_v58 = vadd.f32 %v6769_v32, %v3373_v31  ;;  %v3372_v45 = vmul.f32 %v6763_v50, %v3302_v59  ;;  %v3305_v30 = vmul.f32 %v4277_v62, %v6326_v3  ;;  %4290 = vrsqrt.f32 %v3182_v1 }
 0x435   :  { %v4279_v38 = vpop.eup %4278  ;;  %v3185_v28 = vadd.f32 1e-05, %v3121_v60  ;;  %v3120_v40 = vmul.f32 0.03125, %v3009_v29  ;;  %v3015_v51 = vpop.xlane.xlu1 %3014 }
 0x436   :  { %3505 = vst [vmem:[#allocation8 + $0x38] sm:$0xff] %v3441_v58  ;;  %v3440_v4 = vadd.f32 %v6769_v32, %v3372_v45  ;;  %v3375_v47 = vmul.f32 %v6763_v50, %v3305_v30  ;;  %v3304_v21 = vmul.f32 %v4279_v38, %v6337_v56  ;;  %v3123_v49 = vmul.f32 0.03125, %v3015_v51 }
 0x437   :  { %4292 = vrsqrt.f32 %v3185_v28  ;;  %v3184_v26 = vadd.f32 1e-05, %v3120_v40  ;;  %v3013_v24 = vpop.xlane.xlu0 %3012 }
 0x438   :  { %v4281_v13 = vpop.eup %4280  ;;  %3504 = vst [vmem:[#allocation8 + $0x30] sm:$0xff] %v3440_v4  ;;  %v3443_v3 = vadd.f32 %v6769_v32, %v3375_v47  ;;  %v3374_v37 = vmul.f32 %v6763_v50, %v3304_v21  ;;  %v3187_v9 = vadd.f32 1e-05, %v3123_v49  ;;  %v3122_v20 = vmul.f32 0.03125, %v3013_v24 }
 0x439   :  { %v3307_v61 = vmul.f32 %v4281_v13, %v6344_v14  ;;  %4294 = vrsqrt.f32 %v3184_v26  ;;  %v3019_v17 = vpop.xlane.xlu1 %3018 }
 0x43a   :  { %v4283_v31 = vpop.eup %4282  ;;  %3507 = vst [vmem:[#allocation8 + $0x48] sm:$0xff] %v3443_v3  ;;  %v3442_v56 = vadd.f32 %v6769_v32, %v3374_v37  ;;  %4296 = vrsqrt.f32 %v3187_v9  ;;  %v3186_v59 = vadd.f32 1e-05, %v3122_v20  ;;  %v3125_v1 = vmul.f32 0.03125, %v3019_v17 }
 0x43b   :  { %v4285_v62 = vpop.eup %4284  ;;  %v3377_v60 = vmul.f32 %v6763_v50, %v3307_v61  ;;  %v3306_v29 = vmul.f32 %v4283_v31, %v6355_v33  ;;  %v3017_v58 = vpop.xlane.xlu0 %3016 }
 0x43c   :  { %3506 = vst [vmem:[#allocation8 + $0x40] sm:$0xff] %v3442_v56  ;;  %v3309_v45 = vmul.f32 %v4285_v62, %v6364_v42  ;;  %4298 = vrsqrt.f32 %v3186_v59  ;;  %v3189_v14 = vadd.f32 1e-05, %v3125_v1  ;;  %v3124_v30 = vmul.f32 0.03125, %v3017_v58 }
 0x43d   :  { %v3445_v38 = vadd.f32 %v6769_v32, %v3377_v60  ;;  %v3376_v28 = vmul.f32 %v6763_v50, %v3306_v29  ;;  %v3023_v40 = vpop.xlane.xlu1 %3022 }
 0x43e   :  { %v4287_v51 = vpop.eup %4286  ;;  %v3379_v4 = vmul.f32 %v6763_v50, %v3309_v45  ;;  %4300 = vrsqrt.f32 %v3189_v14  ;;  %v3188_v47 = vadd.f32 1e-05, %v3124_v30  ;;  %v3127_v21 = vmul.f32 0.03125, %v3023_v40 }
 0x43f   :  { %3509 = vst [vmem:[#allocation8 + $0x58] sm:$0xff] %v3445_v38  ;;  %v3444_v33 = vadd.f32 %v6769_v32, %v3376_v28  ;;  %v3308_v49 = vmul.f32 %v4287_v51, %v6377_v22  ;;  %v3021_v42 = vpop.xlane.xlu0 %3020 }
 0x440   :  { %v4289_v26 = vpop.eup %4288  ;;  %v3447_v24 = vadd.f32 %v6769_v32, %v3379_v4  ;;  %4302 = vrsqrt.f32 %v3188_v47  ;;  %v3191_v13 = vadd.f32 1e-05, %v3127_v21  ;;  %v3126_v3 = vmul.f32 0.03125, %v3021_v42 }
 0x441   :  { %v4291_v37 = vpop.eup %4290  ;;  %3508 = vst [vmem:[#allocation8 + $0x50] sm:$0xff] %v3444_v33  ;;  %v3378_v9 = vmul.f32 %v6763_v50, %v3308_v49  ;;  %v3311_v20 = vmul.f32 %v4289_v26, %v6382_v15  ;;  %v3027_v61 = vpop.xlane.xlu1 %3026 }
 0x442   :  { %3511 = vst [vmem:[#allocation8 + $0x68] sm:$0xff] %v3447_v24  ;;  %v3310_v17 = vmul.f32 %v4291_v37, %v6393_v57  ;;  %4304 = vrsqrt.f32 %v3191_v13  ;;  %v3190_v31 = vadd.f32 1e-05, %v3126_v3  ;;  %v3129_v22 = vmul.f32 0.03125, %v3027_v61 }
 0x443   :  { %v3446_v56 = vadd.f32 %v6769_v32, %v3378_v9  ;;  %v3381_v59 = vmul.f32 %v6763_v50, %v3311_v20  ;;  %v3025_v1 = vpop.xlane.xlu0 %3024 }
 0x444   :  { %v4293_v62 = vpop.eup %4292  ;;  %v3380_v60 = vmul.f32 %v6763_v50, %v3310_v17  ;;  %4306 = vrsqrt.f32 %v3190_v31  ;;  %v3193_v29 = vadd.f32 1e-05, %v3129_v22  ;;  %v3128_v58 = vmul.f32 0.03125, %v3025_v1 }
 0x445   :  { %3510 = vst [vmem:[#allocation8 + $0x60] sm:$0xff] %v3446_v56  ;;  %v3449_v15 = vadd.f32 %v6769_v32, %v3381_v59  ;;  %v3313_v45 = vmul.f32 %v4293_v62, %v6400_v6  ;;  %v3031_v57 = vpop.xlane.xlu1 %3030 }
 0x446   :  { %v4295_v14 = vpop.eup %4294  ;;  %v3448_v30 = vadd.f32 %v6769_v32, %v3380_v60  ;;  %4308 = vrsqrt.f32 %v3193_v29  ;;  %v3192_v38 = vadd.f32 1e-05, %v3128_v58  ;;  %v3131_v28 = vmul.f32 0.03125, %v3031_v57 }
 0x447   :  { %v4297_v40 = vpop.eup %4296  ;;  %3513 = vst [vmem:[#allocation8 + $0x78] sm:$0xff] %v3449_v15  ;;  %v3383_v51 = vmul.f32 %v6763_v50, %v3313_v45  ;;  %v3312_v4 = vmul.f32 %v4295_v14, %v6411_v25  ;;  %v3029_v47 = vpop.xlane.xlu0 %3028 }
 0x448   :  { %3512 = vst [vmem:[#allocation8 + $0x70] sm:$0xff] %v3448_v30  ;;  %v3315_v21 = vmul.f32 %v4297_v40, %v6420_v53  ;;  %4310 = vrsqrt.f32 %v3192_v38  ;;  %v3195_v33 = vadd.f32 1e-05, %v3131_v28  ;;  %v3130_v6 = vmul.f32 0.03125, %v3029_v47 }
 0x449   :  { %v4299_v49 = vpop.eup %4298  ;;  %v3451_v42 = vadd.f32 %v6769_v32, %v3383_v51  ;;  %v3382_v26 = vmul.f32 %v6763_v50, %v3312_v4  ;;  %v3035_v24 = vpop.xlane.xlu1 %3034 }
 0x44a   :  { %v3385_v13 = vmul.f32 %v6763_v50, %v3315_v21  ;;  %v3314_v3 = vmul.f32 %v4299_v49, %v6433_v35  ;;  %4312 = vrsqrt.f32 %v3195_v33  ;;  %v3194_v37 = vadd.f32 1e-05, %v3130_v6 }
 0x44b   :  { %v4301_v25 = vpop.eup %4300  ;;  %3515 = vst [vmem:[#allocation8 + $0x88] sm:$0xff] %v3451_v42  ;;  %v3450_v9 = vadd.f32 %v6769_v32, %v3382_v26  ;;  %v3133_v53 = vmul.f32 0.03125, %v3035_v24  ;;  %v3033_v20 = vpop.xlane.xlu0 %3032 }
 0x44c   :  { %v3453_v61 = vadd.f32 %v6769_v32, %v3385_v13  ;;  %v3384_v17 = vmul.f32 %v6763_v50, %v3314_v3  ;;  %v3317_v31 = vmul.f32 %v4301_v25, %v6438_v23  ;;  %4314 = vrsqrt.f32 %v3194_v37 }
 0x44d   :  { %v4303_v22 = vpop.eup %4302  ;;  %3514 = vst [vmem:[#allocation8 + $0x80] sm:$0xff] %v3450_v9  ;;  %v3197_v56 = vadd.f32 1e-05, %v3133_v53  ;;  %v3132_v59 = vmul.f32 0.03125, %v3033_v20  ;;  %v3039_v35 = vpop.xlane.xlu1 %3038 }
 0x44e   :  { %3517 = vst [vmem:[#allocation8 + $0x98] sm:$0xff] %v3453_v61  ;;  %v3452_v1 = vadd.f32 %v6769_v32, %v3384_v17  ;;  %v3387_v62 = vmul.f32 %v6763_v50, %v3317_v31  ;;  %v3316_v60 = vmul.f32 %v4303_v22, %v6449_v54  ;;  %v3135_v29 = vmul.f32 0.03125, %v3039_v35 }
 0x44f   :  { %v4305_v58 = vpop.eup %4304  ;;  %4316 = vrsqrt.f32 %v3197_v56  ;;  %v3196_v15 = vadd.f32 1e-05, %v3132_v59  ;;  %v3037_v45 = vpop.xlane.xlu0 %3036 }
 0x450   :  { %3516 = vst [vmem:[#allocation8 + $0x90] sm:$0xff] %v3452_v1  ;;  %v3455_v23 = vadd.f32 %v6769_v32, %v3387_v62  ;;  %v3386_v57 = vmul.f32 %v6763_v50, %v3316_v60  ;;  %v3319_v14 = vmul.f32 %v4305_v58, %v6456_v0  ;;  %v3199_v30 = vadd.f32 1e-05, %v3135_v29 }
 0x451   :  { %v4307_v38 = vpop.eup %4306  ;;  %4318 = vrsqrt.f32 %v3196_v15  ;;  %v3134_v28 = vmul.f32 0.03125, %v3037_v45  ;;  %v3043_v40 = vpop.xlane.xlu1 %3042 }
 0x452   :  { %3519 = vst [vmem:[#allocation8 + $0xa8] sm:$0xff] %v3455_v23  ;;  %v3454_v54 = vadd.f32 %v6769_v32, %v3386_v57  ;;  %v3389_v51 = vmul.f32 %v6763_v50, %v3319_v14  ;;  %v3318_v4 = vmul.f32 %v4307_v38, %v6467_v12  ;;  %4320 = vrsqrt.f32 %v3199_v30 }
 0x453   :  { %v4309_v47 = vpop.eup %4308  ;;  %v3198_v21 = vadd.f32 1e-05, %v3134_v28  ;;  %v3137_v33 = vmul.f32 0.03125, %v3043_v40  ;;  %v3041_v6 = vpop.xlane.xlu0 %3040 }
 0x454   :  { %3518 = vst [vmem:[#allocation8 + $0xa0] sm:$0xff] %v3454_v54  ;;  %v3457_v0 = vadd.f32 %v6769_v32, %v3389_v51  ;;  %v3388_v49 = vmul.f32 %v6763_v50, %v3318_v4  ;;  %v3321_v42 = vmul.f32 %v4309_v47, %v6474_v18  ;;  %v3136_v26 = vmul.f32 0.03125, %v3041_v6 }
 0x455   :  { %v4311_v24 = vpop.eup %4310  ;;  %4322 = vrsqrt.f32 %v3198_v21  ;;  %v3201_v13 = vadd.f32 1e-05, %v3137_v33  ;;  %v3047_v3 = vpop.xlane.xlu1 %3046 }
 0x456   :  { %3521 = vst [vmem:[#allocation8 + $0xb8] sm:$0xff] %v3457_v0  ;;  %v3456_v12 = vadd.f32 %v6769_v32, %v3388_v49  ;;  %v3391_v37 = vmul.f32 %v6763_v50, %v3321_v42  ;;  %v3320_v25 = vmul.f32 %v4311_v24, %v6485_v10  ;;  %v3200_v9 = vadd.f32 1e-05, %v3136_v26 }
 0x457   :  { %v4313_v53 = vpop.eup %4312  ;;  %4324 = vrsqrt.f32 %v3201_v13  ;;  %v3139_v20 = vmul.f32 0.03125, %v3047_v3  ;;  %v3045_v61 = vpop.xlane.xlu0 %3044 }
 0x458   :  { %3520 = vst [vmem:[#allocation8 + $0xb0] sm:$0xff] %v3456_v12  ;;  %v3459_v18 = vadd.f32 %v6769_v32, %v3391_v37  ;;  %v3390_v17 = vmul.f32 %v6763_v50, %v3320_v25  ;;  %v3323_v31 = vmul.f32 %v4313_v53, %v6490_v39  ;;  %4326 = vrsqrt.f32 %v3200_v9 }
 0x459   :  { %v4315_v22 = vpop.eup %4314  ;;  %v3203_v56 = vadd.f32 1e-05, %v3139_v20  ;;  %v3138_v59 = vmul.f32 0.03125, %v3045_v61  ;;  %v3051_v35 = vpop.xlane.xlu1 %3050 }
 0x45a   :  { %3523 = vst [vmem:[#allocation8 + $0xc8] sm:$0xff] %v3459_v18  ;;  %v3458_v10 = vadd.f32 %v6769_v32, %v3390_v17  ;;  %v3393_v1 = vmul.f32 %v6763_v50, %v3323_v31  ;;  %v3322_v62 = vmul.f32 %v4315_v22, %v6499_v41  ;;  %v3141_v60 = vmul.f32 0.03125, %v3051_v35 }
 0x45b   :  { %4328 = vrsqrt.f32 %v3203_v56  ;;  %v3202_v29 = vadd.f32 1e-05, %v3138_v59  ;;  %v3049_v58 = vpop.xlane.xlu0 %3048 }
 0x45c   :  { %v4317_v15 = vpop.eup %4316  ;;  %3522 = vst [vmem:[#allocation8 + $0xc0] sm:$0xff] %v3458_v10  ;;  %v3461_v39 = vadd.f32 %v6769_v32, %v3393_v1  ;;  %v3392_v45 = vmul.f32 %v6763_v50, %v3322_v62  ;;  %v3205_v23 = vadd.f32 1e-05, %v3141_v60  ;;  %v3140_v57 = vmul.f32 0.03125, %v3049_v58 }
 0x45d   :  { %v3325_v14 = vmul.f32 %v4317_v15, %v6506_v46  ;;  %4330 = vrsqrt.f32 %v3202_v29  ;;  %v3055_v30 = vpop.xlane.xlu1 %3054 }
 0x45e   :  { %v4319_v38 = vpop.eup %4318  ;;  %3525 = vst [vmem:[#allocation8 + $0xd8] sm:$0xff] %v3461_v39  ;;  %v3460_v41 = vadd.f32 %v6769_v32, %v3392_v45  ;;  %4332 = vrsqrt.f32 %v3205_v23  ;;  %v3204_v28 = vadd.f32 1e-05, %v3140_v57  ;;  %v3143_v40 = vmul.f32 0.03125, %v3055_v30 }
 0x45f   :  { %v4321_v54 = vpop.eup %4320  ;;  %v3395_v51 = vmul.f32 %v6763_v50, %v3325_v14  ;;  %v3324_v4 = vmul.f32 %v4319_v38, %v6515_v52  ;;  %v3053_v47 = vpop.xlane.xlu0 %3052 }
 0x460   :  { %3524 = vst [vmem:[#allocation8 + $0xd0] sm:$0xff] %v3460_v41  ;;  %v3327_v21 = vmul.f32 %v4321_v54, %v6522_v16  ;;  %4334 = vrsqrt.f32 %v3204_v28  ;;  %v3207_v46 = vadd.f32 1e-05, %v3143_v40  ;;  %v3142_v33 = vmul.f32 0.03125, %v3053_v47 }
 0x461   :  { %v3463_v6 = vadd.f32 %v6769_v32, %v3395_v51  ;;  %v3394_v0 = vmul.f32 %v6763_v50, %v3324_v4  ;;  %v3059_v49 = vpop.xlane.xlu1 %3058 }
 0x462   :  { %v4323_v42 = vpop.eup %4322  ;;  %v3397_v26 = vmul.f32 %v6763_v50, %v3327_v21  ;;  %4336 = vrsqrt.f32 %v3207_v46  ;;  %v3206_v24 = vadd.f32 1e-05, %v3142_v33  ;;  %v3145_v13 = vmul.f32 0.03125, %v3059_v49 }
 0x463   :  { %3527 = vst [vmem:[#allocation8 + $0xe8] sm:$0xff] %v3463_v6  ;;  %v3462_v52 = vadd.f32 %v6769_v32, %v3394_v0  ;;  %v3326_v3 = vmul.f32 %v4323_v42, %v6533_v19  ;;  %v3057_v16 = vpop.xlane.xlu0 %3056  ;;  %v7133_v0 = vld [vmem:[#allocation13_spill] sm:$0xff] }
 0x464   :  { %v4325_v12 = vpop.eup %4324  ;;  %v3465_v37 = vadd.f32 %v6769_v32, %v3397_v26  ;;  %4338 = vrsqrt.f32 %v3206_v24  ;;  %v3209_v25 = vadd.f32 1e-05, %v3145_v13  ;;  %v3144_v9 = vmul.f32 0.03125, %v3057_v16 }
 0x465   :  { %v4327_v53 = vpop.eup %4326  ;;  %3526 = vst [vmem:[#allocation8 + $0xe0] sm:$0xff] %v3462_v52  ;;  %v3396_v20 = vmul.f32 %v6763_v50, %v3326_v3  ;;  %v3329_v61 = vmul.f32 %v4325_v12, %v6538_v11  ;;  %v3063_v18 = vpop.xlane.xlu1 %3062  ;;  %v7134_v3 = vld [vmem:[#allocation12_spill] sm:$0xff] }
 0x466   :  { %3529 = vst [vmem:[#allocation8 + $0xf8] sm:$0xff] %v3465_v37  ;;  %v3328_v17 = vmul.f32 %v4327_v53, %v6547_v8  ;;  %4340 = vrsqrt.f32 %v3209_v25  ;;  %v3208_v31 = vadd.f32 1e-05, %v3144_v9  ;;  %v3147_v19 = vmul.f32 0.03125, %v3063_v18 }
 0x467   :  { %v3464_v22 = vadd.f32 %v6769_v32, %v3396_v20  ;;  %v3399_v56 = vmul.f32 %v6763_v50, %v3329_v61  ;;  %v3061_v59 = vpop.xlane.xlu0 %3060  ;;  %v7135_v61 = vld [vmem:[#allocation15_spill] sm:$0xff] }
 0x468   :  { %v4329_v35 = vpop.eup %4328  ;;  %v3398_v10 = vmul.f32 %v6763_v50, %v3328_v17  ;;  %4342 = vrsqrt.f32 %v3208_v31  ;;  %v3211_v1 = vadd.f32 1e-05, %v3147_v19  ;;  %v3146_v62 = vmul.f32 0.03125, %v3061_v59 }
 0x469   :  { %3528 = vst [vmem:[#allocation8 + $0xf0] sm:$0xff] %v3464_v22  ;;  %v3467_v11 = vadd.f32 %v6769_v32, %v3399_v56  ;;  %v3331_v60 = vmul.f32 %v4329_v35, %v6551_v36  ;;  %v3067_v8 = vpop.xlane.xlu1 %3066 }
 0x46a   :  { %v4331_v29 = vpop.eup %4330  ;;  %v3466_v58 = vadd.f32 %v6769_v32, %v3398_v10  ;;  %4344 = vrsqrt.f32 %v3211_v1  ;;  %v3210_v15 = vadd.f32 1e-05, %v3146_v62  ;;  %v3149_v39 = vmul.f32 0.03125, %v3067_v8 }
 0x46b   :  { %v4333_v45 = vpop.eup %4332  ;;  %3531 = vst [vmem:[#allocation8 + $0x108] sm:$0xff] %v3467_v11  ;;  %v3401_v23 = vmul.f32 %v6763_v50, %v3331_v60  ;;  %v3330_v57 = vmul.f32 %v4331_v29, %v6557_v43  ;;  %v3065_v14 = vpop.xlane.xlu0 %3064 }
 0x46c   :  { %3530 = vst [vmem:[#allocation8 + $0x100] sm:$0xff] %v3466_v58  ;;  %v3333_v30 = vmul.f32 %v4333_v45, %v6566_v7  ;;  %4346 = vrsqrt.f32 %v3210_v15  ;;  %v3213_v38 = vadd.f32 1e-05, %v3149_v39  ;;  %v3148_v36 = vmul.f32 0.03125, %v3065_v14 }
 0x46d   :  { %v4335_v41 = vpop.eup %4334  ;;  %v3469_v28 = vadd.f32 %v6769_v32, %v3401_v23  ;;  %v3400_v40 = vmul.f32 %v6763_v50, %v3330_v57  ;;  %v3071_v54 = vpop.xlane.xlu1 %3070  ;;  %v7136_v57 = vld [vmem:[#allocation14_spill] sm:$0xff] }
 0x46e   :  { %v3403_v51 = vmul.f32 %v6763_v50, %v3333_v30  ;;  %v3332_v4 = vmul.f32 %v4335_v41, %v6576_v2  ;;  %4348 = vrsqrt.f32 %v3213_v38  ;;  %v3212_v47 = vadd.f32 1e-05, %v3148_v36 }
 0x46f   :  { %v4337_v43 = vpop.eup %4336  ;;  %3533 = vst [vmem:[#allocation8 + $0x118] sm:$0xff] %v3469_v28  ;;  %v3468_v21 = vadd.f32 %v6769_v32, %v3400_v40  ;;  %v3151_v7 = vmul.f32 0.03125, %v3071_v54  ;;  %v3069_v46 = vpop.xlane.xlu0 %3068  ;;  %v7137_v40 = vld [vmem:[#allocation17_spill] sm:$0xff] }
 0x470   :  { %v3471_v33 = vadd.f32 %v6769_v32, %v3403_v51  ;;  %v3402_v6 = vmul.f32 %v6763_v50, %v3332_v4  ;;  %v3335_v49 = vmul.f32 %v4337_v43, %v7133_v0  ;;  %4350 = vrsqrt.f32 %v3212_v47 }
 0x471   :  { %v4339_v42 = vpop.eup %4338  ;;  %3532 = vst [vmem:[#allocation8 + $0x110] sm:$0xff] %v3468_v21  ;;  %v3215_v26 = vadd.f32 1e-05, %v3151_v7  ;;  %v3150_v24 = vmul.f32 0.03125, %v3069_v46  ;;  %v3075_v2 = vpop.xlane.xlu1 %3074  ;;  %v7138_v46 = vld [vmem:[#allocation16_spill] sm:$0xff] }
 0x472   :  { %3535 = vst [vmem:[#allocation8 + $0x128] sm:$0xff] %v3471_v33  ;;  %v3470_v13 = vadd.f32 %v6769_v32, %v3402_v6  ;;  %v3405_v52 = vmul.f32 %v6763_v50, %v3335_v49  ;;  %v3334_v16 = vmul.f32 %v4339_v42, %v7134_v3  ;;  %v3153_v12 = vmul.f32 0.03125, %v3075_v2 }
 0x473   :  { %v4341_v37 = vpop.eup %4340  ;;  %4352 = vrsqrt.f32 %v3215_v26  ;;  %v3214_v25 = vadd.f32 1e-05, %v3150_v24  ;;  %v3073_v9 = vpop.xlane.xlu0 %3072 }
 0x474   :  { %3534 = vst [vmem:[#allocation8 + $0x120] sm:$0xff] %v3470_v13  ;;  %v3473_v53 = vadd.f32 %v6769_v32, %v3405_v52  ;;  %v3404_v20 = vmul.f32 %v6763_v50, %v3334_v16  ;;  %v3337_v18 = vmul.f32 %v4341_v37, %v7135_v61  ;;  %v3217_v17 = vadd.f32 1e-05, %v3153_v12  ;;  %v7139_v52 = vld [vmem:[#allocation18_spill] sm:$0xff] }
 0x475   :  { %v4343_v31 = vpop.eup %4342  ;;  %4354 = vrsqrt.f32 %v3214_v25  ;;  %v3152_v19 = vmul.f32 0.03125, %v3073_v9  ;;  %v3079_v22 = vpop.xlane.xlu1 %3078 }
 0x476   :  { %3537 = vst [vmem:[#allocation8 + $0x138] sm:$0xff] %v3473_v53  ;;  %v3472_v56 = vadd.f32 %v6769_v32, %v3404_v20  ;;  %v3407_v59 = vmul.f32 %v6763_v50, %v3337_v18  ;;  %v3336_v35 = vmul.f32 %v4343_v31, %v6599_v48  ;;  %4356 = vrsqrt.f32 %v3217_v17 }
 0x477   :  { %v4345_v10 = vpop.eup %4344  ;;  %v3216_v1 = vadd.f32 1e-05, %v3152_v19  ;;  %v3155_v62 = vmul.f32 0.03125, %v3079_v22  ;;  %v3077_v11 = vpop.xlane.xlu0 %3076 }
 0x478   :  { %3536 = vst [vmem:[#allocation8 + $0x130] sm:$0xff] %v3472_v56  ;;  %v3475_v60 = vadd.f32 %v6769_v32, %v3407_v59  ;;  %v3406_v8 = vmul.f32 %v6763_v50, %v3336_v35  ;;  %v3339_v29 = vmul.f32 %v4345_v10, %v6608_v5  ;;  %v3154_v58 = vmul.f32 0.03125, %v3077_v11 }
 0x479   :  { %v4347_v15 = vpop.eup %4346  ;;  %4358 = vrsqrt.f32 %v3216_v1  ;;  %v3219_v39 = vadd.f32 1e-05, %v3155_v62  ;;  %v3083_v45 = vpop.xlane.xlu1 %3082 }
 0x47a   :  { %3539 = vst [vmem:[#allocation8 + $0x148] sm:$0xff] %v3475_v60  ;;  %v3474_v48 = vadd.f32 %v6769_v32, %v3406_v8  ;;  %v3409_v23 = vmul.f32 %v6763_v50, %v3339_v29  ;;  %v3338_v14 = vmul.f32 %v4347_v15, %v7136_v57  ;;  %v3218_v30 = vadd.f32 1e-05, %v3154_v58 }
 0x47b   :  { %v4349_v38 = vpop.eup %4348  ;;  %4360 = vrsqrt.f32 %v3219_v39  ;;  %v3157_v36 = vmul.f32 0.03125, %v3083_v45  ;;  %v3081_v41 = vpop.xlane.xlu0 %3080 }
 0x47c   :  { %3538 = vst [vmem:[#allocation8 + $0x140] sm:$0xff] %v3474_v48  ;;  %v3477_v5 = vadd.f32 %v6769_v32, %v3409_v23  ;;  %v3408_v28 = vmul.f32 %v6763_v50, %v3338_v14  ;;  %v3341_v54 = vmul.f32 %v4349_v38, %v7137_v40  ;;  %4362 = vrsqrt.f32 %v3218_v30  ;;  %v7141_v40 = vld [vmem:[#allocation20_spill] sm:$0xff] }
 0x47d   :  { %v4351_v51 = vpop.eup %4350  ;;  %v3221_v4 = vadd.f32 1e-05, %v3157_v36  ;;  %v3156_v47 = vmul.f32 0.03125, %v3081_v41  ;;  %v3087_v43 = vpop.xlane.xlu1 %3086  ;;  %v7140_v36 = vld [vmem:[#allocation26_spill] sm:$0xff] }
 0x47e   :  { %3541 = vst [vmem:[#allocation8 + $0x158] sm:$0xff] %v3477_v5  ;;  %v3476_v21 = vadd.f32 %v6769_v32, %v3408_v28  ;;  %v3411_v7 = vmul.f32 %v6763_v50, %v3341_v54  ;;  %v3340_v33 = vmul.f32 %v4351_v51, %v7138_v46  ;;  %v3159_v6 = vmul.f32 0.03125, %v3087_v43  ;;  %v7142_v51 = vld [vmem:[#allocation19_spill] sm:$0xff]  ;;  %v7143_v46 = vld [vmem:[#allocation22_spill] sm:$0xff] }
 0x47f   :  { %4364 = vrsqrt.f32 %v3221_v4  ;;  %v3220_v0 = vadd.f32 1e-05, %v3156_v47  ;;  %v3085_v49 = vpop.xlane.xlu0 %3084 }
 0x480   :  { %v4353_v42 = vpop.eup %4352  ;;  %3540 = vst [vmem:[#allocation8 + $0x150] sm:$0xff] %v3476_v21  ;;  %v3479_v26 = vadd.f32 %v6769_v32, %v3411_v7  ;;  %v3410_v24 = vmul.f32 %v6763_v50, %v3340_v33  ;;  %v3223_v2 = vadd.f32 1e-05, %v3159_v6  ;;  %v3158_v13 = vmul.f32 0.03125, %v3085_v49 }
 0x481   :  { %v3343_v3 = vmul.f32 %v4353_v42, %v7139_v52  ;;  %4366 = vrsqrt.f32 %v3220_v0  ;;  %v3091_v16 = vpop.xlane.xlu1 %3090 }
 0x482   :  { %v4355_v12 = vpop.eup %4354  ;;  %3543 = vst [vmem:[#allocation8 + $0x168] sm:$0xff] %v3479_v26  ;;  %v3478_v37 = vadd.f32 %v6769_v32, %v3410_v24  ;;  %4368 = vrsqrt.f32 %v3223_v2  ;;  %v3222_v25 = vadd.f32 1e-05, %v3158_v13  ;;  %v3161_v9 = vmul.f32 0.03125, %v3091_v16  ;;  %v7144_v26 = vld [vmem:[#allocation21_spill] sm:$0xff]  ;;  %v7145_v16 = vld [vmem:[#allocation24_spill] sm:$0xff] }
 0x483   :  { %v4357_v53 = vpop.eup %4356  ;;  %v3413_v20 = vmul.f32 %v6763_v50, %v3343_v3  ;;  %v3342_v61 = vmul.f32 %v4355_v12, %v6641_v27  ;;  %v3089_v18 = vpop.xlane.xlu0 %3088 }
 0x484   :  { %3542 = vst [vmem:[#allocation8 + $0x160] sm:$0xff] %v3478_v37  ;;  %v3345_v17 = vmul.f32 %v4357_v53, %v6650_v55  ;;  %4370 = vrsqrt.f32 %v3222_v25  ;;  %v3225_v31 = vadd.f32 1e-05, %v3161_v9  ;;  %v3160_v19 = vmul.f32 0.03125, %v3089_v18 }
 0x485   :  { %v3481_v22 = vadd.f32 %v6769_v32, %v3413_v20  ;;  %v3412_v56 = vmul.f32 %v6763_v50, %v3342_v61 }
 0x486   :  { %v4359_v59 = vpop.eup %4358  ;;  %v3415_v35 = vmul.f32 %v6763_v50, %v3345_v17  ;;  %4372 = vrsqrt.f32 %v3225_v31  ;;  %v3224_v10 = vadd.f32 1e-05, %v3160_v19  ;;  %v7146_v17 = vld [vmem:[#allocation23_spill] sm:$0xff] }
 0x487   :  { %3545 = vst [vmem:[#allocation8 + $0x178] sm:$0xff] %v3481_v22  ;;  %v3480_v27 = vadd.f32 %v6769_v32, %v3412_v56  ;;  %v3344_v62 = vmul.f32 %v4359_v59, %v6660_v44 }
 0x488   :  { %v3095_v1 = vpop.xlane.xlu1 %3094  ;;  %v4361_v55 = vpop.eup %4360  ;;  %v3483_v60 = vadd.f32 %v6769_v32, %v3415_v35  ;;  %4374 = vrsqrt.f32 %v3224_v10  ;;  %v7147_v35 = vld [vmem:[#allocation25_spill] sm:$0xff] }
 0x489   :  { %v3163_v11 = vmul.f32 0.03125, %v3095_v1  ;;  %v4363_v29 = vpop.eup %4362  ;;  %3544 = vst [vmem:[#allocation8 + $0x170] sm:$0xff] %v3480_v27  ;;  %v3414_v58 = vmul.f32 %v6763_v50, %v3344_v62  ;;  %v3347_v15 = vmul.f32 %v4361_v55, %v6664_v63  ;;  %v4388_v27 = vld [vmem:[%s6968_s3] ss:$0 sm:$0xff] }
 0x48a   :  { %v3093_v8 = vpop.xlane.xlu0 %3092  ;;  %3547 = vst [vmem:[#allocation8 + $0x188] sm:$0xff] %v3483_v60  ;;  %v3346_v48 = vmul.f32 %v4363_v29, %v6669_v34 }
 0x48b   :  { %v3227_v39 = vadd.f32 1e-05, %v3163_v11  ;;  %v3162_v45 = vmul.f32 0.03125, %v3093_v8  ;;  %v3482_v23 = vadd.f32 %v6769_v32, %v3414_v58  ;;  %v3417_v44 = vmul.f32 %v6763_v50, %v3347_v15 }
 0x48c   :  { %v4365_v14 = vpop.eup %4364  ;;  %v3416_v30 = vmul.f32 %v6763_v50, %v3346_v48 }
 0x48d   :  { %4376 = vrsqrt.f32 %v3227_v39  ;;  %v3226_v57 = vadd.f32 1e-05, %v3162_v45  ;;  %3546 = vst [vmem:[#allocation8 + $0x180] sm:$0xff] %v3482_v23  ;;  %v3485_v38 = vadd.f32 %v6769_v32, %v3417_v44  ;;  %v3349_v41 = vmul.f32 %v4365_v14, %v7140_v36  ;;  %v7148_v39 = vld [vmem:[#allocation27_spill] sm:$0xff]  ;;  %v7149_v44 = vld [vmem:[#allocation28_spill] sm:$0xff] }
 0x48e   :  { %v4367_v63 = vpop.eup %4366  ;;  %v3484_v5 = vadd.f32 %v6769_v32, %v3416_v30  ;;  %v4389_v14 = vld [vmem:[%s6968_s3 + $0x1] ss:$0 sm:$0xff]  ;;  %s4450_s3 = scalar_lea.vmem %s3568_s12, 8192 }
 0x48f   :  { %4378 = vrsqrt.f32 %v3226_v57  ;;  %v4369_v28 = vpop.eup %4368  ;;  %3549 = vst [vmem:[#allocation8 + $0x198] sm:$0xff] %v3485_v38  ;;  %v3419_v34 = vmul.f32 %v6763_v50, %v3349_v41  ;;  %v3348_v54 = vmul.f32 %v4367_v63, %v7141_v40  ;;  %v7150_v41 = vld [vmem:[#allocation29_spill] sm:$0xff]  ;;  %p4451_p1 = scmp.ne.s32.totalorder %s3568_s12, %s4450_s3  ;;  %p4456_p3 = scmp.lt.s32.totalorder %s4450_s3, %s4450_s3 }
 0x490   :  { %3548 = vst [vmem:[#allocation8 + $0x190] sm:$0xff] %v3484_v5  ;;  %v3351_v4 = vmul.f32 %v4369_v28, %v7142_v51 }
 0x491   :  { %v4371_v47 = vpop.eup %4370  ;;  %v3487_v43 = vadd.f32 %v6769_v32, %v3419_v34  ;;  %v3418_v21 = vmul.f32 %v6763_v50, %v3348_v54  ;;  %v7151_v34 = vld [vmem:[#allocation30_spill] sm:$0xff]  ;;  %p4457_p4 = por %p4456_p3, %p4455_p2 }
 0x492   :  { %v3421_v7 = vmul.f32 %v6763_v50, %v3351_v4  ;;  %v3350_v33 = vmul.f32 %v4371_v47, %v7143_v46 }
 0x493   :  { %v4373_v6 = vpop.eup %4372  ;;  %3551 = vst [vmem:[#allocation8 + $0x1a8] sm:$0xff] %v3487_v43  ;;  %v3486_v0 = vadd.f32 %v6769_v32, %v3418_v21  ;;  %p4458_p5 = pnand %p4457_p4, %p4451_p1 }
 0x494   :  { %v3489_v49 = vadd.f32 %v6769_v32, %v3421_v7  ;;  %v3420_v42 = vmul.f32 %v6763_v50, %v3350_v33  ;;  %v3353_v24 = vmul.f32 %v4373_v6, %v7144_v26 }
 0x495   :  { %v4375_v2 = vpop.eup %4374  ;;  %3550 = vst [vmem:[#allocation8 + $0x1a0] sm:$0xff] %v3486_v0 }
 0x496   :  { %3553 = vst [vmem:[#allocation8 + $0x1b8] sm:$0xff] %v3489_v49  ;;  %v3488_v52 = vadd.f32 %v6769_v32, %v3420_v42  ;;  %v3423_v3 = vmul.f32 %v6763_v50, %v3353_v24  ;;  %v3352_v12 = vmul.f32 %v4375_v2, %v7145_v16 }
 0x497   :  { %v3099_v13 = vpop.xlane.xlu1 %3098 }
 0x498   :  { %v3165_v37 = vmul.f32 0.03125, %v3099_v13  ;;  %3552 = vst [vmem:[#allocation8 + $0x1b0] sm:$0xff] %v3488_v52  ;;  %v3491_v53 = vadd.f32 %v6769_v32, %v3423_v3  ;;  %v3422_v20 = vmul.f32 %v6763_v50, %v3352_v12 }
 0x499   :  { %v3097_v25 = vpop.xlane.xlu0 %3096 }
 0x49a   :  { %v4377_v9 = vpop.eup %4376  ;;  %v3229_v61 = vadd.f32 1e-05, %v3165_v37  ;;  %v3164_v18 = vmul.f32 0.03125, %v3097_v25  ;;  %3555 = vst [vmem:[#allocation8 + $0x1c8] sm:$0xff] %v3491_v53  ;;  %v3490_v22 = vadd.f32 %v6769_v32, %v3422_v20 }
 0x49b   :  { %v3355_v31 = vmul.f32 %v4377_v9, %v7146_v17 }
 0x49c   :  { %v4379_v19 = vpop.eup %4378  ;;  %4380 = vrsqrt.f32 %v3229_v61  ;;  %v3228_v56 = vadd.f32 1e-05, %v3164_v18  ;;  %3554 = vst [vmem:[#allocation8 + $0x1c0] sm:$0xff] %v3490_v22 }
 0x49d   :  { %v3425_v59 = vmul.f32 %v6763_v50, %v3355_v31  ;;  %v3354_v10 = vmul.f32 %v4379_v19, %v7147_v35 }
 0x49e   :  { %4382 = vrsqrt.f32 %v3228_v56  ;;  %v3103_v11 = vpop.xlane.xlu1 %3102 }
 0x49f   :  { %v3493_v1 = vadd.f32 %v6769_v32, %v3425_v59  ;;  %v3424_v62 = vmul.f32 %v4388_v27, %v3354_v10  ;;  %v3167_v60 = vmul.f32 0.03125, %v3103_v11 }
 0x4a0   :  { %v3101_v8 = vpop.xlane.xlu0 %3100 }
 0x4a1   :  { %3557 = vst [vmem:[#allocation8 + $0x1d8] sm:$0xff] %v3493_v1  ;;  %v3492_v55 = vadd.f32 %v6769_v32, %v3424_v62  ;;  %v3231_v29 = vadd.f32 1e-05, %v3167_v60  ;;  %v3166_v50 = vmul.f32 0.03125, %v3101_v8 }
 0x4a3   :  { %3556 = vst [vmem:[#allocation8 + $0x1d0] sm:$0xff] %v3492_v55  ;;  %4384 = vrsqrt.f32 %v3231_v29  ;;  %v3230_v58 = vadd.f32 1e-05, %v3166_v50 }
 0x4a5   :  { %4386 = vrsqrt.f32 %v3230_v58 }
 0x4a9   :  { %v4381_v15 = vpop.eup %4380 }
 0x4aa   :  { %v3357_v45 = vmul.f32 %v4381_v15, %v7148_v39 }
 0x4ab   :  { %v4383_v48 = vpop.eup %4382 }
 0x4ac   :  { %v3427_v23 = vmul.f32 %v4388_v27, %v3357_v45  ;;  %v3356_v57 = vmul.f32 %v4383_v48, %v7149_v44 }
 0x4ae   :  { %v3495_v32 = vadd.f32 %v4389_v14, %v3427_v23  ;;  %v3426_v30 = vmul.f32 %v4388_v27, %v3356_v57 }
 0x4b0   :  { %3559 = vst [vmem:[#allocation8 + $0x1e8] sm:$0xff] %v3495_v32  ;;  %v3494_v38 = vadd.f32 %v4389_v14, %v3426_v30  ;;  %v4385_v36 = vpop.eup %4384 }
 0x4b1   :  { %v3359_v63 = vmul.f32 %v4385_v36, %v7150_v41 }
 0x4b2   :  { %3558 = vst [vmem:[#allocation8 + $0x1e0] sm:$0xff] %v3494_v38  ;;  %v4387_v5 = vpop.eup %4386 }
 0x4b3   :  { %v3429_v28 = vmul.f32 %v4388_v27, %v3359_v63  ;;  %v3358_v40 = vmul.f32 %v4387_v5, %v7151_v34 }
 0x4b5   :  { %v3497_v54 = vadd.f32 %v4389_v14, %v3429_v28  ;;  %v3428_v51 = vmul.f32 %v4388_v27, %v3358_v40 }
 0x4b7   :  { %3561 = vst [vmem:[#allocation8 + $0x1f8] sm:$0xff] %v3497_v54  ;;  %v3496_v4 = vadd.f32 %v4389_v14, %v3428_v51 }
 0x4b9   :  { %3560 = vst [vmem:[#allocation8 + $0x1f0] sm:$0xff] %v3496_v4 }
 0x4ba   :  { %4461 = shalt.err (!%p4458_p5)
}
 0x4bb   :  { %3573 = dma.vmem_to_hbm [thread:$0]  %s3568_s12, 8192, %s6969_s4, [#allocation4], %s4478_s20, %s4478_s20, %s4479_s21  }
 0x4bc   :  { %4474 = dma.done.wait [#allocation4], 8192  }
 0x4bd   :  { %4475 = vsyncadd [#allocation4], 4294959104 }
 0x4be   :  { %3577 = vsyncpa [#allocation3], 1 }
 0x4bf   :  { %3578 = vsyncpa [#allocation6], 1 }
 0x4c0   :  { %3579 = vsyncpa [#allocation4], 1 }

// kernel: tpu_custom_call.1
= control target key start
LH: loop header
LB: loop body
LE: loop exit
PB: predicated region body
PF: predicated region fallthrough
CT: control target
= control target key end

     0   :  { %9 = vsyncpa [#allocation3], 0  ;;  %s6965_s0 = inlined_call_operand.hbm [shape: f32[512,128], index: 0, kind: input, shape index: {}]   ;;  %s6966_s1 = inlined_call_operand.hbm [shape: f32[128,128], index: 1, kind: input, shape index: {}]   ;;  %s6967_s2 = inlined_call_operand.hbm [shape: f32[128,128], index: 2, kind: input, shape index: {}]   ;;  %s6968_s3 = inlined_call_operand.vmem [shape: f32[2,128], index: 3, kind: input, shape index: {}]   ;;  %s6969_s4 = inlined_call_operand.hbm [shape: f32[512,128], index: 4, kind: output, shape index: {}]  }
   0x1   :  { %10 = vsyncpa [#allocation6], 0 }
   0x2   :  { %11 = vsyncpa [#allocation4], 0  ;;  %s4476_s15 = smov [#allocation5]   ;;  %s4477_s17 = smov [#allocation2]  }
   0x3   :  { %s29_s16 = sshll.u32 %s4476_s15, 4  ;;  %s17_s18 = sshll.u32 %s4477_s17, 4  ;;  %s30_s16 = int_to_ptr.vmem [resolvable:$true] %s29_s16  ;;  %s18_s18 = int_to_ptr.vmem [resolvable:$true] %s17_s18 }
   0x4   :  { %s4398_s19 = scalar_lea.vmem %s30_s16, 2048  ;;  %p4403_p1 = scmp.lt.s32.totalorder %s30_s16, %s30_s16 }
   0x5   :  { %p4399_p0 = scmp.ne.s32.totalorder %s30_s16, %s4398_s19  ;;  %p4404_p2 = scmp.lt.s32.totalorder %s4398_s19, %s4398_s19 }
   0x7   :  { %p4405_p3 = por %p4404_p2, %p4403_p1 }
   0x9   :  { %p4406_p4 = pnand %p4405_p3, %p4399_p0 }
   0xb   :  { %4409 = shalt.err (!%p4406_p4)
}
   0xc   :  { %s4478_s20 = smov 128   ;;  %s4479_s21 = smov 8  }
   0xd   :  { %35 = dma.hbm_to_vmem [thread:$0]  %s6966_s1, 2048, %s30_s16, [#allocation6], %s4478_s20, %s4478_s20, %s4479_s21  }
   0xe   :  { %s4418_s24 = scalar_lea.vmem %s18_s18, 8192  ;;  %p4423_p6 = scmp.lt.s32.totalorder %s18_s18, %s18_s18 }
   0xf   :  { %p4419_p5 = scmp.ne.s32.totalorder %s18_s18, %s4418_s24  ;;  %p4424_p7 = scmp.lt.s32.totalorder %s4418_s24, %s4418_s24 }
  0x11   :  { %p4425_p8 = por %p4424_p7, %p4423_p6 }
  0x13   :  { %p4426_p9 = pnand %p4425_p8, %p4419_p5 }
  0x15   :  { %4429 = shalt.err (!%p4426_p9)
}
  0x16   :  { %23 = dma.hbm_to_vmem [thread:$0]  %s6965_s0, 8192, %s18_s18, [#allocation3], %s4478_s20, %s4478_s20, %s4479_s21  }
  0x17   :  { %s4480_s27 = smov [#allocation7]  }
  0x18   :  { %s41_s28 = sshll.u32 %s4480_s27, 4  ;;  %s42_s28 = int_to_ptr.vmem [resolvable:$true] %s41_s28 }
  0x19   :  { %s4438_s29 = scalar_lea.vmem %s42_s28, 2048  ;;  %p4443_p11 = scmp.lt.s32.totalorder %s42_s28, %s42_s28 }
  0x1a   :  { %p4439_p10 = scmp.ne.s32.totalorder %s42_s28, %s4438_s29  ;;  %p4444_p12 = scmp.lt.s32.totalorder %s4438_s29, %s4438_s29 }
  0x1c   :  { %p4445_p13 = por %p4444_p12, %p4443_p11 }
  0x1e   :  { %p4446_p0 = pnand %p4445_p13, %p4439_p10 }
  0x20   :  { %4449 = shalt.err (!%p4446_p0)
}
  0x21   :  { %47 = dma.hbm_to_vmem [thread:$0]  %s6967_s2, 2048, %s42_s28, [#allocation6], %s4478_s20, %s4478_s20, %s4479_s21  }
  0x22   :  { %4470 = dma.done.wait [#allocation3], 8192  }
  0x23   :  { %4471 = vsyncadd [#allocation3], 4294959104 }
  0x24   :  { %4472 = dma.done.wait [#allocation6], 4096  }
  0x25   :  { %4473 = vsyncadd [#allocation6], 4294963200  ;;  %v138_v0 = vld [vmem:[#allocation5 + $0x78] sm:$0xff]  ;;  %v137_v1 = vld [vmem:[#allocation5 + $0x70] sm:$0xff]  ;;  %s4481_s11 = smov [#allocation8]  }
  0x26   :  { %3742 = vmatprep.subr.mxu0 %v138_v0  ;;  %v136_v2 = vld [vmem:[#allocation5 + $0x68] sm:$0xff]  ;;  %v135_v3 = vld [vmem:[#allocation5 + $0x60] sm:$0xff]  ;;  %v134_v5 = vld [vmem:[#allocation5 + $0x58] sm:$0xff]  ;;  %s3567_s12 = sshll.u32 %s4481_s11, 4  ;;  %s3568_s12 = int_to_ptr.vmem [resolvable:$true] %s3567_s12 }
  0x27   :  { %3743 = vmatpush3.msra.mxu0 %v138_v0  ;;  %v59_v4 = vld [vmem:[#allocation2] sm:$0xff]  ;;  %v133_v6 = vld [vmem:[#allocation5 + $0x50] sm:$0xff]  ;;  %v132_v7 = vld [vmem:[#allocation5 + $0x48] sm:$0xff]  ;;  %p4455_p2 = scmp.lt.s32.totalorder %s3568_s12, %s3568_s12 }
  0x28   :  { %3744 = vmatprep.subr.mxu0 %v137_v1  ;;  %3774 = vmatprep.mubr.f32.mxu0 %v59_v4  ;;  %v131_v8 = vld [vmem:[#allocation5 + $0x40] sm:$0xff]  ;;  %v130_v9 = vld [vmem:[#allocation5 + $0x38] sm:$0xff]  ;;  %v129_v10 = vld [vmem:[#allocation5 + $0x30] sm:$0xff] }
  0x29   :  { %3745 = vmatpush3.msra.mxu0 %v137_v1  ;;  %v128_v11 = vld [vmem:[#allocation5 + $0x28] sm:$0xff]  ;;  %v127_v12 = vld [vmem:[#allocation5 + $0x20] sm:$0xff]  ;;  %v126_v13 = vld [vmem:[#allocation5 + $0x18] sm:$0xff] }
  0x2a   :  { %3746 = vmatprep.subr.mxu0 %v136_v2  ;;  %v125_v14 = vld [vmem:[#allocation5 + $0x10] sm:$0xff]  ;;  %v124_v15 = vld [vmem:[#allocation5 + $0x8] sm:$0xff]  ;;  %v123_v16 = vld [vmem:[#allocation5] sm:$0xff] }
  0x2b   :  { %3747 = vmatpush3.msra.mxu0 %v136_v2  ;;  %v60_v17 = vld [vmem:[#allocation2 + $0x8] sm:$0xff]  ;;  %v61_v18 = vld [vmem:[#allocation2 + $0x10] sm:$0xff]  ;;  %v62_v19 = vld [vmem:[#allocation2 + $0x18] sm:$0xff] }
  0x2c   :  { %3748 = vmatprep.subr.mxu0 %v135_v3  ;;  %v63_v20 = vld [vmem:[#allocation2 + $0x20] sm:$0xff]  ;;  %v64_v21 = vld [vmem:[#allocation2 + $0x28] sm:$0xff]  ;;  %v65_v22 = vld [vmem:[#allocation2 + $0x30] sm:$0xff] }
  0x2d   :  { %3749 = vmatpush3.msra.mxu0 %v135_v3  ;;  %v66_v23 = vld [vmem:[#allocation2 + $0x38] sm:$0xff]  ;;  %v67_v24 = vld [vmem:[#allocation2 + $0x40] sm:$0xff]  ;;  %v68_v25 = vld [vmem:[#allocation2 + $0x48] sm:$0xff] }
  0x2e   :  { %3750 = vmatprep.subr.mxu0 %v134_v5  ;;  %v69_v26 = vld [vmem:[#allocation2 + $0x50] sm:$0xff]  ;;  %v70_v27 = vld [vmem:[#allocation2 + $0x58] sm:$0xff]  ;;  %v71_v28 = vld [vmem:[#allocation2 + $0x60] sm:$0xff] }
  0x2f   :  { %3751 = vmatpush3.msra.mxu0 %v134_v5  ;;  %v72_v29 = vld [vmem:[#allocation2 + $0x68] sm:$0xff]  ;;  %v73_v30 = vld [vmem:[#allocation2 + $0x70] sm:$0xff]  ;;  %v74_v31 = vld [vmem:[#allocation2 + $0x78] sm:$0xff] }
  0x30   :  { %3752 = vmatprep.subr.mxu0 %v133_v6  ;;  %v75_v32 = vld [vmem:[#allocation2 + $0x80] sm:$0xff]  ;;  %v76_v33 = vld [vmem:[#allocation2 + $0x88] sm:$0xff]  ;;  %v77_v34 = vld [vmem:[#allocation2 + $0x90] sm:$0xff] }
  0x31   :  { %3753 = vmatpush3.msra.mxu0 %v133_v6  ;;  %v78_v35 = vld [vmem:[#allocation2 + $0x98] sm:$0xff]  ;;  %v79_v36 = vld [vmem:[#allocation2 + $0xa0] sm:$0xff]  ;;  %v80_v37 = vld [vmem:[#allocation2 + $0xa8] sm:$0xff] }
  0x32   :  { %3754 = vmatprep.subr.mxu0 %v132_v7  ;;  %v81_v38 = vld [vmem:[#allocation2 + $0xb0] sm:$0xff]  ;;  %v82_v39 = vld [vmem:[#allocation2 + $0xb8] sm:$0xff]  ;;  %v83_v40 = vld [vmem:[#allocation2 + $0xc0] sm:$0xff] }
  0x33   :  { %3755 = vmatpush3.msra.mxu0 %v132_v7  ;;  %v84_v41 = vld [vmem:[#allocation2 + $0xc8] sm:$0xff]  ;;  %v85_v42 = vld [vmem:[#allocation2 + $0xd0] sm:$0xff]  ;;  %v86_v43 = vld [vmem:[#allocation2 + $0xd8] sm:$0xff] }
  0x34   :  { %3756 = vmatprep.subr.mxu0 %v131_v8  ;;  %v87_v44 = vld [vmem:[#allocation2 + $0xe0] sm:$0xff]  ;;  %v88_v45 = vld [vmem:[#allocation2 + $0xe8] sm:$0xff]  ;;  %v89_v46 = vld [vmem:[#allocation2 + $0xf0] sm:$0xff] }
  0x35   :  { %3757 = vmatpush3.msra.mxu0 %v131_v8  ;;  %v90_v47 = vld [vmem:[#allocation2 + $0xf8] sm:$0xff]  ;;  %v91_v48 = vld [vmem:[#allocation2 + $0x100] sm:$0xff]  ;;  %v92_v49 = vld [vmem:[#allocation2 + $0x108] sm:$0xff] }
  0x36   :  { %3758 = vmatprep.subr.mxu0 %v130_v9  ;;  %v93_v50 = vld [vmem:[#allocation2 + $0x110] sm:$0xff]  ;;  %v94_v51 = vld [vmem:[#allocation2 + $0x118] sm:$0xff]  ;;  %v95_v52 = vld [vmem:[#allocation2 + $0x120] sm:$0xff] }
  0x37   :  { %3759 = vmatpush3.msra.mxu0 %v130_v9  ;;  %v96_v53 = vld [vmem:[#allocation2 + $0x128] sm:$0xff]  ;;  %v97_v54 = vld [vmem:[#allocation2 + $0x130] sm:$0xff]  ;;  %v98_v55 = vld [vmem:[#allocation2 + $0x138] sm:$0xff] }
  0x38   :  { %3760 = vmatprep.subr.mxu0 %v129_v10  ;;  %v99_v56 = vld [vmem:[#allocation2 + $0x140] sm:$0xff]  ;;  %v100_v57 = vld [vmem:[#allocation2 + $0x148] sm:$0xff]  ;;  %v101_v58 = vld [vmem:[#allocation2 + $0x150] sm:$0xff] }
  0x39   :  { %3761 = vmatpush3.msra.mxu0 %v129_v10  ;;  %v102_v59 = vld [vmem:[#allocation2 + $0x158] sm:$0xff]  ;;  %v103_v60 = vld [vmem:[#allocation2 + $0x160] sm:$0xff]  ;;  %v104_v61 = vld [vmem:[#allocation2 + $0x168] sm:$0xff] }
  0x3a   :  { %3762 = vmatprep.subr.mxu0 %v128_v11  ;;  %v105_v62 = vld [vmem:[#allocation2 + $0x170] sm:$0xff]  ;;  %v106_v63 = vld [vmem:[#allocation2 + $0x178] sm:$0xff]  ;;  %v107_v0 = vld [vmem:[#allocation2 + $0x180] sm:$0xff] }
  0x3b   :  { %3763 = vmatpush3.msra.mxu0 %v128_v11  ;;  %v108_v1 = vld [vmem:[#allocation2 + $0x188] sm:$0xff]  ;;  %v109_v2 = vld [vmem:[#allocation2 + $0x190] sm:$0xff]  ;;  %v110_v3 = vld [vmem:[#allocation2 + $0x198] sm:$0xff] }
  0x3c   :  { %3764 = vmatprep.subr.mxu0 %v127_v12  ;;  %v111_v4 = vld [vmem:[#allocation2 + $0x1a0] sm:$0xff]  ;;  %v112_v5 = vld [vmem:[#allocation2 + $0x1a8] sm:$0xff]  ;;  %v113_v6 = vld [vmem:[#allocation2 + $0x1b0] sm:$0xff] }
  0x3d   :  { %3765 = vmatpush3.msra.mxu0 %v127_v12  ;;  %v114_v7 = vld [vmem:[#allocation2 + $0x1b8] sm:$0xff]  ;;  %v115_v8 = vld [vmem:[#allocation2 + $0x1c0] sm:$0xff]  ;;  %v116_v9 = vld [vmem:[#allocation2 + $0x1c8] sm:$0xff] }
  0x3e   :  { %3766 = vmatprep.subr.mxu0 %v126_v13  ;;  %v117_v10 = vld [vmem:[#allocation2 + $0x1d0] sm:$0xff]  ;;  %v118_v11 = vld [vmem:[#allocation2 + $0x1d8] sm:$0xff]  ;;  %v119_v12 = vld [vmem:[#allocation2 + $0x1e0] sm:$0xff] }
  0x3f   :  { %3767 = vmatpush3.msra.mxu0 %v126_v13  ;;  %v120_v13 = vld [vmem:[#allocation2 + $0x1e8] sm:$0xff] }
  0x40   :  { %3768 = vmatprep.subr.mxu0 %v125_v14 }
  0x41   :  { %3769 = vmatpush3.msra.mxu0 %v125_v14  ;;  %v121_v14 = vld [vmem:[#allocation2 + $0x1f0] sm:$0xff] }
  0x42   :  { %3770 = vmatprep.subr.mxu0 %v124_v15 }
  0x43   :  { %3771 = vmatpush3.msra.mxu0 %v124_v15  ;;  %v122_v15 = vld [vmem:[#allocation2 + $0x1f8] sm:$0xff] }
  0x44   :  { %3772 = vmatprep.subr.mxu0 %v123_v16 }
  0x45   :  { %3773 = vmatpush3.msra.mxu0 %v123_v16  ;;  %v154_v16 = vld [vmem:[#allocation7 + $0x78] sm:$0xff] }
  0x46   :  { %3775 = vmatmul.mubr.f32.vlgmr.msra.gmra.mxu0 %v60_v17  ;;  %3870 = vmatprep.subr.mxu1 %v154_v16  ;;  %v153_v17 = vld [vmem:[#allocation7 + $0x70] sm:$0xff] }
  0x47   :  { %3777 = vmatprep.mubr.f32.mxu0 %v61_v18  ;;  %3871 = vmatpush3.msra.mxu1 %v154_v16  ;;  %v152_v18 = vld [vmem:[#allocation7 + $0x68] sm:$0xff] }
  0x48   :  { %3872 = vmatprep.subr.mxu1 %v153_v17 }
  0x49   :  { %3873 = vmatpush3.msra.mxu1 %v153_v17 }
  0x4a   :  { %3778 = vmatmul.mubr.f32.gmra.mxu0 %v62_v19  ;;  %3874 = vmatprep.subr.mxu1 %v152_v18  ;;  %v151_v19 = vld [vmem:[#allocation7 + $0x60] sm:$0xff] }
  0x4b   :  { %3780 = vmatprep.mubr.f32.mxu0 %v63_v20  ;;  %3875 = vmatpush3.msra.mxu1 %v152_v18  ;;  %v150_v20 = vld [vmem:[#allocation7 + $0x58] sm:$0xff] }
  0x4c   :  { %3876 = vmatprep.subr.mxu1 %v151_v19 }
  0x4d   :  { %3877 = vmatpush3.msra.mxu1 %v151_v19 }
  0x4e   :  { %3781 = vmatmul.mubr.f32.gmra.mxu0 %v64_v21  ;;  %3878 = vmatprep.subr.mxu1 %v150_v20  ;;  %v149_v21 = vld [vmem:[#allocation7 + $0x50] sm:$0xff] }
  0x4f   :  { %3783 = vmatprep.mubr.f32.mxu0 %v65_v22  ;;  %3879 = vmatpush3.msra.mxu1 %v150_v20  ;;  %v148_v22 = vld [vmem:[#allocation7 + $0x48] sm:$0xff] }
  0x50   :  { %3880 = vmatprep.subr.mxu1 %v149_v21 }
  0x51   :  { %3881 = vmatpush3.msra.mxu1 %v149_v21 }
  0x52   :  { %3784 = vmatmul.mubr.f32.gmra.mxu0 %v66_v23  ;;  %3882 = vmatprep.subr.mxu1 %v148_v22  ;;  %v147_v23 = vld [vmem:[#allocation7 + $0x40] sm:$0xff] }
  0x53   :  { %3786 = vmatprep.mubr.f32.mxu0 %v67_v24  ;;  %3883 = vmatpush3.msra.mxu1 %v148_v22  ;;  %v146_v24 = vld [vmem:[#allocation7 + $0x38] sm:$0xff] }
  0x54   :  { %3884 = vmatprep.subr.mxu1 %v147_v23 }
  0x55   :  { %3885 = vmatpush3.msra.mxu1 %v147_v23 }
  0x56   :  { %3787 = vmatmul.mubr.f32.gmra.mxu0 %v68_v25  ;;  %3886 = vmatprep.subr.mxu1 %v146_v24  ;;  %v145_v25 = vld [vmem:[#allocation7 + $0x30] sm:$0xff] }
  0x57   :  { %3789 = vmatprep.mubr.f32.mxu0 %v69_v26  ;;  %3887 = vmatpush3.msra.mxu1 %v146_v24  ;;  %v144_v26 = vld [vmem:[#allocation7 + $0x28] sm:$0xff] }
  0x58   :  { %3888 = vmatprep.subr.mxu1 %v145_v25 }
  0x59   :  { %3889 = vmatpush3.msra.mxu1 %v145_v25 }
  0x5a   :  { %3790 = vmatmul.mubr.f32.gmra.mxu0 %v70_v27  ;;  %3890 = vmatprep.subr.mxu1 %v144_v26 }
  0x5b   :  { %3792 = vmatprep.mubr.f32.mxu0 %v71_v28  ;;  %3891 = vmatpush3.msra.mxu1 %v144_v26 }
  0x5e   :  { %3793 = vmatmul.mubr.f32.gmra.mxu0 %v72_v29 }
  0x5f   :  { %3795 = vmatprep.mubr.f32.mxu0 %v73_v30 }
  0x62   :  { %3796 = vmatmul.mubr.f32.gmra.mxu0 %v74_v31 }
  0x63   :  { %3798 = vmatprep.mubr.f32.mxu0 %v75_v32 }
  0x66   :  { %3799 = vmatmul.mubr.f32.gmra.mxu0 %v76_v33 }
  0x67   :  { %3801 = vmatprep.mubr.f32.mxu0 %v77_v34 }
  0x6a   :  { %3802 = vmatmul.mubr.f32.gmra.mxu0 %v78_v35  ;;  %v143_v35 = vld [vmem:[#allocation7 + $0x20] sm:$0xff] }
  0x6b   :  { %3804 = vmatprep.mubr.f32.mxu0 %v79_v36  ;;  %3892 = vmatprep.subr.mxu1 %v143_v35 }
  0x6c   :  { %3893 = vmatpush3.msra.mxu1 %v143_v35 }
  0x6e   :  { %3805 = vmatmul.mubr.f32.gmra.mxu0 %v80_v37  ;;  %v142_v37 = vld [vmem:[#allocation7 + $0x18] sm:$0xff] }
  0x6f   :  { %3807 = vmatprep.mubr.f32.mxu0 %v81_v38  ;;  %3894 = vmatprep.subr.mxu1 %v142_v37 }
  0x70   :  { %3895 = vmatpush3.msra.mxu1 %v142_v37 }
  0x72   :  { %3808 = vmatmul.mubr.f32.gmra.mxu0 %v82_v39 }
  0x73   :  { %3810 = vmatprep.mubr.f32.mxu0 %v83_v40 }
  0x76   :  { %3811 = vmatmul.mubr.f32.gmra.mxu0 %v84_v41 }
  0x77   :  { %3813 = vmatprep.mubr.f32.mxu0 %v85_v42 }
  0x7a   :  { %3814 = vmatmul.mubr.f32.gmra.mxu0 %v86_v43 }
  0x7b   :  { %3816 = vmatprep.mubr.f32.mxu0 %v87_v44 }
  0x7e   :  { %3817 = vmatmul.mubr.f32.gmra.mxu0 %v88_v45  ;;  %v141_v45 = vld [vmem:[#allocation7 + $0x10] sm:$0xff] }
  0x7f   :  { %3819 = vmatprep.mubr.f32.mxu0 %v89_v46  ;;  %3896 = vmatprep.subr.mxu1 %v141_v45 }
  0x80   :  { %3897 = vmatpush3.msra.mxu1 %v141_v45 }
  0x82   :  { %3820 = vmatmul.mubr.f32.gmra.mxu0 %v90_v47 }
  0x83   :  { %3822 = vmatprep.mubr.f32.mxu0 %v91_v48 }
  0x86   :  { %3823 = vmatmul.mubr.f32.gmra.mxu0 %v92_v49 }
  0x87   :  { %3825 = vmatprep.mubr.f32.mxu0 %v93_v50 }
  0x8a   :  { %3826 = vmatmul.mubr.f32.gmra.mxu0 %v94_v51 }
  0x8b   :  { %3828 = vmatprep.mubr.f32.mxu0 %v95_v52 }
  0x8e   :  { %3829 = vmatmul.mubr.f32.gmra.mxu0 %v96_v53 }
  0x8f   :  { %3831 = vmatprep.mubr.f32.mxu0 %v97_v54 }
  0x92   :  { %3832 = vmatmul.mubr.f32.gmra.mxu0 %v98_v55  ;;  %v140_v55 = vld [vmem:[#allocation7 + $0x8] sm:$0xff] }
  0x93   :  { %3834 = vmatprep.mubr.f32.mxu0 %v99_v56  ;;  %3898 = vmatprep.subr.mxu1 %v140_v55 }
  0x94   :  { %3899 = vmatpush3.msra.mxu1 %v140_v55 }
  0x96   :  { %3835 = vmatmul.mubr.f32.gmra.mxu0 %v100_v57 }
  0x97   :  { %3837 = vmatprep.mubr.f32.mxu0 %v101_v58 }
  0x9a   :  { %3838 = vmatmul.mubr.f32.gmra.mxu0 %v102_v59 }
  0x9b   :  { %3840 = vmatprep.mubr.f32.mxu0 %v103_v60 }
  0x9e   :  { %3841 = vmatmul.mubr.f32.gmra.mxu0 %v104_v61  ;;  %v139_v61 = vld [vmem:[#allocation7] sm:$0xff] }
  0x9f   :  { %3843 = vmatprep.mubr.f32.mxu0 %v105_v62  ;;  %3900 = vmatprep.subr.mxu1 %v139_v61 }
  0xa0   :  { %3901 = vmatpush3.msra.mxu1 %v139_v61 }
  0xa2   :  { %3844 = vmatmul.mubr.f32.gmra.mxu0 %v106_v63 }
  0xa3   :  { %3846 = vmatprep.mubr.f32.mxu0 %v107_v0 }
  0xa6   :  { %3847 = vmatmul.mubr.f32.gmra.mxu0 %v108_v1 }
  0xa7   :  { %3849 = vmatprep.mubr.f32.mxu0 %v109_v2 }
  0xaa   :  { %3850 = vmatmul.mubr.f32.gmra.mxu0 %v110_v3 }
  0xab   :  { %3852 = vmatprep.mubr.f32.mxu0 %v111_v4 }
  0xae   :  { %3853 = vmatmul.mubr.f32.gmra.mxu0 %v112_v5 }
  0xaf   :  { %3855 = vmatprep.mubr.f32.mxu0 %v113_v6 }
  0xb2   :  { %3856 = vmatmul.mubr.f32.gmra.mxu0 %v114_v7 }
  0xb3   :  { %3858 = vmatprep.mubr.f32.mxu0 %v115_v8 }
  0xb6   :  { %3859 = vmatmul.mubr.f32.gmra.mxu0 %v116_v9 }
  0xb7   :  { %3861 = vmatprep.mubr.f32.mxu0 %v117_v10 }
  0xba   :  { %3862 = vmatmul.mubr.f32.gmra.mxu0 %v118_v11 }
  0xbb   :  { %3864 = vmatprep.mubr.f32.mxu0 %v119_v12 }
  0xbe   :  { %3865 = vmatmul.mubr.f32.gmra.mxu0 %v120_v13 }
  0xbf   :  { %3867 = vmatprep.mubr.f32.mxu0 %v121_v14 }
  0xc2   :  { %3868 = vmatmul.mubr.f32.gmra.mxu0 %v122_v15 }
 0x106   :  { %v4525_v27 = vpop.f32.mrf.mxu0 }
 0x107   :  { %v4528_v28 = vmul.f32 0.70710677, %v4525_v27  ;;  %v4614_v18 = vmul.f32 0.5, %v4525_v27 }
 0x108   :  { %v4530_v29 = vpop.f32.mrf.mxu0 }
 0x109   :  { %v4533_v30 = vand.u32 2147483647, %v4528_v28  ;;  %v4587_v62 = vmul.f32 0.70710677, %v4530_v29  ;;  %v4622_v21 = vmul.f32 0.5, %v4530_v29  ;;  %vm1885_vm0 = vcmp.lt.f32.partialorder %v4528_v28, 0.0 }
 0x10a   :  { %v4535_v31 = vpop.f32.mrf.mxu0 }
 0x10b   :  { %v733_v32 = vmul.f32 0.3275911, %v4533_v30  ;;  %v4539_v33 = vmul.f32 0.70710677, %v4535_v31  ;;  %v1501_v3 = vsub.f32 0.0, %v4533_v30  ;;  %v4636_v37 = vmul.f32 0.5, %v4535_v31 }
 0x10c   :  { %v4541_v34 = vpop.f32.mrf.mxu0  ;;  %v668_v10 = vand.u32 2147483647, %v4587_v62 }
 0x10d   :  { %v797_v36 = vadd.f32 1.0, %v733_v32  ;;  %v4544_v38 = vand.u32 2147483647, %v4539_v33  ;;  %v4547_v39 = vmul.f32 0.70710677, %v4541_v34  ;;  %v1565_v15 = vmul.f32 %v1501_v3, %v4533_v30 }
 0x10e   :  { %v4549_v40 = vpop.f32.mrf.mxu0  ;;  %v1500_v25 = vsub.f32 0.0, %v668_v10  ;;  %v732_v29 = vmul.f32 0.3275911, %v668_v10  ;;  %vm1887_vm1 = vcmp.lt.f32.partialorder %v4539_v33, 0.0 }
 0x10f   :  { %4004 = vrcp.f32 %v797_v36  ;;  %v735_v41 = vmul.f32 0.3275911, %v4544_v38  ;;  %v4553_v42 = vand.u32 2147483647, %v4547_v39  ;;  %v4558_v44 = vmul.f32 0.70710677, %v4549_v40 }
 0x110   :  { %v4555_v43 = vpop.f32.mrf.mxu0  ;;  %v1503_v13 = vsub.f32 0.0, %v4544_v38  ;;  %v1630_v32 = vmul.f32 1.442695, %v1565_v15  ;;  %v1564_v55 = vmul.f32 %v1500_v25, %v668_v10  ;;  %vm1886_vm2 = vcmp.lt.f32.partialorder %v4547_v39, 0.0 }
 0x111   :  { %v799_v46 = vadd.f32 1.0, %v735_v41  ;;  %v734_v47 = vmul.f32 0.3275911, %v4553_v42  ;;  %v4564_v49 = vand.u32 2147483647, %v4558_v44  ;;  %vm1889_vm3 = vcmp.lt.f32.partialorder %v4558_v44, 0.0 }
 0x112   :  { %v4561_v48 = vpop.f32.mrf.mxu0  ;;  %v4568_v52 = vmul.f32 0.70710677, %v4555_v43  ;;  %v1567_v26 = vmul.f32 %v1503_v13, %v4544_v38  ;;  %v1502_v38 = vsub.f32 0.0, %v4553_v42 }
 0x113   :  { %4006 = vrcp.f32 %v799_v46  ;;  %v798_v50 = vadd.f32 1.0, %v734_v47  ;;  %v737_v51 = vmul.f32 0.3275911, %v4564_v49  ;;  %v4573_v54 = vmul.f32 0.70710677, %v4561_v48 }
 0x114   :  { %v4570_v53 = vpop.f32.mrf.mxu0  ;;  %v4576_v57 = vand.u32 2147483647, %v4568_v52  ;;  %vm1888_vm4 = vcmp.lt.f32.partialorder %v4568_v52, 0.0 }
 0x115   :  { %4008 = vrcp.f32 %v798_v50  ;;  %v801_v56 = vadd.f32 1.0, %v737_v51  ;;  %v4579_v58 = vand.u32 2147483647, %v4573_v54  ;;  %v4582_v59 = vmul.f32 0.70710677, %v4570_v53 }
 0x116   :  { %v4584_v60 = vpop.f32.mrf.mxu0  ;;  %v736_v63 = vmul.f32 0.3275911, %v4576_v57  ;;  %vm1891_vm5 = vcmp.lt.f32.partialorder %v4573_v54, 0.0 }
 0x117   :  { %4010 = vrcp.f32 %v801_v56  ;;  %v739_v0 = vmul.f32 0.3275911, %v4579_v58  ;;  %v4592_v1 = vand.u32 2147483647, %v4582_v59  ;;  %v4598_v6 = vmul.f32 0.70710677, %v4584_v60 }
 0x118   :  { %v800_v4 = vadd.f32 1.0, %v736_v63  ;;  %v4602_v9 = vpop.f32.mrf.mxu0  ;;  %v1634_v56 = vmul.f32 1.442695, %v1567_v26  ;;  %vm1890_vm6 = vcmp.lt.f32.partialorder %v4582_v59, 0.0 }
 0x119   :  { %v803_v5 = vadd.f32 1.0, %v739_v0  ;;  %v738_v8 = vmul.f32 0.3275911, %v4592_v1  ;;  %v4606_v11 = vand.u32 2147483647, %v4598_v6  ;;  %vm1893_vm7 = vcmp.lt.f32.partialorder %v4598_v6, 0.0 }
 0x11a   :  { %4012 = vrcp.f32 %v800_v4  ;;  %v4617_v19 = vmul.f32 0.70710677, %v4602_v9  ;;  %v4619_v20 = vpop.f32.mrf.mxu0  ;;  %v1505_v4 = vsub.f32 0.0, %v4564_v49 }
 0x11b   :  { %4014 = vrcp.f32 %v803_v5  ;;  %v802_v14 = vadd.f32 1.0, %v738_v8  ;;  %v741_v16 = vmul.f32 0.3275911, %v4606_v11  ;;  %v4633_v36 = vmul.f32 0.70710677, %v4619_v20 }
 0x11c   :  { %v4594_v2 = vpop.eup %4004  ;;  %v4628_v27 = vand.u32 2147483647, %v4617_v19  ;;  %v1504_v5 = vsub.f32 0.0, %v4576_v57  ;;  %v796_v8 = vadd.f32 1.0, %v732_v29  ;;  %vm1892_vm8 = vcmp.lt.f32.partialorder %v4617_v19, 0.0 }
 0x11d   :  { %v925_v7 = vmul.f32 1.0614054, %v4594_v2  ;;  %4016 = vrcp.f32 %v802_v14  ;;  %v805_v23 = vadd.f32 1.0, %v741_v16  ;;  %v4643_v47 = vand.u32 2147483647, %v4633_v36 }
 0x11e   :  { %v740_v46 = vmul.f32 0.3275911, %v4628_v27  ;;  %v4657_v14 = vmul.f32 1.442695, %v1564_v55  ;;  %v1566_v16 = vmul.f32 %v1502_v38, %v4553_v42  ;;  %v1507_v38 = vsub.f32 0.0, %v4579_v58 }
 0x11f   :  { %v989_v12 = vadd.f32 -1.4531521, %v925_v7  ;;  %4018 = vrcp.f32 %v805_v23  ;;  %v743_v7 = vmul.f32 0.3275911, %v4643_v47  ;;  %vm1895_vm9 = vcmp.lt.f32.partialorder %v4633_v36, 0.0 }
 0x120   :  { %v4611_v17 = vpop.eup %4006  ;;  %4020 = vpow2.f32 %v1630_v32  ;;  %v804_v0 = vadd.f32 1.0, %v740_v46  ;;  %v1569_v32 = vmul.f32 %v1505_v4, %v4564_v49 }
 0x121   :  { %v927_v22 = vmul.f32 1.0614054, %v4611_v17  ;;  %v1053_v24 = vmul.f32 %v4594_v2, %v989_v12  ;;  %v4653_v12 = vmul.f32 0.5, %v4541_v34 }
 0x122   :  { %v4630_v30 = vpop.eup %4008  ;;  %4022 = vrcp.f32 %v804_v0  ;;  %v1638_v0 = vmul.f32 1.442695, %v1569_v32 }
 0x123   :  { %v991_v35 = vadd.f32 -1.4531521, %v927_v22  ;;  %v926_v41 = vmul.f32 1.0614054, %v4630_v30  ;;  %v1117_v51 = vadd.f32 1.4214138, %v1053_v24  ;;  %4024 = vpow2.f32 %v1634_v56 }
 0x124   :  { %v4645_v50 = vpop.eup %4010  ;;  %v807_v22 = vadd.f32 1.0, %v743_v7 }
 0x125   :  { %v1055_v45 = vmul.f32 %v4611_v17, %v991_v35  ;;  %v990_v61 = vadd.f32 -1.4531521, %v926_v41  ;;  %v929_v63 = vmul.f32 1.0614054, %v4645_v50  ;;  %v1181_v24 = vmul.f32 %v4594_v2, %v1117_v51 }
 0x126   :  { %v1568_v35 = vmul.f32 %v1504_v5, %v4576_v57  ;;  %v1632_v51 = vmul.f32 1.442695, %v1566_v16  ;;  %4026 = vrcp.f32 %v807_v22 }
 0x127   :  { %v1119_v31 = vadd.f32 1.4214138, %v1055_v45  ;;  %v1054_v3 = vmul.f32 %v4630_v30, %v990_v61  ;;  %v993_v10 = vadd.f32 -1.4531521, %v929_v63  ;;  %v4655_v13 = vpop.eup %4012  ;;  %v1506_v61 = vsub.f32 0.0, %v4592_v1 }
 0x128   :  { %v4660_v23 = vpop.eup %4014  ;;  %v928_v34 = vmul.f32 1.0614054, %v4655_v13  ;;  %v1245_v56 = vadd.f32 -0.28449672, %v1181_v24  ;;  %4028 = vpow2.f32 %v1632_v51 }
 0x129   :  { %v1118_v15 = vadd.f32 1.4214138, %v1054_v3  ;;  %v1183_v25 = vmul.f32 %v4611_v17, %v1119_v31  ;;  %v1057_v26 = vmul.f32 %v4645_v50, %v993_v10  ;;  %v931_v29 = vmul.f32 1.0614054, %v4660_v23 }
 0x12a   :  { %v992_v45 = vadd.f32 -1.4531521, %v928_v34  ;;  %v4671_v46 = vpop.eup %4016  ;;  %v1636_v3 = vmul.f32 1.442695, %v1568_v35  ;;  %v1570_v24 = vmul.f32 %v1506_v61, %v4592_v1  ;;  %4030 = vpow2.f32 %v1638_v0 }
 0x12b   :  { %v1182_v42 = vmul.f32 %v4630_v30, %v1118_v15  ;;  %v1121_v41 = vadd.f32 1.4214138, %v1057_v26  ;;  %v995_v55 = vadd.f32 -1.4531521, %v931_v29  ;;  %v1247_v31 = vadd.f32 -0.28449672, %v1183_v25 }
 0x12c   :  { %v1056_v49 = vmul.f32 %v4655_v13, %v992_v45  ;;  %v930_v57 = vmul.f32 1.0614054, %v4671_v46  ;;  %v4678_v5 = vpop.eup %4018  ;;  %v1571_v15 = vmul.f32 %v1507_v38, %v4579_v58  ;;  %v1509_v25 = vsub.f32 0.0, %v4606_v11 }
 0x12d   :  { %v1185_v63 = vmul.f32 %v4645_v50, %v1121_v41  ;;  %v1059_v4 = vmul.f32 %v4660_v23, %v995_v55  ;;  %v1246_v7 = vadd.f32 -0.28449672, %v1182_v42  ;;  %v1309_v26 = vmul.f32 %v4594_v2, %v1245_v56  ;;  %v4021_v29 = vpop.eup %4020 }
 0x12e   :  { %v1120_v10 = vadd.f32 1.4214138, %v1056_v49  ;;  %v994_v16 = vadd.f32 -1.4531521, %v930_v57  ;;  %v1311_v34 = vmul.f32 %v4611_v17, %v1247_v31  ;;  %v933_v41 = vmul.f32 1.0614054, %v4678_v5 }
 0x12f   :  { %v1123_v22 = vadd.f32 1.4214138, %v1059_v4  ;;  %v1249_v42 = vadd.f32 -0.28449672, %v1185_v63  ;;  %v1310_v45 = vmul.f32 %v4630_v30, %v1246_v7  ;;  %4032 = vpow2.f32 %v1636_v3  ;;  %v4690_v51 = vpop.eup %4022 }
 0x130   :  { %v1184_v32 = vmul.f32 %v4655_v13, %v1120_v10  ;;  %v1058_v35 = vmul.f32 %v4671_v46, %v994_v16  ;;  %v1642_v38 = vmul.f32 1.442695, %v1571_v15  ;;  %v1640_v61 = vmul.f32 1.442695, %v1570_v24  ;;  %v4025_v10 = vpop.eup %4024 }
 0x131   :  { %v1187_v58 = vmul.f32 %v4660_v23, %v1123_v22  ;;  %v997_v56 = vadd.f32 -1.4531521, %v933_v41  ;;  %v1573_v31 = vmul.f32 %v1509_v25, %v4606_v11  ;;  %v1373_v49 = vadd.f32 0.2548296, %v1309_v26 }
 0x132   :  { %v1248_v1 = vadd.f32 -0.28449672, %v1184_v32  ;;  %v1122_v55 = vadd.f32 1.4214138, %v1058_v35  ;;  %4034 = vrcp.f32 %v796_v8  ;;  %v1375_v57 = vadd.f32 0.2548296, %v1311_v34 }
 0x133   :  { %v1251_v63 = vadd.f32 -0.28449672, %v1187_v58  ;;  %v1313_v0 = vmul.f32 %v4645_v50, %v1249_v42  ;;  %v1061_v3 = vmul.f32 %v4678_v5, %v997_v56  ;;  %v1374_v15 = vadd.f32 0.2548296, %v1310_v45  ;;  %v4703_v25 = vpop.eup %4026 }
 0x134   :  { %v1312_v4 = vmul.f32 %v4655_v13, %v1248_v1  ;;  %v1186_v7 = vmul.f32 %v4671_v46, %v1122_v55  ;;  %v4698_v16 = vmul.f32 0.5, %v4549_v40  ;;  %4036 = vpow2.f32 %v1642_v38 }
 0x135   :  { %v932_v11 = vmul.f32 1.0614054, %v4690_v51  ;;  %4038 = vpow2.f32 %v4657_v14  ;;  %v1646_v22 = vmul.f32 1.442695, %v1573_v31  ;;  %v1508_v24 = vsub.f32 0.0, %v4628_v27 }
 0x136   :  { %v1250_v8 = vadd.f32 -0.28449672, %v1186_v7  ;;  %v1437_v26 = vmul.f32 %v4594_v2, %v1373_v49  ;;  %v1315_v34 = vmul.f32 %v4660_v23, %v1251_v63  ;;  %v1125_v32 = vadd.f32 1.4214138, %v1061_v3  ;;  %v4716_v2 = vpop.f32.mrf.mxu0 }
 0x137   :  { %v996_v35 = vadd.f32 -1.4531521, %v932_v11  ;;  %v1439_v40 = vmul.f32 %v4611_v17, %v1375_v57  ;;  %v1377_v42 = vadd.f32 0.2548296, %v1313_v0  ;;  %v1376_v58 = vadd.f32 0.2548296, %v1312_v4 }
 0x138   :  { %4040 = vpow2.f32 %v1640_v61  ;;  %v1438_v41 = vmul.f32 %v4630_v30, %v1374_v15  ;;  %v4710_v14 = vmul.f32 0.5, %v4555_v43  ;;  %v4713_v45 = vmul.f32 0.5, %v4561_v48  ;;  %v4029_v61 = vpop.eup %4028  ;;  %v4734_v15 = vpop.f32.mrf.mxu0 }
 0x139   :  { %v1189_v1 = vmul.f32 %v4678_v5, %v1125_v32  ;;  %v1314_v38 = vmul.f32 %v4671_v46, %v1250_v8  ;;  %4042 = vpow2.f32 %v1646_v22  ;;  %v1060_v17 = vmul.f32 %v4690_v51, %v996_v35  ;;  %v4031_v0 = vpop.eup %4030 }
 0x13a   :  { %v935_v55 = vmul.f32 1.0614054, %v4703_v25  ;;  %v4721_v56 = vmul.f32 %v4021_v29, %v1437_v26  ;;  %v1379_v30 = vadd.f32 0.2548296, %v1315_v34  ;;  %v1572_v31 = vmul.f32 %v1508_v24, %v4628_v27 }
 0x13b   :  { %v1253_v43 = vadd.f32 -0.28449672, %v1189_v1  ;;  %v4724_v48 = vmul.f32 %v4025_v10, %v1439_v40  ;;  %v1441_v49 = vmul.f32 %v4645_v50, %v1377_v42  ;;  %v1440_v57 = vmul.f32 %v4655_v13, %v1376_v58 }
 0x13c   :  { %v1124_v63 = vadd.f32 1.4214138, %v1060_v17  ;;  %v4728_v4 = vmul.f32 %v4029_v61, %v1438_v41  ;;  %v999_v3 = vadd.f32 -1.4531521, %v935_v55  ;;  %v4732_v29 = vmul.f32 0.70710677, %v4716_v2  ;;  %v4033_v11 = vpop.eup %4032  ;;  %v4758_v41 = vpop.f32.mrf.mxu0 }
 0x13d   :  { %v1317_v7 = vmul.f32 %v4678_v5, %v1253_v43  ;;  %v4738_v27 = vmul.f32 0.5, %v4570_v53  ;;  %v1378_v50 = vadd.f32 0.2548296, %v1314_v38  ;;  %v4741_v13 = vmul.f32 0.5, %v4584_v60 }
 0x13e   :  { %v1511_v10 = vsub.f32 0.0, %v4643_v47  ;;  %v1821_v8 = vsub.f32 1.0, %v4721_v56  ;;  %v1443_v22 = vmul.f32 %v4660_v23, %v1379_v30  ;;  %v1188_v24 = vmul.f32 %v4690_v51, %v1124_v63 }
 0x13f   :  { %v4749_v26 = vand.u32 2147483647, %v4732_v29  ;;  %v4751_v34 = vpop.eup %4034  ;;  %v1823_v53 = vsub.f32 1.0, %v4724_v48  ;;  %v1761_v60 = vmul.f32 %v4031_v0, %v1441_v49  ;;  %v1760_v32 = vmul.f32 %v4033_v11, %v1440_v57 }
 0x140   :  { %v1644_v35 = vmul.f32 1.442695, %v1572_v31  ;;  %v1822_v40 = vsub.f32 1.0, %v4728_v4  ;;  %v1381_v42 = vadd.f32 0.2548296, %v1317_v7  ;;  %v1063_v58 = vmul.f32 %v4703_v25, %v999_v3 }
 0x141   :  { %v742_v23 = vmul.f32 0.3275911, %v4749_v26  ;;  %v4037_v1 = vpop.eup %4036  ;;  %v1442_v38 = vmul.f32 %v4671_v46, %v1378_v50  ;;  %v4762_v17 = vmul.f32 0.5, %v4602_v9  ;;  %v4765_v55 = vmul.f32 0.5, %v4619_v20 }
 0x142   :  { %v1575_v61 = vmul.f32 %v1511_v10, %v4643_v47  ;;  %v4768_v56 = vpop.eup %4038  ;;  %v1949_v30 = vsub.f32 0.0, %v1821_v8  ;;  %v1763_v43 = vmul.f32 %v4037_v1, %v1443_v22  ;;  %v1252_v31 = vadd.f32 -0.28449672, %v1188_v24  ;;  %v4773_v47 = vpop.f32.mrf.mxu0 }
 0x143   :  { %v806_v48 = vadd.f32 1.0, %v742_v23  ;;  %v1951_v49 = vsub.f32 0.0, %v1823_v53  ;;  %v1825_v46 = vsub.f32 1.0, %v1761_v60  ;;  %v1824_v57 = vsub.f32 1.0, %v1760_v32 }
 0x144   :  { %4044 = vpow2.f32 %v1644_v35  ;;  %v1950_v63 = vsub.f32 0.0, %v1822_v40  ;;  %v1445_v20 = vmul.f32 %v4678_v5, %v1381_v42  ;;  %v1127_v0 = vadd.f32 1.4214138, %v1063_v58  ;;  %v4800_v23 = vpop.f32.mrf.mxu0 }
 0x145   :  { %v4041_v9 = vpop.eup %4040  ;;  %4046 = vrcp.f32 %v806_v48  ;;  %v1650_v7 = vmul.f32 1.442695, %v1575_v61  ;;  %v4777_v3 = vmul.f32 0.5, %v4716_v2  ;;  %v4780_v11 = vmul.f32 0.70710677, %v4734_v15 }
 0x146   :  { %v1762_v4 = vmul.f32 %v4041_v9, %v1442_v38  ;;  %v4043_v50 = vpop.eup %4042  ;;  %v2013_v10 = vsel %vm1885_vm0, %v1949_v30, %v1821_v8  ;;  %v1827_v22 = vsub.f32 1.0, %v1763_v43  ;;  %v1316_v5 = vmul.f32 %v4690_v51, %v1252_v31 }
 0x147   :  { %v4786_v24 = vmul.f32 0.70710677, %v4758_v41  ;;  %v2015_v60 = vsel %vm1887_vm1, %v1951_v49, %v1823_v53  ;;  %v1953_v32 = vsub.f32 0.0, %v1825_v46  ;;  %v1952_v35 = vsub.f32 0.0, %v1824_v57 }
 0x148   :  { %v4791_v2 = vand.u32 2147483647, %v4780_v11  ;;  %v2014_v42 = vsel %vm1886_vm2, %v1950_v63, %v1822_v40  ;;  %v1765_v28 = vmul.f32 %v4043_v50, %v1445_v20  ;;  %v1191_v8 = vmul.f32 %v4703_v25, %v1127_v0  ;;  %v4812_v0 = vpop.f32.mrf.mxu0 }
 0x149   :  { %v4798_v58 = vand.u32 2147483647, %v4786_v24  ;;  %v2077_v33 = vadd.f32 1.0, %v2013_v10  ;;  %v1826_v53 = vsub.f32 1.0, %v1762_v4  ;;  %4048 = vpow2.f32 %v1650_v7 }
 0x14a   :  { %v745_v1 = vmul.f32 0.3275911, %v4791_v2  ;;  %v2079_v38 = vadd.f32 1.0, %v2015_v60  ;;  %v1955_v61 = vsub.f32 0.0, %v1827_v22  ;;  %v1380_v30 = vadd.f32 0.2548296, %v1316_v5 }
 0x14b   :  { %v744_v39 = vmul.f32 0.3275911, %v4798_v58  ;;  %v2078_v40 = vadd.f32 1.0, %v2014_v42  ;;  %v2017_v43 = vsel %vm1889_vm3, %v1953_v32, %v1825_v46  ;;  %v2016_v31 = vsel %vm1888_vm4, %v1952_v35, %v1824_v57  ;;  %v4837_v32 = vpop.f32.mrf.mxu0 }
 0x14c   :  { %v809_v48 = vadd.f32 1.0, %v745_v1  ;;  %v1829_v49 = vsub.f32 1.0, %v1765_v28  ;;  %v1255_v9 = vadd.f32 -0.28449672, %v1191_v8  ;;  %v4810_v20 = vmul.f32 0.70710677, %v4773_v47 }
 0x14d   :  { %v808_v63 = vadd.f32 1.0, %v744_v39  ;;  %v4815_v4 = vmul.f32 %v2077_v33, %v4614_v18  ;;  %v1954_v7 = vsub.f32 0.0, %v1826_v53  ;;  %v4818_v44 = vmul.f32 0.5, %v4734_v15 }
 0x14e   :  { %4050 = vrcp.f32 %v809_v48  ;;  %v2019_v52 = vsel %vm1891_vm5, %v1955_v61, %v1827_v22  ;;  %v1444_v46 = vmul.f32 %v4690_v51, %v1380_v30  ;;  %v1510_v57 = vsub.f32 0.0, %v4749_v26 }
 0x14f   :  { %4052 = vrcp.f32 %v808_v63  ;;  %v2081_v50 = vadd.f32 1.0, %v2017_v43  ;;  %v2080_v10 = vadd.f32 1.0, %v2016_v31  ;;  %v4825_v5 = vand.u32 2147483647, %v4810_v20 }
 0x150   :  { %v4828_v18 = vmul.f32 0.70710677, %v4800_v23  ;;  %v4831_v15 = vmul.f32 %v2079_v38, %v4636_v37  ;;  %v4834_v54 = vmul.f32 %v2078_v40, %v4653_v12  ;;  %v1957_v22 = vsub.f32 0.0, %v1829_v49 }
 0x151   :  { %v4045_v60 = vpop.eup %4044  ;;  %v1319_v51 = vmul.f32 %v4703_v25, %v1255_v9  ;;  %v2083_v42 = vadd.f32 1.0, %v2019_v52  ;;  %v2018_v28 = vsel %vm1890_vm6, %v1954_v7, %v1826_v53  ;;  %v747_v8 = vmul.f32 0.3275911, %v4825_v5 }
 0x152   :  { %v4839_v35 = vpop.eup %4046  ;;  %v4845_v33 = vand.u32 2147483647, %v4828_v18  ;;  %v1764_v37 = vmul.f32 %v4045_v60, %v1444_v46  ;;  %v1574_v1 = vmul.f32 %v1510_v57, %v4749_v26  ;;  %v4850_v38 = vmul.f32 0.70710677, %v4812_v0  ;;  %v4864_v26 = vpop.f32.mrf.mxu0 }
 0x153   :  { %v934_v12 = vmul.f32 1.0614054, %v4839_v35  ;;  %v4853_v61 = vmul.f32 %v2081_v50, %v4698_v16  ;;  %v4856_v30 = vmul.f32 %v2080_v10, %v4710_v14  ;;  %v811_v59 = vadd.f32 1.0, %v747_v8 }
 0x154   :  { %v746_v53 = vmul.f32 0.3275911, %v4845_v33  ;;  %v2021_v39 = vsel %vm1893_vm7, %v1957_v22, %v1829_v49  ;;  %v1383_v40 = vadd.f32 0.2548296, %v1319_v51  ;;  %v4862_v31 = vand.u32 2147483647, %v4850_v38 }
 0x155   :  { %7021 = vst [vmem:[#allocation12_spill] sm:$0xff] %v4853_v61  ;;  %7022 = vst [vmem:[#allocation13_spill] sm:$0xff] %v4856_v30  ;;  %v998_v43 = vadd.f32 -1.4531521, %v934_v12  ;;  %v4867_v48 = vmul.f32 %v2083_v42, %v4713_v45  ;;  %v2082_v16 = vadd.f32 1.0, %v2018_v28  ;;  %4054 = vrcp.f32 %v811_v59 }
 0x156   :  { %v810_v14 = vadd.f32 1.0, %v746_v53  ;;  %v4049_v9 = vpop.eup %4048  ;;  %v1828_v63 = vsub.f32 1.0, %v1764_v37  ;;  %v1648_v49 = vmul.f32 1.442695, %v1574_v1  ;;  %v749_v7 = vmul.f32 0.3275911, %v4862_v31 }
 0x157   :  { %7023 = vst [vmem:[#allocation14_spill] sm:$0xff] %v4867_v48  ;;  %v1062_v6 = vmul.f32 %v4839_v35, %v998_v43  ;;  %v2085_v52 = vadd.f32 1.0, %v2021_v39  ;;  %v4873_v46 = vmul.f32 0.5, %v4758_v41  ;;  %v4876_v57 = vmul.f32 0.70710677, %v4837_v32 }
 0x158   :  { %v4879_v45 = vmul.f32 0.70710677, %v4864_v26  ;;  %v1447_v50 = vmul.f32 %v4703_v25, %v1383_v40  ;;  %v1513_v10 = vsub.f32 0.0, %v4791_v2  ;;  %4056 = vrcp.f32 %v810_v14 }
 0x159   :  { %v813_v60 = vadd.f32 1.0, %v749_v7  ;;  %v4884_v22 = vmul.f32 %v2082_v16, %v4738_v27  ;;  %v1512_v51 = vsub.f32 0.0, %v4798_v58  ;;  %v4888_v41 = vand.u32 2147483647, %v4876_v57 }
 0x15a   :  { %v4891_v42 = vand.u32 2147483647, %v4879_v45  ;;  %v1956_v8 = vsub.f32 0.0, %v1828_v63  ;;  %v1126_v37 = vadd.f32 1.4214138, %v1062_v6  ;;  %4058 = vpow2.f32 %v1648_v49 }
 0x15b   :  { %7024 = vst [vmem:[#allocation15_spill] sm:$0xff] %v4884_v22  ;;  %v4893_v28 = vpop.eup %4050  ;;  %v4896_v25 = vmul.f32 0.5, %v4773_v47  ;;  %v4901_v27 = vmul.f32 %v2085_v52, %v4741_v13  ;;  %4060 = vrcp.f32 %v813_v60  ;;  %v748_v59 = vmul.f32 0.3275911, %v4888_v41  ;;  %v4910_v47 = vpop.f32.mrf.mxu0 }
 0x15c   :  { %v4898_v12 = vpop.eup %4052  ;;  %v937_v1 = vmul.f32 1.0614054, %v4893_v28  ;;  %v4905_v53 = vmul.f32 %v4049_v9, %v1447_v50  ;;  %v1577_v39 = vmul.f32 %v1513_v10, %v4791_v2  ;;  %v1515_v43 = vsub.f32 0.0, %v4825_v5 }
 0x15d   :  { %7025 = vst [vmem:[#allocation16_spill] sm:$0xff] %v4901_v27  ;;  %v936_v40 = vmul.f32 1.0614054, %v4898_v12  ;;  %v1576_v14 = vmul.f32 %v1512_v51, %v4798_v58  ;;  %v812_v13 = vadd.f32 1.0, %v748_v59  ;;  %v751_v6 = vmul.f32 0.3275911, %v4891_v42 }
 0x15e   :  { %v1001_v16 = vadd.f32 -1.4531521, %v937_v1  ;;  %v2020_v49 = vsel %vm1892_vm8, %v1956_v8, %v1828_v63  ;;  %v1190_v9 = vmul.f32 %v4839_v35, %v1126_v37  ;;  %v1514_v2 = vsub.f32 0.0, %v4845_v33  ;;  %v4931_v1 = vpop.f32.mrf.mxu0 }
 0x15f   :  { %v1000_v7 = vadd.f32 -1.4531521, %v936_v40  ;;  %4062 = vrcp.f32 %v812_v13  ;;  %v815_v50 = vadd.f32 1.0, %v751_v6  ;;  %v4920_v10 = vmul.f32 0.70710677, %v4910_v47 }
 0x160   :  { %v1065_v52 = vmul.f32 %v4893_v28, %v1001_v16  ;;  %v1654_v60 = vmul.f32 1.442695, %v1577_v39  ;;  %v1579_v51 = vmul.f32 %v1515_v43, %v4825_v5  ;;  %v1517_v19 = vsub.f32 0.0, %v4862_v31 }
 0x161   :  { %v1064_v58 = vmul.f32 %v4898_v12, %v1000_v7  ;;  %v4926_v8 = vmul.f32 0.5, %v4800_v23  ;;  %4064 = vrcp.f32 %v815_v50  ;;  %v4929_v37 = vand.u32 2147483647, %v4920_v10 }
 0x162   :  { %v1129_v63 = vadd.f32 1.4214138, %v1065_v52  ;;  %v4933_v59 = vpop.eup %4054  ;;  %v2084_v40 = vadd.f32 1.0, %v2020_v49  ;;  %v1254_v39 = vadd.f32 -0.28449672, %v1190_v9  ;;  %v1578_v13 = vmul.f32 %v1514_v2, %v4845_v33 }
 0x163   :  { %v1652_v16 = vmul.f32 1.442695, %v1576_v14  ;;  %v1128_v43 = vadd.f32 1.4214138, %v1064_v58  ;;  %v939_v6 = vmul.f32 1.0614054, %v4933_v59  ;;  %v1581_v50 = vmul.f32 %v1517_v19, %v4862_v31 }
 0x164   :  { %v1193_v5 = vmul.f32 %v4893_v28, %v1129_v63  ;;  %v750_v23 = vmul.f32 0.3275911, %v4929_v37  ;;  %v1831_v7 = vsub.f32 1.0, %v4905_v53  ;;  %v1658_v52 = vmul.f32 1.442695, %v1579_v51 }
 0x165   :  { %v4942_v27 = vmul.f32 0.70710677, %v4931_v1  ;;  %v4944_v49 = vpop.eup %4056  ;;  %4066 = vpow2.f32 %v1654_v60  ;;  %v1003_v14 = vadd.f32 -1.4531521, %v939_v6  ;;  %v1516_v33 = vsub.f32 0.0, %v4888_v41 }
 0x166   :  { %v814_v9 = vadd.f32 1.0, %v750_v23  ;;  %v1318_v2 = vmul.f32 %v4839_v35, %v1254_v39  ;;  %4068 = vpow2.f32 %v1652_v16  ;;  %v938_v58 = vmul.f32 1.0614054, %v4944_v49 }
 0x167   :  { %v1656_v63 = vmul.f32 1.442695, %v1578_v13  ;;  %v4059_v53 = vpop.eup %4058  ;;  %v1257_v51 = vadd.f32 -0.28449672, %v1193_v5  ;;  %v1192_v31 = vmul.f32 %v4898_v12, %v1128_v43  ;;  %v1067_v19 = vmul.f32 %v4933_v59, %v1003_v14 }
 0x168   :  { %4070 = vrcp.f32 %v814_v9  ;;  %v4951_v48 = vpop.eup %4060  ;;  %v1002_v60 = vadd.f32 -1.4531521, %v938_v58  ;;  %v1662_v6 = vmul.f32 1.442695, %v1581_v50  ;;  %v4955_v39 = vand.u32 2147483647, %v4942_v27 }
 0x169   :  { %4072 = vpow2.f32 %v1658_v52  ;;  %v1131_v16 = vadd.f32 1.4214138, %v1067_v19  ;;  %v941_v13 = vmul.f32 1.0614054, %v4951_v48  ;;  %v1580_v5 = vmul.f32 %v1516_v33, %v4888_v41 }
 0x16a   :  { %v1519_v43 = vsub.f32 0.0, %v4891_v42  ;;  %v4961_v23 = vmul.f32 %v2084_v40, %v4762_v17  ;;  %v1382_v14 = vadd.f32 0.2548296, %v1318_v2  ;;  %v1066_v9 = vmul.f32 %v4944_v49, %v1002_v60 }
 0x16b   :  { %4074 = vpow2.f32 %v1656_v63  ;;  %v1321_v52 = vmul.f32 %v4893_v28, %v1257_v51  ;;  %v1256_v50 = vadd.f32 -0.28449672, %v1192_v31  ;;  %v1195_v58 = vmul.f32 %v4933_v59, %v1131_v16 }
 0x16c   :  { %7026 = vst [vmem:[#allocation17_spill] sm:$0xff] %v4961_v23  ;;  %v1005_v22 = vadd.f32 -1.4531521, %v941_v13  ;;  %v4966_v19 = vpop.eup %4062  ;;  %v1959_v61 = vsub.f32 0.0, %v1831_v7  ;;  %v1130_v30 = vadd.f32 1.4214138, %v1066_v9  ;;  %4076 = vpow2.f32 %v1662_v6 }
 0x16d   :  { %v753_v41 = vmul.f32 0.3275911, %v4955_v39  ;;  %v1259_v33 = vadd.f32 -0.28449672, %v1195_v58  ;;  %v1660_v40 = vmul.f32 1.442695, %v1580_v5  ;;  %v1583_v2 = vmul.f32 %v1519_v43, %v4891_v42 }
 0x16e   :  { %v1069_v17 = vmul.f32 %v4951_v48, %v1005_v22  ;;  %v4971_v63 = vpop.eup %4064  ;;  %v1446_v51 = vmul.f32 %v4839_v35, %v1382_v14  ;;  %v1194_v31 = vmul.f32 %v4944_v49, %v1130_v30  ;;  %v940_v60 = vmul.f32 1.0614054, %v4966_v19 }
 0x16f   :  { %v817_v16 = vadd.f32 1.0, %v753_v41  ;;  %v1385_v13 = vadd.f32 0.2548296, %v1321_v52  ;;  %v1320_v6 = vmul.f32 %v4898_v12, %v1256_v50  ;;  %v943_v58 = vmul.f32 1.0614054, %v4971_v63 }
 0x170   :  { %v1133_v9 = vadd.f32 1.4214138, %v1069_v17  ;;  %v1323_v22 = vmul.f32 %v4933_v59, %v1259_v33  ;;  %v1258_v5 = vadd.f32 -0.28449672, %v1194_v31  ;;  %v1004_v23 = vadd.f32 -1.4531521, %v940_v60 }
 0x171   :  { %4078 = vrcp.f32 %v817_v16  ;;  %v2023_v42 = vsel %vm1895_vm9, %v1959_v61, %v1831_v7  ;;  %v1007_v30 = vadd.f32 -1.4531521, %v943_v58  ;;  %v1666_v43 = vmul.f32 1.442695, %v1583_v2 }
 0x172   :  { %v1197_v35 = vmul.f32 %v4951_v48, %v1133_v9  ;;  %v4067_v14 = vpop.eup %4066  ;;  %v4982_v41 = vmul.f32 %v4059_v53, %v1446_v51  ;;  %v1322_v52 = vmul.f32 %v4944_v49, %v1258_v5  ;;  %v1068_v50 = vmul.f32 %v4966_v19, %v1004_v23 }
 0x173   :  { %v1518_v17 = vsub.f32 0.0, %v4929_v37  ;;  %v4069_v33 = vpop.eup %4068  ;;  %v1449_v31 = vmul.f32 %v4893_v28, %v1385_v13  ;;  %v1384_v60 = vadd.f32 0.2548296, %v1320_v6  ;;  %v1071_v36 = vmul.f32 %v4971_v63, %v1007_v30 }
 0x174   :  { %v1261_v16 = vadd.f32 -0.28449672, %v1197_v35  ;;  %v1387_v7 = vadd.f32 0.2548296, %v1323_v22  ;;  %v1386_v2 = vadd.f32 0.2548296, %v1322_v52  ;;  %4080 = vpow2.f32 %v1660_v40 }
 0x175   :  { %v4989_v61 = vpop.eup %4070  ;;  %v1132_v9 = vadd.f32 1.4214138, %v1068_v50  ;;  %v2087_v51 = vadd.f32 1.0, %v2023_v42  ;;  %v1135_v23 = vadd.f32 1.4214138, %v1071_v36  ;;  %4082 = vpow2.f32 %v1666_v43 }
 0x176   :  { %v4073_v53 = vpop.eup %4072  ;;  %v1325_v58 = vmul.f32 %v4951_v48, %v1261_v16  ;;  %v1830_v5 = vsub.f32 1.0, %v4982_v41  ;;  %vm1894_vm10 = vcmp.lt.f32.partialorder %v4732_v29, 0.0  ;;  %v942_v13 = vmul.f32 1.0614054, %v4989_v61  ;;  %v321_v16 = vpop.f32.mrf.mxu0 }
 0x177   :  { %v1196_v28 = vmul.f32 %v4966_v19, %v1132_v9  ;;  %v1582_v6 = vmul.f32 %v1518_v17, %v4929_v37  ;;  %v4997_v35 = vmul.f32 %v4067_v14, %v1449_v31  ;;  %v1448_v40 = vmul.f32 %v4898_v12, %v1384_v60 }
 0x178   :  { %v4075_v22 = vpop.eup %4074  ;;  %v1389_v42 = vadd.f32 0.2548296, %v1325_v58  ;;  %v1199_v30 = vmul.f32 %v4971_v63, %v1135_v23  ;;  %v1451_v43 = vmul.f32 %v4933_v59, %v1387_v7  ;;  %v1450_v41 = vmul.f32 %v4944_v49, %v1386_v2 }
 0x179   :  { %v1260_v52 = vadd.f32 -0.28449672, %v1196_v28  ;;  %v1006_v50 = vadd.f32 -1.4531521, %v942_v13  ;;  %v4077_v36 = vpop.eup %4076  ;;  %v5004_v9 = vmul.f32 %v2087_v51, %v4765_v55  ;;  %v5007_v37 = vmul.f32 0.5, %v4812_v0 }
 0x17a   :  { %v5010_v14 = vmul.f32 0.5, %v4837_v32  ;;  %v1263_v12 = vadd.f32 -0.28449672, %v1199_v30  ;;  %v1958_v17 = vsub.f32 0.0, %v1830_v5  ;;  %v1453_v31 = vmul.f32 %v4951_v48, %v1389_v42 }
 0x17b   :  { %7027 = vst [vmem:[#allocation18_spill] sm:$0xff] %v5004_v9  ;;  %v1324_v59 = vmul.f32 %v4966_v19, %v1260_v52  ;;  %v1070_v49 = vmul.f32 %v4989_v61, %v1006_v50  ;;  %v1833_v60 = vsub.f32 1.0, %v4997_v35  ;;  %vm1897_vm11 = vcmp.lt.f32.partialorder %v4780_v11, 0.0 }
 0x17c   :  { %v5017_v55 = vmul.f32 %v4069_v33, %v1448_v40  ;;  %v1327_v0 = vmul.f32 %v4971_v63, %v1263_v12  ;;  %v5020_v7 = vmul.f32 0.70710677, %v321_v16  ;;  %v1771_v32 = vmul.f32 %v4073_v53, %v1451_v43  ;;  %v5042_v43 = vpop.f32.mrf.mxu0 }
 0x17d   :  { %v1770_v2 = vmul.f32 %v4075_v22, %v1450_v41  ;;  %v1134_v51 = vadd.f32 1.4214138, %v1070_v49  ;;  %v1664_v58 = vmul.f32 1.442695, %v1582_v6  ;;  %v1388_v48 = vadd.f32 0.2548296, %v1324_v59 }
 0x17e   :  { %v5022_v23 = vpop.eup %4078  ;;  %v5025_v28 = vmul.f32 0.5, %v4864_v26  ;;  %v1521_v13 = vsub.f32 0.0, %v4955_v39  ;;  %v5029_v35 = vand.u32 2147483647, %v5020_v7  ;;  %v1773_v33 = vmul.f32 %v4077_v36, %v1453_v31 }
 0x17f   :  { %v1391_v40 = vadd.f32 0.2548296, %v1327_v0  ;;  %v5032_v42 = vmul.f32 0.5, %v4910_v47  ;;  %v1198_v53 = vmul.f32 %v4989_v61, %v1134_v51  ;;  %v2022_v6 = vsel %vm1894_vm10, %v1958_v17, %v1830_v5 }
 0x180   :  { %v1961_v22 = vsub.f32 0.0, %v1833_v60  ;;  %v1832_v30 = vsub.f32 1.0, %v5017_v55  ;;  %vm1896_vm12 = vcmp.lt.f32.partialorder %v4786_v24, 0.0  ;;  %vm1899_vm13 = vcmp.lt.f32.partialorder %v4810_v20, 0.0 }
 0x181   :  { %vm1898_vm14 = vcmp.lt.f32.partialorder %v4828_v18, 0.0  ;;  %v945_v26 = vmul.f32 1.0614054, %v5022_v23  ;;  %v1835_v47 = vsub.f32 1.0, %v1771_v32  ;;  %v1834_v41 = vsub.f32 1.0, %v1770_v2  ;;  %v4081_v29 = vpop.eup %4080 }
 0x182   :  { %v1262_v52 = vadd.f32 -0.28449672, %v1198_v53  ;;  %v752_v50 = vmul.f32 0.3275911, %v5029_v35  ;;  %vm1901_vm15 = vcmp.lt.f32.partialorder %v4850_v38, 0.0  ;;  %v1452_v5 = vmul.f32 %v4966_v19, %v1388_v48  ;;  %v4083_v17 = vpop.eup %4082  ;;  %v5054_v53 = vpop.f32.mrf.mxu0 }
 0x183   :  { %4084 = vpow2.f32 %v1664_v58  ;;  %v1009_v36 = vadd.f32 -1.4531521, %v945_v26  ;;  %v1585_v12 = vmul.f32 %v1521_v13, %v4955_v39  ;;  %v1837_v31 = vsub.f32 1.0, %v1773_v33 }
 0x184   :  { %v1455_v59 = vmul.f32 %v4971_v63, %v1391_v40  ;;  %v5050_v49 = vmul.f32 0.5, %v4931_v1  ;;  %v816_v55 = vadd.f32 1.0, %v752_v50  ;;  %v2086_v0 = vadd.f32 1.0, %v2022_v6  ;;  %v5070_v50 = vpop.f32.mrf.mxu0 }
 0x185   :  { %v1960_v32 = vsub.f32 0.0, %v1832_v30  ;;  %v1326_v2 = vmul.f32 %v4989_v61, %v1262_v52  ;;  %v1073_v51 = vmul.f32 %v5022_v23, %v1009_v36  ;;  %v2025_v19 = vsel %vm1897_vm11, %v1961_v22, %v1833_v60 }
 0x186   :  { %v1963_v39 = vsub.f32 0.0, %v1835_v47  ;;  %v1962_v58 = vsub.f32 0.0, %v1834_v41  ;;  %4086 = vrcp.f32 %v816_v55  ;;  %v1772_v48 = vmul.f32 %v4081_v29, %v1452_v5 }
 0x187   :  { %v1137_v63 = vadd.f32 1.4214138, %v1073_v51  ;;  %v1670_v13 = vmul.f32 1.442695, %v1585_v12  ;;  %v5058_v1 = vmul.f32 0.5, %v321_v16  ;;  %v1965_v33 = vsub.f32 0.0, %v1837_v31 }
 0x188   :  { %v1775_v40 = vmul.f32 %v4083_v17, %v1455_v59  ;;  %v5061_v6 = vmul.f32 0.70710677, %v5042_v43  ;;  %v5064_v26 = vmul.f32 0.70710677, %v5054_v53  ;;  %v5067_v52 = vmul.f32 %v2086_v0, %v4777_v3  ;;  %v5089_v0 = vpop.f32.mrf.mxu0 }
 0x189   :  { %v2089_v11 = vadd.f32 1.0, %v2025_v19  ;;  %v1390_v60 = vadd.f32 0.2548296, %v1326_v2  ;;  %v1201_v22 = vmul.f32 %v5022_v23, %v1137_v63  ;;  %v2024_v16 = vsel %vm1896_vm12, %v1960_v32, %v1832_v30 }
 0x18a   :  { %v2027_v29 = vsel %vm1899_vm13, %v1963_v39, %v1835_v47  ;;  %v2026_v5 = vsel %vm1898_vm14, %v1962_v58, %v1834_v41  ;;  %vm1900_vm0 = vcmp.lt.f32.partialorder %v4876_v57, 0.0  ;;  %v691_v3 = vand.u32 2147483647, %v5061_v6 }
 0x18b   :  { %v1836_v36 = vsub.f32 1.0, %v1772_v48  ;;  %vm1903_vm1 = vcmp.lt.f32.partialorder %v4879_v45, 0.0  ;;  %v1265_v12 = vadd.f32 -0.28449672, %v1201_v22  ;;  %v1520_v17 = vsub.f32 0.0, %v5029_v35  ;;  %v5106_v22 = vpop.f32.mrf.mxu0 }
 0x18c   :  { %v5083_v59 = vand.u32 2147483647, %v5064_v26  ;;  %v2029_v24 = vsel %vm1901_vm15, %v1965_v33, %v1837_v31  ;;  %v1839_v20 = vsub.f32 1.0, %v1775_v40  ;;  %4088 = vpow2.f32 %v1670_v13 }
 0x18d   :  { %v755_v18 = vmul.f32 0.3275911, %v691_v3  ;;  %v2088_v30 = vadd.f32 1.0, %v2024_v16  ;;  %v2091_v47 = vadd.f32 1.0, %v2027_v29  ;;  %v1454_v41 = vmul.f32 %v4989_v61, %v1390_v60 }
 0x18e   :  { %v754_v55 = vmul.f32 0.3275911, %v5083_v59  ;;  %v2090_v32 = vadd.f32 1.0, %v2026_v5  ;;  %v1329_v2 = vmul.f32 %v5022_v23, %v1265_v12  ;;  %v5093_v19 = vmul.f32 0.70710677, %v5070_v50 }
 0x18f   :  { %v819_v51 = vadd.f32 1.0, %v755_v18  ;;  %v2093_v38 = vadd.f32 1.0, %v2029_v24  ;;  %v1964_v31 = vsub.f32 0.0, %v1836_v36  ;;  %v1584_v39 = vmul.f32 %v1520_v17, %v5029_v35 }
 0x190   :  { %v818_v58 = vadd.f32 1.0, %v754_v55  ;;  %v4085_v48 = vpop.eup %4084  ;;  %v5097_v63 = vmul.f32 %v2089_v11, %v4818_v44  ;;  %v1967_v61 = vsub.f32 0.0, %v1839_v20  ;;  %v693_v13 = vand.u32 2147483647, %v5093_v19 }
 0x191   :  { %4090 = vrcp.f32 %v819_v51  ;;  %v5101_v33 = vmul.f32 %v2088_v30, %v4873_v46  ;;  %v5104_v40 = vmul.f32 %v2091_v47, %v4896_v25  ;;  %v1774_v60 = vmul.f32 %v4085_v48, %v1454_v41  ;;  %v5137_v30 = vpop.f32.mrf.mxu0 }
 0x192   :  { %7028 = vst [vmem:[#allocation19_spill] sm:$0xff] %v5097_v63  ;;  %4092 = vrcp.f32 %v818_v58  ;;  %v5109_v35 = vmul.f32 %v2090_v32, %v4926_v8  ;;  %v1393_v16 = vadd.f32 0.2548296, %v1329_v2  ;;  %v5112_v44 = vmul.f32 0.5, %v5042_v43 }
 0x193   :  { %7029 = vst [vmem:[#allocation20_spill] sm:$0xff] %v5101_v33  ;;  %7030 = vst [vmem:[#allocation21_spill] sm:$0xff] %v5104_v40  ;;  %v757_v11 = vmul.f32 0.3275911, %v693_v13  ;;  %v5114_v29 = vpop.eup %4086  ;;  %v5117_v46 = vmul.f32 %v2093_v38, %v5007_v37  ;;  %v2028_v25 = vsel %vm1900_vm0, %v1964_v31, %v1836_v36  ;;  %v1668_v5 = vmul.f32 1.442695, %v1584_v39 }
 0x194   :  { %7031 = vst [vmem:[#allocation22_spill] sm:$0xff] %v5109_v35  ;;  %v5122_v12 = vmul.f32 0.70710677, %v5089_v0  ;;  %v2031_v8 = vsel %vm1903_vm1, %v1967_v61, %v1839_v20  ;;  %vm1902_vm2 = vcmp.lt.f32.partialorder %v4920_v10, 0.0  ;;  %v944_v43 = vmul.f32 1.0614054, %v5114_v29 }
 0x195   :  { %7032 = vst [vmem:[#allocation23_spill] sm:$0xff] %v5117_v46  ;;  %v1523_v17 = vsub.f32 0.0, %v691_v3  ;;  %v821_v24 = vadd.f32 1.0, %v757_v11  ;;  %v1838_v18 = vsub.f32 1.0, %v1774_v60  ;;  %v5129_v37 = vmul.f32 0.5, %v5054_v53 }
 0x196   :  { %v5132_v57 = vand.u32 2147483647, %v5122_v12  ;;  %v5135_v36 = vmul.f32 0.70710677, %v5106_v22  ;;  %v1457_v45 = vmul.f32 %v5022_v23, %v1393_v16  ;;  %v1008_v20 = vadd.f32 -1.4531521, %v944_v43 }
 0x197   :  { %v1522_v47 = vsub.f32 0.0, %v5083_v59  ;;  %4094 = vrcp.f32 %v821_v24  ;;  %v2092_v41 = vadd.f32 1.0, %v2028_v25  ;;  %v2095_v55 = vadd.f32 1.0, %v2031_v8 }
 0x198   :  { %v756_v32 = vmul.f32 0.3275911, %v5132_v57  ;;  %v5143_v53 = vand.u32 2147483647, %v5135_v36  ;;  %v1072_v2 = vmul.f32 %v5114_v29, %v1008_v20  ;;  %4096 = vpow2.f32 %v1668_v5 }
 0x199   :  { %v1587_v51 = vmul.f32 %v1523_v17, %v691_v3  ;;  %v5147_v38 = vmul.f32 0.70710677, %v5137_v30  ;;  %v4089_v31 = vpop.eup %4088  ;;  %v1966_v23 = vsub.f32 0.0, %v1838_v18  ;;  %v1525_v39 = vsub.f32 0.0, %v693_v13 }
 0x19a   :  { %v820_v58 = vadd.f32 1.0, %v756_v32  ;;  %v759_v48 = vmul.f32 0.3275911, %v5143_v53  ;;  %v5150_v61 = vmul.f32 %v4089_v31, %v1457_v45  ;;  %v1136_v60 = vadd.f32 1.4214138, %v1072_v2 }
 0x19b   :  { %v1586_v16 = vmul.f32 %v1522_v47, %v5083_v59  ;;  %v5154_v11 = vand.u32 2147483647, %v5147_v38  ;;  %v5157_v25 = vmul.f32 %v2092_v41, %v5010_v14  ;;  %v5160_v3 = vmul.f32 %v2095_v55, %v5025_v28  ;;  %v5177_v47 = vpop.f32.mrf.mxu0 }
 0x19c   :  { %4098 = vrcp.f32 %v820_v58  ;;  %v823_v5 = vadd.f32 1.0, %v759_v48  ;;  %v1200_v8 = vmul.f32 %v5114_v29, %v1136_v60  ;;  %v1674_v43 = vmul.f32 1.442695, %v1587_v51 }
 0x19d   :  { %7033 = vst [vmem:[#allocation24_spill] sm:$0xff] %v5157_v25  ;;  %7034 = vst [vmem:[#allocation25_spill] sm:$0xff] %v5160_v3  ;;  %v5164_v17 = vmul.f32 0.5, %v5070_v50  ;;  %v758_v24 = vmul.f32 0.3275911, %v5154_v11  ;;  %v5171_v45 = vsel %vm1902_vm2, %v1966_v23, %v1838_v18  ;;  %v1589_v14 = vmul.f32 %v1525_v39, %v693_v13 }
 0x19e   :  { %v5167_v59 = vpop.eup %4090  ;;  %v5174_v28 = vmul.f32 0.5, %v5089_v0  ;;  %v924_v20 = vmul.f32 1.0614054, %v4751_v34  ;;  %v6970_v50 = vsub.f32 1.0, %v5150_v61  ;;  %v1672_v32 = vmul.f32 1.442695, %v1586_v16 }
 0x19f   :  { %v5179_v41 = vpop.eup %4092  ;;  %v947_v55 = vmul.f32 1.0614054, %v5167_v59  ;;  %4100 = vrcp.f32 %v823_v5  ;;  %v1524_v18 = vsub.f32 0.0, %v5132_v57  ;;  %v822_v13 = vadd.f32 1.0, %v758_v24  ;;  %v5194_v5 = vpop.f32.mrf.mxu0 }
 0x1a0   :  { %7035 = vst [vmem:[#allocation26_spill] sm:$0xff] %v5174_v28  ;;  %v946_v10 = vmul.f32 1.0614054, %v5179_v41  ;;  %v988_v2 = vadd.f32 -1.4531521, %v924_v20  ;;  %4102 = vpow2.f32 %v1674_v43  ;;  %v1527_v60 = vsub.f32 0.0, %v5143_v53 }
 0x1a1   :  { %v1264_v0 = vadd.f32 -0.28449672, %v1200_v8  ;;  %v1011_v51 = vadd.f32 -1.4531521, %v947_v55  ;;  %v5186_v31 = vmul.f32 0.70710677, %v5177_v47  ;;  %4104 = vrcp.f32 %v822_v13 }
 0x1a2   :  { %v1010_v23 = vadd.f32 -1.4531521, %v946_v10  ;;  %v1678_v39 = vmul.f32 1.442695, %v1589_v14  ;;  %v1052_v58 = vmul.f32 %v4751_v34, %v988_v2  ;;  %4106 = vpow2.f32 %v1672_v32 }
 0x1a3   :  { %v1075_v48 = vmul.f32 %v5167_v59, %v1011_v51  ;;  %v5192_v16 = vand.u32 2147483647, %v5186_v31  ;;  %v5200_v43 = vsub.f32 0.0, %v6970_v50  ;;  %v1588_v14 = vmul.f32 %v1524_v18, %v5132_v57 }
 0x1a4   :  { %v5196_v8 = vpop.eup %4094  ;;  %v1074_v24 = vmul.f32 %v5179_v41, %v1010_v23  ;;  %v1116_v20 = vadd.f32 1.4214138, %v1052_v58  ;;  %v1328_v55 = vmul.f32 %v5114_v29, %v1264_v0  ;;  %4108 = vpow2.f32 %v1678_v39 }
 0x1a5   :  { %v1139_v32 = vadd.f32 1.4214138, %v1075_v48  ;;  %v949_v10 = vmul.f32 1.0614054, %v5196_v8  ;;  %v761_v13 = vmul.f32 0.3275911, %v5192_v16  ;;  %v4097_v2 = vpop.eup %4096  ;;  %v1591_v57 = vmul.f32 %v1527_v60, %v5143_v53 }
 0x1a6   :  { %v1138_v51 = vadd.f32 1.4214138, %v1074_v24  ;;  %v1180_v3 = vmul.f32 %v4751_v34, %v1116_v20  ;;  %v5209_v50 = vmul.f32 0.70710677, %v5194_v5  ;;  %v1526_v58 = vsub.f32 0.0, %v5154_v11 }
 0x1a7   :  { %v1203_v23 = vmul.f32 %v5167_v59, %v1139_v32  ;;  %v1013_v46 = vadd.f32 -1.4531521, %v949_v10  ;;  %v825_v18 = vadd.f32 1.0, %v761_v13  ;;  %v1392_v24 = vadd.f32 0.2548296, %v1328_v55 }
 0x1a8   :  { %v1202_v0 = vmul.f32 %v5179_v41, %v1138_v51  ;;  %v1244_v48 = vadd.f32 -0.28449672, %v1180_v3  ;;  %v5216_v25 = vand.u32 2147483647, %v5209_v50  ;;  %v1676_v35 = vmul.f32 1.442695, %v1588_v14 }
 0x1a9   :  { %v5218_v39 = vpop.eup %4098  ;;  %v1267_v20 = vadd.f32 -0.28449672, %v1203_v23  ;;  %v1077_v40 = vmul.f32 %v5196_v8, %v1013_v46  ;;  %4110 = vrcp.f32 %v825_v18  ;;  %v1682_v3 = vmul.f32 1.442695, %v1591_v57 }
 0x1aa   :  { %v1266_v32 = vadd.f32 -0.28449672, %v1202_v0  ;;  %v948_v10 = vmul.f32 1.0614054, %v5218_v39  ;;  %v1308_v53 = vmul.f32 %v4751_v34, %v1244_v48  ;;  %v760_v51 = vmul.f32 0.3275911, %v5216_v25 }
 0x1ab   :  { %v1331_v60 = vmul.f32 %v5167_v59, %v1267_v20  ;;  %v1141_v13 = vadd.f32 1.4214138, %v1077_v40  ;;  %v1590_v46 = vmul.f32 %v1526_v58, %v5154_v11  ;;  %vm1905_vm3 = vcmp.lt.f32.partialorder %v4942_v27, 0.0 }
 0x1ac   :  { %v5225_v63 = vpop.eup %4100  ;;  %v1330_v55 = vmul.f32 %v5179_v41, %v1266_v32  ;;  %v1012_v23 = vadd.f32 -1.4531521, %v948_v10  ;;  %v1372_v14 = vadd.f32 0.2548296, %v1308_v53  ;;  %4112 = vpow2.f32 %v1676_v35 }
 0x1ad   :  { %v1395_v0 = vadd.f32 0.2548296, %v1331_v60  ;;  %v1205_v48 = vmul.f32 %v5196_v8, %v1141_v13  ;;  %v951_v18 = vmul.f32 1.0614054, %v5225_v63  ;;  %v4103_v40 = vpop.eup %4102  ;;  %vm1884_vm4 = vcmp.lt.f32.partialorder %v4587_v62, 0.0 }
 0x1ae   :  { %v1456_v57 = vmul.f32 %v5114_v29, %v1392_v24  ;;  %v1394_v20 = vadd.f32 0.2548296, %v1330_v55  ;;  %v1076_v32 = vmul.f32 %v5218_v39, %v1012_v23  ;;  %v1436_v10 = vmul.f32 %v4751_v34, %v1372_v14  ;;  %v5236_v11 = vpop.eup %4104 }
 0x1af   :  { %v1459_v58 = vmul.f32 %v5167_v59, %v1395_v0  ;;  %v1269_v53 = vadd.f32 -0.28449672, %v1205_v48  ;;  %v1015_v60 = vadd.f32 -1.4531521, %v951_v18  ;;  %v824_v13 = vadd.f32 1.0, %v760_v51  ;;  %v4107_v35 = vpop.eup %4106 }
 0x1b0   :  { %v1140_v33 = vadd.f32 1.4214138, %v1076_v32  ;;  %4114 = vpow2.f32 %v1682_v3  ;;  %v950_v28 = vmul.f32 1.0614054, %v5236_v11  ;;  %v1680_v9 = vmul.f32 1.442695, %v1590_v46 }
 0x1b1   :  { %v1333_v29 = vmul.f32 %v5196_v8, %v1269_v53  ;;  %v1079_v24 = vmul.f32 %v5225_v63, %v1015_v60  ;;  %v1756_v55 = vmul.f32 %v4768_v56, %v1436_v10  ;;  %v1529_v34 = vsub.f32 0.0, %v5192_v16  ;;  %v4109_v51 = vpop.eup %4108 }
 0x1b2   :  { %v5244_v23 = vmul.f32 %v4097_v2, %v1456_v57  ;;  %v1204_v59 = vmul.f32 %v5218_v39, %v1140_v33  ;;  %v1014_v14 = vadd.f32 -1.4531521, %v950_v28  ;;  %4116 = vrcp.f32 %v824_v13 }
 0x1b3   :  { %v1779_v0 = vmul.f32 %v4103_v40, %v1459_v58  ;;  %v1458_v3 = vmul.f32 %v5179_v41, %v1394_v20  ;;  %v1143_v48 = vadd.f32 1.4214138, %v1079_v24  ;;  %v1820_v46 = vsub.f32 1.0, %v1756_v55 }
 0x1b4   :  { %v2094_v18 = vadd.f32 1.0, %v5171_v45  ;;  %v1397_v32 = vadd.f32 0.2548296, %v1333_v29  ;;  %v1268_v53 = vadd.f32 -0.28449672, %v1204_v59  ;;  %v1078_v56 = vmul.f32 %v5236_v11, %v1014_v14  ;;  %v5274_v14 = vpop.f32.mrf.mxu0 }
 0x1b5   :  { %v1207_v10 = vmul.f32 %v5225_v63, %v1143_v48  ;;  %4118 = vpow2.f32 %v1680_v9  ;;  %v1948_v2 = vsub.f32 0.0, %v1820_v46  ;;  %v1593_v33 = vmul.f32 %v1529_v34, %v5192_v16 }
 0x1b6   :  { %v7036_v28 = vsub.f32 1.0, %v5150_v61  ;;  %v1840_v40 = vsub.f32 1.0, %v5244_v23  ;;  %vm1904_vm5 = vcmp.lt.f32.partialorder %v5020_v7, 0.0  ;;  %vm1907_vm6 = vcmp.lt.f32.partialorder %v5061_v6, 0.0  ;;  %v5261_v20 = vpop.eup %4110 }
 0x1b7   :  { %v1332_v45 = vmul.f32 %v5218_v39, %v1268_v53  ;;  %v1142_v57 = vadd.f32 1.4214138, %v1078_v56  ;;  %v1843_v9 = vsub.f32 1.0, %v1779_v0  ;;  %v1778_v58 = vmul.f32 %v4107_v35, %v1458_v3 }
 0x1b8   :  { %v2033_v41 = vsel %vm1905_vm3, %v5200_v43, %v7036_v28  ;;  %v1271_v16 = vadd.f32 -0.28449672, %v1207_v10  ;;  %v2012_v61 = vsel %vm1884_vm4, %v1948_v2, %v1820_v46  ;;  %v5266_v27 = vmul.f32 %v2094_v18, %v5032_v42 }
 0x1b9   :  { %v1461_v43 = vmul.f32 %v5196_v8, %v1397_v32  ;;  %v1396_v60 = vadd.f32 0.2548296, %v1332_v45  ;;  %v1206_v13 = vmul.f32 %v5236_v11, %v1142_v57  ;;  %v2076_v24 = vadd.f32 1.0, %v2012_v61  ;;  %v4113_v23 = vpop.eup %4112 }
 0x1ba   :  { %v1335_v29 = vmul.f32 %v5225_v63, %v1271_v16  ;;  %v1686_v55 = vmul.f32 1.442695, %v1593_v33  ;;  %v1528_v34 = vsub.f32 0.0, %v5216_v25  ;;  %v2097_v35 = vadd.f32 1.0, %v2033_v41  ;;  %v5294_v41 = vpop.f32.mrf.mxu0 }
 0x1bb   :  { %v1968_v59 = vsub.f32 0.0, %v1840_v40  ;;  %vm1906_vm7 = vcmp.lt.f32.partialorder %v5064_v26, 0.0  ;;  %v1270_v62 = vadd.f32 -0.28449672, %v1206_v13  ;;  %v953_v42 = vmul.f32 1.0614054, %v5261_v20 }
 0x1bc   :  { %v1971_v8 = vsub.f32 0.0, %v1843_v9  ;;  %v1842_v0 = vsub.f32 1.0, %v1778_v58  ;;  %v1399_v3 = vadd.f32 0.2548296, %v1335_v29  ;;  %v2140_v48 = vmul.f32 %v2076_v24, %v4622_v21 }
 0x1bd   :  { %v5277_v46 = vmul.f32 %v4109_v51, %v1461_v43  ;;  %v1460_v18 = vmul.f32 %v5218_v39, %v1396_v60  ;;  %v1334_v32 = vmul.f32 %v5236_v11, %v1270_v62  ;;  %v1017_v53 = vadd.f32 -1.4531521, %v953_v42  ;;  %v4115_v56 = vpop.eup %4114 }
 0x1be   :  { %v5282_v10 = vmul.f32 0.5, %v5106_v22  ;;  %v1463_v2 = vmul.f32 %v5225_v63, %v1399_v3  ;;  %v5286_v33 = vmul.f32 0.5, %v5137_v30  ;;  %3902 = vmatprep.mubr.f32.mxu1 %v2140_v48  ;;  %v1592_v28 = vmul.f32 %v1528_v34, %v5216_v25  ;;  %v7037_v34 = vld [vmem:[#allocation13_spill] sm:$0xff] }
 0x1bf   :  { %v5290_v21 = vmul.f32 %v2097_v35, %v5050_v49  ;;  %v1398_v51 = vadd.f32 0.2548296, %v1334_v32  ;;  %3903 = vmatmul.mubr.f32.vlgmr.msra.gmra.mxu1 %v4815_v4  ;;  %v1081_v39 = vmul.f32 %v5261_v20, %v1017_v53  ;;  %4120 = vpow2.f32 %v1686_v55  ;;  %v5296_v22 = vpop.eup %4116 }
 0x1c0   :  { %v2032_v63 = vsel %vm1904_vm5, %v1968_v59, %v1840_v40  ;;  %v2035_v30 = vsel %vm1907_vm6, %v1971_v8, %v1843_v9  ;;  %v1970_v25 = vsub.f32 0.0, %v1842_v0  ;;  %vm1909_vm8 = vcmp.lt.f32.partialorder %v5093_v19, 0.0  ;;  %3905 = vmatprep.mubr.f32.mxu1 %v4834_v54 }
 0x1c1   :  { %v5305_v4 = vmul.f32 0.70710677, %v5274_v14  ;;  %v1845_v49 = vsub.f32 1.0, %v5277_v46  ;;  %v5308_v45 = vmul.f32 %v4113_v23, %v1460_v18  ;;  %v1462_v57 = vmul.f32 %v5236_v11, %v1398_v51  ;;  %v5322_v11 = vpop.f32.mrf.mxu0  ;;  %v7038_v46 = vld [vmem:[#allocation12_spill] sm:$0xff] }
 0x1c2   :  { %v1145_v58 = vadd.f32 1.4214138, %v1081_v39  ;;  %v5311_v7 = vmul.f32 %v4115_v56, %v1463_v2  ;;  %v952_v6 = vmul.f32 1.0614054, %v5296_v22  ;;  %v1684_v40 = vmul.f32 1.442695, %v1592_v28  ;;  %v4119_v16 = vpop.eup %4118 }
 0x1c3   :  { %v5315_v9 = vand.u32 2147483647, %v5305_v4  ;;  %v2096_v54 = vadd.f32 1.0, %v2032_v63  ;;  %v2099_v61 = vadd.f32 1.0, %v2035_v30  ;;  %3906 = vmatmul.mubr.f32.gmra.mxu1 %v4831_v15  ;;  %v5320_v60 = vmul.f32 0.70710677, %v5294_v41  ;;  %v5343_v18 = vpop.f32.mrf.mxu0 }
 0x1c4   :  { %v1209_v43 = vmul.f32 %v5261_v20, %v1145_v58  ;;  %v2034_v13 = vsel %vm1906_vm7, %v1970_v25, %v1842_v0  ;;  %vm1908_vm9 = vcmp.lt.f32.partialorder %v5122_v12, 0.0  ;;  %v1782_v29 = vmul.f32 %v4119_v16, %v1462_v57  ;;  %3908 = vmatprep.mubr.f32.mxu1 %v7037_v34  ;;  %v7039_v2 = vld [vmem:[#allocation15_spill] sm:$0xff]  ;;  %v7041_v16 = vld [vmem:[#allocation17_spill] sm:$0xff] }
 0x1c5   :  { %v1016_v24 = vadd.f32 -1.4531521, %v952_v6  ;;  %v763_v55 = vmul.f32 0.3275911, %v5315_v9  ;;  %v1973_v23 = vsub.f32 0.0, %v1845_v49  ;;  %v1844_v35 = vsub.f32 1.0, %v5308_v45  ;;  %v5364_v58 = vpop.f32.mrf.mxu0 }
 0x1c6   :  { %vm1911_vm10 = vcmp.lt.f32.partialorder %v5135_v36, 0.0  ;;  %v1273_v15 = vadd.f32 -0.28449672, %v1209_v43  ;;  %v698_v59 = vand.u32 2147483647, %v5320_v60  ;;  %v1847_v62 = vsub.f32 1.0, %v5311_v7 }
 0x1c7   :  { %v1080_v26 = vmul.f32 %v5296_v22, %v1016_v24  ;;  %4122 = vpow2.f32 %v1684_v40  ;;  %v827_v42 = vadd.f32 1.0, %v763_v55  ;;  %v2098_v8 = vadd.f32 1.0, %v2034_v13  ;;  %3909 = vmatmul.mubr.f32.gmra.mxu1 %v7038_v46 }
 0x1c8   :  { %vm1910_vm11 = vcmp.lt.f32.partialorder %v5147_v38, 0.0  ;;  %v5336_v0 = vmul.f32 0.5, %v5177_v47  ;;  %v1337_v3 = vmul.f32 %v5261_v20, %v1273_v15  ;;  %v5340_v48 = vmul.f32 0.5, %v5194_v5  ;;  %3911 = vmatprep.mubr.f32.mxu1 %v7039_v2  ;;  %v5397_v38 = vpop.f32.mrf.mxu0 }
 0x1c9   :  { %v1846_v32 = vsub.f32 1.0, %v1782_v29  ;;  %v1144_v53 = vadd.f32 1.4214138, %v1080_v26  ;;  %4124 = vrcp.f32 %v827_v42  ;;  %v762_v56 = vmul.f32 0.3275911, %v698_v59 }
 0x1ca   :  { %v5347_v28 = vmul.f32 %v2096_v54, %v5058_v1  ;;  %v2037_v47 = vsel %vm1909_vm8, %v1973_v23, %v1845_v49  ;;  %v1972_v51 = vsub.f32 0.0, %v1844_v35  ;;  %v1401_v39 = vadd.f32 0.2548296, %v1337_v3  ;;  %v7040_v49 = vld [vmem:[#allocation14_spill] sm:$0xff]  ;;  %v7042_v23 = vld [vmem:[#allocation16_spill] sm:$0xff] }
 0x1cb   :  { %v5352_v5 = vmul.f32 %v2099_v61, %v5112_v44  ;;  %v1975_v63 = vsub.f32 0.0, %v1847_v62  ;;  %v1208_v30 = vmul.f32 %v5296_v22, %v1144_v53  ;;  %v826_v25 = vadd.f32 1.0, %v762_v56  ;;  %3912 = vmatmul.mubr.f32.gmra.mxu1 %v7040_v49 }
 0x1cc   :  { %v5356_v45 = vmul.f32 %v2098_v8, %v5129_v37  ;;  %v1465_v57 = vmul.f32 %v5261_v20, %v1401_v39  ;;  %v5360_v1 = vmul.f32 0.5, %v5274_v14  ;;  %v1531_v19 = vsub.f32 0.0, %v5315_v9  ;;  %v4121_v44 = vpop.eup %4120  ;;  %3914 = vmatprep.mubr.f32.mxu1 %v7041_v16 }
 0x1cd   :  { %v2101_v7 = vadd.f32 1.0, %v2037_v47  ;;  %v1974_v6 = vsub.f32 0.0, %v1846_v32  ;;  %v1272_v40 = vadd.f32 -0.28449672, %v1208_v30  ;;  %4126 = vrcp.f32 %v826_v25  ;;  %v7045_v25 = vld [vmem:[#allocation20_spill] sm:$0xff] }
 0x1ce   :  { %v2036_v37 = vsel %vm1908_vm9, %v1972_v51, %v1844_v35  ;;  %v1530_v20 = vsub.f32 0.0, %v698_v59  ;;  %v5370_v14 = vmul.f32 0.70710677, %v5322_v11  ;;  %v5373_v54 = vmul.f32 0.70710677, %v5343_v18  ;;  %v7043_v51 = vld [vmem:[#allocation18_spill] sm:$0xff] }
 0x1cf   :  { %v2039_v61 = vsel %vm1911_vm10, %v1975_v63, %v1847_v62  ;;  %v1785_v43 = vmul.f32 %v4121_v44, %v1465_v57  ;;  %v1336_v13 = vmul.f32 %v5296_v22, %v1272_v40  ;;  %v5379_v29 = vmul.f32 0.70710677, %v5364_v58  ;;  %3915 = vmatmul.mubr.f32.gmra.mxu1 %v7042_v23  ;;  %v5411_v40 = vpop.f32.mrf.mxu0 }
 0x1d0   :  { %v1595_v24 = vmul.f32 %v1531_v19, %v5315_v9  ;;  %v5383_v12 = vmul.f32 0.5, %v5294_v41  ;;  %v701_v55 = vand.u32 2147483647, %v5370_v14  ;;  %v700_v34 = vand.u32 2147483647, %v5373_v54  ;;  %3917 = vmatprep.mubr.f32.mxu1 %v5067_v52 }
 0x1d1   :  { %v2100_v35 = vadd.f32 1.0, %v2036_v37  ;;  %v2038_v36 = vsel %vm1910_vm11, %v1974_v6, %v1846_v32  ;;  %v1400_v15 = vadd.f32 0.2548296, %v1336_v13  ;;  %v703_v62 = vand.u32 2147483647, %v5379_v29 }
 0x1d2   :  { %v2103_v26 = vadd.f32 1.0, %v2039_v61  ;;  %vm1913_vm12 = vcmp.lt.f32.partialorder %v5186_v31, 0.0  ;;  %v1594_v41 = vmul.f32 %v1530_v20, %v698_v59  ;;  %v765_v9 = vmul.f32 0.3275911, %v701_v55  ;;  %v7044_v59 = vld [vmem:[#allocation26_spill] sm:$0xff] }
 0x1d3   :  { %v764_v42 = vmul.f32 0.3275911, %v700_v34  ;;  %v5394_v8 = vmul.f32 %v2101_v7, %v5164_v17  ;;  %v1849_v3 = vsub.f32 1.0, %v1785_v43  ;;  %v1464_v46 = vmul.f32 %v5296_v22, %v1400_v15  ;;  %3918 = vmatmul.mubr.f32.gmra.mxu1 %v7043_v51 }
 0x1d4   :  { %v767_v53 = vmul.f32 0.3275911, %v703_v62  ;;  %v4123_v32 = vpop.eup %4122  ;;  %v2102_v56 = vadd.f32 1.0, %v2038_v36  ;;  %vm1912_vm13 = vcmp.lt.f32.partialorder %v5209_v50, 0.0  ;;  %v1690_v52 = vmul.f32 1.442695, %v1595_v24  ;;  %3920 = vmatprep.mubr.f32.mxu1 %v7045_v25 }
 0x1d5   :  { %v829_v2 = vadd.f32 1.0, %v765_v9  ;;  %v828_v47 = vadd.f32 1.0, %v764_v42  ;;  %v5402_v39 = vmul.f32 %v2100_v35, %v7044_v59  ;;  %v1784_v17 = vmul.f32 %v4123_v32, %v1464_v46  ;;  %v7047_v24 = vld [vmem:[#allocation22_spill] sm:$0xff]  ;;  %v5434_v9 = vpop.f32.mrf.mxu0 }
 0x1d6   :  { %v1533_v63 = vsub.f32 0.0, %v701_v55  ;;  %v831_v30 = vadd.f32 1.0, %v767_v53  ;;  %v5405_v22 = vpop.eup %4124  ;;  %v5408_v57 = vmul.f32 %v2103_v26, %v5282_v10  ;;  %v1688_v19 = vmul.f32 1.442695, %v1594_v41  ;;  %v7046_v10 = vld [vmem:[#allocation19_spill] sm:$0xff]  ;;  %v7048_v53 = vld [vmem:[#allocation21_spill] sm:$0xff] }
 0x1d7   :  { %4128 = vrcp.f32 %v829_v2  ;;  %v1532_v49 = vsub.f32 0.0, %v700_v34  ;;  %v1977_v44 = vsub.f32 0.0, %v1849_v3  ;;  %v1848_v7 = vsub.f32 1.0, %v1784_v17  ;;  %3921 = vmatmul.mubr.f32.gmra.mxu1 %v7046_v10  ;;  %v5446_v25 = vpop.f32.mrf.mxu0 }
 0x1d8   :  { %v955_v6 = vmul.f32 1.0614054, %v5405_v22  ;;  %4130 = vrcp.f32 %v828_v47  ;;  %v5414_v16 = vmul.f32 %v2102_v56, %v5286_v33  ;;  %v1535_v37 = vsub.f32 0.0, %v703_v62  ;;  %3923 = vmatprep.mubr.f32.mxu1 %v7047_v24 }
 0x1d9   :  { %4132 = vpow2.f32 %v1690_v52  ;;  %v5417_v20 = vmul.f32 0.70710677, %v5397_v38  ;;  %v1976_v61 = vsub.f32 0.0, %v1848_v7  ;;  %v1597_v13 = vmul.f32 %v1533_v63, %v701_v55  ;;  %v7049_v52 = vld [vmem:[#allocation24_spill] sm:$0xff] }
 0x1da   :  { %v1019_v43 = vadd.f32 -1.4531521, %v955_v6  ;;  %4134 = vrcp.f32 %v831_v30  ;;  %v5421_v23 = vpop.eup %4126  ;;  %v5424_v35 = vmul.f32 0.5, %v5343_v18  ;;  %v1596_v33 = vmul.f32 %v1532_v49, %v700_v34 }
 0x1db   :  { %v702_v36 = vand.u32 2147483647, %v5417_v20  ;;  %v5428_v15 = vmul.f32 0.70710677, %v5411_v40  ;;  %v2041_v26 = vsel %vm1913_vm12, %v1977_v44, %v1849_v3  ;;  %v954_v55 = vmul.f32 1.0614054, %v5421_v23  ;;  %3924 = vmatmul.mubr.f32.gmra.mxu1 %v7048_v53 }
 0x1dc   :  { %v1083_v41 = vmul.f32 %v5405_v22, %v1019_v43  ;;  %4136 = vpow2.f32 %v1688_v19  ;;  %v1599_v42 = vmul.f32 %v1535_v37, %v703_v62  ;;  %v2040_v32 = vsel %vm1912_vm13, %v1976_v61, %v1848_v7  ;;  %3926 = vmatprep.mubr.f32.mxu1 %v7049_v52  ;;  %v7050_v44 = vld [vmem:[#allocation23_spill] sm:$0xff] }
 0x1dd   :  { %v766_v46 = vmul.f32 0.3275911, %v702_v36  ;;  %v1534_v18 = vsub.f32 0.0, %v702_v36  ;;  %v705_v34 = vand.u32 2147483647, %v5428_v15  ;;  %v2105_v2 = vadd.f32 1.0, %v2041_v26 }
 0x1de   :  { %v1147_v56 = vadd.f32 1.4214138, %v1083_v41  ;;  %v1018_v31 = vadd.f32 -1.4531521, %v954_v55  ;;  %v1694_v3 = vmul.f32 1.442695, %v1597_v13 }
 0x1df   :  { %v1692_v47 = vmul.f32 1.442695, %v1596_v33  ;;  %v830_v51 = vadd.f32 1.0, %v766_v46  ;;  %v769_v59 = vmul.f32 0.3275911, %v705_v34  ;;  %v1598_v63 = vmul.f32 %v1534_v18, %v702_v36  ;;  %3927 = vmatmul.mubr.f32.gmra.mxu1 %v7050_v44  ;;  %v7051_v55 = vld [vmem:[#allocation25_spill] sm:$0xff] }
 0x1e0   :  { %v1211_v62 = vmul.f32 %v5405_v22, %v1147_v56  ;;  %v1082_v17 = vmul.f32 %v5421_v23, %v1018_v31  ;;  %v5444_v30 = vmul.f32 0.70710677, %v5434_v9  ;;  %v2104_v50 = vadd.f32 1.0, %v2040_v32  ;;  %3929 = vmatprep.mubr.f32.mxu1 %v5266_v27 }
 0x1e1   :  { %v1698_v19 = vmul.f32 1.442695, %v1599_v42  ;;  %4138 = vrcp.f32 %v830_v51  ;;  %v833_v49 = vadd.f32 1.0, %v769_v59  ;;  %v5452_v10 = vmul.f32 %v2105_v2, %v5336_v0 }
 0x1e2   :  { %v1275_v7 = vadd.f32 -0.28449672, %v1211_v62  ;;  %v1146_v6 = vadd.f32 1.4214138, %v1082_v17  ;;  %4140 = vpow2.f32 %v1694_v3  ;;  %v704_v37 = vand.u32 2147483647, %v5444_v30 }
 0x1e3   :  { %4142 = vpow2.f32 %v1692_v47  ;;  %v1537_v61 = vsub.f32 0.0, %v705_v34  ;;  %v5455_v43 = vmul.f32 0.70710677, %v5446_v25  ;;  %v1696_v36 = vmul.f32 1.442695, %v1598_v63  ;;  %3930 = vmatmul.mubr.f32.gmra.mxu1 %v7051_v55 }
 0x1e4   :  { %v5457_v13 = vpop.eup %4128  ;;  %v1339_v24 = vmul.f32 %v5405_v22, %v1275_v7  ;;  %v1210_v33 = vmul.f32 %v5421_v23, %v1146_v6  ;;  %4144 = vrcp.f32 %v833_v49  ;;  %v768_v0 = vmul.f32 0.3275911, %v704_v37  ;;  %3932 = vmatprep.mubr.f32.mxu1 %v5347_v28 }
 0x1e5   :  { %v5461_v26 = vpop.eup %4130  ;;  %v957_v27 = vmul.f32 1.0614054, %v5457_v13  ;;  %4146 = vpow2.f32 %v1698_v19  ;;  %v1536_v41 = vsub.f32 0.0, %v704_v37  ;;  %v5466_v46 = vmul.f32 %v2104_v50, %v5340_v48 }
 0x1e6   :  { %v4133_v42 = vpop.eup %4132  ;;  %v1403_v18 = vadd.f32 0.2548296, %v1339_v24  ;;  %v1274_v53 = vadd.f32 -0.28449672, %v1210_v33  ;;  %v956_v32 = vmul.f32 1.0614054, %v5461_v26  ;;  %v1601_v3 = vmul.f32 %v1537_v61, %v705_v34 }
 0x1e7   :  { %v5470_v56 = vpop.eup %4134  ;;  %vm1915_vm14 = vcmp.lt.f32.partialorder %v5305_v4, 0.0  ;;  %v1021_v31 = vadd.f32 -1.4531521, %v957_v27  ;;  %v832_v52 = vadd.f32 1.0, %v768_v0  ;;  %v707_v2 = vand.u32 2147483647, %v5455_v43  ;;  %3933 = vmatmul.mubr.f32.gmra.mxu1 %v5290_v21  ;;  %v5484_v21 = vpop.f32.mrf.mxu0 }
 0x1e8   :  { %v1467_v47 = vmul.f32 %v5405_v22, %v1403_v18  ;;  %v1338_v48 = vmul.f32 %v5421_v23, %v1274_v53  ;;  %v1020_v51 = vadd.f32 -1.4531521, %v956_v32  ;;  %v959_v59 = vmul.f32 1.0614054, %v5470_v56  ;;  %3935 = vmatprep.mubr.f32.mxu1 %v5356_v45 }
 0x1e9   :  { %v4137_v62 = vpop.eup %4136  ;;  %v1085_v17 = vmul.f32 %v5457_v13, %v1021_v31  ;;  %4148 = vrcp.f32 %v832_v52  ;;  %v1600_v28 = vmul.f32 %v1536_v41, %v704_v37  ;;  %v771_v63 = vmul.f32 0.3275911, %v707_v2 }
 0x1ea   :  { %v1787_v50 = vmul.f32 %v4133_v42, %v1467_v47  ;;  %v1402_v34 = vadd.f32 0.2548296, %v1338_v48  ;;  %v1084_v19 = vmul.f32 %v5461_v26, %v1020_v51  ;;  %v1023_v49 = vadd.f32 -1.4531521, %v959_v59 }
 0x1eb   :  { %vm1914_vm15 = vcmp.lt.f32.partialorder %v5320_v60, 0.0  ;;  %v1149_v22 = vadd.f32 1.4214138, %v1085_v17  ;;  %4150 = vpow2.f32 %v1696_v36  ;;  %v1702_v44 = vmul.f32 1.442695, %v1601_v3  ;;  %3936 = vmatmul.mubr.f32.gmra.mxu1 %v5352_v5 }
 0x1ec   :  { %v835_v7 = vadd.f32 1.0, %v771_v63  ;;  %v1851_v6 = vsub.f32 1.0, %v1787_v50  ;;  %v1466_v61 = vmul.f32 %v5421_v23, %v1402_v34  ;;  %v1148_v37 = vadd.f32 1.4214138, %v1084_v19  ;;  %3938 = vmatprep.mubr.f32.mxu1 %v5402_v39 }
 0x1ed   :  { %v1087_v24 = vmul.f32 %v5470_v56, %v1023_v49  ;;  %v1213_v33 = vmul.f32 %v5457_v13, %v1149_v22  ;;  %v1700_v27 = vmul.f32 1.442695, %v1600_v28  ;;  %v1539_v0 = vsub.f32 0.0, %v707_v2 }
 0x1ee   :  { %4152 = vrcp.f32 %v835_v7  ;;  %v5488_v45 = vpop.eup %4138  ;;  %v1979_v36 = vsub.f32 0.0, %v1851_v6  ;;  %v1786_v41 = vmul.f32 %v4137_v62, %v1466_v61  ;;  %v1212_v55 = vmul.f32 %v5461_v26, %v1148_v37 }
 0x1ef   :  { %v1151_v42 = vadd.f32 1.4214138, %v1087_v24  ;;  %v4141_v23 = vpop.eup %4140  ;;  %v1277_v18 = vadd.f32 -0.28449672, %v1213_v33  ;;  %v958_v53 = vmul.f32 1.0614054, %v5488_v45  ;;  %4154 = vpow2.f32 %v1702_v44  ;;  %3939 = vmatmul.mubr.f32.gmra.mxu1 %v5394_v8 }
 0x1f0   :  { %v5494_v32 = vmul.f32 0.70710677, %v5484_v21  ;;  %v4143_v31 = vpop.eup %4142  ;;  %v2043_v5 = vsel %vm1915_vm14, %v1979_v36, %v1851_v6  ;;  %v1850_v3 = vsub.f32 1.0, %v1786_v41  ;;  %v1276_v52 = vadd.f32 -0.28449672, %v1212_v55  ;;  %3941 = vmatprep.mubr.f32.mxu1 %v5414_v16 }
 0x1f1   :  { %v1215_v47 = vmul.f32 %v5470_v56, %v1151_v42  ;;  %v5499_v48 = vpop.eup %4144  ;;  %v2107_v51 = vadd.f32 1.0, %v2043_v5  ;;  %v1341_v39 = vmul.f32 %v5457_v13, %v1277_v18  ;;  %v1022_v59 = vadd.f32 -1.4531521, %v958_v53 }
 0x1f2   :  { %4156 = vpow2.f32 %v1700_v27  ;;  %v4147_v62 = vpop.eup %4146  ;;  %v1978_v17 = vsub.f32 0.0, %v1850_v3  ;;  %v1340_v28 = vmul.f32 %v5461_v26, %v1276_v52  ;;  %v961_v4 = vmul.f32 1.0614054, %v5499_v48 }
 0x1f3   :  { %v1279_v63 = vadd.f32 -0.28449672, %v1215_v47  ;;  %v1405_v50 = vadd.f32 0.2548296, %v1341_v39  ;;  %v1086_v34 = vmul.f32 %v5488_v45, %v1022_v59  ;;  %v1603_v19 = vmul.f32 %v1539_v0, %v707_v2  ;;  %3942 = vmatmul.mubr.f32.gmra.mxu1 %v5408_v57 }
 0x1f4   :  { %v706_v49 = vand.u32 2147483647, %v5494_v32  ;;  %v2042_v22 = vsel %vm1914_vm15, %v1978_v17, %v1850_v3  ;;  %vm1917_vm0 = vcmp.lt.f32.partialorder %v5370_v14, 0.0  ;;  %v1404_v8 = vadd.f32 0.2548296, %v1340_v28  ;;  %3944 = vmatprep.mubr.f32.mxu1 %v5466_v46 }
 0x1f5   :  { %v1343_v44 = vmul.f32 %v5470_v56, %v1279_v63  ;;  %v1025_v7 = vadd.f32 -1.4531521, %v961_v4  ;;  %v2106_v6 = vadd.f32 1.0, %v2042_v22  ;;  %v1469_v61 = vmul.f32 %v5457_v13, %v1405_v50 }
 0x1f6   :  { %vm1916_vm1 = vcmp.lt.f32.partialorder %v5373_v54, 0.0  ;;  %v1150_v16 = vadd.f32 1.4214138, %v1086_v34  ;;  %v770_v37 = vmul.f32 0.3275911, %v706_v49  ;;  %v5515_v2 = vpop.eup %4148  ;;  %v2171_v60 = vmul.f32 %v2107_v51, %v5360_v1  ;;  %v5534_v34 = vpop.f32.mrf.mxu0 }
 0x1f7   :  { %v1468_v24 = vmul.f32 %v5461_v26, %v1404_v8  ;;  %v1407_v33 = vadd.f32 0.2548296, %v1343_v44  ;;  %v1089_v27 = vmul.f32 %v5499_v48, %v1025_v7  ;;  %v2170_v0 = vmul.f32 %v2106_v6, %v5383_v12  ;;  %3945 = vmatmul.mubr.f32.gmra.mxu1 %v5452_v10 }
 0x1f8   :  { %v1789_v13 = vmul.f32 %v4141_v23, %v1469_v61  ;;  %v1214_v36 = vmul.f32 %v5488_v45, %v1150_v16  ;;  %v960_v41 = vmul.f32 1.0614054, %v5515_v2  ;;  %v4151_v55 = vpop.eup %4150  ;;  %v834_v1 = vadd.f32 1.0, %v770_v37  ;;  %v5544_v54 = vpop.f32.mrf.mxu0 }
 0x1f9   :  { %v1788_v57 = vmul.f32 %v4143_v31, %v1468_v24  ;;  %v1471_v42 = vmul.f32 %v5470_v56, %v1407_v33  ;;  %v1153_v18 = vadd.f32 1.4214138, %v1089_v27  ;;  %v1538_v3 = vsub.f32 0.0, %v706_v49  ;;  %3947 = vmatprep.mubr.f32.mxu1 %v2170_v0 }
 0x1fa   :  { %v1853_v53 = vsub.f32 1.0, %v1789_v13  ;;  %v1278_v26 = vadd.f32 -0.28449672, %v1214_v36  ;;  %v1024_v5 = vadd.f32 -1.4531521, %v960_v41  ;;  %4158 = vrcp.f32 %v834_v1 }
 0x1fb   :  { %v5526_v46 = vpop.eup %4152  ;;  %v1852_v12 = vsub.f32 1.0, %v1788_v57  ;;  %v1791_v23 = vmul.f32 %v4147_v62, %v1471_v42  ;;  %v1217_v52 = vmul.f32 %v5499_v48, %v1153_v18  ;;  %v1706_v10 = vmul.f32 1.442695, %v1603_v19  ;;  %3948 = vmatmul.mubr.f32.gmra.mxu1 %v2171_v60 }
 0x1fc   :  { %v1981_v47 = vsub.f32 0.0, %v1853_v53  ;;  %v1342_v31 = vmul.f32 %v5488_v45, %v1278_v26  ;;  %v1088_v56 = vmul.f32 %v5515_v2, %v1024_v5  ;;  %v963_v51 = vmul.f32 1.0614054, %v5526_v46  ;;  %v4155_v39 = vpop.eup %4154 }
 0x1fd   :  { %v1980_v59 = vsub.f32 0.0, %v1852_v12  ;;  %v1855_v17 = vsub.f32 1.0, %v1791_v23  ;;  %v1281_v28 = vadd.f32 -0.28449672, %v1217_v52  ;;  %v1602_v6 = vmul.f32 %v1538_v3, %v706_v49 }
 0x1fe   :  { %v2045_v63 = vsel %vm1917_vm0, %v1981_v47, %v1853_v53  ;;  %v1406_v62 = vadd.f32 0.2548296, %v1342_v31  ;;  %v1152_v4 = vadd.f32 1.4214138, %v1088_v56  ;;  %v1027_v50 = vadd.f32 -1.4531521, %v963_v51 }
 0x1ff   :  { %v4157_v22 = vpop.eup %4156  ;;  %v2109_v8 = vadd.f32 1.0, %v2045_v63  ;;  %v2044_v44 = vsel %vm1916_vm1, %v1980_v59, %v1852_v12  ;;  %v1345_v7 = vmul.f32 %v5499_v48, %v1281_v28  ;;  %v573_v37 = vmul.f32 0.5, %v5322_v11  ;;  %v5567_v59 = vpop.f32.mrf.mxu0 }
 0x200   :  { %v2108_v61 = vadd.f32 1.0, %v2044_v44  ;;  %v1470_v19 = vmul.f32 %v5488_v45, %v1406_v62  ;;  %v1216_v14 = vmul.f32 %v5515_v2, %v1152_v4  ;;  %v1091_v16 = vmul.f32 %v5526_v46, %v1027_v50 }
 0x201   :  { %v1983_v24 = vsub.f32 0.0, %v1855_v17  ;;  %v1409_v33 = vadd.f32 0.2548296, %v1345_v7  ;;  %4160 = vpow2.f32 %v1706_v10  ;;  %v2173_v13 = vmul.f32 %v2109_v8, %v573_v37 }
 0x202   :  { %v2172_v60 = vmul.f32 %v2108_v61, %v5424_v35  ;;  %v1790_v27 = vmul.f32 %v4151_v55, %v1470_v19  ;;  %v1280_v0 = vadd.f32 -0.28449672, %v1216_v14  ;;  %vm1919_vm2 = vcmp.lt.f32.partialorder %v5379_v29, 0.0 }
 0x203   :  { %v1473_v45 = vmul.f32 %v5499_v48, %v1409_v33  ;;  %v1155_v49 = vadd.f32 1.4214138, %v1091_v16  ;;  %v1704_v57 = vmul.f32 1.442695, %v1602_v6  ;;  %v5550_v11 = vmul.f32 0.70710677, %v5534_v34 }
 0x204   :  { %v1854_v36 = vsub.f32 1.0, %v1790_v27  ;;  %v1344_v41 = vmul.f32 %v5515_v2, %v1280_v0  ;;  %3950 = vmatprep.mubr.f32.mxu1 %v2172_v60  ;;  %v2047_v35 = vsel %vm1919_vm2, %v1983_v24, %v1855_v17  ;;  %v5554_v18 = vmul.f32 0.70710677, %v5544_v54 }
 0x205   :  { %v1793_v55 = vmul.f32 %v4155_v39, %v1473_v45  ;;  %v1219_v42 = vmul.f32 %v5526_v46, %v1155_v49  ;;  %3951 = vmatmul.mubr.f32.gmra.mxu1 %v2173_v13  ;;  %v574_v29 = vmul.f32 0.5, %v5397_v38  ;;  %v709_v53 = vand.u32 2147483647, %v5550_v11 }
 0x206   :  { %v1982_v48 = vsub.f32 0.0, %v1854_v36  ;;  %v1408_v1 = vadd.f32 0.2548296, %v1344_v41  ;;  %vm1918_vm3 = vcmp.lt.f32.partialorder %v5417_v20, 0.0  ;;  %v5560_v3 = vand.u32 2147483647, %v5554_v18 }
 0x207   :  { %v1857_v26 = vsub.f32 1.0, %v1793_v55  ;;  %v1283_v5 = vadd.f32 -0.28449672, %v1219_v42  ;;  %v5562_v12 = vpop.eup %4158  ;;  %v2111_v23 = vadd.f32 1.0, %v2047_v35  ;;  %v773_v31 = vmul.f32 0.3275911, %v709_v53 }
 0x208   :  { %v2046_v52 = vsel %vm1918_vm3, %v1982_v48, %v1854_v36  ;;  %v1472_v47 = vmul.f32 %v5515_v2, %v1408_v1  ;;  %v962_v39 = vmul.f32 1.0614054, %v5562_v12  ;;  %v575_v20 = vmul.f32 0.5, %v5364_v58  ;;  %v5574_v58 = vpop.f32.mrf.mxu0 }
 0x209   :  { %v2110_v56 = vadd.f32 1.0, %v2046_v52  ;;  %v1985_v38 = vsub.f32 0.0, %v1857_v26  ;;  %v1347_v51 = vmul.f32 %v5526_v46, %v1283_v5  ;;  %v837_v28 = vadd.f32 1.0, %v773_v31 }
 0x20a   :  { %v1792_v17 = vmul.f32 %v4157_v22, %v1472_v47  ;;  %v772_v10 = vmul.f32 0.3275911, %v5560_v3  ;;  %vm1921_vm4 = vcmp.lt.f32.partialorder %v5428_v15, 0.0  ;;  %v1026_v2 = vadd.f32 -1.4531521, %v962_v39  ;;  %v5588_v45 = vpop.f32.mrf.mxu0 }
 0x20b   :  { %v2174_v63 = vmul.f32 %v2110_v56, %v574_v29  ;;  %v1411_v62 = vadd.f32 0.2548296, %v1347_v51  ;;  %v2175_v4 = vmul.f32 %v2111_v23, %v575_v20  ;;  %v2049_v50 = vsel %vm1921_vm4, %v1985_v38, %v1857_v26 }
 0x20c   :  { %v1856_v8 = vsub.f32 1.0, %v1792_v17  ;;  %4162 = vrcp.f32 %v837_v28  ;;  %v1090_v7 = vmul.f32 %v5562_v12, %v1026_v2  ;;  %v836_v6 = vadd.f32 1.0, %v772_v10  ;;  %v5602_v23 = vpop.f32.mrf.mxu0 }
 0x20d   :  { %v1475_v44 = vmul.f32 %v5526_v46, %v1411_v62  ;;  %4164 = vpow2.f32 %v1704_v57  ;;  %3953 = vmatprep.mubr.f32.mxu1 %v2174_v63  ;;  %vm1920_vm5 = vcmp.lt.f32.partialorder %v5444_v30, 0.0  ;;  %v2113_v61 = vadd.f32 1.0, %v2049_v50 }
 0x20e   :  { %v1984_v22 = vsub.f32 0.0, %v1856_v8  ;;  %3954 = vmatmul.mubr.f32.gmra.mxu1 %v2175_v4  ;;  %v4161_v15 = vpop.eup %4160  ;;  %v1154_v19 = vadd.f32 1.4214138, %v1090_v7  ;;  %v1541_v14 = vsub.f32 0.0, %v709_v53  ;;  %4166 = vrcp.f32 %v836_v6 }
 0x20f   :  { %v1795_v37 = vmul.f32 %v4161_v15, %v1475_v44  ;;  %v5578_v46 = vmul.f32 0.70710677, %v5567_v59  ;;  %v5581_v24 = vmul.f32 0.70710677, %v5574_v58  ;;  %v576_v33 = vmul.f32 0.5, %v5434_v9 }
 0x210   :  { %v2048_v16 = vsel %vm1920_vm5, %v1984_v22, %v1856_v8  ;;  %v1218_v30 = vmul.f32 %v5562_v12, %v1154_v19  ;;  %v577_v27 = vmul.f32 0.5, %v5411_v40  ;;  %v1605_v41 = vmul.f32 %v1541_v14, %v709_v53 }
 0x211   :  { %v2112_v60 = vadd.f32 1.0, %v2048_v16  ;;  %v711_v0 = vand.u32 2147483647, %v5578_v46  ;;  %v710_v13 = vand.u32 2147483647, %v5581_v24  ;;  %v1540_v57 = vsub.f32 0.0, %v5560_v3 }
 0x212   :  { %v1282_v36 = vadd.f32 -0.28449672, %v1218_v30  ;;  %v2177_v35 = vmul.f32 %v2113_v61, %v577_v27  ;;  %v1859_v55 = vsub.f32 1.0, %v1795_v37  ;;  %v5592_v29 = vmul.f32 0.5, %v5446_v25 }
 0x213   :  { %v2176_v49 = vmul.f32 %v2112_v60, %v576_v33  ;;  %v775_v42 = vmul.f32 0.3275911, %v711_v0  ;;  %v774_v9 = vmul.f32 0.3275911, %v710_v13  ;;  %v5595_v40 = vmul.f32 0.5, %v5484_v21 }
 0x214   :  { %v1346_v48 = vmul.f32 %v5562_v12, %v1282_v36  ;;  %v5599_v1 = vmul.f32 0.70710677, %v5588_v45  ;;  %vm1923_vm6 = vcmp.lt.f32.partialorder %v5455_v43, 0.0  ;;  %v1543_v26 = vsub.f32 0.0, %v711_v0 }
 0x215   :  { %3956 = vmatprep.mubr.f32.mxu1 %v2176_v49  ;;  %v839_v53 = vadd.f32 1.0, %v775_v42  ;;  %v838_v5 = vadd.f32 1.0, %v774_v9  ;;  %v1710_v25 = vmul.f32 1.442695, %v1605_v41  ;;  %v1604_v47 = vmul.f32 %v1540_v57, %v5560_v3 }
 0x216   :  { %3957 = vmatmul.mubr.f32.gmra.mxu1 %v2177_v35  ;;  %v1410_v52 = vadd.f32 0.2548296, %v1346_v48  ;;  %v713_v21 = vand.u32 2147483647, %v5599_v1  ;;  %v1987_v31 = vsub.f32 0.0, %v1859_v55  ;;  %vm1922_vm7 = vcmp.lt.f32.partialorder %v5494_v32, 0.0 }
 0x217   :  { %v5608_v56 = vmul.f32 0.5, %v5534_v34  ;;  %4168 = vrcp.f32 %v839_v53  ;;  %v5614_v39 = vmul.f32 0.5, %v5544_v54  ;;  %v1607_v28 = vmul.f32 %v1543_v26, %v711_v0  ;;  %v5620_v34 = vpop.f32.mrf.mxu0 }
 0x218   :  { %v1474_v51 = vmul.f32 %v5562_v12, %v1410_v52  ;;  %4170 = vrcp.f32 %v838_v5  ;;  %v777_v20 = vmul.f32 0.3275911, %v713_v21  ;;  %v1542_v10 = vsub.f32 0.0, %v710_v13 }
 0x219   :  { %v5610_v38 = vpop.eup %4162  ;;  %v5618_v63 = vmul.f32 0.70710677, %v5602_v23  ;;  %4172 = vpow2.f32 %v1710_v25  ;;  %v1708_v2 = vmul.f32 1.442695, %v1604_v47  ;;  %v2051_v54 = vsel %vm1923_vm6, %v1987_v31, %v1859_v55  ;;  %v5636_v0 = vpop.f32.mrf.mxu0 }
 0x21a   :  { %v4165_v17 = vpop.eup %4164  ;;  %v965_v3 = vmul.f32 1.0614054, %v5610_v38  ;;  %v841_v4 = vadd.f32 1.0, %v777_v20  ;;  %v1545_v8 = vsub.f32 0.0, %v713_v21  ;;  %v5629_v22 = vmul.f32 0.70710677, %v5620_v34 }
 0x21b   :  { %v1794_v62 = vmul.f32 %v4165_v17, %v1474_v51  ;;  %v5622_v12 = vpop.eup %4166  ;;  %v712_v44 = vand.u32 2147483647, %v5618_v63  ;;  %v1714_v61 = vmul.f32 1.442695, %v1607_v28  ;;  %v1606_v19 = vmul.f32 %v1542_v10, %v710_v13  ;;  %v5646_v32 = vpop.f32.mrf.mxu0 }
 0x21c   :  { %v1029_v50 = vadd.f32 -1.4531521, %v965_v3  ;;  %v964_v6 = vmul.f32 1.0614054, %v5622_v12  ;;  %4174 = vrcp.f32 %v841_v4  ;;  %v5633_v43 = vmul.f32 0.5, %v5574_v58 }
 0x21d   :  { %v1858_v7 = vsub.f32 1.0, %v1794_v62  ;;  %v776_v14 = vmul.f32 0.3275911, %v712_v44  ;;  %v715_v33 = vand.u32 2147483647, %v5629_v22  ;;  %4176 = vpow2.f32 %v1708_v2 }
 0x21e   :  { %v1093_v15 = vmul.f32 %v5610_v38, %v1029_v50  ;;  %v1028_v37 = vadd.f32 -1.4531521, %v964_v6  ;;  %v1609_v30 = vmul.f32 %v1545_v8, %v713_v21  ;;  %v2115_v49 = vadd.f32 1.0, %v2051_v54 }
 0x21f   :  { %v1986_v16 = vsub.f32 0.0, %v1858_v7  ;;  %v840_v27 = vadd.f32 1.0, %v776_v14  ;;  %v779_v41 = vmul.f32 0.3275911, %v715_v33  ;;  %v1712_v58 = vmul.f32 1.442695, %v1606_v19 }
 0x220   :  { %v1157_v60 = vadd.f32 1.4214138, %v1093_v15  ;;  %v1092_v13 = vmul.f32 %v5622_v12, %v1028_v37  ;;  %v1544_v42 = vsub.f32 0.0, %v712_v44  ;;  %v1718_v26 = vmul.f32 1.442695, %v1609_v30 }
 0x221   :  { %v2050_v36 = vsel %vm1922_vm7, %v1986_v16, %v1858_v7  ;;  %4178 = vrcp.f32 %v840_v27  ;;  %v843_v9 = vadd.f32 1.0, %v779_v41  ;;  %v5644_v5 = vmul.f32 0.70710677, %v5636_v0 }
 0x222   :  { %v2114_v57 = vadd.f32 1.0, %v2050_v36  ;;  %v1221_v35 = vmul.f32 %v5610_v38, %v1157_v60  ;;  %v1156_v55 = vadd.f32 1.4214138, %v1092_v13  ;;  %4180 = vpow2.f32 %v1714_v61 }
 0x223   :  { %v2179_v25 = vmul.f32 %v2115_v49, %v5592_v29  ;;  %4182 = vrcp.f32 %v843_v9  ;;  %v1547_v21 = vsub.f32 0.0, %v715_v33  ;;  %v714_v20 = vand.u32 2147483647, %v5644_v5 }
 0x224   :  { %v2178_v48 = vmul.f32 %v2114_v57, %v5595_v40  ;;  %v1285_v53 = vadd.f32 -0.28449672, %v1221_v35  ;;  %v5648_v52 = vpop.eup %4168  ;;  %v1220_v47 = vmul.f32 %v5622_v12, %v1156_v55  ;;  %4184 = vpow2.f32 %v1712_v58 }
 0x225   :  { %v5652_v31 = vpop.eup %4170  ;;  %v967_v40 = vmul.f32 1.0614054, %v5648_v52  ;;  %v1608_v28 = vmul.f32 %v1544_v42, %v712_v44  ;;  %v5659_v29 = vmul.f32 0.70710677, %v5646_v32  ;;  %4186 = vpow2.f32 %v1718_v26 }
 0x226   :  { %v1349_v51 = vmul.f32 %v5610_v38, %v1285_v53  ;;  %3959 = vmatprep.mubr.f32.mxu1 %v2178_v48  ;;  %v1284_v17 = vadd.f32 -0.28449672, %v1220_v47  ;;  %v966_v3 = vmul.f32 1.0614054, %v5652_v31  ;;  %v4173_v10 = vpop.eup %4172  ;;  %v778_v4 = vmul.f32 0.3275911, %v714_v20 }
 0x227   :  { %3960 = vmatmul.mubr.f32.gmra.mxu1 %v2179_v25  ;;  %v1031_v2 = vadd.f32 -1.4531521, %v967_v40  ;;  %vm1925_vm8 = vcmp.lt.f32.partialorder %v5550_v11, 0.0  ;;  %v1611_v8 = vmul.f32 %v1547_v21, %v715_v33  ;;  %v717_v7 = vand.u32 2147483647, %v5659_v29 }
 0x228   :  { %v1413_v62 = vadd.f32 0.2548296, %v1349_v51  ;;  %v1348_v54 = vmul.f32 %v5622_v12, %v1284_v17  ;;  %v1030_v50 = vadd.f32 -1.4531521, %v966_v3  ;;  %v842_v61 = vadd.f32 1.0, %v778_v4 }
 0x229   :  { %v5664_v6 = vpop.eup %4174  ;;  %v1095_v15 = vmul.f32 %v5648_v52, %v1031_v2  ;;  %v1546_v19 = vsub.f32 0.0, %v714_v20  ;;  %v1716_v60 = vmul.f32 1.442695, %v1608_v28  ;;  %vm1924_vm9 = vcmp.lt.f32.partialorder %v5554_v18, 0.0 }
 0x22a   :  { %v1477_v44 = vmul.f32 %v5610_v38, %v1413_v62  ;;  %v1412_v14 = vadd.f32 0.2548296, %v1348_v54  ;;  %v1094_v16 = vmul.f32 %v5652_v31, %v1030_v50  ;;  %v969_v37 = vmul.f32 1.0614054, %v5664_v6  ;;  %v4177_v49 = vpop.eup %4176 }
 0x22b   :  { %v1159_v33 = vadd.f32 1.4214138, %v1095_v15  ;;  %4188 = vrcp.f32 %v842_v61  ;;  %v781_v27 = vmul.f32 0.3275911, %v717_v7  ;;  %v1722_v41 = vmul.f32 1.442695, %v1611_v8 }
 0x22c   :  { %v1797_v30 = vmul.f32 %v4173_v10, %v1477_v44  ;;  %v1476_v36 = vmul.f32 %v5622_v12, %v1412_v14  ;;  %v1158_v38 = vadd.f32 1.4214138, %v1094_v16  ;;  %v1033_v13 = vadd.f32 -1.4531521, %v969_v37 }
 0x22d   :  { %v1223_v35 = vmul.f32 %v5648_v52, %v1159_v33  ;;  %v1610_v58 = vmul.f32 %v1546_v19, %v714_v20  ;;  %v845_v55 = vadd.f32 1.0, %v781_v27  ;;  %v1549_v26 = vsub.f32 0.0, %v717_v7  ;;  %v5687_v19 = vpop.f32.mrf.mxu0 }
 0x22e   :  { %v1861_v57 = vsub.f32 1.0, %v1797_v30  ;;  %v5673_v42 = vpop.eup %4178  ;;  %v1796_v9 = vmul.f32 %v4177_v49, %v1476_v36  ;;  %v1222_v48 = vmul.f32 %v5652_v31, %v1158_v38  ;;  %v1097_v53 = vmul.f32 %v5664_v6, %v1033_v13 }
 0x22f   :  { %v4181_v25 = vpop.eup %4180  ;;  %v1287_v21 = vadd.f32 -0.28449672, %v1223_v35  ;;  %v968_v12 = vmul.f32 1.0614054, %v5673_v42  ;;  %4190 = vrcp.f32 %v845_v55  ;;  %v1613_v50 = vmul.f32 %v1549_v26, %v717_v7 }
 0x230   :  { %v1989_v47 = vsub.f32 0.0, %v1861_v57  ;;  %v1860_v51 = vsub.f32 1.0, %v1796_v9  ;;  %v1286_v40 = vadd.f32 -0.28449672, %v1222_v48  ;;  %v1161_v17 = vadd.f32 1.4214138, %v1097_v53  ;;  %v5678_v20 = vpop.eup %4182 }
 0x231   :  { %4192 = vpow2.f32 %v1716_v60  ;;  %v1351_v28 = vmul.f32 %v5648_v52, %v1287_v21  ;;  %v1032_v10 = vadd.f32 -1.4531521, %v968_v12  ;;  %v4185_v62 = vpop.eup %4184  ;;  %v971_v15 = vmul.f32 1.0614054, %v5678_v20 }
 0x232   :  { %v2053_v3 = vsel %vm1925_vm8, %v1989_v47, %v1861_v57  ;;  %4194 = vpow2.f32 %v1722_v41  ;;  %v1988_v2 = vsub.f32 0.0, %v1860_v51  ;;  %v1350_v4 = vmul.f32 %v5652_v31, %v1286_v40  ;;  %v4187_v11 = vpop.eup %4186 }
 0x233   :  { %v1225_v54 = vmul.f32 %v5664_v6, %v1161_v17  ;;  %v1415_v8 = vadd.f32 0.2548296, %v1351_v28  ;;  %v1096_v44 = vmul.f32 %v5673_v42, %v1032_v10  ;;  %v1720_v61 = vmul.f32 1.442695, %v1610_v58 }
 0x234   :  { %v2117_v14 = vadd.f32 1.0, %v2053_v3  ;;  %v2052_v16 = vsel %vm1924_vm9, %v1988_v2, %v1860_v51  ;;  %vm1927_vm10 = vcmp.lt.f32.partialorder %v5578_v46, 0.0  ;;  %v1414_v37 = vadd.f32 0.2548296, %v1350_v4  ;;  %v5723_v46 = vpop.f32.mrf.mxu0 }
 0x235   :  { %v1289_v60 = vadd.f32 -0.28449672, %v1225_v54  ;;  %v2116_v30 = vadd.f32 1.0, %v2052_v16  ;;  %v1479_v7 = vmul.f32 %v5648_v52, %v1415_v8  ;;  %vm1926_vm11 = vcmp.lt.f32.partialorder %v5581_v24, 0.0 }
 0x236   :  { %v1160_v33 = vadd.f32 1.4214138, %v1096_v44  ;;  %v1035_v27 = vadd.f32 -1.4531521, %v971_v15  ;;  %v1478_v49 = vmul.f32 %v5652_v31, %v1414_v37  ;;  %v1726_v38 = vmul.f32 1.442695, %v1613_v50 }
 0x237   :  { %v1353_v36 = vmul.f32 %v5664_v6, %v1289_v60  ;;  %v5697_v13 = vmul.f32 0.70710677, %v5687_v19  ;;  %v2180_v18 = vmul.f32 %v2116_v30, %v5614_v39  ;;  %v1799_v41 = vmul.f32 %v4181_v25, %v1479_v7 }
 0x238   :  { %v1224_v57 = vmul.f32 %v5673_v42, %v1160_v33  ;;  %v1099_v35 = vmul.f32 %v5678_v20, %v1035_v27  ;;  %v5702_v52 = vpop.eup %4188  ;;  %v2181_v58 = vmul.f32 %v2117_v14, %v5608_v56  ;;  %v1798_v55 = vmul.f32 %v4185_v62, %v1478_v49 }
 0x239   :  { %v1417_v9 = vadd.f32 0.2548296, %v1353_v36  ;;  %v5706_v31 = vand.u32 2147483647, %v5697_v13  ;;  %v1863_v48 = vsub.f32 1.0, %v1799_v41  ;;  %4196 = vpow2.f32 %v1720_v61  ;;  %3962 = vmatprep.mubr.f32.mxu1 %v2180_v18 }
 0x23a   :  { %v1288_v53 = vadd.f32 -0.28449672, %v1224_v57  ;;  %v1163_v26 = vadd.f32 1.4214138, %v1099_v35  ;;  %v1862_v39 = vsub.f32 1.0, %v1798_v55  ;;  %3963 = vmatmul.mubr.f32.gmra.mxu1 %v2181_v58  ;;  %4198 = vpow2.f32 %v1726_v38  ;;  %v5738_v55 = vpop.f32.mrf.mxu0 }
 0x23b   :  { %v1481_v25 = vmul.f32 %v5664_v6, %v1417_v9  ;;  %v970_v47 = vmul.f32 1.0614054, %v5702_v52  ;;  %v780_v21 = vmul.f32 0.3275911, %v5706_v31  ;;  %v1991_v12 = vsub.f32 0.0, %v1863_v48 }
 0x23c   :  { %v1352_v56 = vmul.f32 %v5673_v42, %v1288_v53  ;;  %v1227_v51 = vmul.f32 %v5678_v20, %v1163_v26  ;;  %v5713_v40 = vpop.eup %4190  ;;  %v1990_v17 = vsub.f32 0.0, %v1862_v39  ;;  %v583_v60 = vmul.f32 0.5, %v5567_v59 }
 0x23d   :  { %v1801_v3 = vmul.f32 %v4187_v11, %v1481_v25  ;;  %v1034_v28 = vadd.f32 -1.4531521, %v970_v47  ;;  %v844_v10 = vadd.f32 1.0, %v780_v21  ;;  %v2055_v6 = vsel %vm1927_vm10, %v1991_v12, %v1863_v48 }
 0x23e   :  { %v4193_v62 = vpop.eup %4192  ;;  %v1416_v2 = vadd.f32 0.2548296, %v1352_v56  ;;  %v1291_v4 = vadd.f32 -0.28449672, %v1227_v51  ;;  %v973_v54 = vmul.f32 1.0614054, %v5713_v40  ;;  %v2054_v44 = vsel %vm1926_vm11, %v1990_v17, %v1862_v39 }
 0x23f   :  { %v4195_v50 = vpop.eup %4194  ;;  %v2119_v8 = vadd.f32 1.0, %v2055_v6  ;;  %v1865_v15 = vsub.f32 1.0, %v1801_v3  ;;  %v1098_v61 = vmul.f32 %v5702_v52, %v1034_v28  ;;  %v2118_v14 = vadd.f32 1.0, %v2054_v44 }
 0x240   :  { %v1480_v11 = vmul.f32 %v5673_v42, %v1416_v2  ;;  %v1355_v16 = vmul.f32 %v5678_v20, %v1291_v4  ;;  %v1037_v37 = vadd.f32 -1.4531521, %v973_v54  ;;  %4200 = vrcp.f32 %v844_v10  ;;  %v5746_v10 = vpop.f32.mrf.mxu0 }
 0x241   :  { %v1993_v30 = vsub.f32 0.0, %v1865_v15  ;;  %v1162_v7 = vadd.f32 1.4214138, %v1098_v61  ;;  %v2182_v33 = vmul.f32 %v2118_v14, %v5633_v43  ;;  %v2183_v36 = vmul.f32 %v2119_v8, %v583_v60 }
 0x242   :  { %v1800_v24 = vmul.f32 %v4193_v62, %v1480_v11  ;;  %v1419_v27 = vadd.f32 0.2548296, %v1355_v16  ;;  %v1101_v49 = vmul.f32 %v5713_v40, %v1037_v37  ;;  %v1548_v42 = vsub.f32 0.0, %v5706_v31 }
 0x243   :  { %v1226_v38 = vmul.f32 %v5702_v52, %v1162_v7  ;;  %v5731_v18 = vmul.f32 0.70710677, %v5723_v46  ;;  %vm1929_vm12 = vcmp.lt.f32.partialorder %v5599_v1, 0.0  ;;  %3965 = vmatprep.mubr.f32.mxu1 %v2182_v33  ;;  %vm1928_vm13 = vcmp.lt.f32.partialorder %v5618_v63, 0.0 }
 0x244   :  { %v1864_v59 = vsub.f32 1.0, %v1800_v24  ;;  %v1483_v41 = vmul.f32 %v5678_v20, %v1419_v27  ;;  %v1165_v57 = vadd.f32 1.4214138, %v1101_v49  ;;  %v2057_v43 = vsel %vm1929_vm12, %v1993_v30, %v1865_v15  ;;  %3966 = vmatmul.mubr.f32.gmra.mxu1 %v2183_v36  ;;  %v5755_v15 = vpop.f32.mrf.mxu0 }
 0x245   :  { %v1290_v35 = vadd.f32 -0.28449672, %v1226_v38  ;;  %v5736_v58 = vand.u32 2147483647, %v5731_v18  ;;  %v1612_v20 = vmul.f32 %v1548_v42, %v5706_v31  ;;  %v2121_v25 = vadd.f32 1.0, %v2057_v43 }
 0x246   :  { %v1992_v9 = vsub.f32 0.0, %v1864_v59  ;;  %v1803_v48 = vmul.f32 %v4195_v50, %v1483_v41  ;;  %v1229_v53 = vmul.f32 %v5713_v40, %v1165_v57  ;;  %v4197_v26 = vpop.eup %4196  ;;  %v584_v51 = vmul.f32 0.5, %v5602_v23  ;;  %v5770_v49 = vpop.f32.mrf.mxu0 }
 0x247   :  { %v1354_v1 = vmul.f32 %v5702_v52, %v1290_v35  ;;  %v783_v39 = vmul.f32 0.3275911, %v5736_v58  ;;  %v4199_v56 = vpop.eup %4198  ;;  %v585_v63 = vmul.f32 0.5, %v5588_v45  ;;  %v5751_v31 = vmul.f32 0.70710677, %v5738_v55 }
 0x248   :  { %v2056_v47 = vsel %vm1928_vm13, %v1992_v9, %v1864_v59  ;;  %v1867_v21 = vsub.f32 1.0, %v1803_v48  ;;  %v1293_v12 = vadd.f32 -0.28449672, %v1229_v53  ;;  %v1724_v4 = vmul.f32 1.442695, %v1612_v20 }
 0x249   :  { %v2120_v17 = vadd.f32 1.0, %v2056_v47  ;;  %v1418_v3 = vadd.f32 0.2548296, %v1354_v1  ;;  %v847_v28 = vadd.f32 1.0, %v783_v39  ;;  %v2185_v54 = vmul.f32 %v2121_v25, %v585_v63  ;;  %v5778_v1 = vpop.f32.mrf.mxu0 }
 0x24a   :  { %v1357_v62 = vmul.f32 %v5713_v40, %v1293_v12  ;;  %v1995_v50 = vsub.f32 0.0, %v1867_v21  ;;  %v718_v8 = vand.u32 2147483647, %v5751_v31  ;;  %v5761_v11 = vmul.f32 0.70710677, %v5746_v10 }
 0x24b   :  { %v2184_v6 = vmul.f32 %v2120_v17, %v584_v51  ;;  %v1482_v2 = vmul.f32 %v5702_v52, %v1418_v3  ;;  %4202 = vrcp.f32 %v847_v28  ;;  %vm1931_vm14 = vcmp.lt.f32.partialorder %v5629_v22, 0.0 }
 0x24c   :  { %v1421_v23 = vadd.f32 0.2548296, %v1357_v62  ;;  %v782_v14 = vmul.f32 0.3275911, %v718_v8  ;;  %4204 = vpow2.f32 %v1724_v4  ;;  %v2059_v37 = vsel %vm1931_vm14, %v1995_v50, %v1867_v21 }
 0x24d   :  { %v1802_v44 = vmul.f32 %v4197_v26, %v1482_v2  ;;  %3968 = vmatprep.mubr.f32.mxu1 %v2184_v6  ;;  %v5757_v45 = vpop.eup %4200  ;;  %v721_v7 = vand.u32 2147483647, %v5761_v11  ;;  %v5768_v27 = vmul.f32 0.70710677, %v5755_v15  ;;  %vm1930_vm15 = vcmp.lt.f32.partialorder %v5644_v5, 0.0 }
 0x24e   :  { %v1485_v61 = vmul.f32 %v5713_v40, %v1421_v23  ;;  %3969 = vmatmul.mubr.f32.gmra.mxu1 %v2185_v54  ;;  %v972_v16 = vmul.f32 1.0614054, %v5757_v45  ;;  %v846_v30 = vadd.f32 1.0, %v782_v14  ;;  %v1551_v40 = vsub.f32 0.0, %v5736_v58 }
 0x24f   :  { %v1866_v52 = vsub.f32 1.0, %v1802_v44  ;;  %v1550_v22 = vsub.f32 0.0, %v718_v8  ;;  %v785_v36 = vmul.f32 0.3275911, %v721_v7  ;;  %v2123_v38 = vadd.f32 1.0, %v2059_v37 }
 0x250   :  { %v1805_v60 = vmul.f32 %v4199_v56, %v1485_v61  ;;  %v1036_v24 = vadd.f32 -1.4531521, %v972_v16  ;;  %4206 = vrcp.f32 %v846_v30  ;;  %v720_v41 = vand.u32 2147483647, %v5768_v27 }
 0x251   :  { %v1994_v33 = vsub.f32 0.0, %v1866_v52  ;;  %v586_v57 = vmul.f32 0.5, %v5636_v0  ;;  %v849_v9 = vadd.f32 1.0, %v785_v36  ;;  %v587_v48 = vmul.f32 0.5, %v5620_v34 }
 0x252   :  { %v1100_v59 = vmul.f32 %v5757_v45, %v1036_v24  ;;  %v1869_v35 = vsub.f32 1.0, %v1805_v60  ;;  %v1615_v26 = vmul.f32 %v1551_v40, %v5736_v58  ;;  %v784_v5 = vmul.f32 0.3275911, %v720_v41 }
 0x253   :  { %v2058_v42 = vsel %vm1930_vm15, %v1994_v33, %v1866_v52  ;;  %v1614_v39 = vmul.f32 %v1550_v22, %v718_v8  ;;  %4208 = vrcp.f32 %v849_v9  ;;  %v2187_v25 = vmul.f32 %v2123_v38, %v587_v48 }
 0x254   :  { %v2122_v43 = vadd.f32 1.0, %v2058_v42  ;;  %v1164_v53 = vadd.f32 1.4214138, %v1100_v59  ;;  %v589_v47 = vmul.f32 0.5, %v5646_v32  ;;  %v848_v0 = vadd.f32 1.0, %v784_v5  ;;  %v5792_v32 = vpop.f32.mrf.mxu0 }
 0x255   :  { %vm1933_vm0 = vcmp.lt.f32.partialorder %v5659_v29, 0.0  ;;  %v1997_v34 = vsub.f32 0.0, %v1869_v35  ;;  %v5786_v56 = vmul.f32 0.5, %v5687_v19  ;;  %v5789_v58 = vmul.f32 0.70710677, %v5770_v49 }
 0x256   :  { %v2186_v20 = vmul.f32 %v2122_v43, %v586_v57  ;;  %v1228_v21 = vmul.f32 %v5757_v45, %v1164_v53  ;;  %v1730_v3 = vmul.f32 1.442695, %v1615_v26  ;;  %v1728_v28 = vmul.f32 1.442695, %v1614_v39  ;;  %v5826_v39 = vpop.f32.mrf.mxu0 }
 0x257   :  { %v1553_v63 = vsub.f32 0.0, %v721_v7  ;;  %4210 = vrcp.f32 %v848_v0  ;;  %v723_v62 = vand.u32 2147483647, %v5789_v58  ;;  %v5797_v19 = vmul.f32 0.5, %v5723_v46 }
 0x258   :  { %v5782_v12 = vpop.eup %4202  ;;  %3971 = vmatprep.mubr.f32.mxu1 %v2186_v20  ;;  %v1292_v51 = vadd.f32 -0.28449672, %v1228_v21  ;;  %v5800_v4 = vmul.f32 0.70710677, %v5778_v1  ;;  %v2061_v50 = vsel %vm1933_vm0, %v1997_v34, %v1869_v35  ;;  %v1552_v23 = vsub.f32 0.0, %v720_v41 }
 0x259   :  { %v975_v17 = vmul.f32 1.0614054, %v5782_v12  ;;  %3972 = vmatmul.mubr.f32.gmra.mxu1 %v2187_v25  ;;  %v4205_v54 = vpop.eup %4204  ;;  %v787_v8 = vmul.f32 0.3275911, %v723_v62  ;;  %v5805_v44 = vmul.f32 0.70710677, %v5792_v32  ;;  %4212 = vpow2.f32 %v1730_v3 }
 0x25a   :  { %v1356_v6 = vmul.f32 %v5757_v45, %v1292_v51  ;;  %v722_v46 = vand.u32 2147483647, %v5800_v4  ;;  %vm1932_vm1 = vcmp.lt.f32.partialorder %v5697_v13, 0.0  ;;  %4214 = vpow2.f32 %v1728_v28 }
 0x25b   :  { %v1039_v2 = vadd.f32 -1.4531521, %v975_v17  ;;  %v1617_v52 = vmul.f32 %v1553_v63, %v721_v7  ;;  %v851_v16 = vadd.f32 1.0, %v787_v8  ;;  %v5811_v37 = vand.u32 2147483647, %v5805_v44 }
 0x25c   :  { %v1420_v61 = vadd.f32 0.2548296, %v1356_v6  ;;  %v2125_v60 = vadd.f32 1.0, %v2061_v50  ;;  %v786_v24 = vmul.f32 0.3275911, %v722_v46  ;;  %v1616_v22 = vmul.f32 %v1552_v23, %v720_v41  ;;  %v5840_v23 = vpop.f32.mrf.mxu0 }
 0x25d   :  { %v1103_v14 = vmul.f32 %v5782_v12, %v1039_v2  ;;  %v5813_v29 = vpop.eup %4206  ;;  %4216 = vrcp.f32 %v851_v16  ;;  %v789_v36 = vmul.f32 0.3275911, %v5811_v37  ;;  %v1555_v42 = vsub.f32 0.0, %v723_v62 }
 0x25e   :  { %v1484_v30 = vmul.f32 %v5757_v45, %v1420_v61  ;;  %v974_v40 = vmul.f32 1.0614054, %v5813_v29  ;;  %v850_v59 = vadd.f32 1.0, %v786_v24  ;;  %v1734_v43 = vmul.f32 1.442695, %v1617_v52 }
 0x25f   :  { %v1167_v33 = vadd.f32 1.4214138, %v1103_v14  ;;  %v1554_v35 = vsub.f32 0.0, %v722_v46  ;;  %v853_v9 = vadd.f32 1.0, %v789_v36  ;;  %v5822_v26 = vmul.f32 0.5, %v5738_v55 }
 0x260   :  { %v1804_v38 = vmul.f32 %v4205_v54, %v1484_v30  ;;  %v1038_v57 = vadd.f32 -1.4531521, %v974_v40  ;;  %v5819_v48 = vpop.eup %4208  ;;  %4218 = vrcp.f32 %v850_v59  ;;  %v2189_v41 = vmul.f32 %v2125_v60, %v589_v47 }
 0x261   :  { %v1231_v7 = vmul.f32 %v5782_v12, %v1167_v33  ;;  %v977_v20 = vmul.f32 1.0614054, %v5819_v48  ;;  %4220 = vrcp.f32 %v853_v9  ;;  %v1732_v0 = vmul.f32 1.442695, %v1616_v22 }
 0x262   :  { %v1868_v45 = vsub.f32 1.0, %v1804_v38  ;;  %v1102_v5 = vmul.f32 %v5813_v29, %v1038_v57  ;;  %v1619_v34 = vmul.f32 %v1555_v42, %v723_v62  ;;  %4222 = vpow2.f32 %v1734_v43 }
 0x263   :  { %v1295_v53 = vadd.f32 -0.28449672, %v1231_v7  ;;  %v1041_v17 = vadd.f32 -1.4531521, %v977_v20  ;;  %v1618_v3 = vmul.f32 %v1554_v35, %v722_v46  ;;  %v1557_v63 = vsub.f32 0.0, %v5811_v37 }
 0x264   :  { %v1996_v25 = vsub.f32 0.0, %v1868_v45  ;;  %v1166_v51 = vadd.f32 1.4214138, %v1102_v5  ;;  %v5829_v55 = vpop.eup %4210  ;;  %v5835_v6 = vmul.f32 0.70710677, %v5826_v39  ;;  %4224 = vpow2.f32 %v1732_v0 }
 0x265   :  { %v1359_v21 = vmul.f32 %v5782_v12, %v1295_v53  ;;  %v1105_v62 = vmul.f32 %v5819_v48, %v1041_v17  ;;  %v976_v50 = vmul.f32 1.0614054, %v5829_v55  ;;  %v1738_v13 = vmul.f32 1.442695, %v1619_v34 }
 0x266   :  { %v2060_v47 = vsel %vm1932_vm1, %v1996_v25, %v1868_v45  ;;  %v1230_v54 = vmul.f32 %v5813_v29, %v1166_v51  ;;  %v724_v61 = vand.u32 2147483647, %v5835_v6  ;;  %v4213_v14 = vpop.eup %4212  ;;  %vm1935_vm2 = vcmp.lt.f32.partialorder %v5731_v18, 0.0 }
 0x267   :  { %v1423_v28 = vadd.f32 0.2548296, %v1359_v21  ;;  %v2124_v2 = vadd.f32 1.0, %v2060_v47  ;;  %v1169_v16 = vadd.f32 1.4214138, %v1105_v62  ;;  %v4215_v30 = vpop.eup %4214  ;;  %4226 = vpow2.f32 %v1738_v13 }
 0x268   :  { %v1294_v52 = vadd.f32 -0.28449672, %v1230_v54  ;;  %v1040_v60 = vadd.f32 -1.4531521, %v976_v50  ;;  %v1736_v24 = vmul.f32 1.442695, %v1618_v3 }
 0x269   :  { %v1487_v8 = vmul.f32 %v5782_v12, %v1423_v28  ;;  %v2188_v46 = vmul.f32 %v2124_v2, %v5786_v56  ;;  %v788_v40 = vmul.f32 0.3275911, %v724_v61  ;;  %v5847_v22 = vmul.f32 0.70710677, %v5840_v23 }
 0x26a   :  { %v1358_v12 = vmul.f32 %v5813_v29, %v1294_v52  ;;  %v1233_v36 = vmul.f32 %v5819_v48, %v1169_v16  ;;  %v1104_v38 = vmul.f32 %v5829_v55, %v1040_v60  ;;  %v1621_v56 = vmul.f32 %v1557_v63, %v5811_v37  ;;  %v5853_v7 = vpop.eup %4216 }
 0x26b   :  { %v1807_v33 = vmul.f32 %v4213_v14, %v1487_v8  ;;  %3974 = vmatprep.mubr.f32.mxu1 %v2188_v46  ;;  %v852_v59 = vadd.f32 1.0, %v788_v40  ;;  %v1556_v57 = vsub.f32 0.0, %v724_v61  ;;  %v5856_v43 = vand.u32 2147483647, %v5847_v22 }
 0x26c   :  { %3975 = vmatmul.mubr.f32.gmra.mxu1 %v2189_v41  ;;  %v1422_v35 = vadd.f32 0.2548296, %v1358_v12  ;;  %v1297_v9 = vadd.f32 -0.28449672, %v1233_v36  ;;  %v1168_v45 = vadd.f32 1.4214138, %v1104_v38  ;;  %v5882_v36 = vpop.f32.mrf.mxu0 }
 0x26d   :  { %v1871_v42 = vsub.f32 1.0, %v1807_v33  ;;  %vm1934_vm3 = vcmp.lt.f32.partialorder %v5751_v31, 0.0  ;;  %v5860_v5 = vmul.f32 0.5, %v5755_v15  ;;  %v979_v37 = vmul.f32 1.0614054, %v5853_v7  ;;  %v5863_v20 = vpop.eup %4218 }
 0x26e   :  { %4228 = vrcp.f32 %v852_v59  ;;  %v1486_v25 = vmul.f32 %v5813_v29, %v1422_v35  ;;  %v1361_v21 = vmul.f32 %v5819_v48, %v1297_v9  ;;  %v1232_v41 = vmul.f32 %v5829_v55, %v1168_v45  ;;  %v5869_v34 = vpop.eup %4220 }
 0x26f   :  { %v1999_v53 = vsub.f32 0.0, %v1871_v42  ;;  %v791_v0 = vmul.f32 0.3275911, %v5856_v43  ;;  %v1043_v51 = vadd.f32 -1.4531521, %v979_v37  ;;  %4230 = vpow2.f32 %v1736_v24  ;;  %v4223_v2 = vpop.eup %4222 }
 0x270   :  { %v978_v17 = vmul.f32 1.0614054, %v5863_v20  ;;  %v1742_v15 = vmul.f32 1.442695, %v1621_v56  ;;  %v1806_v3 = vmul.f32 %v4215_v30, %v1486_v25  ;;  %v1425_v47 = vadd.f32 0.2548296, %v1361_v21 }
 0x271   :  { %v1296_v28 = vadd.f32 -0.28449672, %v1232_v41  ;;  %v1620_v63 = vmul.f32 %v1556_v57, %v724_v61  ;;  %v1107_v29 = vmul.f32 %v5853_v7, %v1043_v51  ;;  %v981_v62 = vmul.f32 1.0614054, %v5869_v34  ;;  %v4225_v60 = vpop.eup %4224 }
 0x272   :  { %v1042_v54 = vadd.f32 -1.4531521, %v978_v17  ;;  %v855_v50 = vadd.f32 1.0, %v791_v0  ;;  %v2063_v8 = vsel %vm1935_vm2, %v1999_v53, %v1871_v42  ;;  %v1870_v13 = vsub.f32 1.0, %v1806_v3 }
 0x273   :  { %v1489_v14 = vmul.f32 %v5819_v48, %v1425_v47  ;;  %vm1937_vm4 = vcmp.lt.f32.partialorder %v5761_v11, 0.0  ;;  %v1360_v46 = vmul.f32 %v5829_v55, %v1296_v28  ;;  %v1171_v52 = vadd.f32 1.4214138, %v1107_v29 }
 0x274   :  { %v1106_v61 = vmul.f32 %v5863_v20, %v1042_v54  ;;  %v1045_v16 = vadd.f32 -1.4531521, %v981_v62  ;;  %4232 = vrcp.f32 %v855_v50  ;;  %v1998_v30 = vsub.f32 0.0, %v1870_v13  ;;  %v4227_v41 = vpop.eup %4226 }
 0x275   :  { %v1809_v33 = vmul.f32 %v4223_v2, %v1489_v14  ;;  %v1424_v24 = vadd.f32 0.2548296, %v1360_v46  ;;  %4234 = vpow2.f32 %v1742_v15  ;;  %v1235_v18 = vmul.f32 %v5853_v7, %v1171_v52 }
 0x276   :  { %v1170_v40 = vadd.f32 1.4214138, %v1106_v61  ;;  %v1109_v12 = vmul.f32 %v5869_v34, %v1045_v16  ;;  %v1740_v48 = vmul.f32 1.442695, %v1620_v63  ;;  %v2127_v38 = vadd.f32 1.0, %v2063_v8  ;;  %v5912_v16 = vpop.f32.mrf.mxu0 }
 0x277   :  { %v2062_v56 = vsel %vm1934_vm3, %v1998_v30, %v1870_v13  ;;  %v1873_v42 = vsub.f32 1.0, %v1809_v33  ;;  %v1488_v59 = vmul.f32 %v5829_v55, %v1424_v24  ;;  %v1299_v35 = vadd.f32 -0.28449672, %v1235_v18 }
 0x278   :  { %v2126_v57 = vadd.f32 1.0, %v2062_v56  ;;  %v1234_v9 = vmul.f32 %v5863_v20, %v1170_v40  ;;  %v1173_v45 = vadd.f32 1.4214138, %v1109_v12  ;;  %v1559_v25 = vsub.f32 0.0, %v5856_v43 }
 0x279   :  { %v2001_v53 = vsub.f32 0.0, %v1873_v42  ;;  %v1808_v37 = vmul.f32 %v4225_v60, %v1488_v59  ;;  %v5890_v21 = vmul.f32 0.70710677, %v5882_v36  ;;  %v1363_v31 = vmul.f32 %v5853_v7, %v1299_v35  ;;  %v5926_v59 = vpop.f32.mrf.mxu0 }
 0x27a   :  { %v2190_v0 = vmul.f32 %v2126_v57, %v5822_v26  ;;  %v1298_v51 = vadd.f32 -0.28449672, %v1234_v9  ;;  %v1237_v55 = vmul.f32 %v5869_v34, %v1173_v45  ;;  %v2191_v15 = vmul.f32 %v2127_v38, %v5797_v19 }
 0x27b   :  { %v5895_v17 = vpop.eup %4228  ;;  %v1872_v3 = vsub.f32 1.0, %v1808_v37  ;;  %vm1936_vm5 = vcmp.lt.f32.partialorder %v5768_v27, 0.0  ;;  %v5900_v47 = vand.u32 2147483647, %v5890_v21  ;;  %v2065_v28 = vsel %vm1937_vm4, %v2001_v53, %v1873_v42 }
 0x27c   :  { %v1427_v63 = vadd.f32 0.2548296, %v1363_v31  ;;  %v1362_v26 = vmul.f32 %v5863_v20, %v1298_v51  ;;  %v1301_v2 = vadd.f32 -0.28449672, %v1237_v55  ;;  %3977 = vmatprep.mubr.f32.mxu1 %v2190_v0  ;;  %v4231_v29 = vpop.eup %4230  ;;  %v980_v62 = vmul.f32 1.0614054, %v5895_v17 }
 0x27d   :  { %v2000_v54 = vsub.f32 0.0, %v1872_v3  ;;  %4236 = vpow2.f32 %v1740_v48  ;;  %v790_v19 = vmul.f32 0.3275911, %v5900_v47  ;;  %3978 = vmatmul.mubr.f32.gmra.mxu1 %v2191_v15  ;;  %v1623_v11 = vmul.f32 %v1559_v25, %v5856_v43 }
 0x27e   :  { %v1491_v50 = vmul.f32 %v5853_v7, %v1427_v63  ;;  %v1426_v8 = vadd.f32 0.2548296, %v1362_v26  ;;  %v1365_v13 = vmul.f32 %v5869_v34, %v1301_v2  ;;  %v2129_v14 = vadd.f32 1.0, %v2065_v28 }
 0x27f   :  { %v2064_v46 = vsel %vm1936_vm5, %v2000_v54, %v1872_v3  ;;  %v1044_v52 = vadd.f32 -1.4531521, %v980_v62  ;;  %v854_v61 = vadd.f32 1.0, %v790_v19  ;;  %v593_v7 = vmul.f32 0.5, %v5746_v10  ;;  %v5919_v43 = vpop.f32.mrf.mxu1 }
 0x280   :  { %v2128_v60 = vadd.f32 1.0, %v2064_v46  ;;  %v1811_v30 = vmul.f32 %v4227_v41, %v1491_v50  ;;  %v1490_v33 = vmul.f32 %v5863_v20, %v1426_v8  ;;  %v1429_v24 = vadd.f32 0.2548296, %v1365_v13  ;;  %2591 = vadd.xlane.f32.xlu0 %v5919_v43  ;;  %v5957_v50 = vpop.f32.mrf.mxu0 }
 0x281   :  { %v5915_v18 = vpop.eup %4232  ;;  %v1108_v40 = vmul.f32 %v5895_v17, %v1044_v52  ;;  %4238 = vrcp.f32 %v854_v61  ;;  %v2193_v20 = vmul.f32 %v2129_v14, %v593_v7  ;;  %vm1939_vm6 = vcmp.lt.f32.partialorder %v5789_v58, 0.0  ;;  %v5928_v57 = vpop.f32.mrf.mxu1 }
 0x282   :  { %v4235_v27 = vpop.eup %4234  ;;  %v2192_v12 = vmul.f32 %v2128_v60, %v5860_v5  ;;  %v1875_v48 = vsub.f32 1.0, %v1811_v30  ;;  %v1810_v38 = vmul.f32 %v4231_v29, %v1490_v33  ;;  %v1493_v56 = vmul.f32 %v5869_v34, %v1429_v24  ;;  %v5973_v24 = vpop.f32.mrf.mxu0 }
 0x283   :  { %v1172_v42 = vadd.f32 1.4214138, %v1108_v40  ;;  %v983_v10 = vmul.f32 1.0614054, %v5915_v18  ;;  %v1746_v45 = vmul.f32 1.442695, %v1623_v11  ;;  %v5937_v41 = vpop.f32.mrf.mxu1 }
 0x284   :  { %v2003_v35 = vsub.f32 0.0, %v1875_v48  ;;  %v1874_v9 = vsub.f32 1.0, %v1810_v38  ;;  %v5931_v5 = vmul.f32 0.70710677, %v5912_v16  ;;  %3980 = vmatprep.mubr.f32.mxu1 %v2192_v12  ;;  %v5933_v34 = vmul.f32 %v4235_v27, %v1493_v56  ;;  %2589 = vadd.xlane.f32.xlu0 %v5928_v57 }
 0x285   :  { %v1236_v53 = vmul.f32 %v5895_v17, %v1172_v42  ;;  %v1047_v37 = vadd.f32 -1.4531521, %v983_v10  ;;  %v1558_v25 = vsub.f32 0.0, %v5900_v47  ;;  %3981 = vmatmul.mubr.f32.gmra.mxu1 %v2193_v20  ;;  %v5945_v55 = vmul.f32 0.70710677, %v5926_v59  ;;  %2595 = vadd.xlane.f32.xlu1 %v5937_v41  ;;  %v5952_v58 = vpop.f32.mrf.mxu1 }
 0x286   :  { %v2067_v0 = vsel %vm1939_vm6, %v2003_v35, %v1875_v48  ;;  %v2002_v31 = vsub.f32 0.0, %v1874_v9  ;;  %v5942_v51 = vand.u32 2147483647, %v5931_v5  ;;  %v595_v15 = vmul.f32 0.5, %v5770_v49 }
 0x287   :  { %vm1938_vm7 = vcmp.lt.f32.partialorder %v5800_v4, 0.0  ;;  %v1300_v3 = vadd.f32 -0.28449672, %v1236_v53  ;;  %v1111_v28 = vmul.f32 %v5915_v18, %v1047_v37  ;;  %v2131_v63 = vadd.f32 1.0, %v2067_v0  ;;  %v5959_v49 = vpop.f32.mrf.mxu1 }
 0x288   :  { %v594_v26 = vmul.f32 0.5, %v5778_v1  ;;  %v2066_v2 = vsel %vm1938_vm7, %v2002_v31, %v1874_v9  ;;  %v793_v29 = vmul.f32 0.3275911, %v5942_v51  ;;  %4240 = vpow2.f32 %v1746_v45 }
 0x289   :  { %v2130_v54 = vadd.f32 1.0, %v2066_v2  ;;  %v1364_v62 = vmul.f32 %v5895_v17, %v1300_v3  ;;  %v1175_v19 = vadd.f32 1.4214138, %v1111_v28  ;;  %v1877_v8 = vsub.f32 1.0, %v5933_v34  ;;  %2593 = vadd.xlane.f32.xlu1 %v5952_v58  ;;  %v5968_v61 = vpop.f32.mrf.mxu1 }
 0x28a   :  { %v4237_v4 = vpop.eup %4236  ;;  %v1622_v13 = vmul.f32 %v1558_v25, %v5900_v47  ;;  %v857_v11 = vadd.f32 1.0, %v793_v29  ;;  %v5964_v1 = vand.u32 2147483647, %v5945_v55  ;;  %v2195_v60 = vmul.f32 %v2131_v63, %v595_v15  ;;  %2597 = vadd.xlane.f32.xlu0 %v5968_v61 }
 0x28b   :  { %v2194_v14 = vmul.f32 %v2130_v54, %v594_v26  ;;  %v1428_v46 = vadd.f32 0.2548296, %v1364_v62  ;;  %v1239_v52 = vmul.f32 %v5915_v18, %v1175_v19  ;;  %v5975_v7 = vpop.f32.mrf.mxu1  ;;  %v2005_v27 = vsub.f32 0.0, %v1877_v8 }
 0x28c   :  { %4242 = vrcp.f32 %v857_v11  ;;  %v792_v30 = vmul.f32 0.3275911, %v5964_v1  ;;  %v1744_v12 = vmul.f32 1.442695, %v1622_v13  ;;  %vm1941_vm8 = vcmp.lt.f32.partialorder %v5805_v44, 0.0 }
 0x28d   :  { %v1492_v47 = vmul.f32 %v5895_v17, %v1428_v46  ;;  %v1303_v33 = vadd.f32 -0.28449672, %v1239_v52  ;;  %3983 = vmatprep.mubr.f32.mxu1 %v2194_v14  ;;  %2599 = vadd.xlane.f32.xlu1 %v5959_v49  ;;  %v5983_v17 = vmul.f32 0.70710677, %v5957_v50  ;;  %v5985_v42 = vpop.f32.mrf.mxu1  ;;  %v5989_v10 = vmul.f32 0.70710677, %v5973_v24 }
 0x28e   :  { %v5977_v40 = vpop.eup %4238  ;;  %v856_v48 = vadd.f32 1.0, %v792_v30  ;;  %3984 = vmatmul.mubr.f32.gmra.mxu1 %v2195_v60  ;;  %2601 = vadd.xlane.f32.xlu0 %v5985_v42  ;;  %v1561_v34 = vsub.f32 0.0, %v5942_v51  ;;  %v2069_v37 = vsel %vm1941_vm8, %v2005_v27, %v1877_v8  ;;  %v596_v44 = vmul.f32 0.5, %v5826_v39 }
 0x28f   :  { %v1812_v38 = vmul.f32 %v4237_v4, %v1492_v47  ;;  %v1367_v56 = vmul.f32 %v5915_v18, %v1303_v33  ;;  %v982_v20 = vmul.f32 1.0614054, %v5977_v40  ;;  %v5993_v53 = vpop.f32.mrf.mxu1  ;;  %v5996_v25 = vand.u32 2147483647, %v5983_v17 }
 0x290   :  { %4244 = vrcp.f32 %v856_v48  ;;  %v5999_v0 = vand.u32 2147483647, %v5989_v10  ;;  %vm1940_vm9 = vcmp.lt.f32.partialorder %v5835_v6, 0.0  ;;  %v2133_v2 = vadd.f32 1.0, %v2069_v37 }
 0x291   :  { %v1876_v35 = vsub.f32 1.0, %v1812_v38  ;;  %v1431_v9 = vadd.f32 0.2548296, %v1367_v56  ;;  %v1046_v45 = vadd.f32 -1.4531521, %v982_v20  ;;  %2603 = vadd.xlane.f32.xlu1 %v5975_v7  ;;  %4246 = vpow2.f32 %v1744_v12  ;;  %v6004_v3 = vpop.f32.mrf.mxu1 }
 0x292   :  { %v795_v63 = vmul.f32 0.3275911, %v5996_v25  ;;  %v794_v26 = vmul.f32 0.3275911, %v5999_v0  ;;  %2605 = vadd.xlane.f32.xlu0 %v6004_v3  ;;  %v1625_v39 = vmul.f32 %v1561_v34, %v5942_v51  ;;  %v1560_v8 = vsub.f32 0.0, %v5964_v1 }
 0x293   :  { %v2004_v31 = vsub.f32 0.0, %v1876_v35  ;;  %v1110_v15 = vmul.f32 %v5977_v40, %v1046_v45  ;;  %v1495_v28 = vmul.f32 %v5915_v18, %v1431_v9  ;;  %v6012_v62 = vpop.f32.mrf.mxu1  ;;  %v597_v18 = vmul.f32 0.5, %v5792_v32 }
 0x294   :  { %v859_v6 = vadd.f32 1.0, %v795_v63  ;;  %v858_v13 = vadd.f32 1.0, %v794_v26  ;;  %v1750_v47 = vmul.f32 1.442695, %v1625_v39  ;;  %v1624_v32 = vmul.f32 %v1560_v8, %v5964_v1 }
 0x295   :  { %v2068_v29 = vsel %vm1940_vm9, %v2004_v31, %v1876_v35  ;;  %v1174_v54 = vadd.f32 1.4214138, %v1110_v15  ;;  %v4241_v19 = vpop.eup %4240  ;;  %2607 = vadd.xlane.f32.xlu1 %v5993_v53  ;;  %v6018_v14 = vpop.f32.mrf.mxu1  ;;  %v2197_v60 = vmul.f32 %v2133_v2, %v597_v18  ;;  %v1563_v37 = vsub.f32 0.0, %v5996_v25 }
 0x296   :  { %v2132_v4 = vadd.f32 1.0, %v2068_v29  ;;  %v1815_v52 = vmul.f32 %v4241_v19, %v1495_v28  ;;  %4248 = vrcp.f32 %v859_v6  ;;  %2609 = vadd.xlane.f32.xlu0 %v6018_v14  ;;  %v1748_v34 = vmul.f32 1.442695, %v1624_v32 }
 0x297   :  { %v1238_v11 = vmul.f32 %v5977_v40, %v1174_v54  ;;  %4250 = vrcp.f32 %v858_v13  ;;  %v6023_v33 = vpop.f32.mrf.mxu1  ;;  %v1562_v31 = vsub.f32 0.0, %v5999_v0  ;;  %vm1943_vm10 = vcmp.lt.f32.partialorder %v5847_v22, 0.0 }
 0x298   :  { %v2196_v46 = vmul.f32 %v2132_v4, %v596_v44  ;;  %v1879_v38 = vsub.f32 1.0, %v1815_v52  ;;  %4252 = vpow2.f32 %v1750_v47  ;;  %vm1942_vm11 = vcmp.lt.f32.partialorder %v5890_v21, 0.0 }
 0x299   :  { %v6021_v51 = vpop.eup %4242  ;;  %v1302_v30 = vadd.f32 -0.28449672, %v1238_v11  ;;  %2611 = vadd.xlane.f32.xlu1 %v6012_v62  ;;  %v6029_v48 = vpop.f32.mrf.mxu1  ;;  %4254 = vpow2.f32 %v1748_v34  ;;  %v1626_v8 = vmul.f32 %v1562_v31, %v5999_v0  ;;  %v599_v34 = vmul.f32 0.5, %v5840_v23 }
 0x29a   :  { %v985_v27 = vmul.f32 1.0614054, %v6021_v51  ;;  %3986 = vmatprep.mubr.f32.mxu1 %v2196_v46  ;;  %2613 = vadd.xlane.f32.xlu0 %v6029_v48  ;;  %v2007_v63 = vsub.f32 0.0, %v1879_v38  ;;  %vm1945_vm12 = vcmp.lt.f32.partialorder %v5931_v5, 0.0  ;;  %vm1944_vm13 = vcmp.lt.f32.partialorder %v5945_v55, 0.0 }
 0x29b   :  { %v1366_v12 = vmul.f32 %v5977_v40, %v1302_v30  ;;  %3987 = vmatmul.mubr.f32.gmra.mxu1 %v2197_v60  ;;  %v6034_v9 = vpop.f32.mrf.mxu1  ;;  %v601_v55 = vmul.f32 0.5, %v5912_v16  ;;  %vm1947_vm14 = vcmp.lt.f32.partialorder %v5983_v17, 0.0  ;;  %vm1946_vm15 = vcmp.lt.f32.partialorder %v5989_v10, 0.0 }
 0x29c   :  { %v1049_v56 = vadd.f32 -1.4531521, %v985_v27  ;;  %v2071_v13 = vsel %vm1943_vm10, %v2007_v63, %v1879_v38  ;;  %v1752_v38 = vmul.f32 1.442695, %v1626_v8 }
 0x29d   :  { %v6032_v20 = vpop.eup %4244  ;;  %v1430_v35 = vadd.f32 0.2548296, %v1366_v12  ;;  %2615 = vadd.xlane.f32.xlu1 %v6023_v33  ;;  %v6042_v15 = vpop.f32.mrf.mxu1  ;;  %v2135_v27 = vadd.f32 1.0, %v2071_v13 }
 0x29e   :  { %v1113_v1 = vmul.f32 %v6021_v51, %v1049_v56  ;;  %v984_v45 = vmul.f32 1.0614054, %v6032_v20  ;;  %v4247_v28 = vpop.eup %4246  ;;  %2617 = vadd.xlane.f32.xlu0 %v6042_v15  ;;  %v598_v56 = vmul.f32 0.5, %v5882_v36 }
 0x29f   :  { %v1494_v44 = vmul.f32 %v5977_v40, %v1430_v35  ;;  %v6045_v54 = vpop.f32.mrf.mxu1  ;;  %v1627_v40 = vmul.f32 %v1563_v37, %v5996_v25  ;;  %v2199_v36 = vmul.f32 %v2135_v27, %v599_v34 }
 0x2a0   :  { %v1177_v26 = vadd.f32 1.4214138, %v1113_v1  ;;  %v1048_v2 = vadd.f32 -1.4531521, %v984_v45 }
 0x2a1   :  { %v1814_v29 = vmul.f32 %v4247_v28, %v1494_v44  ;;  %2619 = vadd.xlane.f32.xlu1 %v6034_v9  ;;  %v6053_v6 = vpop.f32.mrf.mxu1  ;;  %v1754_v47 = vmul.f32 1.442695, %v1627_v40 }
 0x2a2   :  { %v1241_v39 = vmul.f32 %v6021_v51, %v1177_v26  ;;  %v1112_v19 = vmul.f32 %v6032_v20, %v1048_v2  ;;  %2621 = vadd.xlane.f32.xlu0 %v6053_v6 }
 0x2a3   :  { %v1878_v4 = vsub.f32 1.0, %v1814_v29  ;;  %v6056_v46 = vpop.eup %4248  ;;  %v6059_v25 = vpop.f32.mrf.mxu1  ;;  %4256 = vpow2.f32 %v1754_v47 }
 0x2a4   :  { %v1305_v18 = vadd.f32 -0.28449672, %v1241_v39  ;;  %v1176_v11 = vadd.f32 1.4214138, %v1112_v19  ;;  %v6061_v60 = vpop.eup %4250  ;;  %v987_v30 = vmul.f32 1.0614054, %v6056_v46  ;;  %4258 = vpow2.f32 %v1752_v38 }
 0x2a5   :  { %v2006_v52 = vsub.f32 0.0, %v1878_v4  ;;  %2623 = vadd.xlane.f32.xlu1 %v6045_v54  ;;  %v986_v12 = vmul.f32 1.0614054, %v6061_v60  ;;  %v6068_v21 = vpop.f32.mrf.mxu1  ;;  %v4253_v28 = vpop.eup %4252 }
 0x2a6   :  { %v1369_v22 = vmul.f32 %v6021_v51, %v1305_v18  ;;  %v1240_v0 = vmul.f32 %v6032_v20, %v1176_v11  ;;  %2625 = vadd.xlane.f32.xlu0 %v6068_v21  ;;  %v1051_v37 = vadd.f32 -1.4531521, %v987_v30  ;;  %v4255_v11 = vpop.eup %4254 }
 0x2a7   :  { %v2070_v32 = vsel %vm1942_vm11, %v2006_v52, %v1878_v4  ;;  %v1050_v44 = vadd.f32 -1.4531521, %v986_v12  ;;  %v6073_v31 = vpop.f32.mrf.mxu1 }
 0x2a8   :  { %v2134_v35 = vadd.f32 1.0, %v2070_v32  ;;  %v1433_v1 = vadd.f32 0.2548296, %v1369_v22  ;;  %v1304_v45 = vadd.f32 -0.28449672, %v1240_v0  ;;  %v1115_v29 = vmul.f32 %v6056_v46, %v1051_v37 }
 0x2a9   :  { %2627 = vadd.xlane.f32.xlu1 %v6059_v25  ;;  %v1114_v39 = vmul.f32 %v6061_v60, %v1050_v44  ;;  %v6080_v23 = vpop.f32.mrf.mxu1 }
 0x2aa   :  { %v2198_v63 = vmul.f32 %v2134_v35, %v598_v56  ;;  %v1497_v26 = vmul.f32 %v6021_v51, %v1433_v1  ;;  %v1368_v2 = vmul.f32 %v6032_v20, %v1304_v45  ;;  %2629 = vadd.xlane.f32.xlu0 %v6080_v23  ;;  %v1179_v4 = vadd.f32 1.4214138, %v1115_v29 }
 0x2ab   :  { %v1178_v51 = vadd.f32 1.4214138, %v1114_v39  ;;  %v6083_v8 = vpop.f32.mrf.mxu1 }
 0x2ac   :  { %v1817_v19 = vmul.f32 %v4253_v28, %v1497_v26  ;;  %v1432_v40 = vadd.f32 0.2548296, %v1368_v2  ;;  %3989 = vmatprep.mubr.f32.mxu1 %v2198_v63  ;;  %v1243_v52 = vmul.f32 %v6056_v46, %v1179_v4  ;;  %v600_v26 = vmul.f32 0.5, %v5926_v59 }
 0x2ad   :  { %3990 = vmatmul.mubr.f32.gmra.mxu1 %v2199_v36  ;;  %2631 = vadd.xlane.f32.xlu1 %v6073_v31  ;;  %v1242_v22 = vmul.f32 %v6061_v60, %v1178_v51  ;;  %v6089_v0 = vpop.f32.mrf.mxu1 }
 0x2ae   :  { %v1881_v13 = vsub.f32 1.0, %v1817_v19  ;;  %v1496_v18 = vmul.f32 %v6032_v20, %v1432_v40  ;;  %2633 = vadd.xlane.f32.xlu0 %v6089_v0  ;;  %v1307_v27 = vadd.f32 -0.28449672, %v1243_v52 }
 0x2af   :  { %v1306_v32 = vadd.f32 -0.28449672, %v1242_v22  ;;  %v6092_v12 = vpop.f32.mrf.mxu1 }
 0x2b0   :  { %v2009_v30 = vsub.f32 0.0, %v1881_v13  ;;  %v1816_v47 = vmul.f32 %v4255_v11, %v1496_v18  ;;  %v1371_v56 = vmul.f32 %v6056_v46, %v1307_v27  ;;  %v4257_v63 = vpop.eup %4256 }
 0x2b1   :  { %2635 = vadd.xlane.f32.xlu1 %v6083_v8  ;;  %v1370_v35 = vmul.f32 %v6061_v60, %v1306_v32  ;;  %v6098_v1 = vpop.f32.mrf.mxu1  ;;  %v4259_v19 = vpop.eup %4258  ;;  %v602_v32 = vmul.f32 0.5, %v5973_v24 }
 0x2b2   :  { %v1880_v20 = vsub.f32 1.0, %v1816_v47  ;;  %v2073_v38 = vsel %vm1945_vm12, %v2009_v30, %v1881_v13  ;;  %2637 = vadd.xlane.f32.xlu0 %v6098_v1  ;;  %v1435_v34 = vadd.f32 0.2548296, %v1371_v56 }
 0x2b3   :  { %v1434_v37 = vadd.f32 0.2548296, %v1370_v35  ;;  %v6102_v44 = vpop.f32.mrf.mxu1  ;;  %v2137_v5 = vadd.f32 1.0, %v2073_v38  ;;  %v603_v38 = vmul.f32 0.5, %v5957_v50 }
 0x2b4   :  { %v2008_v45 = vsub.f32 0.0, %v1880_v20  ;;  %v1499_v36 = vmul.f32 %v6056_v46, %v1435_v34 }
 0x2b5   :  { %2639 = vadd.xlane.f32.xlu1 %v6092_v12  ;;  %v1498_v29 = vmul.f32 %v6061_v60, %v1434_v37  ;;  %v6108_v39 = vpop.f32.mrf.mxu1  ;;  %v2201_v18 = vmul.f32 %v2137_v5, %v601_v55 }
 0x2b6   :  { %v2072_v28 = vsel %vm1944_vm13, %v2008_v45, %v1880_v20  ;;  %2641 = vadd.xlane.f32.xlu0 %v6108_v39  ;;  %v1819_v4 = vmul.f32 %v4257_v63, %v1499_v36 }
 0x2b7   :  { %v2136_v2 = vadd.f32 1.0, %v2072_v28  ;;  %v1818_v51 = vmul.f32 %v4259_v19, %v1498_v29  ;;  %v6112_v13 = vpop.f32.mrf.mxu1 }
 0x2b8   :  { %v1883_v59 = vsub.f32 1.0, %v1819_v4 }
 0x2b9   :  { %v2200_v40 = vmul.f32 %v2136_v2, %v600_v26  ;;  %2643 = vadd.xlane.f32.xlu1 %v6102_v44  ;;  %v1882_v11 = vsub.f32 1.0, %v1818_v51  ;;  %v6115_v46 = vpop.f32.mrf.mxu1 }
 0x2ba   :  { %2645 = vadd.xlane.f32.xlu0 %v6115_v46  ;;  %v2011_v60 = vsub.f32 0.0, %v1883_v59 }
 0x2bb   :  { %3992 = vmatprep.mubr.f32.mxu1 %v2200_v40  ;;  %v2010_v16 = vsub.f32 0.0, %v1882_v11  ;;  %v6118_v52 = vpop.f32.mrf.mxu1 }
 0x2bc   :  { %3993 = vmatmul.mubr.f32.gmra.mxu1 %v2201_v18  ;;  %v2075_v22 = vsel %vm1947_vm14, %v2011_v60, %v1883_v59 }
 0x2bd   :  { %2647 = vadd.xlane.f32.xlu1 %v6112_v13  ;;  %v2074_v30 = vsel %vm1946_vm15, %v2010_v16, %v1882_v11  ;;  %v6123_v47 = vpop.f32.mrf.mxu1  ;;  %v2139_v27 = vadd.f32 1.0, %v2075_v22 }
 0x2be   :  { %v2138_v20 = vadd.f32 1.0, %v2074_v30  ;;  %2649 = vadd.xlane.f32.xlu0 %v6123_v47 }
 0x2bf   :  { %v2203_v17 = vmul.f32 %v2139_v27, %v603_v38 }
 0x2c0   :  { %v2202_v56 = vmul.f32 %v2138_v20, %v602_v32 }
 0x2c1   :  { %2651 = vadd.xlane.f32.xlu1 %v6118_v52 }
 0x2c2   :  { %3995 = vmatprep.mubr.f32.mxu1 %v2202_v56 }
 0x2c3   :  { %3996 = vmatmul.mubr.f32.gmra.mxu1 %v2203_v17 }
 0x2c5   :  { %v6129_v10 = vpop.f32.mrf.mxu1 }
 0x2c6   :  { %7052 = vst [vmem:[#allocation13_spill] sm:$0xff] %v6129_v10  ;;  %2655 = vadd.xlane.f32.xlu1 %v6129_v10 }
 0x2c7   :  { %v6131_v35 = vpop.f32.mrf.mxu1 }
 0x2c8   :  { %7053 = vst [vmem:[#allocation12_spill] sm:$0xff] %v6131_v35  ;;  %2653 = vadd.xlane.f32.xlu0 %v6131_v35 }
 0x2ce   :  { %v6135_v24 = vpop.f32.mrf.mxu1 }
 0x2cf   :  { %7054 = vst [vmem:[#allocation15_spill] sm:$0xff] %v6135_v24  ;;  %2659 = vadd.xlane.f32.xlu1 %v6135_v24 }
 0x2d0   :  { %v6138_v45 = vpop.f32.mrf.mxu1 }
 0x2d1   :  { %7055 = vst [vmem:[#allocation14_spill] sm:$0xff] %v6138_v45  ;;  %2657 = vadd.xlane.f32.xlu0 %v6138_v45 }
 0x2d6   :  { %v6141_v50 = vpop.f32.mrf.mxu1 }
 0x2d7   :  { %7056 = vst [vmem:[#allocation17_spill] sm:$0xff] %v6141_v50  ;;  %2663 = vadd.xlane.f32.xlu1 %v6141_v50 }
 0x2d8   :  { %v6144_v34 = vpop.f32.mrf.mxu1 }
 0x2d9   :  { %7057 = vst [vmem:[#allocation16_spill] sm:$0xff] %v6144_v34  ;;  %2661 = vadd.xlane.f32.xlu0 %v6144_v34 }
 0x2e7   :  { %v6147_v37 = vpop.f32.mrf.mxu1 }
 0x2e8   :  { %7058 = vst [vmem:[#allocation18_spill] sm:$0xff] %v6147_v37  ;;  %2667 = vadd.xlane.f32.xlu1 %v6147_v37 }
 0x2e9   :  { %v6150_v5 = vpop.f32.mrf.mxu1 }
 0x2ea   :  { %7059 = vst [vmem:[#allocation26_spill] sm:$0xff] %v6150_v5  ;;  %2665 = vadd.xlane.f32.xlu0 %v6150_v5 }
 0x2fa   :  { %v6153_v28 = vpop.f32.mrf.mxu1 }
 0x2fb   :  { %7060 = vst [vmem:[#allocation20_spill] sm:$0xff] %v6153_v28  ;;  %2671 = vadd.xlane.f32.xlu1 %v6153_v28 }
 0x2fc   :  { %v6156_v63 = vpop.f32.mrf.mxu1 }
 0x2fd   :  { %7061 = vst [vmem:[#allocation19_spill] sm:$0xff] %v6156_v63  ;;  %2669 = vadd.xlane.f32.xlu0 %v6156_v63 }
 0x304   :  { %v6159_v26 = vpop.f32.mrf.mxu1 }
 0x305   :  { %7062 = vst [vmem:[#allocation22_spill] sm:$0xff] %v6159_v26  ;;  %2675 = vadd.xlane.f32.xlu1 %v6159_v26  ;;  %v2781_v26 = vlaneseq }
 0x306   :  { %v6162_v2 = vpop.f32.mrf.mxu1 }
 0x307   :  { %7063 = vst [vmem:[#allocation21_spill] sm:$0xff] %v6162_v2  ;;  %2673 = vadd.xlane.f32.xlu0 %v6162_v2  ;;  %v6235_v37 = vand.u32 127, %v2781_v26 }
 0x309   :  { %v2592_v60 = vpop.xlane.xlu0 %2591  ;;  %vm2783_vm0 = vcmp.lt.s32.totalorder %v6235_v37, 32 }
 0x30a   :  { %v2718_v28 = vmul.f32 0.03125, %v2592_v60 }
 0x30c   :  { %v2785_v50 = vsub.f32 %v5919_v43, %v2718_v28 }
 0x30d   :  { %v2590_v30 = vpop.xlane.xlu0 %2589 }
 0x30e   :  { %v6165_v36 = vpop.f32.mrf.mxu1  ;;  %v2596_v59 = vpop.xlane.xlu1 %2595  ;;  %v2717_v34 = vmul.f32 0.03125, %v2590_v30  ;;  %v6253_v30 = vsel %vm2783_vm0, %v2785_v50, 0.0 }
 0x30f   :  { %7064 = vst [vmem:[#allocation24_spill] sm:$0xff] %v6165_v36  ;;  %2679 = vadd.xlane.f32.xlu1 %v6165_v36  ;;  %v2720_v45 = vmul.f32 0.03125, %v2596_v59 }
 0x310   :  { %v6168_v29 = vpop.f32.mrf.mxu1  ;;  %v2784_v60 = vsub.f32 %v5928_v57, %v2717_v34  ;;  %v2913_v57 = vmul.f32 %v6253_v30, %v6253_v30 }
 0x311   :  { %7065 = vst [vmem:[#allocation23_spill] sm:$0xff] %v6168_v29  ;;  %2677 = vadd.xlane.f32.xlu0 %v6168_v29  ;;  %v2787_v10 = vsub.f32 %v5937_v41, %v2720_v45 }
 0x312   :  { %v2594_v16 = vpop.xlane.xlu1 %2593  ;;  %v6260_v28 = vsel %vm2783_vm0, %v2784_v60, 0.0 }
 0x313   :  { %v2598_v38 = vpop.xlane.xlu0 %2597  ;;  %v2719_v26 = vmul.f32 0.03125, %v2594_v16  ;;  %7082 = vst [vmem:[#allocation42_spill] sm:$0xff] %v6260_v28  ;;  %v6272_v59 = vsel %vm2783_vm0, %v2787_v10, 0.0  ;;  %v2912_v16 = vmul.f32 %v6260_v28, %v6260_v28 }
 0x314   :  { %v2721_v34 = vmul.f32 0.03125, %v2598_v38 }
 0x315   :  { %v2786_v43 = vsub.f32 %v5952_v58, %v2719_v26 }
 0x316   :  { %v2600_v27 = vpop.xlane.xlu1 %2599  ;;  %v2788_v60 = vsub.f32 %v5968_v61, %v2721_v34 }
 0x317   :  { %v2602_v17 = vpop.xlane.xlu0 %2601  ;;  %v6281_v38 = vsel %vm2783_vm0, %v2786_v43, 0.0 }
 0x318   :  { %v2723_v10 = vmul.f32 0.03125, %v2602_v17  ;;  %v2914_v28 = vmul.f32 %v6281_v38, %v6281_v38  ;;  %v6299_v17 = vsel %vm2783_vm0, %v2788_v60, 0.0 }
 0x319   :  { %v6171_v19 = vpop.f32.mrf.mxu1 }
 0x31a   :  { %7066 = vst [vmem:[#allocation25_spill] sm:$0xff] %v6171_v19  ;;  %2683 = vadd.xlane.f32.xlu1 %v6171_v19  ;;  %v2604_v56 = vpop.xlane.xlu1 %2603 }
 0x31b   :  { %v6174_v55 = vpop.f32.mrf.mxu1  ;;  %v2724_v58 = vmul.f32 0.03125, %v2604_v56 }
 0x31c   :  { %7067 = vst [vmem:[#allocation27_spill] sm:$0xff] %v6174_v55  ;;  %2681 = vadd.xlane.f32.xlu0 %v6174_v55 }
 0x32c   :  { %v6177_v40 = vpop.f32.mrf.mxu1 }
 0x32d   :  { %7068 = vst [vmem:[#allocation28_spill] sm:$0xff] %v6177_v40  ;;  %2687 = vadd.xlane.f32.xlu1 %v6177_v40 }
 0x32e   :  { %v6180_v4 = vpop.f32.mrf.mxu1 }
 0x32f   :  { %7069 = vst [vmem:[#allocation29_spill] sm:$0xff] %v6180_v4  ;;  %2685 = vadd.xlane.f32.xlu0 %v6180_v4 }
 0x33d   :  { %v6183_v51 = vpop.f32.mrf.mxu1 }
 0x33e   :  { %7070 = vst [vmem:[#allocation30_spill] sm:$0xff] %v6183_v51  ;;  %2691 = vadd.xlane.f32.xlu1 %v6183_v51  ;;  %v2606_v51 = vpop.xlane.xlu0 %2605 }
 0x33f   :  { %v6186_v18 = vpop.f32.mrf.mxu1 }
 0x340   :  { %7071 = vst [vmem:[#allocation31_spill] sm:$0xff] %v6186_v18  ;;  %2689 = vadd.xlane.f32.xlu0 %v6186_v18 }
 0x345   :  { %v6189_v11 = vpop.f32.mrf.mxu1 }
 0x346   :  { %7072 = vst [vmem:[#allocation32_spill] sm:$0xff] %v6189_v11  ;;  %2695 = vadd.xlane.f32.xlu1 %v6189_v11  ;;  %v2608_v11 = vpop.xlane.xlu1 %2607 }
 0x347   :  { %v6192_v22 = vpop.f32.mrf.mxu1  ;;  %v2726_v56 = vmul.f32 0.03125, %v2608_v11  ;;  %v2790_v11 = vsub.f32 %v5985_v42, %v2723_v10 }
 0x348   :  { %7073 = vst [vmem:[#allocation33_spill] sm:$0xff] %v6192_v22  ;;  %2693 = vadd.xlane.f32.xlu0 %v6192_v22 }
 0x349   :  { %v2793_v34 = vsub.f32 %v5993_v53, %v2726_v56 }
 0x34a   :  { %v6207_v4 = vpop.xlane.xlu1 %2611 }
 0x34e   :  { %v6195_v32 = vpop.f32.mrf.mxu1  ;;  %v6211_v40 = vpop.xlane.xlu1 %2615 }
 0x34f   :  { %7074 = vst [vmem:[#allocation34_spill] sm:$0xff] %v6195_v32  ;;  %2699 = vadd.xlane.f32.xlu1 %v6195_v32  ;;  %v6209_v32 = vpop.xlane.xlu0 %2609 }
 0x350   :  { %v6198_v20 = vpop.f32.mrf.mxu1  ;;  %v2727_v60 = vmul.f32 0.03125, %v6209_v32 }
 0x351   :  { %7075 = vst [vmem:[#allocation35_spill] sm:$0xff] %v6198_v20  ;;  %2697 = vadd.xlane.f32.xlu0 %v6198_v20 }
 0x352   :  { %v6215_v20 = vpop.xlane.xlu1 %2619  ;;  %v2794_v32 = vsub.f32 %v6018_v14, %v2727_v60 }
 0x353   :  { %v6213_v55 = vpop.xlane.xlu0 %2613 }
 0x35b   :  { %v6201_v18 = vpop.f32.mrf.mxu1 }
 0x35c   :  { %7076 = vst [vmem:[#allocation36_spill] sm:$0xff] %v6201_v18  ;;  %2703 = vadd.xlane.f32.xlu1 %v6201_v18  ;;  %v6220_v18 = vpop.xlane.xlu0 %2617 }
 0x35d   :  { %v6204_v22 = vpop.f32.mrf.mxu1 }
 0x35e   :  { %7077 = vst [vmem:[#allocation37_spill] sm:$0xff] %v6204_v22  ;;  %2701 = vadd.xlane.f32.xlu0 %v6204_v22  ;;  %v6225_v22 = vpop.xlane.xlu1 %2623 }
 0x35f   :  { %v2734_v60 = vmul.f32 0.03125, %v6225_v22 }
 0x360   :  { %v6227_v36 = vpop.xlane.xlu0 %2621 }
 0x362   :  { %v6229_v2 = vpop.xlane.xlu1 %2627 }
 0x364   :  { %v6231_v63 = vpop.xlane.xlu0 %2625 }
 0x368   :  { %v6245_v24 = vpop.xlane.xlu0 %2629 }
 0x36c   :  { %v6265_v41 = vpop.xlane.xlu0 %2633 }
 0x36d   :  { %v6217_v19 = vpop.f32.mrf.mxu1 }
 0x36e   :  { %7078 = vst [vmem:[#allocation38_spill] sm:$0xff] %v6217_v19  ;;  %2707 = vadd.xlane.f32.xlu1 %v6217_v19  ;;  %v6237_v19 = vpop.xlane.xlu1 %2631 }
 0x36f   :  { %v6222_v29 = vpop.f32.mrf.mxu1 }
 0x370   :  { %7079 = vst [vmem:[#allocation39_spill] sm:$0xff] %v6222_v29  ;;  %2705 = vadd.xlane.f32.xlu0 %v6222_v29  ;;  %v6293_v43 = vpop.xlane.xlu0 %2637 }
 0x372   :  { %v6248_v35 = vpop.xlane.xlu1 %2635 }
 0x37c   :  { %v6233_v5 = vpop.f32.mrf.mxu1 }
 0x37d   :  { %7080 = vst [vmem:[#allocation40_spill] sm:$0xff] %v6233_v5  ;;  %2711 = vadd.xlane.f32.xlu1 %v6233_v5  ;;  %v2722_v5 = vmul.f32 0.03125, %v2600_v27  ;;  %v6277_v27 = vpop.xlane.xlu1 %2639 }
 0x37e   :  { %v6240_v29 = vpop.f32.mrf.mxu1 }
 0x37f   :  { %7081 = vst [vmem:[#allocation41_spill] sm:$0xff] %v6240_v29  ;;  %2709 = vadd.xlane.f32.xlu0 %v6240_v29  ;;  %v2789_v50 = vsub.f32 %v5959_v49, %v2722_v5  ;;  %v2915_v49 = vmul.f32 %v6272_v59, %v6272_v59  ;;  %v2791_v5 = vsub.f32 %v5975_v7, %v2724_v58 }
 0x381   :  { %v6289_v26 = vsel %vm2783_vm0, %v2789_v50, 0.0  ;;  %v6301_v7 = vpop.xlane.xlu1 %2643  ;;  %v2728_v50 = vmul.f32 0.03125, %v6207_v4  ;;  %v6308_v58 = vsel %vm2783_vm0, %v2791_v5, 0.0  ;;  %v6321_v4 = vsel %vm2783_vm0, %v2790_v11, 0.0 }
 0x382   :  { %v2917_v61 = vmul.f32 %v6289_v26, %v6289_v26  ;;  %v2919_v42 = vmul.f32 %v6308_v58, %v6308_v58  ;;  %v2918_v5 = vmul.f32 %v6321_v4, %v6321_v4 }
 0x383   :  { %v6255_v29 = vpop.f32.mrf.mxu1  ;;  %v2795_v53 = vsub.f32 %v6012_v62, %v2728_v50  ;;  %v2731_v50 = vmul.f32 0.03125, %v6220_v18 }
 0x384   :  { %2715 = vadd.xlane.f32.xlu1 %v6255_v29 }
 0x385   :  { %v6267_v45 = vpop.f32.mrf.mxu1  ;;  %v6328_v10 = vpop.xlane.xlu1 %2647  ;;  %v6344_v14 = vsel %vm2783_vm0, %v2795_v53, 0.0  ;;  %v2798_v18 = vsub.f32 %v6042_v15, %v2731_v50 }
 0x386   :  { %2713 = vadd.xlane.f32.xlu0 %v6267_v45 }
 0x388   :  { %2978 = vadd.xlane.f32.xlu1 %v2913_v57  ;;  %v2725_v57 = vmul.f32 0.03125, %v2606_v51 }
 0x38a   :  { %2976 = vadd.xlane.f32.xlu0 %v2912_v16  ;;  %v2792_v51 = vsub.f32 %v6004_v3, %v2725_v57  ;;  %v2916_v16 = vmul.f32 %v6299_v17, %v6299_v17  ;;  %v6326_v3 = vsel %vm2783_vm0, %v2793_v34, 0.0 }
 0x38b   :  { %v2921_v62 = vmul.f32 %v6326_v3, %v6326_v3 }
 0x38c   :  { %2982 = vadd.xlane.f32.xlu1 %v2915_v49  ;;  %v6316_v49 = vpop.xlane.xlu0 %2641  ;;  %v6337_v56 = vsel %vm2783_vm0, %v2792_v51, 0.0 }
 0x38d   :  { %v2920_v34 = vmul.f32 %v6337_v56, %v6337_v56 }
 0x38e   :  { %2980 = vadd.xlane.f32.xlu0 %v2914_v28  ;;  %v2730_v28 = vmul.f32 0.03125, %v6211_v40  ;;  %v2729_v40 = vmul.f32 0.03125, %v6213_v55  ;;  %v2923_v55 = vmul.f32 %v6344_v14, %v6344_v14 }
 0x390   :  { %2986 = vadd.xlane.f32.xlu1 %v2917_v61  ;;  %v2797_v57 = vsub.f32 %v6023_v33, %v2730_v28  ;;  %v2732_v61 = vmul.f32 0.03125, %v6215_v20  ;;  %v6346_v11 = vpop.xlane.xlu0 %2645  ;;  %v6355_v33 = vsel %vm2783_vm0, %v2794_v32, 0.0  ;;  %v6357_v20 = vpop.xlane.xlu1 %2651  ;;  %v2796_v51 = vsub.f32 %v6029_v48, %v2729_v40 }
 0x391   :  { %v2922_v53 = vmul.f32 %v6355_v33, %v6355_v33  ;;  %v2733_v28 = vmul.f32 0.03125, %v6227_v36 }
 0x392   :  { %2984 = vadd.xlane.f32.xlu0 %v2916_v16  ;;  %v2799_v16 = vsub.f32 %v6034_v9, %v2732_v61  ;;  %v2801_v9 = vsub.f32 %v6045_v54, %v2734_v60  ;;  %v6377_v22 = vsel %vm2783_vm0, %v2796_v51, 0.0  ;;  %v2737_v51 = vmul.f32 0.03125, %v6245_v24 }
 0x393   :  { %v2800_v36 = vsub.f32 %v6053_v6, %v2733_v28  ;;  %v2924_v40 = vmul.f32 %v6377_v22, %v6377_v22 }
 0x394   :  { %2990 = vadd.xlane.f32.xlu1 %v2919_v42  ;;  %v6364_v42 = vsel %vm2783_vm0, %v2797_v57, 0.0  ;;  %v6372_v32 = vpop.xlane.xlu0 %2649  ;;  %v6382_v15 = vsel %vm2783_vm0, %v2799_v16, 0.0  ;;  %v6393_v57 = vsel %vm2783_vm0, %v2798_v18, 0.0  ;;  %v6400_v6 = vsel %vm2783_vm0, %v2801_v9, 0.0 }
 0x395   :  { %v2925_v48 = vmul.f32 %v6364_v42, %v6364_v42  ;;  %v2927_v54 = vmul.f32 %v6382_v15, %v6382_v15  ;;  %v2740_v18 = vmul.f32 0.03125, %v6248_v35  ;;  %v2804_v24 = vsub.f32 %v6080_v23, %v2737_v51 }
 0x396   :  { %2988 = vadd.xlane.f32.xlu0 %v2918_v5  ;;  %v2736_v5 = vmul.f32 0.03125, %v6229_v2  ;;  %v2735_v2 = vmul.f32 0.03125, %v6231_v63  ;;  %v2929_v63 = vmul.f32 %v6400_v6, %v6400_v6  ;;  %v2743_v51 = vmul.f32 0.03125, %v6316_v49 }
 0x398   :  { %2994 = vadd.xlane.f32.xlu1 %v2921_v62  ;;  %v6384_v62 = vpop.xlane.xlu1 %2655  ;;  %v2803_v61 = vsub.f32 %v6059_v25, %v2736_v5  ;;  %v6402_v50 = vpop.xlane.xlu0 %2653  ;;  %v6411_v25 = vsel %vm2783_vm0, %v2800_v36, 0.0  ;;  %v2802_v16 = vsub.f32 %v6068_v21, %v2735_v2  ;;  %v2742_v5 = vmul.f32 0.03125, %v6277_v27 }
 0x399   :  { %v2928_v28 = vmul.f32 %v6411_v25, %v6411_v25  ;;  %v2741_v27 = vmul.f32 0.03125, %v6293_v43  ;;  %v2810_v49 = vsub.f32 %v6108_v39, %v2743_v51  ;;  %v7083_v51 = vld [vmem:[#allocation13_spill] sm:$0xff] }
 0x39a   :  { %2992 = vadd.xlane.f32.xlu0 %v2920_v34  ;;  %v2738_v34 = vmul.f32 0.03125, %v6237_v19  ;;  %v6433_v35 = vsel %vm2783_vm0, %v2802_v16, 0.0  ;;  %v2809_v2 = vsub.f32 %v6092_v12, %v2742_v5 }
 0x39c   :  { %2998 = vadd.xlane.f32.xlu1 %v2923_v55  ;;  %v2926_v55 = vmul.f32 %v6393_v57, %v6393_v57  ;;  %v6413_v19 = vpop.xlane.xlu1 %2659  ;;  %v2805_v60 = vsub.f32 %v6073_v31, %v2738_v34  ;;  %v6428_v9 = vpop.xlane.xlu0 %2657  ;;  %v2807_v31 = vsub.f32 %v6083_v8, %v2740_v18  ;;  %v6474_v18 = vsel %vm2783_vm0, %v2809_v2, 0.0 }
 0x39e   :  { %2996 = vadd.xlane.f32.xlu0 %v2922_v53  ;;  %v6420_v53 = vsel %vm2783_vm0, %v2803_v61, 0.0  ;;  %v6438_v23 = vsel %vm2783_vm0, %v2805_v60, 0.0  ;;  %v2744_v61 = vmul.f32 0.03125, %v6301_v7  ;;  %v2746_v60 = vmul.f32 0.03125, %v6328_v10 }
 0x39f   :  { %v2931_v21 = vmul.f32 %v6420_v53, %v6420_v53  ;;  %v2933_v8 = vmul.f32 %v6438_v23, %v6438_v23 }
 0x3a0   :  { %3002 = vadd.xlane.f32.xlu1 %v2925_v48  ;;  %v2739_v48 = vmul.f32 0.03125, %v6265_v41  ;;  %v6440_v36 = vpop.xlane.xlu1 %2663  ;;  %v6458_v34 = vpop.xlane.xlu0 %2661  ;;  %v2811_v16 = vsub.f32 %v6102_v44, %v2744_v61  ;;  %v2813_v44 = vsub.f32 %v6112_v13, %v2746_v60  ;;  %v2749_v61 = vmul.f32 0.03125, %v6402_v50  ;;  %v7084_v50 = vld [vmem:[#allocation12_spill] sm:$0xff] }
 0x3a2   :  { %3000 = vadd.xlane.f32.xlu0 %v2924_v40  ;;  %v2806_v41 = vsub.f32 %v6089_v0, %v2739_v48  ;;  %v2930_v40 = vmul.f32 %v6433_v35, %v6433_v35  ;;  %v6456_v0 = vsel %vm2783_vm0, %v2807_v31, 0.0  ;;  %v6490_v39 = vsel %vm2783_vm0, %v2811_v16, 0.0 }
 0x3a3   :  { %v2935_v43 = vmul.f32 %v6456_v0, %v6456_v0  ;;  %v2939_v13 = vmul.f32 %v6490_v39, %v6490_v39  ;;  %v2816_v60 = vsub.f32 %v7084_v50, %v2749_v61  ;;  %v7087_v61 = vld [vmem:[#allocation17_spill] sm:$0xff] }
 0x3a4   :  { %3006 = vadd.xlane.f32.xlu1 %v2927_v54  ;;  %v6449_v54 = vsel %vm2783_vm0, %v2804_v24, 0.0  ;;  %v6467_v12 = vsel %vm2783_vm0, %v2806_v41, 0.0  ;;  %v2668_v7 = vpop.xlane.xlu1 %2667  ;;  %v2666_v48 = vpop.xlane.xlu0 %2665  ;;  %v6499_v41 = vsel %vm2783_vm0, %v2810_v49, 0.0 }
 0x3a5   :  { %v2934_v24 = vmul.f32 %v6467_v12, %v6467_v12  ;;  %v2938_v2 = vmul.f32 %v6499_v41, %v6499_v41  ;;  %v2755_v50 = vmul.f32 0.03125, %v2666_v48 }
 0x3a6   :  { %3004 = vadd.xlane.f32.xlu0 %v2926_v55  ;;  %v2932_v55 = vmul.f32 %v6449_v54, %v6449_v54 }
 0x3a8   :  { %3010 = vadd.xlane.f32.xlu1 %v2929_v63  ;;  %v2808_v63 = vsub.f32 %v6098_v1, %v2741_v27  ;;  %v2937_v1 = vmul.f32 %v6474_v18, %v6474_v18  ;;  %v2672_v31 = vpop.xlane.xlu1 %2671  ;;  %v2670_v27 = vpop.xlane.xlu0 %2669 }
 0x3aa   :  { %3008 = vadd.xlane.f32.xlu0 %v2928_v28  ;;  %v2745_v28 = vmul.f32 0.03125, %v6346_v11  ;;  %v6485_v10 = vsel %vm2783_vm0, %v2808_v63, 0.0  ;;  %v2752_v63 = vmul.f32 0.03125, %v6413_v19 }
 0x3ab   :  { %v2936_v5 = vmul.f32 %v6485_v10, %v6485_v10 }
 0x3ac   :  { %3014 = vadd.xlane.f32.xlu1 %v2931_v21  ;;  %v2748_v21 = vmul.f32 0.03125, %v6357_v20  ;;  %v2812_v11 = vsub.f32 %v6115_v46, %v2745_v28  ;;  %v2747_v20 = vmul.f32 0.03125, %v6372_v32  ;;  %v6506_v46 = vsel %vm2783_vm0, %v2813_v44, 0.0  ;;  %v2676_v32 = vpop.xlane.xlu1 %2675  ;;  %v2674_v28 = vpop.xlane.xlu0 %2673 }
 0x3ae   :  { %3012 = vadd.xlane.f32.xlu0 %v2930_v40  ;;  %v2815_v40 = vsub.f32 %v6118_v52, %v2748_v21  ;;  %v6515_v52 = vsel %vm2783_vm0, %v2812_v11, 0.0  ;;  %v2754_v21 = vmul.f32 0.03125, %v6440_v36 }
 0x3af   :  { %v2940_v49 = vmul.f32 %v6515_v52, %v6515_v52 }
 0x3b0   :  { %3018 = vadd.xlane.f32.xlu1 %v2933_v8  ;;  %v2750_v8 = vmul.f32 0.03125, %v6384_v62  ;;  %v2814_v62 = vsub.f32 %v6123_v47, %v2747_v20  ;;  %v6522_v16 = vsel %vm2783_vm0, %v2815_v40, 0.0 }
 0x3b1   :  { %v2943_v47 = vmul.f32 %v6522_v16, %v6522_v16 }
 0x3b2   :  { %3016 = vadd.xlane.f32.xlu0 %v2932_v55  ;;  %v2941_v55 = vmul.f32 %v6506_v46, %v6506_v46  ;;  %v6533_v19 = vsel %vm2783_vm0, %v2814_v62, 0.0  ;;  %v2756_v62 = vmul.f32 0.03125, %v2668_v7 }
 0x3b3   :  { %v2942_v20 = vmul.f32 %v6533_v19, %v6533_v19 }
 0x3b4   :  { %3022 = vadd.xlane.f32.xlu1 %v2935_v43  ;;  %v2817_v43 = vsub.f32 %v7083_v51, %v2750_v8  ;;  %v6547_v8 = vsel %vm2783_vm0, %v2816_v60, 0.0  ;;  %v2678_v51 = vpop.xlane.xlu0 %2677 }
 0x3b6   :  { %3020 = vadd.xlane.f32.xlu0 %v2934_v24  ;;  %v2751_v24 = vmul.f32 0.03125, %v6428_v9  ;;  %v6538_v11 = vsel %vm2783_vm0, %v2817_v43, 0.0 }
 0x3b7   :  { %v2945_v40 = vmul.f32 %v6538_v11, %v6538_v11 }
 0x3b8   :  { %3026 = vadd.xlane.f32.xlu1 %v2937_v1  ;;  %v7085_v1 = vld [vmem:[#allocation15_spill] sm:$0xff] }
 0x3b9   :  { %v2819_v44 = vsub.f32 %v7085_v1, %v2752_v63  ;;  %v2944_v63 = vmul.f32 %v6547_v8, %v6547_v8 }
 0x3ba   :  { %3024 = vadd.xlane.f32.xlu0 %v2936_v5  ;;  %v2680_v5 = vpop.xlane.xlu1 %2679 }
 0x3bb   :  { %v6551_v36 = vsel %vm2783_vm0, %v2819_v44, 0.0  ;;  %v2758_v44 = vmul.f32 0.03125, %v2672_v31  ;;  %v7092_v31 = vld [vmem:[#allocation20_spill] sm:$0xff] }
 0x3bc   :  { %3030 = vadd.xlane.f32.xlu1 %v2939_v13  ;;  %v7086_v13 = vld [vmem:[#allocation14_spill] sm:$0xff]  ;;  %v2947_v60 = vmul.f32 %v6551_v36, %v6551_v36 }
 0x3bd   :  { %v2818_v9 = vsub.f32 %v7086_v13, %v2751_v24  ;;  %v7088_v24 = vld [vmem:[#allocation16_spill] sm:$0xff] }
 0x3be   :  { %3028 = vadd.xlane.f32.xlu0 %v2938_v2  ;;  %v2753_v2 = vmul.f32 0.03125, %v6458_v34 }
 0x3bf   :  { %v6557_v43 = vsel %vm2783_vm0, %v2818_v9, 0.0  ;;  %v2757_v9 = vmul.f32 0.03125, %v2670_v27 }
 0x3c0   :  { %3034 = vadd.xlane.f32.xlu1 %v2941_v55  ;;  %v2821_v55 = vsub.f32 %v7087_v61, %v2754_v21  ;;  %v2820_v34 = vsub.f32 %v7088_v24, %v2753_v2  ;;  %v7090_v21 = vld [vmem:[#allocation26_spill] sm:$0xff]  ;;  %v2946_v48 = vmul.f32 %v6557_v43, %v6557_v43 }
 0x3c1   :  { %v2822_v13 = vsub.f32 %v7090_v21, %v2755_v50  ;;  %v7094_v50 = vld [vmem:[#allocation19_spill] sm:$0xff]  ;;  %v2762_v21 = vmul.f32 0.03125, %v2680_v5 }
 0x3c2   :  { %3032 = vadd.xlane.f32.xlu0 %v2940_v49  ;;  %v2684_v49 = vpop.xlane.xlu1 %2683  ;;  %v6566_v7 = vsel %vm2783_vm0, %v2821_v55, 0.0  ;;  %v6576_v2 = vsel %vm2783_vm0, %v2820_v34, 0.0  ;;  %v2825_v55 = vsub.f32 %v7092_v31, %v2758_v44 }
 0x3c3   :  { %v6585_v27 = vsel %vm2783_vm0, %v2822_v13, 0.0  ;;  %v2948_v24 = vmul.f32 %v6576_v2, %v6576_v2 }
 0x3c4   :  { %3038 = vadd.xlane.f32.xlu1 %v2943_v47  ;;  %v7089_v47 = vld [vmem:[#allocation18_spill] sm:$0xff]  ;;  %7093 = vst [vmem:[#allocation12_spill] sm:$0xff] %v6585_v27 }
 0x3c5   :  { %v2823_v1 = vsub.f32 %v7089_v47, %v2756_v62  ;;  %v2760_v62 = vmul.f32 0.03125, %v2676_v32  ;;  %v6594_v47 = vsel %vm2783_vm0, %v2825_v55, 0.0  ;;  %v2759_v32 = vmul.f32 0.03125, %v2674_v28 }
 0x3c6   :  { %3036 = vadd.xlane.f32.xlu0 %v2942_v20  ;;  %v2949_v20 = vmul.f32 %v6566_v7, %v6566_v7  ;;  %7095 = vst [vmem:[#allocation15_spill] sm:$0xff] %v6594_v47  ;;  %v2953_v31 = vmul.f32 %v6594_v47, %v6594_v47 }
 0x3c7   :  { %v6580_v61 = vsel %vm2783_vm0, %v2823_v1, 0.0  ;;  %v7096_v1 = vld [vmem:[#allocation22_spill] sm:$0xff] }
 0x3c8   :  { %3042 = vadd.xlane.f32.xlu1 %v2945_v40  ;;  %v2682_v40 = vpop.xlane.xlu0 %2681  ;;  %7091 = vst [vmem:[#allocation13_spill] sm:$0xff] %v6580_v61  ;;  %v2951_v34 = vmul.f32 %v6580_v61, %v6580_v61  ;;  %v2827_v44 = vsub.f32 %v7096_v1, %v2760_v62  ;;  %v7098_v62 = vld [vmem:[#allocation24_spill] sm:$0xff]  ;;  %v2764_v1 = vmul.f32 0.03125, %v2684_v49  ;;  %v7102_v49 = vld [vmem:[#allocation25_spill] sm:$0xff] }
 0x3ca   :  { %3040 = vadd.xlane.f32.xlu0 %v2944_v63  ;;  %v2688_v63 = vpop.xlane.xlu1 %2687  ;;  %v6608_v5 = vsel %vm2783_vm0, %v2827_v44, 0.0 }
 0x3cb   :  { %v2955_v47 = vmul.f32 %v6608_v5, %v6608_v5 }
 0x3cc   :  { %3046 = vadd.xlane.f32.xlu1 %v2947_v60  ;;  %v2824_v60 = vsub.f32 %v7094_v50, %v2757_v9  ;;  %v2686_v13 = vpop.xlane.xlu0 %2685  ;;  %v2950_v9 = vmul.f32 %v6585_v27, %v6585_v27  ;;  %v7097_v50 = vld [vmem:[#allocation21_spill] sm:$0xff]  ;;  %v2763_v27 = vmul.f32 0.03125, %v2682_v40 }
 0x3cd   :  { %v2826_v28 = vsub.f32 %v7097_v50, %v2759_v32 }
 0x3ce   :  { %3044 = vadd.xlane.f32.xlu0 %v2946_v48  ;;  %v6599_v48 = vsel %vm2783_vm0, %v2824_v60, 0.0  ;;  %v2692_v55 = vpop.xlane.xlu1 %2691  ;;  %v7099_v60 = vld [vmem:[#allocation23_spill] sm:$0xff] }
 0x3cf   :  { %v6618_v32 = vsel %vm2783_vm0, %v2826_v28, 0.0 }
 0x3d0   :  { %3050 = vadd.xlane.f32.xlu1 %v2949_v20  ;;  %v2761_v20 = vmul.f32 0.03125, %v2678_v51  ;;  %v2952_v51 = vmul.f32 %v6599_v48, %v6599_v48  ;;  %v2690_v61 = vpop.xlane.xlu0 %2689  ;;  %7100 = vst [vmem:[#allocation14_spill] sm:$0xff] %v6618_v32  ;;  %v2954_v28 = vmul.f32 %v6618_v32, %v6618_v32 }
 0x3d2   :  { %3048 = vadd.xlane.f32.xlu0 %v2948_v24  ;;  %v2829_v24 = vsub.f32 %v7098_v62, %v2762_v21  ;;  %v2831_v21 = vsub.f32 %v7102_v49, %v2764_v1  ;;  %v7106_v1 = vld [vmem:[#allocation28_spill] sm:$0xff]  ;;  %v2767_v49 = vmul.f32 0.03125, %v2690_v61 }
 0x3d4   :  { %3054 = vadd.xlane.f32.xlu1 %v2951_v34  ;;  %v2828_v34 = vsub.f32 %v7099_v60, %v2761_v20  ;;  %v6622_v44 = vsel %vm2783_vm0, %v2829_v24, 0.0  ;;  %v2696_v20 = vpop.xlane.xlu1 %2695  ;;  %v6636_v24 = vsel %vm2783_vm0, %v2831_v21, 0.0 }
 0x3d5   :  { %7101 = vst [vmem:[#allocation17_spill] sm:$0xff] %v6622_v44  ;;  %v2957_v62 = vmul.f32 %v6622_v44, %v6622_v44  ;;  %7105 = vst [vmem:[#allocation18_spill] sm:$0xff] %v6636_v24  ;;  %v7107_v44 = vld [vmem:[#allocation29_spill] sm:$0xff] }
 0x3d6   :  { %3052 = vadd.xlane.f32.xlu0 %v2950_v9  ;;  %v2766_v9 = vmul.f32 0.03125, %v2688_v63  ;;  %v6627_v40 = vsel %vm2783_vm0, %v2828_v34, 0.0  ;;  %v2765_v63 = vmul.f32 0.03125, %v2686_v13  ;;  %v2694_v34 = vpop.xlane.xlu0 %2693 }
 0x3d7   :  { %7103 = vst [vmem:[#allocation16_spill] sm:$0xff] %v6627_v40 }
 0x3d8   :  { %3058 = vadd.xlane.f32.xlu1 %v2953_v31  ;;  %v7104_v31 = vld [vmem:[#allocation27_spill] sm:$0xff]  ;;  %v2833_v60 = vsub.f32 %v7106_v1, %v2766_v9  ;;  %v2700_v21 = vpop.xlane.xlu1 %2699  ;;  %v2832_v13 = vsub.f32 %v7107_v44, %v2765_v63  ;;  %v7108_v9 = vld [vmem:[#allocation30_spill] sm:$0xff]  ;;  %v2770_v1 = vmul.f32 0.03125, %v2696_v20  ;;  %v7110_v20 = vld [vmem:[#allocation32_spill] sm:$0xff] }
 0x3d9   :  { %v2830_v50 = vsub.f32 %v7104_v31, %v2763_v27  ;;  %v2959_v31 = vmul.f32 %v6636_v24, %v6636_v24 }
 0x3da   :  { %3056 = vadd.xlane.f32.xlu0 %v2952_v51  ;;  %v2768_v51 = vmul.f32 0.03125, %v2692_v55  ;;  %v6650_v55 = vsel %vm2783_vm0, %v2833_v60, 0.0  ;;  %v2698_v32 = vpop.xlane.xlu0 %2697  ;;  %v6660_v44 = vsel %vm2783_vm0, %v2832_v13, 0.0  ;;  %v2837_v60 = vsub.f32 %v7110_v20, %v2770_v1  ;;  %v7113_v1 = vld [vmem:[#allocation34_spill] sm:$0xff] }
 0x3db   :  { %v6641_v27 = vsel %vm2783_vm0, %v2830_v50, 0.0  ;;  %v7109_v50 = vld [vmem:[#allocation31_spill] sm:$0xff]  ;;  %v2961_v24 = vmul.f32 %v6650_v55, %v6650_v55  ;;  %v2960_v13 = vmul.f32 %v6660_v44, %v6660_v44 }
 0x3dc   :  { %3062 = vadd.xlane.f32.xlu1 %v2955_v47  ;;  %v2956_v47 = vmul.f32 %v6627_v40, %v6627_v40  ;;  %v2958_v61 = vmul.f32 %v6641_v27, %v6641_v27  ;;  %v2769_v40 = vmul.f32 0.03125, %v2694_v34 }
 0x3de   :  { %3060 = vadd.xlane.f32.xlu0 %v2954_v28  ;;  %v2835_v28 = vsub.f32 %v7108_v9, %v2768_v51  ;;  %v2772_v51 = vmul.f32 0.03125, %v2700_v21  ;;  %v2771_v21 = vmul.f32 0.03125, %v2698_v32 }
 0x3e0   :  { %3066 = vadd.xlane.f32.xlu1 %v2957_v62  ;;  %v2834_v62 = vsub.f32 %v7109_v50, %v2767_v49  ;;  %v6664_v63 = vsel %vm2783_vm0, %v2835_v28, 0.0  ;;  %v7111_v49 = vld [vmem:[#allocation33_spill] sm:$0xff]  ;;  %v6678_v28 = vsel %vm2783_vm0, %v2837_v60, 0.0  ;;  %v2839_v50 = vsub.f32 %v7113_v1, %v2772_v51 }
 0x3e1   :  { %v2963_v9 = vmul.f32 %v6664_v63, %v6664_v63  ;;  %7112 = vst [vmem:[#allocation26_spill] sm:$0xff] %v6678_v28  ;;  %v2965_v20 = vmul.f32 %v6678_v28, %v6678_v28 }
 0x3e2   :  { %3064 = vadd.xlane.f32.xlu0 %v2956_v47  ;;  %v6669_v34 = vsel %vm2783_vm0, %v2834_v62, 0.0  ;;  %v6692_v32 = vsel %vm2783_vm0, %v2839_v50, 0.0 }
 0x3e3   :  { %7116 = vst [vmem:[#allocation19_spill] sm:$0xff] %v6692_v32 }
 0x3e4   :  { %3070 = vadd.xlane.f32.xlu1 %v2959_v31  ;;  %v2836_v31 = vsub.f32 %v7111_v49, %v2769_v40  ;;  %v7115_v49 = vld [vmem:[#allocation35_spill] sm:$0xff] }
 0x3e5   :  { %v2704_v47 = vpop.xlane.xlu1 %2703  ;;  %v2838_v60 = vsub.f32 %v7115_v49, %v2771_v21  ;;  %v7119_v21 = vld [vmem:[#allocation37_spill] sm:$0xff] }
 0x3e6   :  { %3068 = vadd.xlane.f32.xlu0 %v2958_v61  ;;  %v2774_v61 = vmul.f32 0.03125, %v2704_v47  ;;  %v6683_v40 = vsel %vm2783_vm0, %v2836_v31, 0.0  ;;  %v7117_v47 = vld [vmem:[#allocation36_spill] sm:$0xff] }
 0x3e7   :  { %v2702_v62 = vpop.xlane.xlu0 %2701  ;;  %7114 = vst [vmem:[#allocation20_spill] sm:$0xff] %v6683_v40  ;;  %v2964_v31 = vmul.f32 %v6683_v40, %v6683_v40  ;;  %v6701_v1 = vsel %vm2783_vm0, %v2838_v60, 0.0 }
 0x3e8   :  { %3074 = vadd.xlane.f32.xlu1 %v2961_v24  ;;  %v2962_v24 = vmul.f32 %v6669_v34, %v6669_v34  ;;  %v2773_v51 = vmul.f32 0.03125, %v2702_v62  ;;  %7118 = vst [vmem:[#allocation22_spill] sm:$0xff] %v6701_v1 }
 0x3ea   :  { %3072 = vadd.xlane.f32.xlu0 %v2960_v13  ;;  %v2841_v13 = vsub.f32 %v7117_v47, %v2774_v61  ;;  %v2840_v49 = vsub.f32 %v7119_v21, %v2773_v51  ;;  %v2966_v61 = vmul.f32 %v6701_v1, %v6701_v1  ;;  %v7122_v21 = vld [vmem:[#allocation38_spill] sm:$0xff] }
 0x3ec   :  { %3078 = vadd.xlane.f32.xlu1 %v2963_v9  ;;  %v2967_v9 = vmul.f32 %v6692_v32, %v6692_v32  ;;  %v6706_v50 = vsel %vm2783_vm0, %v2841_v13, 0.0 }
 0x3ed   :  { %7120 = vst [vmem:[#allocation21_spill] sm:$0xff] %v6706_v50  ;;  %v2969_v62 = vmul.f32 %v6706_v50, %v6706_v50 }
 0x3ee   :  { %3076 = vadd.xlane.f32.xlu0 %v2962_v24  ;;  %v6714_v24 = vsel %vm2783_vm0, %v2840_v49, 0.0 }
 0x3ef   :  { %7121 = vst [vmem:[#allocation24_spill] sm:$0xff] %v6714_v24 }
 0x3f0   :  { %3082 = vadd.xlane.f32.xlu1 %v2965_v20 }
 0x3f2   :  { %3080 = vadd.xlane.f32.xlu0 %v2964_v31  ;;  %v2968_v31 = vmul.f32 %v6714_v24, %v6714_v24 }
 0x3f4   :  { %3086 = vadd.xlane.f32.xlu1 %v2967_v9  ;;  %v7123_v9 = vld [vmem:[#allocation39_spill] sm:$0xff] }
 0x3f6   :  { %3084 = vadd.xlane.f32.xlu0 %v2966_v61 }
 0x3f7   :  { %v2708_v20 = vpop.xlane.xlu1 %2707 }
 0x3f8   :  { %v2776_v60 = vmul.f32 0.03125, %v2708_v20  ;;  %3090 = vadd.xlane.f32.xlu1 %v2969_v62 }
 0x3f9   :  { %v2706_v51 = vpop.xlane.xlu0 %2705 }
 0x3fa   :  { %v2775_v47 = vmul.f32 0.03125, %v2706_v51  ;;  %v2843_v13 = vsub.f32 %v7122_v21, %v2776_v60  ;;  %3088 = vadd.xlane.f32.xlu0 %v2968_v31  ;;  %v7126_v21 = vld [vmem:[#allocation40_spill] sm:$0xff] }
 0x3fc   :  { %v2842_v1 = vsub.f32 %v7123_v9, %v2775_v47  ;;  %v6722_v50 = vsel %vm2783_vm0, %v2843_v13, 0.0  ;;  %v7127_v9 = vld [vmem:[#allocation41_spill] sm:$0xff] }
 0x3fd   :  { %7124 = vst [vmem:[#allocation23_spill] sm:$0xff] %v6722_v50  ;;  %v2971_v49 = vmul.f32 %v6722_v50, %v6722_v50 }
 0x3fe   :  { %v6728_v61 = vsel %vm2783_vm0, %v2842_v1, 0.0 }
 0x3ff   :  { %7125 = vst [vmem:[#allocation25_spill] sm:$0xff] %v6728_v61  ;;  %3094 = vadd.xlane.f32.xlu1 %v2971_v49  ;;  %v2970_v62 = vmul.f32 %v6728_v61, %v6728_v61 }
 0x401   :  { %3092 = vadd.xlane.f32.xlu0 %v2970_v62 }
 0x406   :  { %v2712_v20 = vpop.xlane.xlu1 %2711 }
 0x407   :  { %v2778_v60 = vmul.f32 0.03125, %v2712_v20 }
 0x408   :  { %v2710_v51 = vpop.xlane.xlu0 %2709 }
 0x409   :  { %v2777_v47 = vmul.f32 0.03125, %v2710_v51  ;;  %v2845_v13 = vsub.f32 %v7126_v21, %v2778_v60 }
 0x40b   :  { %v2844_v31 = vsub.f32 %v7127_v9, %v2777_v47  ;;  %v6736_v50 = vsel %vm2783_vm0, %v2845_v13, 0.0 }
 0x40c   :  { %7128 = vst [vmem:[#allocation27_spill] sm:$0xff] %v6736_v50  ;;  %v2973_v1 = vmul.f32 %v6736_v50, %v6736_v50 }
 0x40d   :  { %v6742_v49 = vsel %vm2783_vm0, %v2844_v31, 0.0  ;;  %v2716_v20 = vpop.xlane.xlu1 %2715 }
 0x40e   :  { %7129 = vst [vmem:[#allocation28_spill] sm:$0xff] %v6742_v49  ;;  %3098 = vadd.xlane.f32.xlu1 %v2973_v1  ;;  %v2972_v62 = vmul.f32 %v6742_v49, %v6742_v49  ;;  %v2780_v51 = vmul.f32 0.03125, %v2716_v20 }
 0x40f   :  { %v2714_v60 = vpop.xlane.xlu0 %2713 }
 0x410   :  { %3096 = vadd.xlane.f32.xlu0 %v2972_v62  ;;  %v2779_v47 = vmul.f32 0.03125, %v2714_v60  ;;  %v2847_v21 = vsub.f32 %v6255_v29, %v2780_v51 }
 0x411   :  { %v2979_v13 = vpop.xlane.xlu1 %2978 }
 0x412   :  { %v2846_v9 = vsub.f32 %v6267_v45, %v2779_v47  ;;  %v6750_v50 = vsel %vm2783_vm0, %v2847_v21, 0.0  ;;  %v3105_v31 = vmul.f32 0.03125, %v2979_v13 }
 0x413   :  { %7130 = vst [vmem:[#allocation29_spill] sm:$0xff] %v6750_v50  ;;  %v2975_v1 = vmul.f32 %v6750_v50, %v6750_v50  ;;  %v2977_v61 = vpop.xlane.xlu0 %2976 }
 0x414   :  { %v6756_v20 = vsel %vm2783_vm0, %v2846_v9, 0.0  ;;  %v3169_v62 = vadd.f32 1e-05, %v3105_v31  ;;  %v3104_v60 = vmul.f32 0.03125, %v2977_v61 }
 0x415   :  { %7131 = vst [vmem:[#allocation30_spill] sm:$0xff] %v6756_v20  ;;  %3102 = vadd.xlane.f32.xlu1 %v2975_v1  ;;  %v2974_v29 = vmul.f32 %v6756_v20, %v6756_v20  ;;  %v2983_v45 = vpop.xlane.xlu1 %2982 }
 0x416   :  { %4260 = vrsqrt.f32 %v3169_v62  ;;  %v3107_v51 = vmul.f32 0.03125, %v2983_v45  ;;  %v3168_v47 = vadd.f32 1e-05, %v3104_v60 }
 0x417   :  { %3100 = vadd.xlane.f32.xlu0 %v2974_v29  ;;  %v2981_v21 = vpop.xlane.xlu0 %2980 }
 0x418   :  { %v3171_v13 = vadd.f32 1e-05, %v3107_v51  ;;  %4262 = vrsqrt.f32 %v3168_v47  ;;  %v3106_v50 = vmul.f32 0.03125, %v2981_v21 }
 0x419   :  { %v2987_v49 = vpop.xlane.xlu1 %2986 }
 0x41a   :  { %4264 = vrsqrt.f32 %v3171_v13  ;;  %v3170_v37 = vadd.f32 1e-05, %v3106_v50  ;;  %v3109_v9 = vmul.f32 0.03125, %v2987_v49  ;;  %v6763_v50 = vld [vmem:[%s6968_s3] ss:$0 sm:$0xff] }
 0x41b   :  { %v2985_v24 = vpop.xlane.xlu0 %2984 }
 0x41c   :  { %4266 = vrsqrt.f32 %v3170_v37  ;;  %v3173_v61 = vadd.f32 1e-05, %v3109_v9  ;;  %v3108_v31 = vmul.f32 0.03125, %v2985_v24 }
 0x41d   :  { %v2991_v1 = vpop.xlane.xlu1 %2990 }
 0x41e   :  { %4268 = vrsqrt.f32 %v3173_v61  ;;  %v3172_v20 = vadd.f32 1e-05, %v3108_v31  ;;  %v3111_v32 = vmul.f32 0.03125, %v2991_v1  ;;  %v7132_v31 = vld [vmem:[#allocation42_spill] sm:$0xff] }
 0x41f   :  { %v2989_v62 = vpop.xlane.xlu0 %2988 }
 0x420   :  { %4270 = vrsqrt.f32 %v3172_v20  ;;  %v3175_v60 = vadd.f32 1e-05, %v3111_v32  ;;  %v3110_v29 = vmul.f32 0.03125, %v2989_v62  ;;  %v6769_v32 = vld [vmem:[%s6968_s3 + $0x1] ss:$0 sm:$0xff] }
 0x421   :  { %v2995_v45 = vpop.xlane.xlu1 %2994 }
 0x422   :  { %4272 = vrsqrt.f32 %v3175_v60  ;;  %v3174_v51 = vadd.f32 1e-05, %v3110_v29  ;;  %v3113_v47 = vmul.f32 0.03125, %v2995_v45 }
 0x423   :  { %v4261_v21 = vpop.eup %4260  ;;  %v2993_v49 = vpop.xlane.xlu0 %2992 }
 0x424   :  { %v3297_v24 = vmul.f32 %v4261_v21, %v6253_v30  ;;  %4274 = vrsqrt.f32 %v3174_v51  ;;  %v3177_v13 = vadd.f32 1e-05, %v3113_v47  ;;  %v3112_v37 = vmul.f32 0.03125, %v2993_v49 }
 0x425   :  { %v4263_v9 = vpop.eup %4262  ;;  %v2999_v20 = vpop.xlane.xlu1 %2998 }
 0x426   :  { %v3367_v61 = vmul.f32 %v6763_v50, %v3297_v24  ;;  %v3296_v1 = vmul.f32 %v4263_v9, %v7132_v31  ;;  %4276 = vrsqrt.f32 %v3177_v13  ;;  %v3176_v62 = vadd.f32 1e-05, %v3112_v37 }
 0x427   :  { %v4265_v60 = vpop.eup %4264  ;;  %v3115_v29 = vmul.f32 0.03125, %v2999_v20  ;;  %v2997_v45 = vpop.xlane.xlu0 %2996 }
 0x428   :  { %v3435_v30 = vadd.f32 %v6769_v32, %v3367_v61  ;;  %v3299_v51 = vmul.f32 %v4265_v60, %v6272_v59  ;;  %v3366_v47 = vmul.f32 %v6763_v50, %v3296_v1  ;;  %4278 = vrsqrt.f32 %v3176_v62 }
 0x429   :  { %v4267_v21 = vpop.eup %4266  ;;  %v3179_v49 = vadd.f32 1e-05, %v3115_v29  ;;  %v3114_v40 = vmul.f32 0.03125, %v2997_v45  ;;  %v3003_v28 = vpop.xlane.xlu1 %3002 }
 0x42a   :  { %3499 = vst [vmem:[#allocation8 + $0x8] sm:$0xff] %v3435_v30  ;;  %v3369_v24 = vmul.f32 %v6763_v50, %v3299_v51  ;;  %v3434_v13 = vadd.f32 %v6769_v32, %v3366_v47  ;;  %v3298_v37 = vmul.f32 %v4267_v21, %v6281_v38  ;;  %v3117_v9 = vmul.f32 0.03125, %v3003_v28 }
 0x42b   :  { %v4269_v20 = vpop.eup %4268  ;;  %4280 = vrsqrt.f32 %v3179_v49  ;;  %v3178_v61 = vadd.f32 1e-05, %v3114_v40  ;;  %v3001_v31 = vpop.xlane.xlu0 %3000 }
 0x42c   :  { %v3437_v59 = vadd.f32 %v6769_v32, %v3369_v24  ;;  %3498 = vst [vmem:[#allocation8] sm:$0xff] %v3434_v13  ;;  %v3368_v1 = vmul.f32 %v6763_v50, %v3298_v37  ;;  %v3301_v62 = vmul.f32 %v4269_v20, %v6289_v26  ;;  %v3181_v60 = vadd.f32 1e-05, %v3117_v9 }
 0x42d   :  { %v4271_v29 = vpop.eup %4270  ;;  %4282 = vrsqrt.f32 %v3178_v61  ;;  %v3116_v45 = vmul.f32 0.03125, %v3001_v31  ;;  %v3007_v30 = vpop.xlane.xlu1 %3006 }
 0x42e   :  { %3501 = vst [vmem:[#allocation8 + $0x18] sm:$0xff] %v3437_v59  ;;  %v3436_v38 = vadd.f32 %v6769_v32, %v3368_v1  ;;  %v3371_v28 = vmul.f32 %v6763_v50, %v3301_v62  ;;  %v3300_v40 = vmul.f32 %v4271_v29, %v6299_v17  ;;  %4284 = vrsqrt.f32 %v3181_v60 }
 0x42f   :  { %v4273_v51 = vpop.eup %4272  ;;  %v3180_v47 = vadd.f32 1e-05, %v3116_v45  ;;  %v3119_v21 = vmul.f32 0.03125, %v3007_v30  ;;  %v3005_v49 = vpop.xlane.xlu0 %3004 }
 0x430   :  { %3500 = vst [vmem:[#allocation8 + $0x10] sm:$0xff] %v3436_v38  ;;  %v3439_v26 = vadd.f32 %v6769_v32, %v3371_v28  ;;  %v3370_v24 = vmul.f32 %v6763_v50, %v3300_v40  ;;  %v3303_v13 = vmul.f32 %v4273_v51, %v6308_v58  ;;  %v3118_v37 = vmul.f32 0.03125, %v3005_v49 }
 0x431   :  { %v4275_v9 = vpop.eup %4274  ;;  %4286 = vrsqrt.f32 %v3180_v47  ;;  %v3183_v20 = vadd.f32 1e-05, %v3119_v21  ;;  %v3011_v61 = vpop.xlane.xlu1 %3010 }
 0x432   :  { %3503 = vst [vmem:[#allocation8 + $0x28] sm:$0xff] %v3439_v26  ;;  %v3438_v17 = vadd.f32 %v6769_v32, %v3370_v24  ;;  %v3373_v31 = vmul.f32 %v6763_v50, %v3303_v13  ;;  %v3302_v59 = vmul.f32 %v4275_v9, %v6321_v4  ;;  %v3182_v1 = vadd.f32 1e-05, %v3118_v37 }
 0x433   :  { %v4277_v62 = vpop.eup %4276  ;;  %4288 = vrsqrt.f32 %v3183_v20  ;;  %v3121_v60 = vmul.f32 0.03125, %v3011_v61  ;;  %v3009_v29 = vpop.xlane.xlu0 %3008 }
 0x434   :  { %3502 = vst [vmem:[#allocation8 + $0x20] sm:$0xff] %v3438_v17  ;;  %v3441_v58 = vadd.f32 %v6769_v32, %v3373_v31  ;;  %v3372_v45 = vmul.f32 %v6763_v50, %v3302_v59  ;;  %v3305_v30 = vmul.f32 %v4277_v62, %v6326_v3  ;;  %4290 = vrsqrt.f32 %v3182_v1 }
 0x435   :  { %v4279_v38 = vpop.eup %4278  ;;  %v3185_v28 = vadd.f32 1e-05, %v3121_v60  ;;  %v3120_v40 = vmul.f32 0.03125, %v3009_v29  ;;  %v3015_v51 = vpop.xlane.xlu1 %3014 }
 0x436   :  { %3505 = vst [vmem:[#allocation8 + $0x38] sm:$0xff] %v3441_v58  ;;  %v3440_v4 = vadd.f32 %v6769_v32, %v3372_v45  ;;  %v3375_v47 = vmul.f32 %v6763_v50, %v3305_v30  ;;  %v3304_v21 = vmul.f32 %v4279_v38, %v6337_v56  ;;  %v3123_v49 = vmul.f32 0.03125, %v3015_v51 }
 0x437   :  { %4292 = vrsqrt.f32 %v3185_v28  ;;  %v3184_v26 = vadd.f32 1e-05, %v3120_v40  ;;  %v3013_v24 = vpop.xlane.xlu0 %3012 }
 0x438   :  { %v4281_v13 = vpop.eup %4280  ;;  %3504 = vst [vmem:[#allocation8 + $0x30] sm:$0xff] %v3440_v4  ;;  %v3443_v3 = vadd.f32 %v6769_v32, %v3375_v47  ;;  %v3374_v37 = vmul.f32 %v6763_v50, %v3304_v21  ;;  %v3187_v9 = vadd.f32 1e-05, %v3123_v49  ;;  %v3122_v20 = vmul.f32 0.03125, %v3013_v24 }
 0x439   :  { %v3307_v61 = vmul.f32 %v4281_v13, %v6344_v14  ;;  %4294 = vrsqrt.f32 %v3184_v26  ;;  %v3019_v17 = vpop.xlane.xlu1 %3018 }
 0x43a   :  { %v4283_v31 = vpop.eup %4282  ;;  %3507 = vst [vmem:[#allocation8 + $0x48] sm:$0xff] %v3443_v3  ;;  %v3442_v56 = vadd.f32 %v6769_v32, %v3374_v37  ;;  %4296 = vrsqrt.f32 %v3187_v9  ;;  %v3186_v59 = vadd.f32 1e-05, %v3122_v20  ;;  %v3125_v1 = vmul.f32 0.03125, %v3019_v17 }
 0x43b   :  { %v4285_v62 = vpop.eup %4284  ;;  %v3377_v60 = vmul.f32 %v6763_v50, %v3307_v61  ;;  %v3306_v29 = vmul.f32 %v4283_v31, %v6355_v33  ;;  %v3017_v58 = vpop.xlane.xlu0 %3016 }
 0x43c   :  { %3506 = vst [vmem:[#allocation8 + $0x40] sm:$0xff] %v3442_v56  ;;  %v3309_v45 = vmul.f32 %v4285_v62, %v6364_v42  ;;  %4298 = vrsqrt.f32 %v3186_v59  ;;  %v3189_v14 = vadd.f32 1e-05, %v3125_v1  ;;  %v3124_v30 = vmul.f32 0.03125, %v3017_v58 }
 0x43d   :  { %v3445_v38 = vadd.f32 %v6769_v32, %v3377_v60  ;;  %v3376_v28 = vmul.f32 %v6763_v50, %v3306_v29  ;;  %v3023_v40 = vpop.xlane.xlu1 %3022 }
 0x43e   :  { %v4287_v51 = vpop.eup %4286  ;;  %v3379_v4 = vmul.f32 %v6763_v50, %v3309_v45  ;;  %4300 = vrsqrt.f32 %v3189_v14  ;;  %v3188_v47 = vadd.f32 1e-05, %v3124_v30  ;;  %v3127_v21 = vmul.f32 0.03125, %v3023_v40 }
 0x43f   :  { %3509 = vst [vmem:[#allocation8 + $0x58] sm:$0xff] %v3445_v38  ;;  %v3444_v33 = vadd.f32 %v6769_v32, %v3376_v28  ;;  %v3308_v49 = vmul.f32 %v4287_v51, %v6377_v22  ;;  %v3021_v42 = vpop.xlane.xlu0 %3020 }
 0x440   :  { %v4289_v26 = vpop.eup %4288  ;;  %v3447_v24 = vadd.f32 %v6769_v32, %v3379_v4  ;;  %4302 = vrsqrt.f32 %v3188_v47  ;;  %v3191_v13 = vadd.f32 1e-05, %v3127_v21  ;;  %v3126_v3 = vmul.f32 0.03125, %v3021_v42 }
 0x441   :  { %v4291_v37 = vpop.eup %4290  ;;  %3508 = vst [vmem:[#allocation8 + $0x50] sm:$0xff] %v3444_v33  ;;  %v3378_v9 = vmul.f32 %v6763_v50, %v3308_v49  ;;  %v3311_v20 = vmul.f32 %v4289_v26, %v6382_v15  ;;  %v3027_v61 = vpop.xlane.xlu1 %3026 }
 0x442   :  { %3511 = vst [vmem:[#allocation8 + $0x68] sm:$0xff] %v3447_v24  ;;  %v3310_v17 = vmul.f32 %v4291_v37, %v6393_v57  ;;  %4304 = vrsqrt.f32 %v3191_v13  ;;  %v3190_v31 = vadd.f32 1e-05, %v3126_v3  ;;  %v3129_v22 = vmul.f32 0.03125, %v3027_v61 }
 0x443   :  { %v3446_v56 = vadd.f32 %v6769_v32, %v3378_v9  ;;  %v3381_v59 = vmul.f32 %v6763_v50, %v3311_v20  ;;  %v3025_v1 = vpop.xlane.xlu0 %3024 }
 0x444   :  { %v4293_v62 = vpop.eup %4292  ;;  %v3380_v60 = vmul.f32 %v6763_v50, %v3310_v17  ;;  %4306 = vrsqrt.f32 %v3190_v31  ;;  %v3193_v29 = vadd.f32 1e-05, %v3129_v22  ;;  %v3128_v58 = vmul.f32 0.03125, %v3025_v1 }
 0x445   :  { %3510 = vst [vmem:[#allocation8 + $0x60] sm:$0xff] %v3446_v56  ;;  %v3449_v15 = vadd.f32 %v6769_v32, %v3381_v59  ;;  %v3313_v45 = vmul.f32 %v4293_v62, %v6400_v6  ;;  %v3031_v57 = vpop.xlane.xlu1 %3030 }
 0x446   :  { %v4295_v14 = vpop.eup %4294  ;;  %v3448_v30 = vadd.f32 %v6769_v32, %v3380_v60  ;;  %4308 = vrsqrt.f32 %v3193_v29  ;;  %v3192_v38 = vadd.f32 1e-05, %v3128_v58  ;;  %v3131_v28 = vmul.f32 0.03125, %v3031_v57 }
 0x447   :  { %v4297_v40 = vpop.eup %4296  ;;  %3513 = vst [vmem:[#allocation8 + $0x78] sm:$0xff] %v3449_v15  ;;  %v3383_v51 = vmul.f32 %v6763_v50, %v3313_v45  ;;  %v3312_v4 = vmul.f32 %v4295_v14, %v6411_v25  ;;  %v3029_v47 = vpop.xlane.xlu0 %3028 }
 0x448   :  { %3512 = vst [vmem:[#allocation8 + $0x70] sm:$0xff] %v3448_v30  ;;  %v3315_v21 = vmul.f32 %v4297_v40, %v6420_v53  ;;  %4310 = vrsqrt.f32 %v3192_v38  ;;  %v3195_v33 = vadd.f32 1e-05, %v3131_v28  ;;  %v3130_v6 = vmul.f32 0.03125, %v3029_v47 }
 0x449   :  { %v4299_v49 = vpop.eup %4298  ;;  %v3451_v42 = vadd.f32 %v6769_v32, %v3383_v51  ;;  %v3382_v26 = vmul.f32 %v6763_v50, %v3312_v4  ;;  %v3035_v24 = vpop.xlane.xlu1 %3034 }
 0x44a   :  { %v3385_v13 = vmul.f32 %v6763_v50, %v3315_v21  ;;  %v3314_v3 = vmul.f32 %v4299_v49, %v6433_v35  ;;  %4312 = vrsqrt.f32 %v3195_v33  ;;  %v3194_v37 = vadd.f32 1e-05, %v3130_v6 }
 0x44b   :  { %v4301_v25 = vpop.eup %4300  ;;  %3515 = vst [vmem:[#allocation8 + $0x88] sm:$0xff] %v3451_v42  ;;  %v3450_v9 = vadd.f32 %v6769_v32, %v3382_v26  ;;  %v3133_v53 = vmul.f32 0.03125, %v3035_v24  ;;  %v3033_v20 = vpop.xlane.xlu0 %3032 }
 0x44c   :  { %v3453_v61 = vadd.f32 %v6769_v32, %v3385_v13  ;;  %v3384_v17 = vmul.f32 %v6763_v50, %v3314_v3  ;;  %v3317_v31 = vmul.f32 %v4301_v25, %v6438_v23  ;;  %4314 = vrsqrt.f32 %v3194_v37 }
 0x44d   :  { %v4303_v22 = vpop.eup %4302  ;;  %3514 = vst [vmem:[#allocation8 + $0x80] sm:$0xff] %v3450_v9  ;;  %v3197_v56 = vadd.f32 1e-05, %v3133_v53  ;;  %v3132_v59 = vmul.f32 0.03125, %v3033_v20  ;;  %v3039_v35 = vpop.xlane.xlu1 %3038 }
 0x44e   :  { %3517 = vst [vmem:[#allocation8 + $0x98] sm:$0xff] %v3453_v61  ;;  %v3452_v1 = vadd.f32 %v6769_v32, %v3384_v17  ;;  %v3387_v62 = vmul.f32 %v6763_v50, %v3317_v31  ;;  %v3316_v60 = vmul.f32 %v4303_v22, %v6449_v54  ;;  %v3135_v29 = vmul.f32 0.03125, %v3039_v35 }
 0x44f   :  { %v4305_v58 = vpop.eup %4304  ;;  %4316 = vrsqrt.f32 %v3197_v56  ;;  %v3196_v15 = vadd.f32 1e-05, %v3132_v59  ;;  %v3037_v45 = vpop.xlane.xlu0 %3036 }
 0x450   :  { %3516 = vst [vmem:[#allocation8 + $0x90] sm:$0xff] %v3452_v1  ;;  %v3455_v23 = vadd.f32 %v6769_v32, %v3387_v62  ;;  %v3386_v57 = vmul.f32 %v6763_v50, %v3316_v60  ;;  %v3319_v14 = vmul.f32 %v4305_v58, %v6456_v0  ;;  %v3199_v30 = vadd.f32 1e-05, %v3135_v29 }
 0x451   :  { %v4307_v38 = vpop.eup %4306  ;;  %4318 = vrsqrt.f32 %v3196_v15  ;;  %v3134_v28 = vmul.f32 0.03125, %v3037_v45  ;;  %v3043_v40 = vpop.xlane.xlu1 %3042 }
 0x452   :  { %3519 = vst [vmem:[#allocation8 + $0xa8] sm:$0xff] %v3455_v23  ;;  %v3454_v54 = vadd.f32 %v6769_v32, %v3386_v57  ;;  %v3389_v51 = vmul.f32 %v6763_v50, %v3319_v14  ;;  %v3318_v4 = vmul.f32 %v4307_v38, %v6467_v12  ;;  %4320 = vrsqrt.f32 %v3199_v30 }
 0x453   :  { %v4309_v47 = vpop.eup %4308  ;;  %v3198_v21 = vadd.f32 1e-05, %v3134_v28  ;;  %v3137_v33 = vmul.f32 0.03125, %v3043_v40  ;;  %v3041_v6 = vpop.xlane.xlu0 %3040 }
 0x454   :  { %3518 = vst [vmem:[#allocation8 + $0xa0] sm:$0xff] %v3454_v54  ;;  %v3457_v0 = vadd.f32 %v6769_v32, %v3389_v51  ;;  %v3388_v49 = vmul.f32 %v6763_v50, %v3318_v4  ;;  %v3321_v42 = vmul.f32 %v4309_v47, %v6474_v18  ;;  %v3136_v26 = vmul.f32 0.03125, %v3041_v6 }
 0x455   :  { %v4311_v24 = vpop.eup %4310  ;;  %4322 = vrsqrt.f32 %v3198_v21  ;;  %v3201_v13 = vadd.f32 1e-05, %v3137_v33  ;;  %v3047_v3 = vpop.xlane.xlu1 %3046 }
 0x456   :  { %3521 = vst [vmem:[#allocation8 + $0xb8] sm:$0xff] %v3457_v0  ;;  %v3456_v12 = vadd.f32 %v6769_v32, %v3388_v49  ;;  %v3391_v37 = vmul.f32 %v6763_v50, %v3321_v42  ;;  %v3320_v25 = vmul.f32 %v4311_v24, %v6485_v10  ;;  %v3200_v9 = vadd.f32 1e-05, %v3136_v26 }
 0x457   :  { %v4313_v53 = vpop.eup %4312  ;;  %4324 = vrsqrt.f32 %v3201_v13  ;;  %v3139_v20 = vmul.f32 0.03125, %v3047_v3  ;;  %v3045_v61 = vpop.xlane.xlu0 %3044 }
 0x458   :  { %3520 = vst [vmem:[#allocation8 + $0xb0] sm:$0xff] %v3456_v12  ;;  %v3459_v18 = vadd.f32 %v6769_v32, %v3391_v37  ;;  %v3390_v17 = vmul.f32 %v6763_v50, %v3320_v25  ;;  %v3323_v31 = vmul.f32 %v4313_v53, %v6490_v39  ;;  %4326 = vrsqrt.f32 %v3200_v9 }
 0x459   :  { %v4315_v22 = vpop.eup %4314  ;;  %v3203_v56 = vadd.f32 1e-05, %v3139_v20  ;;  %v3138_v59 = vmul.f32 0.03125, %v3045_v61  ;;  %v3051_v35 = vpop.xlane.xlu1 %3050 }
 0x45a   :  { %3523 = vst [vmem:[#allocation8 + $0xc8] sm:$0xff] %v3459_v18  ;;  %v3458_v10 = vadd.f32 %v6769_v32, %v3390_v17  ;;  %v3393_v1 = vmul.f32 %v6763_v50, %v3323_v31  ;;  %v3322_v62 = vmul.f32 %v4315_v22, %v6499_v41  ;;  %v3141_v60 = vmul.f32 0.03125, %v3051_v35 }
 0x45b   :  { %4328 = vrsqrt.f32 %v3203_v56  ;;  %v3202_v29 = vadd.f32 1e-05, %v3138_v59  ;;  %v3049_v58 = vpop.xlane.xlu0 %3048 }
 0x45c   :  { %v4317_v15 = vpop.eup %4316  ;;  %3522 = vst [vmem:[#allocation8 + $0xc0] sm:$0xff] %v3458_v10  ;;  %v3461_v39 = vadd.f32 %v6769_v32, %v3393_v1  ;;  %v3392_v45 = vmul.f32 %v6763_v50, %v3322_v62  ;;  %v3205_v23 = vadd.f32 1e-05, %v3141_v60  ;;  %v3140_v57 = vmul.f32 0.03125, %v3049_v58 }
 0x45d   :  { %v3325_v14 = vmul.f32 %v4317_v15, %v6506_v46  ;;  %4330 = vrsqrt.f32 %v3202_v29  ;;  %v3055_v30 = vpop.xlane.xlu1 %3054 }
 0x45e   :  { %v4319_v38 = vpop.eup %4318  ;;  %3525 = vst [vmem:[#allocation8 + $0xd8] sm:$0xff] %v3461_v39  ;;  %v3460_v41 = vadd.f32 %v6769_v32, %v3392_v45  ;;  %4332 = vrsqrt.f32 %v3205_v23  ;;  %v3204_v28 = vadd.f32 1e-05, %v3140_v57  ;;  %v3143_v40 = vmul.f32 0.03125, %v3055_v30 }
 0x45f   :  { %v4321_v54 = vpop.eup %4320  ;;  %v3395_v51 = vmul.f32 %v6763_v50, %v3325_v14  ;;  %v3324_v4 = vmul.f32 %v4319_v38, %v6515_v52  ;;  %v3053_v47 = vpop.xlane.xlu0 %3052 }
 0x460   :  { %3524 = vst [vmem:[#allocation8 + $0xd0] sm:$0xff] %v3460_v41  ;;  %v3327_v21 = vmul.f32 %v4321_v54, %v6522_v16  ;;  %4334 = vrsqrt.f32 %v3204_v28  ;;  %v3207_v46 = vadd.f32 1e-05, %v3143_v40  ;;  %v3142_v33 = vmul.f32 0.03125, %v3053_v47 }
 0x461   :  { %v3463_v6 = vadd.f32 %v6769_v32, %v3395_v51  ;;  %v3394_v0 = vmul.f32 %v6763_v50, %v3324_v4  ;;  %v3059_v49 = vpop.xlane.xlu1 %3058 }
 0x462   :  { %v4323_v42 = vpop.eup %4322  ;;  %v3397_v26 = vmul.f32 %v6763_v50, %v3327_v21  ;;  %4336 = vrsqrt.f32 %v3207_v46  ;;  %v3206_v24 = vadd.f32 1e-05, %v3142_v33  ;;  %v3145_v13 = vmul.f32 0.03125, %v3059_v49 }
 0x463   :  { %3527 = vst [vmem:[#allocation8 + $0xe8] sm:$0xff] %v3463_v6  ;;  %v3462_v52 = vadd.f32 %v6769_v32, %v3394_v0  ;;  %v3326_v3 = vmul.f32 %v4323_v42, %v6533_v19  ;;  %v3057_v16 = vpop.xlane.xlu0 %3056  ;;  %v7133_v0 = vld [vmem:[#allocation13_spill] sm:$0xff] }
 0x464   :  { %v4325_v12 = vpop.eup %4324  ;;  %v3465_v37 = vadd.f32 %v6769_v32, %v3397_v26  ;;  %4338 = vrsqrt.f32 %v3206_v24  ;;  %v3209_v25 = vadd.f32 1e-05, %v3145_v13  ;;  %v3144_v9 = vmul.f32 0.03125, %v3057_v16 }
 0x465   :  { %v4327_v53 = vpop.eup %4326  ;;  %3526 = vst [vmem:[#allocation8 + $0xe0] sm:$0xff] %v3462_v52  ;;  %v3396_v20 = vmul.f32 %v6763_v50, %v3326_v3  ;;  %v3329_v61 = vmul.f32 %v4325_v12, %v6538_v11  ;;  %v3063_v18 = vpop.xlane.xlu1 %3062  ;;  %v7134_v3 = vld [vmem:[#allocation12_spill] sm:$0xff] }
 0x466   :  { %3529 = vst [vmem:[#allocation8 + $0xf8] sm:$0xff] %v3465_v37  ;;  %v3328_v17 = vmul.f32 %v4327_v53, %v6547_v8  ;;  %4340 = vrsqrt.f32 %v3209_v25  ;;  %v3208_v31 = vadd.f32 1e-05, %v3144_v9  ;;  %v3147_v19 = vmul.f32 0.03125, %v3063_v18 }
 0x467   :  { %v3464_v22 = vadd.f32 %v6769_v32, %v3396_v20  ;;  %v3399_v56 = vmul.f32 %v6763_v50, %v3329_v61  ;;  %v3061_v59 = vpop.xlane.xlu0 %3060  ;;  %v7135_v61 = vld [vmem:[#allocation15_spill] sm:$0xff] }
 0x468   :  { %v4329_v35 = vpop.eup %4328  ;;  %v3398_v10 = vmul.f32 %v6763_v50, %v3328_v17  ;;  %4342 = vrsqrt.f32 %v3208_v31  ;;  %v3211_v1 = vadd.f32 1e-05, %v3147_v19  ;;  %v3146_v62 = vmul.f32 0.03125, %v3061_v59 }
 0x469   :  { %3528 = vst [vmem:[#allocation8 + $0xf0] sm:$0xff] %v3464_v22  ;;  %v3467_v11 = vadd.f32 %v6769_v32, %v3399_v56  ;;  %v3331_v60 = vmul.f32 %v4329_v35, %v6551_v36  ;;  %v3067_v8 = vpop.xlane.xlu1 %3066 }
 0x46a   :  { %v4331_v29 = vpop.eup %4330  ;;  %v3466_v58 = vadd.f32 %v6769_v32, %v3398_v10  ;;  %4344 = vrsqrt.f32 %v3211_v1  ;;  %v3210_v15 = vadd.f32 1e-05, %v3146_v62  ;;  %v3149_v39 = vmul.f32 0.03125, %v3067_v8 }
 0x46b   :  { %v4333_v45 = vpop.eup %4332  ;;  %3531 = vst [vmem:[#allocation8 + $0x108] sm:$0xff] %v3467_v11  ;;  %v3401_v23 = vmul.f32 %v6763_v50, %v3331_v60  ;;  %v3330_v57 = vmul.f32 %v4331_v29, %v6557_v43  ;;  %v3065_v14 = vpop.xlane.xlu0 %3064 }
 0x46c   :  { %3530 = vst [vmem:[#allocation8 + $0x100] sm:$0xff] %v3466_v58  ;;  %v3333_v30 = vmul.f32 %v4333_v45, %v6566_v7  ;;  %4346 = vrsqrt.f32 %v3210_v15  ;;  %v3213_v38 = vadd.f32 1e-05, %v3149_v39  ;;  %v3148_v36 = vmul.f32 0.03125, %v3065_v14 }
 0x46d   :  { %v4335_v41 = vpop.eup %4334  ;;  %v3469_v28 = vadd.f32 %v6769_v32, %v3401_v23  ;;  %v3400_v40 = vmul.f32 %v6763_v50, %v3330_v57  ;;  %v3071_v54 = vpop.xlane.xlu1 %3070  ;;  %v7136_v57 = vld [vmem:[#allocation14_spill] sm:$0xff] }
 0x46e   :  { %v3403_v51 = vmul.f32 %v6763_v50, %v3333_v30  ;;  %v3332_v4 = vmul.f32 %v4335_v41, %v6576_v2  ;;  %4348 = vrsqrt.f32 %v3213_v38  ;;  %v3212_v47 = vadd.f32 1e-05, %v3148_v36 }
 0x46f   :  { %v4337_v43 = vpop.eup %4336  ;;  %3533 = vst [vmem:[#allocation8 + $0x118] sm:$0xff] %v3469_v28  ;;  %v3468_v21 = vadd.f32 %v6769_v32, %v3400_v40  ;;  %v3151_v7 = vmul.f32 0.03125, %v3071_v54  ;;  %v3069_v46 = vpop.xlane.xlu0 %3068  ;;  %v7137_v40 = vld [vmem:[#allocation17_spill] sm:$0xff] }
 0x470   :  { %v3471_v33 = vadd.f32 %v6769_v32, %v3403_v51  ;;  %v3402_v6 = vmul.f32 %v6763_v50, %v3332_v4  ;;  %v3335_v49 = vmul.f32 %v4337_v43, %v7133_v0  ;;  %4350 = vrsqrt.f32 %v3212_v47 }
 0x471   :  { %v4339_v42 = vpop.eup %4338  ;;  %3532 = vst [vmem:[#allocation8 + $0x110] sm:$0xff] %v3468_v21  ;;  %v3215_v26 = vadd.f32 1e-05, %v3151_v7  ;;  %v3150_v24 = vmul.f32 0.03125, %v3069_v46  ;;  %v3075_v2 = vpop.xlane.xlu1 %3074  ;;  %v7138_v46 = vld [vmem:[#allocation16_spill] sm:$0xff] }
 0x472   :  { %3535 = vst [vmem:[#allocation8 + $0x128] sm:$0xff] %v3471_v33  ;;  %v3470_v13 = vadd.f32 %v6769_v32, %v3402_v6  ;;  %v3405_v52 = vmul.f32 %v6763_v50, %v3335_v49  ;;  %v3334_v16 = vmul.f32 %v4339_v42, %v7134_v3  ;;  %v3153_v12 = vmul.f32 0.03125, %v3075_v2 }
 0x473   :  { %v4341_v37 = vpop.eup %4340  ;;  %4352 = vrsqrt.f32 %v3215_v26  ;;  %v3214_v25 = vadd.f32 1e-05, %v3150_v24  ;;  %v3073_v9 = vpop.xlane.xlu0 %3072 }
 0x474   :  { %3534 = vst [vmem:[#allocation8 + $0x120] sm:$0xff] %v3470_v13  ;;  %v3473_v53 = vadd.f32 %v6769_v32, %v3405_v52  ;;  %v3404_v20 = vmul.f32 %v6763_v50, %v3334_v16  ;;  %v3337_v18 = vmul.f32 %v4341_v37, %v7135_v61  ;;  %v3217_v17 = vadd.f32 1e-05, %v3153_v12  ;;  %v7139_v52 = vld [vmem:[#allocation18_spill] sm:$0xff] }
 0x475   :  { %v4343_v31 = vpop.eup %4342  ;;  %4354 = vrsqrt.f32 %v3214_v25  ;;  %v3152_v19 = vmul.f32 0.03125, %v3073_v9  ;;  %v3079_v22 = vpop.xlane.xlu1 %3078 }
 0x476   :  { %3537 = vst [vmem:[#allocation8 + $0x138] sm:$0xff] %v3473_v53  ;;  %v3472_v56 = vadd.f32 %v6769_v32, %v3404_v20  ;;  %v3407_v59 = vmul.f32 %v6763_v50, %v3337_v18  ;;  %v3336_v35 = vmul.f32 %v4343_v31, %v6599_v48  ;;  %4356 = vrsqrt.f32 %v3217_v17 }
 0x477   :  { %v4345_v10 = vpop.eup %4344  ;;  %v3216_v1 = vadd.f32 1e-05, %v3152_v19  ;;  %v3155_v62 = vmul.f32 0.03125, %v3079_v22  ;;  %v3077_v11 = vpop.xlane.xlu0 %3076 }
 0x478   :  { %3536 = vst [vmem:[#allocation8 + $0x130] sm:$0xff] %v3472_v56  ;;  %v3475_v60 = vadd.f32 %v6769_v32, %v3407_v59  ;;  %v3406_v8 = vmul.f32 %v6763_v50, %v3336_v35  ;;  %v3339_v29 = vmul.f32 %v4345_v10, %v6608_v5  ;;  %v3154_v58 = vmul.f32 0.03125, %v3077_v11 }
 0x479   :  { %v4347_v15 = vpop.eup %4346  ;;  %4358 = vrsqrt.f32 %v3216_v1  ;;  %v3219_v39 = vadd.f32 1e-05, %v3155_v62  ;;  %v3083_v45 = vpop.xlane.xlu1 %3082 }
 0x47a   :  { %3539 = vst [vmem:[#allocation8 + $0x148] sm:$0xff] %v3475_v60  ;;  %v3474_v48 = vadd.f32 %v6769_v32, %v3406_v8  ;;  %v3409_v23 = vmul.f32 %v6763_v50, %v3339_v29  ;;  %v3338_v14 = vmul.f32 %v4347_v15, %v7136_v57  ;;  %v3218_v30 = vadd.f32 1e-05, %v3154_v58 }
 0x47b   :  { %v4349_v38 = vpop.eup %4348  ;;  %4360 = vrsqrt.f32 %v3219_v39  ;;  %v3157_v36 = vmul.f32 0.03125, %v3083_v45  ;;  %v3081_v41 = vpop.xlane.xlu0 %3080 }
 0x47c   :  { %3538 = vst [vmem:[#allocation8 + $0x140] sm:$0xff] %v3474_v48  ;;  %v3477_v5 = vadd.f32 %v6769_v32, %v3409_v23  ;;  %v3408_v28 = vmul.f32 %v6763_v50, %v3338_v14  ;;  %v3341_v54 = vmul.f32 %v4349_v38, %v7137_v40  ;;  %4362 = vrsqrt.f32 %v3218_v30  ;;  %v7141_v40 = vld [vmem:[#allocation20_spill] sm:$0xff] }
 0x47d   :  { %v4351_v51 = vpop.eup %4350  ;;  %v3221_v4 = vadd.f32 1e-05, %v3157_v36  ;;  %v3156_v47 = vmul.f32 0.03125, %v3081_v41  ;;  %v3087_v43 = vpop.xlane.xlu1 %3086  ;;  %v7140_v36 = vld [vmem:[#allocation26_spill] sm:$0xff] }
 0x47e   :  { %3541 = vst [vmem:[#allocation8 + $0x158] sm:$0xff] %v3477_v5  ;;  %v3476_v21 = vadd.f32 %v6769_v32, %v3408_v28  ;;  %v3411_v7 = vmul.f32 %v6763_v50, %v3341_v54  ;;  %v3340_v33 = vmul.f32 %v4351_v51, %v7138_v46  ;;  %v3159_v6 = vmul.f32 0.03125, %v3087_v43  ;;  %v7142_v51 = vld [vmem:[#allocation19_spill] sm:$0xff]  ;;  %v7143_v46 = vld [vmem:[#allocation22_spill] sm:$0xff] }
 0x47f   :  { %4364 = vrsqrt.f32 %v3221_v4  ;;  %v3220_v0 = vadd.f32 1e-05, %v3156_v47  ;;  %v3085_v49 = vpop.xlane.xlu0 %3084 }
 0x480   :  { %v4353_v42 = vpop.eup %4352  ;;  %3540 = vst [vmem:[#allocation8 + $0x150] sm:$0xff] %v3476_v21  ;;  %v3479_v26 = vadd.f32 %v6769_v32, %v3411_v7  ;;  %v3410_v24 = vmul.f32 %v6763_v50, %v3340_v33  ;;  %v3223_v2 = vadd.f32 1e-05, %v3159_v6  ;;  %v3158_v13 = vmul.f32 0.03125, %v3085_v49 }
 0x481   :  { %v3343_v3 = vmul.f32 %v4353_v42, %v7139_v52  ;;  %4366 = vrsqrt.f32 %v3220_v0  ;;  %v3091_v16 = vpop.xlane.xlu1 %3090 }
 0x482   :  { %v4355_v12 = vpop.eup %4354  ;;  %3543 = vst [vmem:[#allocation8 + $0x168] sm:$0xff] %v3479_v26  ;;  %v3478_v37 = vadd.f32 %v6769_v32, %v3410_v24  ;;  %4368 = vrsqrt.f32 %v3223_v2  ;;  %v3222_v25 = vadd.f32 1e-05, %v3158_v13  ;;  %v3161_v9 = vmul.f32 0.03125, %v3091_v16  ;;  %v7144_v26 = vld [vmem:[#allocation21_spill] sm:$0xff]  ;;  %v7145_v16 = vld [vmem:[#allocation24_spill] sm:$0xff] }
 0x483   :  { %v4357_v53 = vpop.eup %4356  ;;  %v3413_v20 = vmul.f32 %v6763_v50, %v3343_v3  ;;  %v3342_v61 = vmul.f32 %v4355_v12, %v6641_v27  ;;  %v3089_v18 = vpop.xlane.xlu0 %3088 }
 0x484   :  { %3542 = vst [vmem:[#allocation8 + $0x160] sm:$0xff] %v3478_v37  ;;  %v3345_v17 = vmul.f32 %v4357_v53, %v6650_v55  ;;  %4370 = vrsqrt.f32 %v3222_v25  ;;  %v3225_v31 = vadd.f32 1e-05, %v3161_v9  ;;  %v3160_v19 = vmul.f32 0.03125, %v3089_v18 }
 0x485   :  { %v3481_v22 = vadd.f32 %v6769_v32, %v3413_v20  ;;  %v3412_v56 = vmul.f32 %v6763_v50, %v3342_v61 }
 0x486   :  { %v4359_v59 = vpop.eup %4358  ;;  %v3415_v35 = vmul.f32 %v6763_v50, %v3345_v17  ;;  %4372 = vrsqrt.f32 %v3225_v31  ;;  %v3224_v10 = vadd.f32 1e-05, %v3160_v19  ;;  %v7146_v17 = vld [vmem:[#allocation23_spill] sm:$0xff] }
 0x487   :  { %3545 = vst [vmem:[#allocation8 + $0x178] sm:$0xff] %v3481_v22  ;;  %v3480_v27 = vadd.f32 %v6769_v32, %v3412_v56  ;;  %v3344_v62 = vmul.f32 %v4359_v59, %v6660_v44 }
 0x488   :  { %v3095_v1 = vpop.xlane.xlu1 %3094  ;;  %v4361_v55 = vpop.eup %4360  ;;  %v3483_v60 = vadd.f32 %v6769_v32, %v3415_v35  ;;  %4374 = vrsqrt.f32 %v3224_v10  ;;  %v7147_v35 = vld [vmem:[#allocation25_spill] sm:$0xff] }
 0x489   :  { %v3163_v11 = vmul.f32 0.03125, %v3095_v1  ;;  %v4363_v29 = vpop.eup %4362  ;;  %3544 = vst [vmem:[#allocation8 + $0x170] sm:$0xff] %v3480_v27  ;;  %v3414_v58 = vmul.f32 %v6763_v50, %v3344_v62  ;;  %v3347_v15 = vmul.f32 %v4361_v55, %v6664_v63  ;;  %v4388_v27 = vld [vmem:[%s6968_s3] ss:$0 sm:$0xff] }
 0x48a   :  { %v3093_v8 = vpop.xlane.xlu0 %3092  ;;  %3547 = vst [vmem:[#allocation8 + $0x188] sm:$0xff] %v3483_v60  ;;  %v3346_v48 = vmul.f32 %v4363_v29, %v6669_v34 }
 0x48b   :  { %v3227_v39 = vadd.f32 1e-05, %v3163_v11  ;;  %v3162_v45 = vmul.f32 0.03125, %v3093_v8  ;;  %v3482_v23 = vadd.f32 %v6769_v32, %v3414_v58  ;;  %v3417_v44 = vmul.f32 %v6763_v50, %v3347_v15 }
 0x48c   :  { %v4365_v14 = vpop.eup %4364  ;;  %v3416_v30 = vmul.f32 %v6763_v50, %v3346_v48 }
 0x48d   :  { %4376 = vrsqrt.f32 %v3227_v39  ;;  %v3226_v57 = vadd.f32 1e-05, %v3162_v45  ;;  %3546 = vst [vmem:[#allocation8 + $0x180] sm:$0xff] %v3482_v23  ;;  %v3485_v38 = vadd.f32 %v6769_v32, %v3417_v44  ;;  %v3349_v41 = vmul.f32 %v4365_v14, %v7140_v36  ;;  %v7148_v39 = vld [vmem:[#allocation27_spill] sm:$0xff]  ;;  %v7149_v44 = vld [vmem:[#allocation28_spill] sm:$0xff] }
 0x48e   :  { %v4367_v63 = vpop.eup %4366  ;;  %v3484_v5 = vadd.f32 %v6769_v32, %v3416_v30  ;;  %v4389_v14 = vld [vmem:[%s6968_s3 + $0x1] ss:$0 sm:$0xff]  ;;  %s4450_s3 = scalar_lea.vmem %s3568_s12, 8192 }
 0x48f   :  { %4378 = vrsqrt.f32 %v3226_v57  ;;  %v4369_v28 = vpop.eup %4368  ;;  %3549 = vst [vmem:[#allocation8 + $0x198] sm:$0xff] %v3485_v38  ;;  %v3419_v34 = vmul.f32 %v6763_v50, %v3349_v41  ;;  %v3348_v54 = vmul.f32 %v4367_v63, %v7141_v40  ;;  %v7150_v41 = vld [vmem:[#allocation29_spill] sm:$0xff]  ;;  %p4451_p1 = scmp.ne.s32.totalorder %s3568_s12, %s4450_s3  ;;  %p4456_p3 = scmp.lt.s32.totalorder %s4450_s3, %s4450_s3 }
 0x490   :  { %3548 = vst [vmem:[#allocation8 + $0x190] sm:$0xff] %v3484_v5  ;;  %v3351_v4 = vmul.f32 %v4369_v28, %v7142_v51 }
 0x491   :  { %v4371_v47 = vpop.eup %4370  ;;  %v3487_v43 = vadd.f32 %v6769_v32, %v3419_v34  ;;  %v3418_v21 = vmul.f32 %v6763_v50, %v3348_v54  ;;  %v7151_v34 = vld [vmem:[#allocation30_spill] sm:$0xff]  ;;  %p4457_p4 = por %p4456_p3, %p4455_p2 }
 0x492   :  { %v3421_v7 = vmul.f32 %v6763_v50, %v3351_v4  ;;  %v3350_v33 = vmul.f32 %v4371_v47, %v7143_v46 }
 0x493   :  { %v4373_v6 = vpop.eup %4372  ;;  %3551 = vst [vmem:[#allocation8 + $0x1a8] sm:$0xff] %v3487_v43  ;;  %v3486_v0 = vadd.f32 %v6769_v32, %v3418_v21  ;;  %p4458_p5 = pnand %p4457_p4, %p4451_p1 }
 0x494   :  { %v3489_v49 = vadd.f32 %v6769_v32, %v3421_v7  ;;  %v3420_v42 = vmul.f32 %v6763_v50, %v3350_v33  ;;  %v3353_v24 = vmul.f32 %v4373_v6, %v7144_v26 }
 0x495   :  { %v4375_v2 = vpop.eup %4374  ;;  %3550 = vst [vmem:[#allocation8 + $0x1a0] sm:$0xff] %v3486_v0 }
 0x496   :  { %3553 = vst [vmem:[#allocation8 + $0x1b8] sm:$0xff] %v3489_v49  ;;  %v3488_v52 = vadd.f32 %v6769_v32, %v3420_v42  ;;  %v3423_v3 = vmul.f32 %v6763_v50, %v3353_v24  ;;  %v3352_v12 = vmul.f32 %v4375_v2, %v7145_v16 }
 0x497   :  { %v3099_v13 = vpop.xlane.xlu1 %3098 }
 0x498   :  { %v3165_v37 = vmul.f32 0.03125, %v3099_v13  ;;  %3552 = vst [vmem:[#allocation8 + $0x1b0] sm:$0xff] %v3488_v52  ;;  %v3491_v53 = vadd.f32 %v6769_v32, %v3423_v3  ;;  %v3422_v20 = vmul.f32 %v6763_v50, %v3352_v12 }
 0x499   :  { %v3097_v25 = vpop.xlane.xlu0 %3096 }
 0x49a   :  { %v4377_v9 = vpop.eup %4376  ;;  %v3229_v61 = vadd.f32 1e-05, %v3165_v37  ;;  %v3164_v18 = vmul.f32 0.03125, %v3097_v25  ;;  %3555 = vst [vmem:[#allocation8 + $0x1c8] sm:$0xff] %v3491_v53  ;;  %v3490_v22 = vadd.f32 %v6769_v32, %v3422_v20 }
 0x49b   :  { %v3355_v31 = vmul.f32 %v4377_v9, %v7146_v17 }
 0x49c   :  { %v4379_v19 = vpop.eup %4378  ;;  %4380 = vrsqrt.f32 %v3229_v61  ;;  %v3228_v56 = vadd.f32 1e-05, %v3164_v18  ;;  %3554 = vst [vmem:[#allocation8 + $0x1c0] sm:$0xff] %v3490_v22 }
 0x49d   :  { %v3425_v59 = vmul.f32 %v6763_v50, %v3355_v31  ;;  %v3354_v10 = vmul.f32 %v4379_v19, %v7147_v35 }
 0x49e   :  { %4382 = vrsqrt.f32 %v3228_v56  ;;  %v3103_v11 = vpop.xlane.xlu1 %3102 }
 0x49f   :  { %v3493_v1 = vadd.f32 %v6769_v32, %v3425_v59  ;;  %v3424_v62 = vmul.f32 %v4388_v27, %v3354_v10  ;;  %v3167_v60 = vmul.f32 0.03125, %v3103_v11 }
 0x4a0   :  { %v3101_v8 = vpop.xlane.xlu0 %3100 }
 0x4a1   :  { %3557 = vst [vmem:[#allocation8 + $0x1d8] sm:$0xff] %v3493_v1  ;;  %v3492_v55 = vadd.f32 %v6769_v32, %v3424_v62  ;;  %v3231_v29 = vadd.f32 1e-05, %v3167_v60  ;;  %v3166_v50 = vmul.f32 0.03125, %v3101_v8 }
 0x4a3   :  { %3556 = vst [vmem:[#allocation8 + $0x1d0] sm:$0xff] %v3492_v55  ;;  %4384 = vrsqrt.f32 %v3231_v29  ;;  %v3230_v58 = vadd.f32 1e-05, %v3166_v50 }
 0x4a5   :  { %4386 = vrsqrt.f32 %v3230_v58 }
 0x4a9   :  { %v4381_v15 = vpop.eup %4380 }
 0x4aa   :  { %v3357_v45 = vmul.f32 %v4381_v15, %v7148_v39 }
 0x4ab   :  { %v4383_v48 = vpop.eup %4382 }
 0x4ac   :  { %v3427_v23 = vmul.f32 %v4388_v27, %v3357_v45  ;;  %v3356_v57 = vmul.f32 %v4383_v48, %v7149_v44 }
 0x4ae   :  { %v3495_v32 = vadd.f32 %v4389_v14, %v3427_v23  ;;  %v3426_v30 = vmul.f32 %v4388_v27, %v3356_v57 }
 0x4b0   :  { %3559 = vst [vmem:[#allocation8 + $0x1e8] sm:$0xff] %v3495_v32  ;;  %v3494_v38 = vadd.f32 %v4389_v14, %v3426_v30  ;;  %v4385_v36 = vpop.eup %4384 }
 0x4b1   :  { %v3359_v63 = vmul.f32 %v4385_v36, %v7150_v41 }
 0x4b2   :  { %3558 = vst [vmem:[#allocation8 + $0x1e0] sm:$0xff] %v3494_v38  ;;  %v4387_v5 = vpop.eup %4386 }
 0x4b3   :  { %v3429_v28 = vmul.f32 %v4388_v27, %v3359_v63  ;;  %v3358_v40 = vmul.f32 %v4387_v5, %v7151_v34 }
 0x4b5   :  { %v3497_v54 = vadd.f32 %v4389_v14, %v3429_v28  ;;  %v3428_v51 = vmul.f32 %v4388_v27, %v3358_v40 }
 0x4b7   :  { %3561 = vst [vmem:[#allocation8 + $0x1f8] sm:$0xff] %v3497_v54  ;;  %v3496_v4 = vadd.f32 %v4389_v14, %v3428_v51 }
 0x4b9   :  { %3560 = vst [vmem:[#allocation8 + $0x1f0] sm:$0xff] %v3496_v4 }
 0x4ba   :  { %4461 = shalt.err (!%p4458_p5)
}
 0x4bb   :  { %3573 = dma.vmem_to_hbm [thread:$0]  %s3568_s12, 8192, %s6969_s4, [#allocation4], %s4478_s20, %s4478_s20, %s4479_s21  }
 0x4bc   :  { %4474 = dma.done.wait [#allocation4], 8192  }
 0x4bd   :  { %4475 = vsyncadd [#allocation4], 4294959104 }
 0x4be   :  { %3577 = vsyncpa [#allocation3], 1 }
 0x4bf   :  { %3578 = vsyncpa [#allocation6], 1 }
 0x4c0   :  { %3579 = vsyncpa [#allocation4], 1 }

</bundles_post_ra>
